<compile_context>
chip_gen: v7x
topology: tpu7x:2x2x1
jax: 0.10.0
libtpu: 0.0.40
codegen_flags: <defaults>
</compile_context>

<pallas_src>
import functools

import jax
import jax.numpy as jnp
from jax import lax
from jax.experimental import pallas as pl
from jax.experimental.pallas import tpu as pltpu


_PADW = 8  # sublane-aligned left halo pad (column 7 is the 1-wide "same"-conv halo)


def _vmem_capacity_bytes():
    try:
        return int(pltpu.get_tpu_info().vmem_capacity_bytes)
    except Exception:
        return 64 * 1024 * 1024  # conservative (v7x-sized) fallback


_VMEM_CAP = _vmem_capacity_bytes()
_VMEM_LIMIT = max(48 * 2**20, min(int(_VMEM_CAP * 0.85), 112 * 2**20))
_VMEM_BUDGET = max(32 * 2**20, min(int(_VMEM_CAP * 0.55), 96 * 2**20))


# ------------------------------------------------------------------------------- kernel


def _vgg_group_kernel(*refs, layers, norm):
    """Fused group of 3x3 conv + ReLU layers sharing one output spatial size.

    layers: tuple of (pool, cin, cout, im2col) static per-layer config (pool only ever
    set on the group's first layer).  Ref order: x, [scale, shift], (w, b) per layer,
    o per layer, halo scratch.
    """
    n_layers = len(layers)
    it = iter(refs)
    x_ref = next(it)
    scale_ref = shift_ref = None
    if norm:
        scale_ref = next(it)
        shift_ref = next(it)
    wb_refs = [(next(it), next(it)) for _ in range(n_layers)]
    o_refs = [next(it) for _ in range(n_layers)]
    xpad_ref = next(it)

    # Zero the halo scratch once: the 1-wide border ring around every layer's interior
    # is never overwritten by the interior stores below, so it stays zero for all later
    # layers and grid steps (interior writes always cover the full (H, W) interior).
    @pl.when(pl.program_id(0) == 0)
    def _zero_halo():
        xpad_ref[...] = jnp.zeros(xpad_ref.shape, xpad_ref.dtype)

    x = x_ref[...]
    if norm:
        # ((x + 1)/2 - mean)/std  ==  x * (0.5/std) + (0.5 - mean)/std, applied before
        # the zero halo so border semantics match the PyTorch reference.
        x = x.astype(jnp.float32) * scale_ref[...] + shift_ref[...]

    for li, (pool, cin, cout, im2col) in enumerate(layers):
        w_ref, b_ref = wb_refs[li]
        o_ref = o_refs[li]
        nb, h, w_sp, _ = o_ref.shape
        rows = nb * h * w_sp

        if pool:
            # 2x2 / stride-2 max pool: pair-max along W (single 2-sublane reduce), then
            # pair-max along H (elementwise VPU max of the two phases, H is not a
            # layout dim so the second reshape is free).
            nb_, h2, w2, c = x.shape
            x = jnp.max(x.reshape(nb_, h2, w2 // 2, 2, c), axis=3)
            x = jnp.max(x.reshape(nb_, h2 // 2, 2, w2 // 2, c), axis=2)

        # Sublane-aligned interior store (offset _PADW along W); the surrounding ring is
        # the pre-zeroed scratch border.
        xpad_ref[:, 1:h + 1, _PADW:_PADW + w_sp, :cin] = x.astype(xpad_ref.dtype)

        def tap(kh, kw):
            return xpad_ref[:, kh:kh + h,
                            _PADW - 1 + kw:_PADW - 1 + kw + w_sp,
                            :cin].reshape(rows, cin)

        if im2col:
            # one K = 9*cin matmul; w_ref was pre-reshaped to (9*cin, cout) on the host
            patch = jnp.concatenate(
                [tap(kh, kw) for kh in range(3) for kw in range(3)], axis=-1)
            acc = jnp.dot(patch, w_ref[...], preferred_element_type=jnp.float32)
        else:
            # three K = 3*cin matmuls; w_ref was pre-reshaped to (3, 3*cin, cout)
            acc = None
            for kh in range(3):
                patch = jnp.concatenate([tap(kh, kw) for kw in range(3)], axis=-1)
                part = jnp.dot(patch, w_ref[kh], preferred_element_type=jnp.float32)
                acc = part if acc is None else acc + part

        acc = jnp.maximum(acc + b_ref[...], 0.0)          # bias + ReLU in f32
        y = acc.reshape(nb, h, w_sp, cout)
        o_ref[...] = y.astype(o_ref.dtype)
        if li + 1 < n_layers:
            x = y.astype(jnp.bfloat16)                    # stays in VMEM for next layer


# ------------------------------------------------------------------------------ helpers


def _layer_cfg(group, cin0):
    cfg = []
    cin = cin0
    for lyr in group:
        cout = lyr["w"].shape[-1]
        # full 9-tap im2col contraction up to Cin=64 (K=576); 3-tap per kernel-row above
        cfg.append((lyr["pool"], cin, cout, 9 * cin <= 576))
        cin = cout
    return tuple(cfg)


def _estimate_bytes(nb, hin, win, cin0, h, w, cfg):
    """Conservative per-grid-step VMEM working set for a fused layer group."""
    rows = nb * h * w
    cmax = max(ci for _, ci, _, _ in cfg)
    total = 2 * nb * hin * win * cin0 * 2                 # input block (double buffered, bf16)
    total += nb * hin * win * cin0 * 4                    # loaded / normalised f32 temp
    total += nb * (h + 2) * (w + _PADW + 1) * cmax * 2    # halo scratch
    transient = 0
    for _, ci, co, im2col in cfg:
        k = 9 * ci if im2col else 3 * ci
        total += 2 * 9 * ci * co * 2 + 2 * co * 4         # weights (2 buffers) + bias
        total += 2 * nb * h * w * co * 2                  # output block (double buffered)
        transient = max(transient, rows * k * 2 + rows * co * 4)  # patch + f32 acc
    return total + transient


def _build_groups(params, h0, w0):
    """Split the 16 conv layers into fused groups: a new group starts at every maxpool
    (stage boundary) or when the NB=1 working set would overflow the VMEM budget."""
    groups, cur = [], []
    cur_in = None                 # (hin, win, cin0) of the current group's input
    h, w, cin = h0, w0, 3         # spatial / channels entering the next layer

    for lyr in params:
        if lyr["pool"] and cur:
            groups.append(cur)
            cur = []
        if cur:
            cand = cur + [lyr]
            cfg = _layer_cfg(cand, cur_in[2])
            hout = cur_in[0] // 2 if cand[0]["pool"] else cur_in[0]
            wout = cur_in[1] // 2 if cand[0]["pool"] else cur_in[1]
            if _estimate_bytes(1, cur_in[0], cur_in[1], cur_in[2],
                               hout, wout, cfg) > _VMEM_BUDGET:
                groups.append(cur)
                cur = []
        if not cur:
            cur_in = (h, w, cin)
        cur.append(lyr)
        if lyr["pool"]:
            h, w = h // 2, w // 2
        cin = lyr["w"].shape[-1]
    if cur:
        groups.append(cur)
    return groups


# ------------------------------------------------------------------------------ wrapper


def _conv_group(x, group, *, norm_scale=None, norm_shift=None):
    """Run one fused group of conv3x3+ReLU layers; returns one feature per layer."""
    N, Hin, Win, Cin0 = x.shape
    pool0 = group[0]["pool"]
    H, W = (Hin // 2, Win // 2) if pool0 else (Hin, Win)
    norm = norm_scale is not None

    layer_cfg = _layer_cfg(group, Cin0)
    cmax = max(ci for _, ci, _, _ in layer_cfg)

    # Block-batch choice: whole-batch blocks for tiny spatial extents (fills the MXU and
    # amortises per-step overhead); one image per step for large spatial extents so the
    # "parallel" grid can feed both megacore TensorCores.
    if H * W >= 128:
        candidates = [1]
    else:
        candidates = [nb for nb in range(N, 0, -1) if N % nb == 0]
    NB = None
    for nb in candidates:
        if _estimate_bytes(nb, Hin, Win, Cin0, H, W, layer_cfg) <= _VMEM_BUDGET:
            NB = nb
            break
    if NB is None:
        # TODO(synk): H-strip grid axis with a 2-row halo is required once even a
        # single-image block overflows VMEM (realistic 224x224 inputs).
        NB = 1

    kernel = functools.partial(_vgg_group_kernel, layers=layer_cfg, norm=norm)

    in_specs = [pl.BlockSpec((NB, Hin, Win, Cin0), lambda n: (n, 0, 0, 0))]
    args = [x]
    if norm:
        in_specs += [pl.BlockSpec((1, 1, 1, Cin0), lambda n: (0, 0, 0, 0)),
                     pl.BlockSpec((1, 1, 1, Cin0), lambda n: (0, 0, 0, 0))]
        args += [norm_scale.reshape(1, 1, 1, Cin0).astype(jnp.float32),
                 norm_shift.reshape(1, 1, 1, Cin0).astype(jnp.float32)]

    out_shapes, out_specs = [], []
    for (_, ci, co, im2col), lyr in zip(layer_cfg, group):
        w = lyr["w"].astype(jnp.bfloat16)
        if im2col:
            w = w.reshape(9 * ci, co)                       # host-side reshape, once
            in_specs.append(pl.BlockSpec((9 * ci, co), lambda n: (0, 0)))
        else:
            w = w.reshape(3, 3 * ci, co)
            in_specs.append(pl.BlockSpec((3, 3 * ci, co), lambda n: (0, 0, 0)))
        in_specs.append(pl.BlockSpec((1, co), lambda n: (0, 0)))
        args += [w, lyr["b"].reshape(1, co).astype(jnp.float32)]
        out_shapes.append(jax.ShapeDtypeStruct((N, H, W, co), jnp.bfloat16))
        out_specs.append(pl.BlockSpec((NB, H, W, co), lambda n: (n, 0, 0, 0)))

    outs = pl.pallas_call(
        kernel,
        out_shape=tuple(out_shapes),
        grid=(N // NB,),
        in_specs=in_specs,
        out_specs=tuple(out_specs),
        scratch_shapes=[pltpu.VMEM((NB, H + 2, W + _PADW + 1, cmax), jnp.bfloat16)],
        compiler_params=pltpu.CompilerParams(
            dimension_semantics=("parallel",),
            vmem_limit_bytes=_VMEM_LIMIT),
    )(*args)
    return list(outs)


# -------------------------------------------------------------------------------- model


# (name, Cin, Cout, maxpool-before-this-conv) -- mirrors torchvision vgg19.features,
# grouped exactly as the reference module's relu{i}_{j} Sequential blocks.
_VGG19_CFG = [
    ("relu1_1",   3,  64, False), ("relu1_2",  64,  64, False),
    ("relu2_1",  64, 128, True),  ("relu2_2", 128, 128, False),
    ("relu3_1", 128, 256, True),  ("relu3_2", 256, 256, False),
    ("relu3_3", 256, 256, False), ("relu3_4", 256, 256, False),
    ("relu4_1", 256, 512, True),  ("relu4_2", 512, 512, False),
    ("relu4_3", 512, 512, False), ("relu4_4", 512, 512, False),
    ("relu5_1", 512, 512, True),  ("relu5_2", 512, 512, False),
    ("relu5_3", 512, 512, False), ("relu5_4", 512, 512, False),
]


def init_vgg19_params(key):
    # TODO(synk): reference loads torchvision pretrained weights; here weights are
    # synthetic, deterministically initialized (Kaiming-like scale) with PRNGKey.
    params = []
    for i, (name, cin, cout, pool) in enumerate(_VGG19_CFG):
        k_w, k_b = jax.random.split(jax.random.fold_in(key, i))
        w = (jax.random.normal(k_w, (3, 3, cin, cout), jnp.float32)
             * jnp.sqrt(2.0 / (9.0 * cin))).astype(jnp.bfloat16)
        b = jax.random.normal(k_b, (cout,), jnp.float32) * 0.01
        params.append(dict(name=name, pool=pool, w=w, b=b))
    return params


def vgg19_forward(x_nchw, params, *, to_nchw=False):
    """Replicates VGG19.forward: returns dict {relu1_1: ..., ..., relu5_4: ...}.

    Features are kept in NHWC (channels on the TPU lane axis); pass to_nchw=True for the
    PyTorch NCHW layout (done lazily, outside the hot loop).
    """
    mean = jnp.array([0.485, 0.456, 0.406], jnp.float32)
    std = jnp.array([0.229, 0.224, 0.225], jnp.float32)
    # ((x+1)/2 - mean)/std is fused into the first conv kernel as x*scale + shift.
    scale = 0.5 / std
    shift = (0.5 - mean) / std

    x = jnp.transpose(x_nchw.astype(jnp.float32), (0, 2, 3, 1))  # NCHW -> NHWC, once
    groups = _build_groups(params, x.shape[1], x.shape[2])
    features = {}
    for gi, group in enumerate(groups):
        outs = _conv_group(x, group,
                           norm_scale=scale if gi == 0 else None,
                           norm_shift=shift if gi == 0 else None)
        for lyr, o in zip(group, outs):
            features[lyr["name"]] = o
        x = outs[-1]
    if to_nchw:
        features = {k: jnp.transpose(v, (0, 3, 1, 2)) for k, v in features.items()}
    return features


# ---------------------------------------------------------------------------- reference


def _vgg19_reference(x_nchw, params):
    """Pure-JAX reference mirroring the kernel's bf16 quantisation points."""
    mean = jnp.array([0.485, 0.456, 0.406], jnp.float32).reshape(1, 1, 1, 3)
    std = jnp.array([0.229, 0.224, 0.225], jnp.float32).reshape(1, 1, 1, 3)
    x = jnp.transpose(x_nchw.astype(jnp.float32), (0, 2, 3, 1))
    x = (((x + 1.0) / 2.0) - mean) / std
    x = x.astype(jnp.bfloat16)
    feats = {}
    for lyr in params:
        if lyr["pool"]:
            n, h, w, c = x.shape
            x = jnp.max(x.reshape(n, h // 2, 2, w // 2, 2, c), axis=(2, 4))
        y = lax.conv_general_dilated(
            x.astype(jnp.float32), lyr["w"].astype(jnp.float32),
            window_strides=(1, 1), padding="SAME",
            dimension_numbers=("NHWC", "HWIO", "NHWC"),
            precision=lax.Precision.HIGHEST)
        y = jnp.maximum(y + lyr["b"].astype(jnp.float32).reshape(1, 1, 1, -1), 0.0)
        x = y.astype(jnp.bfloat16)
        feats[lyr["name"]] = x
    return feats


# --------------------------------------------------------------------------------- main


if __name__ == "__main__":
    key = jax.random.PRNGKey(0)
    k_x, k_p = jax.random.split(key)

    # small toy input consistent with the module: NCHW, 3 channels, values in [-1, 1]
    x = jax.random.uniform(k_x, (2, 3, 16, 16), jnp.float32, minval=-1.0, maxval=1.0)

    params = init_vgg19_params(k_p)
    feats = vgg19_forward(x, params)
    feats = jax.block_until_ready(feats)

    # sanity: 16 feature maps, correct (NHWC) shapes, finite values
    assert len(feats) == 16
    assert feats["relu1_1"].shape == (2, 16, 16, 64)
    assert feats["relu3_4"].shape == (2, 4, 4, 256)
    assert feats["relu5_4"].shape == (2, 1, 1, 512)
    assert all(bool(jnp.all(jnp.isfinite(v.astype(jnp.float32))))
               for v in feats.values())

    # numerical check against a pure-JAX reference (same bf16 quantisation points)
    ref = _vgg19_reference(x, params)
    for name, want in ref.items():
        got = feats[name].astype(jnp.float32)
        assert bool(jnp.allclose(got, want.astype(jnp.float32),
                                 rtol=5e-2, atol=5e-2)), f"mismatch in {name}"

    print("KERNEL_OK")
</pallas_src>

<mosaic_0001>
module attributes {stable_mosaic.version = 11 : i64} {
  func.func @_vgg_group_kernel(%arg0: i32, %arg1: memref<1x16x16x3xf32, #tpu.memory_space<vmem>>, %arg2: memref<1x1x1x3xf32, #tpu.memory_space<vmem>>, %arg3: memref<1x1x1x3xf32, #tpu.memory_space<vmem>>, %arg4: memref<27x64xbf16, #tpu.memory_space<vmem>>, %arg5: memref<1x64xf32, #tpu.memory_space<vmem>>, %arg6: memref<576x64xbf16, #tpu.memory_space<vmem>>, %arg7: memref<1x64xf32, #tpu.memory_space<vmem>>, %arg8: memref<1x16x16x64xbf16, #tpu.memory_space<vmem>>, %arg9: memref<1x16x16x64xbf16, #tpu.memory_space<vmem>>, %arg10: memref<1x18x25x64xbf16, #tpu.memory_space<vmem>>) attributes {dimension_semantics = [#tpu.dimension_semantics<parallel>], iteration_bounds = array<i64: 2>, scalar_prefetch = 0 : i64, scratch_operands = 1 : i64, tpu.core_type = #tpu.core_type<tc>, window_params = [{transform_indices = @transform_0, window_bounds = array<i64: 1, 16, 16, 3>}, {pipeline_mode = #tpu.pipeline_mode<synchronous>, transform_indices = @transform_1, window_bounds = array<i64: 1, 1, 1, 3>}, {pipeline_mode = #tpu.pipeline_mode<synchronous>, transform_indices = @transform_2, window_bounds = array<i64: 1, 1, 1, 3>}, {pipeline_mode = #tpu.pipeline_mode<synchronous>, transform_indices = @transform_3, window_bounds = array<i64: 27, 64>}, {pipeline_mode = #tpu.pipeline_mode<synchronous>, transform_indices = @transform_4, window_bounds = array<i64: 1, 64>}, {pipeline_mode = #tpu.pipeline_mode<synchronous>, transform_indices = @transform_5, window_bounds = array<i64: 576, 64>}, {pipeline_mode = #tpu.pipeline_mode<synchronous>, transform_indices = @transform_6, window_bounds = array<i64: 1, 64>}, {transform_indices = @transform_7, window_bounds = array<i64: 1, 16, 16, 64>}, {transform_indices = @transform_8, window_bounds = array<i64: 1, 16, 16, 64>}]} {
    %c0_i32 = arith.constant 0 : i32
    %0 = arith.cmpi eq, %arg0, %c0_i32 : i32
    %1 = arith.extui %0 : i1 to i32
    %c0_i32_0 = arith.constant 0 : i32
    %2 = arith.cmpi ne, %1, %c0_i32_0 : i32
    scf.if %2 {
      %cst_106 = arith.constant 0.000000e+00 : bf16
      %72 = vector.broadcast %cst_106 : bf16 to vector<1x18x25x64xbf16>
      %c0_107 = arith.constant 0 : index
      %c0_108 = arith.constant 0 : index
      %c0_109 = arith.constant 0 : index
      %c0_110 = arith.constant 0 : index
      %73 = vector.load %arg10[%c0_107, %c0_108, %c0_109, %c0_110] : memref<1x18x25x64xbf16, #tpu.memory_space<vmem>>, vector<1x18x25x64xbf16>
      tpu.vector_store %arg10[%c0_107, %c0_108, %c0_109, %c0_110], %72 {strides = array<i32>} : memref<1x18x25x64xbf16, #tpu.memory_space<vmem>>, vector<1x18x25x64xbf16>,
    } else {
    }
    %c0 = arith.constant 0 : index
    %c0_1 = arith.constant 0 : index
    %c0_2 = arith.constant 0 : index
    %c0_3 = arith.constant 0 : index
    %3 = vector.load %arg1[%c0, %c0_1, %c0_2, %c0_3] : memref<1x16x16x3xf32, #tpu.memory_space<vmem>>, vector<1x16x16x3xf32>
    %c0_4 = arith.constant 0 : index
    %c0_5 = arith.constant 0 : index
    %c0_6 = arith.constant 0 : index
    %c0_7 = arith.constant 0 : index
    %4 = vector.load %arg2[%c0_4, %c0_5, %c0_6, %c0_7] : memref<1x1x1x3xf32, #tpu.memory_space<vmem>>, vector<1x1x1x3xf32>
    %5 = vector.broadcast %4 : vector<1x1x1x3xf32> to vector<1x16x16x3xf32>
    %6 = arith.mulf %3, %5 : vector<1x16x16x3xf32>
    %c0_8 = arith.constant 0 : index
    %c0_9 = arith.constant 0 : index
    %c0_10 = arith.constant 0 : index
    %c0_11 = arith.constant 0 : index
    %7 = vector.load %arg3[%c0_8, %c0_9, %c0_10, %c0_11] : memref<1x1x1x3xf32, #tpu.memory_space<vmem>>, vector<1x1x1x3xf32>
    %8 = vector.broadcast %7 : vector<1x1x1x3xf32> to vector<1x16x16x3xf32>
    %9 = arith.addf %6, %8 : vector<1x16x16x3xf32>
    %10 = arith.truncf %9 : vector<1x16x16x3xf32> to vector<1x16x16x3xbf16>
    %c0_12 = arith.constant 0 : index
    %c1 = arith.constant 1 : index
    %c8 = arith.constant 8 : index
    %c0_13 = arith.constant 0 : index
    %11 = vector.load %arg10[%c0_12, %c1, %c8, %c0_13] : memref<1x18x25x64xbf16, #tpu.memory_space<vmem>>, vector<1x16x16x3xbf16>
    tpu.vector_store %arg10[%c0_12, %c1, %c8, %c0_13], %10 {strides = array<i32>} : memref<1x18x25x64xbf16, #tpu.memory_space<vmem>>, vector<1x16x16x3xbf16>,
    %c0_14 = arith.constant 0 : index
    %c0_15 = arith.constant 0 : index
    %c7 = arith.constant 7 : index
    %c0_16 = arith.constant 0 : index
    %12 = vector.load %arg10[%c0_14, %c0_15, %c7, %c0_16] : memref<1x18x25x64xbf16, #tpu.memory_space<vmem>>, vector<1x16x16x3xbf16>
    %13 = vector.shape_cast %12 : vector<1x16x16x3xbf16> to vector<256x3xbf16>
    %c0_17 = arith.constant 0 : index
    %c0_18 = arith.constant 0 : index
    %c8_19 = arith.constant 8 : index
    %c0_20 = arith.constant 0 : index
    %14 = vector.load %arg10[%c0_17, %c0_18, %c8_19, %c0_20] : memref<1x18x25x64xbf16, #tpu.memory_space<vmem>>, vector<1x16x16x3xbf16>
    %15 = vector.shape_cast %14 : vector<1x16x16x3xbf16> to vector<256x3xbf16>
    %c0_21 = arith.constant 0 : index
    %c0_22 = arith.constant 0 : index
    %c9 = arith.constant 9 : index
    %c0_23 = arith.constant 0 : index
    %16 = vector.load %arg10[%c0_21, %c0_22, %c9, %c0_23] : memref<1x18x25x64xbf16, #tpu.memory_space<vmem>>, vector<1x16x16x3xbf16>
    %17 = vector.shape_cast %16 : vector<1x16x16x3xbf16> to vector<256x3xbf16>
    %c0_24 = arith.constant 0 : index
    %c1_25 = arith.constant 1 : index
    %c7_26 = arith.constant 7 : index
    %c0_27 = arith.constant 0 : index
    %18 = vector.load %arg10[%c0_24, %c1_25, %c7_26, %c0_27] : memref<1x18x25x64xbf16, #tpu.memory_space<vmem>>, vector<1x16x16x3xbf16>
    %19 = vector.shape_cast %18 : vector<1x16x16x3xbf16> to vector<256x3xbf16>
    %c0_28 = arith.constant 0 : index
    %c1_29 = arith.constant 1 : index
    %c8_30 = arith.constant 8 : index
    %c0_31 = arith.constant 0 : index
    %20 = vector.load %arg10[%c0_28, %c1_29, %c8_30, %c0_31] : memref<1x18x25x64xbf16, #tpu.memory_space<vmem>>, vector<1x16x16x3xbf16>
    %21 = vector.shape_cast %20 : vector<1x16x16x3xbf16> to vector<256x3xbf16>
    %c0_32 = arith.constant 0 : index
    %c1_33 = arith.constant 1 : index
    %c9_34 = arith.constant 9 : index
    %c0_35 = arith.constant 0 : index
    %22 = vector.load %arg10[%c0_32, %c1_33, %c9_34, %c0_35] : memref<1x18x25x64xbf16, #tpu.memory_space<vmem>>, vector<1x16x16x3xbf16>
    %23 = vector.shape_cast %22 : vector<1x16x16x3xbf16> to vector<256x3xbf16>
    %c0_36 = arith.constant 0 : index
    %c2 = arith.constant 2 : index
    %c7_37 = arith.constant 7 : index
    %c0_38 = arith.constant 0 : index
    %24 = vector.load %arg10[%c0_36, %c2, %c7_37, %c0_38] : memref<1x18x25x64xbf16, #tpu.memory_space<vmem>>, vector<1x16x16x3xbf16>
    %25 = vector.shape_cast %24 : vector<1x16x16x3xbf16> to vector<256x3xbf16>
    %c0_39 = arith.constant 0 : index
    %c2_40 = arith.constant 2 : index
    %c8_41 = arith.constant 8 : index
    %c0_42 = arith.constant 0 : index
    %26 = vector.load %arg10[%c0_39, %c2_40, %c8_41, %c0_42] : memref<1x18x25x64xbf16, #tpu.memory_space<vmem>>, vector<1x16x16x3xbf16>
    %27 = vector.shape_cast %26 : vector<1x16x16x3xbf16> to vector<256x3xbf16>
    %c0_43 = arith.constant 0 : index
    %c2_44 = arith.constant 2 : index
    %c9_45 = arith.constant 9 : index
    %c0_46 = arith.constant 0 : index
    %28 = vector.load %arg10[%c0_43, %c2_44, %c9_45, %c0_46] : memref<1x18x25x64xbf16, #tpu.memory_space<vmem>>, vector<1x16x16x3xbf16>
    %29 = vector.shape_cast %28 : vector<1x16x16x3xbf16> to vector<256x3xbf16>
    %30 = tpu.concatenate %13, %15, %17, %19, %21, %23, %25, %27, %29 in 1 : vector<256x3xbf16>, vector<256x3xbf16>, vector<256x3xbf16>, vector<256x3xbf16>, vector<256x3xbf16>, vector<256x3xbf16>, vector<256x3xbf16>, vector<256x3xbf16>, vector<256x3xbf16> -> vector<256x27xbf16>
    %c0_47 = arith.constant 0 : index
    %c0_48 = arith.constant 0 : index
    %31 = vector.load %arg4[%c0_47, %c0_48] : memref<27x64xbf16, #tpu.memory_space<vmem>>, vector<27x64xbf16>
    %cst = arith.constant dense<0.000000e+00> : vector<256x64xf32>
    %32 = tpu.matmul %30, %31, %cst {dimension_numbers = #tpu.dot_dimension_numbers<[1], [0], [0], [1], [0, 0, 1, 1], [], []>} : vector<256x27xbf16>, vector<27x64xbf16>, vector<256x64xf32> -> vector<256x64xf32>
    %c0_49 = arith.constant 0 : index
    %c0_50 = arith.constant 0 : index
    %33 = vector.load %arg5[%c0_49, %c0_50] : memref<1x64xf32, #tpu.memory_space<vmem>>, vector<1x64xf32>
    %34 = vector.broadcast %33 : vector<1x64xf32> to vector<256x64xf32>
    %35 = arith.addf %32, %34 : vector<256x64xf32>
    %cst_51 = arith.constant 0.000000e+00 : f32
    %36 = vector.broadcast %cst_51 : f32 to vector<256x64xf32>
    %37 = arith.maximumf %35, %36 : vector<256x64xf32>
    %38 = vector.shape_cast %37 : vector<256x64xf32> to vector<1x16x16x64xf32>
    %39 = arith.truncf %38 : vector<1x16x16x64xf32> to vector<1x16x16x64xbf16>
    %c0_52 = arith.constant 0 : index
    %c0_53 = arith.constant 0 : index
    %c0_54 = arith.constant 0 : index
    %c0_55 = arith.constant 0 : index
    %40 = vector.load %arg8[%c0_52, %c0_53, %c0_54, %c0_55] : memref<1x16x16x64xbf16, #tpu.memory_space<vmem>>, vector<1x16x16x64xbf16>
    tpu.vector_store %arg8[%c0_52, %c0_53, %c0_54, %c0_55], %39 {strides = array<i32>} : memref<1x16x16x64xbf16, #tpu.memory_space<vmem>>, vector<1x16x16x64xbf16>,
    %41 = arith.truncf %38 : vector<1x16x16x64xf32> to vector<1x16x16x64xbf16>
    %c0_56 = arith.constant 0 : index
    %c1_57 = arith.constant 1 : index
    %c8_58 = arith.constant 8 : index
    %c0_59 = arith.constant 0 : index
    %42 = vector.load %arg10[%c0_56, %c1_57, %c8_58, %c0_59] : memref<1x18x25x64xbf16, #tpu.memory_space<vmem>>, vector<1x16x16x64xbf16>
    tpu.vector_store %arg10[%c0_56, %c1_57, %c8_58, %c0_59], %41 {strides = array<i32>} : memref<1x18x25x64xbf16, #tpu.memory_space<vmem>>, vector<1x16x16x64xbf16>,
    %c0_60 = arith.constant 0 : index
    %c0_61 = arith.constant 0 : index
    %c7_62 = arith.constant 7 : index
    %c0_63 = arith.constant 0 : index
    %43 = vector.load %arg10[%c0_60, %c0_61, %c7_62, %c0_63] : memref<1x18x25x64xbf16, #tpu.memory_space<vmem>>, vector<1x16x16x64xbf16>
    %44 = vector.shape_cast %43 : vector<1x16x16x64xbf16> to vector<256x64xbf16>
    %c0_64 = arith.constant 0 : index
    %c0_65 = arith.constant 0 : index
    %c8_66 = arith.constant 8 : index
    %c0_67 = arith.constant 0 : index
    %45 = vector.load %arg10[%c0_64, %c0_65, %c8_66, %c0_67] : memref<1x18x25x64xbf16, #tpu.memory_space<vmem>>, vector<1x16x16x64xbf16>
    %46 = vector.shape_cast %45 : vector<1x16x16x64xbf16> to vector<256x64xbf16>
    %c0_68 = arith.constant 0 : index
    %c0_69 = arith.constant 0 : index
    %c9_70 = arith.constant 9 : index
    %c0_71 = arith.constant 0 : index
    %47 = vector.load %arg10[%c0_68, %c0_69, %c9_70, %c0_71] : memref<1x18x25x64xbf16, #tpu.memory_space<vmem>>, vector<1x16x16x64xbf16>
    %48 = vector.shape_cast %47 : vector<1x16x16x64xbf16> to vector<256x64xbf16>
    %c0_72 = arith.constant 0 : index
    %c1_73 = arith.constant 1 : index
    %c7_74 = arith.constant 7 : index
    %c0_75 = arith.constant 0 : index
    %49 = vector.load %arg10[%c0_72, %c1_73, %c7_74, %c0_75] : memref<1x18x25x64xbf16, #tpu.memory_space<vmem>>, vector<1x16x16x64xbf16>
    %50 = vector.shape_cast %49 : vector<1x16x16x64xbf16> to vector<256x64xbf16>
    %c0_76 = arith.constant 0 : index
    %c1_77 = arith.constant 1 : index
    %c8_78 = arith.constant 8 : index
    %c0_79 = arith.constant 0 : index
    %51 = vector.load %arg10[%c0_76, %c1_77, %c8_78, %c0_79] : memref<1x18x25x64xbf16, #tpu.memory_space<vmem>>, vector<1x16x16x64xbf16>
    %52 = vector.shape_cast %51 : vector<1x16x16x64xbf16> to vector<256x64xbf16>
    %c0_80 = arith.constant 0 : index
    %c1_81 = arith.constant 1 : index
    %c9_82 = arith.constant 9 : index
    %c0_83 = arith.constant 0 : index
    %53 = vector.load %arg10[%c0_80, %c1_81, %c9_82, %c0_83] : memref<1x18x25x64xbf16, #tpu.memory_space<vmem>>, vector<1x16x16x64xbf16>
    %54 = vector.shape_cast %53 : vector<1x16x16x64xbf16> to vector<256x64xbf16>
    %c0_84 = arith.constant 0 : index
    %c2_85 = arith.constant 2 : index
    %c7_86 = arith.constant 7 : index
    %c0_87 = arith.constant 0 : index
    %55 = vector.load %arg10[%c0_84, %c2_85, %c7_86, %c0_87] : memref<1x18x25x64xbf16, #tpu.memory_space<vmem>>, vector<1x16x16x64xbf16>
    %56 = vector.shape_cast %55 : vector<1x16x16x64xbf16> to vector<256x64xbf16>
    %c0_88 = arith.constant 0 : index
    %c2_89 = arith.constant 2 : index
    %c8_90 = arith.constant 8 : index
    %c0_91 = arith.constant 0 : index
    %57 = vector.load %arg10[%c0_88, %c2_89, %c8_90, %c0_91] : memref<1x18x25x64xbf16, #tpu.memory_space<vmem>>, vector<1x16x16x64xbf16>
    %58 = vector.shape_cast %57 : vector<1x16x16x64xbf16> to vector<256x64xbf16>
    %c0_92 = arith.constant 0 : index
    %c2_93 = arith.constant 2 : index
    %c9_94 = arith.constant 9 : index
    %c0_95 = arith.constant 0 : index
    %59 = vector.load %arg10[%c0_92, %c2_93, %c9_94, %c0_95] : memref<1x18x25x64xbf16, #tpu.memory_space<vmem>>, vector<1x16x16x64xbf16>
    %60 = vector.shape_cast %59 : vector<1x16x16x64xbf16> to vector<256x64xbf16>
    %61 = tpu.concatenate %44, %46, %48, %50, %52, %54, %56, %58, %60 in 1 : vector<256x64xbf16>, vector<256x64xbf16>, vector<256x64xbf16>, vector<256x64xbf16>, vector<256x64xbf16>, vector<256x64xbf16>, vector<256x64xbf16>, vector<256x64xbf16>, vector<256x64xbf16> -> vector<256x576xbf16>
    %c0_96 = arith.constant 0 : index
    %c0_97 = arith.constant 0 : index
    %62 = vector.load %arg6[%c0_96, %c0_97] : memref<576x64xbf16, #tpu.memory_space<vmem>>, vector<576x64xbf16>
    %cst_98 = arith.constant dense<0.000000e+00> : vector<256x64xf32>
    %63 = tpu.matmul %61, %62, %cst_98 {dimension_numbers = #tpu.dot_dimension_numbers<[1], [0], [0], [1], [0, 0, 1, 1], [], []>} : vector<256x576xbf16>, vector<576x64xbf16>, vector<256x64xf32> -> vector<256x64xf32>
    %c0_99 = arith.constant 0 : index
    %c0_100 = arith.constant 0 : index
    %64 = vector.load %arg7[%c0_99, %c0_100] : memref<1x64xf32, #tpu.memory_space<vmem>>, vector<1x64xf32>
    %65 = vector.broadcast %64 : vector<1x64xf32> to vector<256x64xf32>
    %66 = arith.addf %63, %65 : vector<256x64xf32>
    %cst_101 = arith.constant 0.000000e+00 : f32
    %67 = vector.broadcast %cst_101 : f32 to vector<256x64xf32>
    %68 = arith.maximumf %66, %67 : vector<256x64xf32>
    %69 = vector.shape_cast %68 : vector<256x64xf32> to vector<1x16x16x64xf32>
    %70 = arith.truncf %69 : vector<1x16x16x64xf32> to vector<1x16x16x64xbf16>
    %c0_102 = arith.constant 0 : index
    %c0_103 = arith.constant 0 : index
    %c0_104 = arith.constant 0 : index
    %c0_105 = arith.constant 0 : index
    %71 = vector.load %arg9[%c0_102, %c0_103, %c0_104, %c0_105] : memref<1x16x16x64xbf16, #tpu.memory_space<vmem>>, vector<1x16x16x64xbf16>
    tpu.vector_store %arg9[%c0_102, %c0_103, %c0_104, %c0_105], %70 {strides = array<i32>} : memref<1x16x16x64xbf16, #tpu.memory_space<vmem>>, vector<1x16x16x64xbf16>,
    return
  }
  func.func @transform_0(%arg0: i32) -> (i32, i32, i32, i32) {
    %c0_i32 = arith.constant 0 : i32
    %c0_i32_0 = arith.constant 0 : i32
    %c0_i32_1 = arith.constant 0 : i32
    %c0_i32_2 = arith.constant 0 : i32
    return %arg0, %c0_i32, %c0_i32_0, %c0_i32_1 : i32, i32, i32, i32
  }
  func.func @transform_1(%arg0: i32) -> (i32, i32, i32, i32) {
    %c0_i32 = arith.constant 0 : i32
    %c0_i32_0 = arith.constant 0 : i32
    %c0_i32_1 = arith.constant 0 : i32
    %c0_i32_2 = arith.constant 0 : i32
    %c0_i32_3 = arith.constant 0 : i32
    return %c0_i32, %c0_i32_0, %c0_i32_1, %c0_i32_2 : i32, i32, i32, i32
  }
  func.func @transform_2(%arg0: i32) -> (i32, i32, i32, i32) {
    %c0_i32 = arith.constant 0 : i32
    %c0_i32_0 = arith.constant 0 : i32
    %c0_i32_1 = arith.constant 0 : i32
    %c0_i32_2 = arith.constant 0 : i32
    %c0_i32_3 = arith.constant 0 : i32
    return %c0_i32, %c0_i32_0, %c0_i32_1, %c0_i32_2 : i32, i32, i32, i32
  }
  func.func @transform_3(%arg0: i32) -> (i32, i32) {
    %c0_i32 = arith.constant 0 : i32
    %c0_i32_0 = arith.constant 0 : i32
    %c0_i32_1 = arith.constant 0 : i32
    return %c0_i32, %c0_i32_0 : i32, i32
  }
  func.func @transform_4(%arg0: i32) -> (i32, i32) {
    %c0_i32 = arith.constant 0 : i32
    %c0_i32_0 = arith.constant 0 : i32
    %c0_i32_1 = arith.constant 0 : i32
    return %c0_i32, %c0_i32_0 : i32, i32
  }
  func.func @transform_5(%arg0: i32) -> (i32, i32) {
    %c0_i32 = arith.constant 0 : i32
    %c0_i32_0 = arith.constant 0 : i32
    %c0_i32_1 = arith.constant 0 : i32
    return %c0_i32, %c0_i32_0 : i32, i32
  }
  func.func @transform_6(%arg0: i32) -> (i32, i32) {
    %c0_i32 = arith.constant 0 : i32
    %c0_i32_0 = arith.constant 0 : i32
    %c0_i32_1 = arith.constant 0 : i32
    return %c0_i32, %c0_i32_0 : i32, i32
  }
  func.func @transform_7(%arg0: i32) -> (i32, i32, i32, i32) {
    %c0_i32 = arith.constant 0 : i32
    %c0_i32_0 = arith.constant 0 : i32
    %c0_i32_1 = arith.constant 0 : i32
    %c0_i32_2 = arith.constant 0 : i32
    return %arg0, %c0_i32, %c0_i32_0, %c0_i32_1 : i32, i32, i32, i32
  }
  func.func @transform_8(%arg0: i32) -> (i32, i32, i32, i32) {
    %c0_i32 = arith.constant 0 : i32
    %c0_i32_0 = arith.constant 0 : i32
    %c0_i32_1 = arith.constant 0 : i32
    %c0_i32_2 = arith.constant 0 : i32
    return %arg0, %c0_i32, %c0_i32_0, %c0_i32_1 : i32, i32, i32, i32
  }
}

</mosaic_0001>

<bundles_post_ra>
// kernel: tpu_custom_call.1
= control target key start
LH: loop header
LB: loop body
LE: loop exit
PB: predicated region body
PF: predicated region fallthrough
CT: control target
= control target key end

     0   :  { %14 = vsyncpa [#allocation4], 0  ;;  %s14949_s0 = inlined_call_operand.vmem [shape: f32[2,16,16,3], index: 0, kind: input, shape index: {}]   ;;  %s14950_s1 = inlined_call_operand.vmem [shape: f32[1,1,1,3], index: 1, kind: input, shape index: {}]   ;;  %s14951_s2 = inlined_call_operand.vmem [shape: f32[1,1,1,3], index: 2, kind: input, shape index: {}]   ;;  %s14952_s3 = inlined_call_operand.vmem [shape: bf16[27,64], index: 3, kind: input, shape index: {}]   ;;  %s14953_s4 = inlined_call_operand.vmem [shape: f32[1,64], index: 4, kind: input, shape index: {}]   ;;  %s14954_s5 = inlined_call_operand.vmem [shape: bf16[576,64], index: 5, kind: input, shape index: {}]   ;;  %s14955_s6 = inlined_call_operand.vmem [shape: f32[1,64], index: 6, kind: input, shape index: {}]   ;;  %s14956_s7 = inlined_call_operand.hbm [shape: bf16[2,16,16,64], index: 7, kind: output, shape index: {0}]   ;;  %s14957_s8 = inlined_call_operand.hbm [shape: bf16[2,16,16,64], index: 8, kind: output, shape index: {1}]  }
   0x1   :  { %16 = vsyncpa [#allocation4 + $0x1], 0 }
   0x2   :  { %17 = vsyncpa [#allocation6], 0 }
   0x3   :  { %19 = vsyncpa [#allocation6 + $0x1], 0  ;;  %s9473_s27 = smov 0   ;;  %s9475_s28 = smov 0  }
   0x4   :  { %s9477_s29 = smov 0   ;;  %s9479_s30 = smov 0  }
   0x5 LB: > { %s9494_s9 = sadd.s32 4294967295, %s9412_s30   ;;  %s8123_s10 = sadd.s32 4294967294, %s9412_s30   ;;  %s9412_s30 = sphi %s9479_s30, %s15676_s30   ;;  %s9408_s29 = sphi %s9477_s29, %s15675_s29   ;;  %s9404_s28 = sphi %s9475_s28, %s15674_s28   ;;  %s9400_s27 = sphi %s9473_s27, %s15673_s27  }
   0x6   : > { %s9498_s11 = sadd.s32 1, %s9412_s30   ;;  %s184_s12 = sadd.s32 1, %s9408_s29 }
   0x7   : > { %s181_s13 = ssub.s32 %s9412_s30, %s9498_s11  ;;  %p194_p0 = scmp.ne.s32.totalorder %s9408_s29, %s9404_s28 }
   0x8   : > { %p182_p1 = scmp.eq.s32.totalorder %s181_s13, 0  ;;  %p195_p2 = scmp.eq.s32.totalorder %s9494_s9, 1 }
   0x9   : > { %p200_p3 = scmp.ne.s32.totalorder %s9404_s28, %s9400_s27  ;;  %p201_p4 = scmp.eq.s32.totalorder %s8123_s10, 1 }
   0xa   : > { %s9509_s14 = scalar_select %p182_p1, %s9408_s29, %s184_s12  }
   0xb   : > { %p9511_p5 = por %p195_p2, %p194_p0  ;;  %p9515_p6 = por %p201_p4, %p200_p3 }
   0xc   : > { %p8126_p7 = scmp.ge.s32.totalorder %s9412_s30, 1  ;;  %p271_p8 = scmp.lt.s32.totalorder %s9412_s30, 3 }
   0xe   : > { %p272_p9 = pnand %p8126_p7, %p271_p8 }
  0x10   : > { %275 = sbr.rel (%p272_p9) target bundleno = 1250 (0x4e2), region = 48 }
  0x17   : > { %s9522_s17 = sand.u32 1, %s9404_s28   ;;  %p310_p10 = scmp.lt.s32.totalorder %s9494_s9, 1 }
  0x18   : > { %s8127_s18 = sshll.u32 %s9522_s17, 7  ;;  %p8131_p11 = scmp.ne.s32.totalorder %s9494_s9, 0 }
  0x19   : > { %s311_s19 = scalar_select %p310_p10, %s9494_s9, 1 }
  0x1a   : > { %s9532_s24 = scalar_lea.vmem [#allocation3], %s8127_s18  ;;  %s9534_s25 = scalar_lea.vmem [#allocation5], %s8127_s18  ;;  %vm320_vm0 = vcmask (!%p8131_p11), 519168   ;;  %vm324_vm1 = vcmask (!%p8131_p11), 516096   ;;  %vm325_vm2 = vsmask.f32 (!%p8131_p11), 256 }
  0x1b   : > { %s8694_s20 = sshll.u32 %s311_s19, 8  ;;  %319 = sbr.rel (%p8131_p11) target bundleno = 64 (0x40), region = 52  ;;  %v9414_v0 = vmov (!%p8131_p11), 0   ;;  %vm9593_vm3 = vmand (!%p8131_p11), %vm324_vm1, %vm325_vm2  ;;  %v327_v2 = vld [vmem:[#allocation2 + $0xc] sm:$0x1] (!%p8131_p11) }
  0x1c   : > { %s9530_s23 = scalar_lea.vmem %s14949_s0, %s8694_s20  ;;  %321 = vst.msk [vmem:[#allocation2] sm:$0xf] (!%p8131_p11), %vm320_vm0, %v9414_v0  ;;  %322 = vst.msk [vmem:[#allocation2 + $0x4] sm:$0xf] (!%p8131_p11), %vm320_vm0, %v9414_v0  ;;  %v333_v3 = vld [vmem:[#allocation2 + $0x1c] sm:$0x1] (!%p8131_p11) }
  0x1d   : > { %323 = vst.msk [vmem:[#allocation2 + $0x8] sm:$0xf] (!%p8131_p11), %vm320_vm0, %v9414_v0  ;;  %330 = vst.msk [vmem:[#allocation2 + $0x10] sm:$0xf] (!%p8131_p11), %vm320_vm0, %v9414_v0  ;;  %v328_v4 = vsel (!%p8131_p11), %vm9593_vm3, 0, %v327_v2  ;;  %v334_v5 = vsel (!%p8131_p11), %vm9593_vm3, 0, %v333_v3 }
  0x1e   : > { %331 = vst.msk [vmem:[#allocation2 + $0x14] sm:$0xf] (!%p8131_p11), %vm320_vm0, %v9414_v0  ;;  %332 = vst.msk [vmem:[#allocation2 + $0x18] sm:$0xf] (!%p8131_p11), %vm320_vm0, %v9414_v0  ;;  %v339_v6 = vld [vmem:[#allocation2 + $0x2c] sm:$0x1] (!%p8131_p11) }
  0x1f   : > { %336 = vst.msk [vmem:[#allocation2 + $0x20] sm:$0xf] (!%p8131_p11), %vm320_vm0, %v9414_v0  ;;  %337 = vst.msk [vmem:[#allocation2 + $0x24] sm:$0xf] (!%p8131_p11), %vm320_vm0, %v9414_v0  ;;  %v345_v7 = vld [vmem:[#allocation2 + $0x3c] sm:$0x1] (!%p8131_p11) }
  0x20   : > { %338 = vst.msk [vmem:[#allocation2 + $0x28] sm:$0xf] (!%p8131_p11), %vm320_vm0, %v9414_v0  ;;  %342 = vst.msk [vmem:[#allocation2 + $0x30] sm:$0xf] (!%p8131_p11), %vm320_vm0, %v9414_v0  ;;  %v340_v8 = vsel (!%p8131_p11), %vm9593_vm3, 0, %v339_v6  ;;  %v346_v9 = vsel (!%p8131_p11), %vm9593_vm3, 0, %v345_v7 }
  0x21   : > { %343 = vst.msk [vmem:[#allocation2 + $0x34] sm:$0xf] (!%p8131_p11), %vm320_vm0, %v9414_v0  ;;  %344 = vst.msk [vmem:[#allocation2 + $0x38] sm:$0xf] (!%p8131_p11), %vm320_vm0, %v9414_v0  ;;  %v351_v10 = vld [vmem:[#allocation2 + $0x4c] sm:$0x1] (!%p8131_p11) }
  0x22   : > { %348 = vst.msk [vmem:[#allocation2 + $0x40] sm:$0xf] %vm320_vm0, %v9414_v0  ;;  %349 = vst.msk [vmem:[#allocation2 + $0x44] sm:$0xf] %vm320_vm0, %v9414_v0  ;;  %v357_v11 = vld [vmem:[#allocation2 + $0x5c] sm:$0x1] }
  0x23   : > { %350 = vst.msk [vmem:[#allocation2 + $0x48] sm:$0xf] %vm320_vm0, %v9414_v0  ;;  %354 = vst.msk [vmem:[#allocation2 + $0x50] sm:$0xf] %vm320_vm0, %v9414_v0  ;;  %v352_v12 = vsel %vm9593_vm3, 0, %v351_v10  ;;  %v358_v13 = vsel %vm9593_vm3, 0, %v357_v11 }
  0x24   : > { %355 = vst.msk [vmem:[#allocation2 + $0x54] sm:$0xf] %vm320_vm0, %v9414_v0  ;;  %356 = vst.msk [vmem:[#allocation2 + $0x58] sm:$0xf] %vm320_vm0, %v9414_v0  ;;  %v363_v14 = vld [vmem:[#allocation2 + $0x6c] sm:$0x1] }
  0x25   : > { %360 = vst.msk [vmem:[#allocation2 + $0x60] sm:$0xf] %vm320_vm0, %v9414_v0  ;;  %361 = vst.msk [vmem:[#allocation2 + $0x64] sm:$0xf] %vm320_vm0, %v9414_v0  ;;  %v369_v15 = vld [vmem:[#allocation2 + $0x7c] sm:$0x1] }
  0x26   : > { %362 = vst.msk [vmem:[#allocation2 + $0x68] sm:$0xf] %vm320_vm0, %v9414_v0  ;;  %366 = vst.msk [vmem:[#allocation2 + $0x70] sm:$0xf] %vm320_vm0, %v9414_v0  ;;  %v364_v16 = vsel %vm9593_vm3, 0, %v363_v14  ;;  %v370_v17 = vsel %vm9593_vm3, 0, %v369_v15 }
  0x27   : > { %367 = vst.msk [vmem:[#allocation2 + $0x74] sm:$0xf] %vm320_vm0, %v9414_v0  ;;  %368 = vst.msk [vmem:[#allocation2 + $0x78] sm:$0xf] %vm320_vm0, %v9414_v0  ;;  %v375_v18 = vld [vmem:[#allocation2 + $0x8c] sm:$0x1] }
  0x28   : > { %372 = vst.msk [vmem:[#allocation2 + $0x80] sm:$0xf] %vm320_vm0, %v9414_v0  ;;  %373 = vst.msk [vmem:[#allocation2 + $0x84] sm:$0xf] %vm320_vm0, %v9414_v0  ;;  %v381_v19 = vld [vmem:[#allocation2 + $0x9c] sm:$0x1] }
  0x29   : > { %374 = vst.msk [vmem:[#allocation2 + $0x88] sm:$0xf] %vm320_vm0, %v9414_v0  ;;  %378 = vst.msk [vmem:[#allocation2 + $0x90] sm:$0xf] %vm320_vm0, %v9414_v0  ;;  %v376_v20 = vsel %vm9593_vm3, 0, %v375_v18  ;;  %v382_v21 = vsel %vm9593_vm3, 0, %v381_v19 }
  0x2a   : > { %379 = vst.msk [vmem:[#allocation2 + $0x94] sm:$0xf] %vm320_vm0, %v9414_v0  ;;  %380 = vst.msk [vmem:[#allocation2 + $0x98] sm:$0xf] %vm320_vm0, %v9414_v0  ;;  %v387_v22 = vld [vmem:[#allocation2 + $0xac] sm:$0x1] }
  0x2b   : > { %384 = vst.msk [vmem:[#allocation2 + $0xa0] sm:$0xf] %vm320_vm0, %v9414_v0  ;;  %385 = vst.msk [vmem:[#allocation2 + $0xa4] sm:$0xf] %vm320_vm0, %v9414_v0  ;;  %v393_v23 = vld [vmem:[#allocation2 + $0xbc] sm:$0x1] }
  0x2c   : > { %386 = vst.msk [vmem:[#allocation2 + $0xa8] sm:$0xf] %vm320_vm0, %v9414_v0  ;;  %390 = vst.msk [vmem:[#allocation2 + $0xb0] sm:$0xf] %vm320_vm0, %v9414_v0  ;;  %v388_v24 = vsel %vm9593_vm3, 0, %v387_v22  ;;  %v394_v25 = vsel %vm9593_vm3, 0, %v393_v23 }
  0x2d   : > { %391 = vst.msk [vmem:[#allocation2 + $0xb4] sm:$0xf] %vm320_vm0, %v9414_v0  ;;  %392 = vst.msk [vmem:[#allocation2 + $0xb8] sm:$0xf] %vm320_vm0, %v9414_v0  ;;  %v399_v26 = vld [vmem:[#allocation2 + $0xcc] sm:$0x1] }
  0x2e   : > { %396 = vst.msk [vmem:[#allocation2 + $0xc0] sm:$0xf] %vm320_vm0, %v9414_v0  ;;  %397 = vst.msk [vmem:[#allocation2 + $0xc4] sm:$0xf] %vm320_vm0, %v9414_v0  ;;  %v405_v27 = vld [vmem:[#allocation2 + $0xdc] sm:$0x1] }
  0x2f   : > { %398 = vst.msk [vmem:[#allocation2 + $0xc8] sm:$0xf] %vm320_vm0, %v9414_v0  ;;  %402 = vst.msk [vmem:[#allocation2 + $0xd0] sm:$0xf] %vm320_vm0, %v9414_v0  ;;  %v400_v28 = vsel %vm9593_vm3, 0, %v399_v26  ;;  %v406_v29 = vsel %vm9593_vm3, 0, %v405_v27 }
  0x30   : > { %403 = vst.msk [vmem:[#allocation2 + $0xd4] sm:$0xf] %vm320_vm0, %v9414_v0  ;;  %404 = vst.msk [vmem:[#allocation2 + $0xd8] sm:$0xf] %vm320_vm0, %v9414_v0  ;;  %v411_v30 = vld [vmem:[#allocation2 + $0xec] sm:$0x1] }
  0x31   : > { %408 = vst.msk [vmem:[#allocation2 + $0xe0] sm:$0xf] %vm320_vm0, %v9414_v0  ;;  %409 = vst.msk [vmem:[#allocation2 + $0xe4] sm:$0xf] %vm320_vm0, %v9414_v0  ;;  %v417_v31 = vld [vmem:[#allocation2 + $0xfc] sm:$0x1] }
  0x32   : > { %410 = vst.msk [vmem:[#allocation2 + $0xe8] sm:$0xf] %vm320_vm0, %v9414_v0  ;;  %414 = vst.msk [vmem:[#allocation2 + $0xf0] sm:$0xf] %vm320_vm0, %v9414_v0  ;;  %v412_v32 = vsel %vm9593_vm3, 0, %v411_v30  ;;  %v418_v33 = vsel %vm9593_vm3, 0, %v417_v31 }
  0x33   : > { %415 = vst.msk [vmem:[#allocation2 + $0xf4] sm:$0xf] %vm320_vm0, %v9414_v0  ;;  %416 = vst.msk [vmem:[#allocation2 + $0xf8] sm:$0xf] %vm320_vm0, %v9414_v0  ;;  %v423_v34 = vld [vmem:[#allocation2 + $0x10c] sm:$0x1] }
  0x34   : > { %420 = vst.msk [vmem:[#allocation2 + $0x100] sm:$0xf] %vm320_vm0, %v9414_v0  ;;  %421 = vst.msk [vmem:[#allocation2 + $0x104] sm:$0xf] %vm320_vm0, %v9414_v0  ;;  %v429_v35 = vld [vmem:[#allocation2 + $0x11c] sm:$0x1] }
  0x35   : > { %422 = vst.msk [vmem:[#allocation2 + $0x108] sm:$0xf] %vm320_vm0, %v9414_v0  ;;  %426 = vst.msk [vmem:[#allocation2 + $0x110] sm:$0xf] %vm320_vm0, %v9414_v0  ;;  %v424_v36 = vsel %vm9593_vm3, 0, %v423_v34  ;;  %v430_v37 = vsel %vm9593_vm3, 0, %v429_v35 }
  0x36   : > { %427 = vst.msk [vmem:[#allocation2 + $0x114] sm:$0xf] %vm320_vm0, %v9414_v0  ;;  %428 = vst.msk [vmem:[#allocation2 + $0x118] sm:$0xf] %vm320_vm0, %v9414_v0 }
  0x37   : > { %329 = vst [vmem:[#allocation2 + $0xc] sm:$0x1] %v328_v4  ;;  %335 = vst [vmem:[#allocation2 + $0x1c] sm:$0x1] %v334_v5 }
  0x38   : > { %341 = vst [vmem:[#allocation2 + $0x2c] sm:$0x1] %v340_v8  ;;  %347 = vst [vmem:[#allocation2 + $0x3c] sm:$0x1] %v346_v9 }
  0x39   : > { %353 = vst [vmem:[#allocation2 + $0x4c] sm:$0x1] %v352_v12  ;;  %359 = vst [vmem:[#allocation2 + $0x5c] sm:$0x1] %v358_v13 }
  0x3a   : > { %365 = vst [vmem:[#allocation2 + $0x6c] sm:$0x1] %v364_v16  ;;  %371 = vst [vmem:[#allocation2 + $0x7c] sm:$0x1] %v370_v17 }
  0x3b   : > { %377 = vst [vmem:[#allocation2 + $0x8c] sm:$0x1] %v376_v20  ;;  %383 = vst [vmem:[#allocation2 + $0x9c] sm:$0x1] %v382_v21 }
  0x3c   : > { %389 = vst [vmem:[#allocation2 + $0xac] sm:$0x1] %v388_v24  ;;  %395 = vst [vmem:[#allocation2 + $0xbc] sm:$0x1] %v394_v25 }
  0x3d   : > { %401 = vst [vmem:[#allocation2 + $0xcc] sm:$0x1] %v400_v28  ;;  %407 = vst [vmem:[#allocation2 + $0xdc] sm:$0x1] %v406_v29 }
  0x3e   : > { %413 = vst [vmem:[#allocation2 + $0xec] sm:$0x1] %v412_v32  ;;  %419 = vst [vmem:[#allocation2 + $0xfc] sm:$0x1] %v418_v33 }
  0x3f   : > { %425 = vst [vmem:[#allocation2 + $0x10c] sm:$0x1] %v424_v36  ;;  %431 = vst [vmem:[#allocation2 + $0x11c] sm:$0x1] %v430_v37 }
  0x40 PF: > { %v1107_v44 = vld [vmem:[#allocation2 + $0xc] sm:$0x1]  ;;  %v434_v45 = vld [vmem:[%s9530_s23 + $0x10] sm:$0xff]  ;;  %vm1123_vm4 = vsmask.f32 3328  ;;  %s14995_s26 = smov 3  }
  0x41   : > { %v705_v38 = vld [vmem:[#allocation2 + $0x4] sm:$0xf]  ;;  %vm1124_vm5 = vsmask.f32 7440  ;;  %v1136_v47 = vshll.u32 %v1107_v44, 16  ;;  %v435_v52 = vld [vmem:[%s9530_s23 + $0x18] sm:$0xff] }
  0x42   : > { %v706_v39 = vld [vmem:[#allocation2 + $0x8] sm:$0xf]  ;;  %v761_v43 = vshrl.u32 %v705_v38, 16  ;;  %v764_v46 = vshll.u32 %v705_v38, 16  ;;  %v9641_v56 = vld [vmem:[%s14950_s1] ss:$0 sm:$0xff]  ;;  %vm9663_vm7 = vmor %vm1123_vm4, %vm1124_vm5 }
  0x43   : > { %v770_v40 = vshrl.u32 %v706_v39, 16  ;;  %v773_v41 = vshll.u32 %v706_v39, 16  ;;  %v8230_v42 = vcombine.low %v705_v38, %v706_v39  ;;  %v1138_v55 = vrot.slane %v1136_v47, 5  ;;  %v9653_v61 = vld [vmem:[%s14951_s2] ss:$0 sm:$0xff]  ;;  %v433_v63 = vld [vmem:[%s9530_s23 + $0x8] sm:$0xff] }
  0x44   : > { %v9635_v50 = vrot.slane %v761_v43, 7  ;;  %v1126_v51 = vrot.slane %v761_v43, 4  ;;  %v1127_v53 = vrot.slane %v764_v46, 5  ;;  %vm671_vm6 = vcmask 19456   ;;  %v432_v62 = vld [vmem:[%s9530_s23] sm:$0xff]  ;;  %v437_v5 = vld [vmem:[%s9530_s23 + $0x28] sm:$0xff] }
  0x45   : > { %v772_v48 = vrot.slane %v770_v40, 7  ;;  %v1132_v49 = vrot.slane %v770_v40, 4  ;;  %2759 = vrot.lane.b32.xlu0 %v8230_v42, %s14995_s26  ;;  %v1130_v54 = vrot.slane %v773_v41, 5  ;;  %v473_v60 = vmul.f32 %v9641_v56, %v434_v45  ;;  %v436_v4 = vld [vmem:[%s9530_s23 + $0x20] sm:$0xff]  ;;  %v1994_v20 = vld [vmem:[#allocation2 + $0x30] sm:$0x8] }
  0x46   : > { %v9646_v58 = vor.u32 %v764_v46, %v9635_v50  ;;  %v1128_v0 = vor.u32 %v1127_v53, %v1126_v51  ;;  %v474_v2 = vmul.f32 %v9641_v56, %v435_v52  ;;  %v471_v3 = vmul.f32 %v9641_v56, %v432_v62  ;;  %v1353_v15 = vld [vmem:[#allocation2 + $0x20] sm:$0x8]  ;;  %v1350_v21 = vld [vmem:[#allocation2 + $0x10] sm:$0x8]  ;;  %v1108_v27 = vld [vmem:[#allocation2 + $0x1c] sm:$0x1] }
  0x47   : > { %v9643_v57 = vor.u32 %v773_v41, %v772_v48  ;;  %v1133_v1 = vor.u32 %v1132_v49, %v1130_v54  ;;  %v512_v7 = vadd.f32 %v9653_v61, %v473_v60  ;;  %v472_v8 = vmul.f32 %v9641_v56, %v433_v63  ;;  %v1991_v22 = vld [vmem:[#allocation2 + $0x20] sm:$0x8]  ;;  %v1750_v28 = vld [vmem:[#allocation2 + $0x1c] sm:$0x1]  ;;  %v1751_v29 = vld [vmem:[#allocation2 + $0x2c] sm:$0x1] }
  0x48   : > { %v475_v9 = vmul.f32 %v9641_v56, %v436_v4  ;;  %v476_v10 = vmul.f32 %v9641_v56, %v437_v5  ;;  %v1129_v11 = vrot.slane %v1128_v0, 4  ;;  %v513_v13 = vadd.f32 %v9653_v61, %v474_v2  ;;  %v2391_v34 = vld [vmem:[#allocation2 + $0x2c] sm:$0x1]  ;;  %v2392_v35 = vld [vmem:[#allocation2 + $0x3c] sm:$0x1]  ;;  %s15014_s19 = smov 6  }
  0x49   : > { %v1134_v12 = vrot.slane %v1133_v1, 4  ;;  %v510_v14 = vadd.f32 %v9653_v61, %v471_v3  ;;  %v8697_v16 = vpack.c.bf16 %v512_v7, %v512_v7  ;;  %v511_v17 = vadd.f32 %v9653_v61, %v472_v8  ;;  %v1109_v36 = vld [vmem:[#allocation2 + $0x2c] sm:$0x1]  ;;  %v9683_v39 = vld [vmem:[#allocation2 + $0x3c] sm:$0x1]  ;;  %v438_v49 = vld [vmem:[%s9530_s23 + $0x30] sm:$0xff] }
  0x4a   : > { %v514_v18 = vadd.f32 %v9653_v61, %v475_v9  ;;  %v515_v19 = vadd.f32 %v9653_v61, %v476_v10  ;;  %v1131_v23 = vsel %vm9663_vm7, %v1129_v11, %v1130_v54  ;;  %v8698_v25 = vpack.c.bf16 %v513_v13, %v513_v13  ;;  %v9689_v44 = vld [vmem:[#allocation2 + $0x30] sm:$0x8]  ;;  %v439_v51 = vld [vmem:[%s9530_s23 + $0x38] sm:$0xff]  ;;  %v440_v5 = vld [vmem:[%s9530_s23 + $0x40] sm:$0xff]  ;;  %s14961_s20 = smov 12   ;;  %s9418_s21 = smov 21  }
  0x4b   : > { %v1139_v24 = vsel %vm9663_vm7, %v1134_v12, %v1138_v55  ;;  %v8695_v26 = vpack.c.bf16 %v510_v14, %v510_v14  ;;  %674 = vst.msk [vmem:[#allocation2 + $0x24] sm:$0xf] %vm671_vm6, %v8697_v16  ;;  %v8696_v31 = vpack.c.bf16 %v511_v17, %v511_v17  ;;  %vm752_vm8 = vsmask.f32 256  ;;  %v441_v7 = vld [vmem:[%s9530_s23 + $0x48] sm:$0xff]  ;;  %s9419_s22 = smov 9  }
  0x4c   : > { %v8246_v30 = vcombine.low %v1131_v23, %v1139_v24  ;;  %v8699_v32 = vpack.c.bf16 %v514_v18, %v514_v18  ;;  %v8700_v33 = vpack.c.bf16 %v515_v19, %v515_v19  ;;  %675 = vst.msk [vmem:[#allocation2 + $0x28] sm:$0xf] %vm671_vm6, %v8698_v25  ;;  %vm753_vm9 = vsmask.f32 4368  ;;  %s15002_s10 = smov 18   ;;  %s9421_s12 = smov 15  }
  0x4d   : > { %672 = vst.msk [vmem:[#allocation2 + $0x14] sm:$0xf] %vm671_vm6, %v8695_v26  ;;  %v1421_v37 = vshrl.u32 %v1353_v15, 16  ;;  %v2062_v38 = vshrl.u32 %v1994_v20, 16  ;;  %673 = vst.msk [vmem:[#allocation2 + $0x18] sm:$0xf] %vm671_vm6, %v8696_v31  ;;  %v477_v3 = vmul.f32 %v9641_v56, %v438_v49  ;;  %v478_v4 = vmul.f32 %v9641_v56, %v439_v51 }
  0x4e   : > { %2839 = vrot.lane.b32.xlu1 %v8246_v30, %s15014_s19  ;;  %676 = vst.msk [vmem:[#allocation2 + $0x34] sm:$0xf] %vm671_vm6, %v8699_v32  ;;  %677 = vst.msk [vmem:[#allocation2 + $0x38] sm:$0xf] %vm671_vm6, %v8700_v33  ;;  %v1399_v40 = vshrl.u32 %v1350_v21, 16  ;;  %v2040_v41 = vshrl.u32 %v1991_v22, 16  ;;  %v9722_v11 = vmul.f32 %v9641_v56, %v440_v5  ;;  %v9725_v12 = vmul.f32 %v9641_v56, %v441_v7 }
  0x4f   : > { %v1150_v42 = vshll.u32 %v1108_v27, 16  ;;  %v1776_v43 = vshll.u32 %v1750_v28, 16  ;;  %v9691_v45 = vrot.slane %v1421_v37, 11  ;;  %v9693_v46 = vrot.slane %v2062_v38, 11  ;;  %vm9764_vm10 = vmor %vm752_vm8, %vm753_vm9  ;;  %s9422_s13 = smov 24   ;;  %s15114_s18 = sshll.u32 %s9494_s9, 11 }
  0x50   : > { %v1790_v47 = vshll.u32 %v1751_v29, 16  ;;  %v2417_v48 = vshll.u32 %v2391_v34, 16  ;;  %v9697_v52 = vrot.slane %v1399_v40, 11  ;;  %v9699_v53 = vrot.slane %v2040_v41, 11 }
  0x51   : > { %v9701_v54 = vrot.slane %v1150_v42, 5  ;;  %v9703_v55 = vrot.slane %v1776_v43, 5  ;;  %v2431_v63 = vshll.u32 %v2392_v35, 16  ;;  %v1164_v0 = vshll.u32 %v1109_v36, 16 }
  0x52   : > { %v9705_v60 = vrot.slane %v1790_v47, 5  ;;  %v9707_v62 = vrot.slane %v2417_v48, 5  ;;  %v1178_v1 = vshll.u32 %v9683_v39, 16  ;;  %v9715_v8 = vld [vmem:[#allocation2 + $0x24] sm:$0xf]  ;;  %v516_v18 = vadd.f32 %v9653_v61, %v477_v3 }
  0x53   : > { %v9717_v9 = vrot.slane %v2431_v63, 5  ;;  %v9719_v10 = vrot.slane %v1164_v0, 5  ;;  %v9727_v13 = vld [vmem:[#allocation2 + $0x28] sm:$0xf]  ;;  %v1426_v14 = vshrl.u32 %v9715_v8, 16  ;;  %v1429_v16 = vshll.u32 %v9715_v8, 16 }
  0x54   : > { %v9730_v15 = vld [vmem:[#allocation2 + $0x14] sm:$0xf]  ;;  %v9733_v17 = vld [vmem:[#allocation2 + $0x24] sm:$0xf]  ;;  %v517_v19 = vadd.f32 %v9653_v61, %v478_v4  ;;  %v1435_v20 = vshrl.u32 %v9727_v13, 16  ;;  %v8279_v21 = vcombine.low %v9715_v8, %v9727_v13  ;;  %v8701_v30 = vpack.c.bf16 %v516_v18, %v516_v18 }
  0x55   : > { %v9740_v22 = vld [vmem:[#allocation2 + $0x18] sm:$0xf]  ;;  %v14959_v23 = vshrl.u32 %v9730_v15, 16  ;;  %v14958_v24 = vshll.u32 %v9730_v15, 16  ;;  %v9747_v27 = vld [vmem:[#allocation2 + $0x34] sm:$0xf] }
  0x56   : > { %v792_v25 = vshrl.u32 %v9740_v22, 16  ;;  %v8231_v26 = vcombine.low %v9730_v15, %v9740_v22  ;;  %v9749_v28 = vld [vmem:[#allocation2 + $0x38] sm:$0xf]  ;;  %v1428_v29 = vrot.slane %v1426_v14, 7  ;;  %3033 = vrot.lane.b32.xlu1 %v8279_v21, %s14961_s20  ;;  %v2067_v31 = vshrl.u32 %v9747_v27, 16 }
  0x57   : > { %v2076_v32 = vshrl.u32 %v9749_v28, 16  ;;  %v8327_v33 = vcombine.low %v9747_v27, %v9749_v28  ;;  %v9758_v34 = vld [vmem:[#allocation2 + $0x14] sm:$0xf]  ;;  %v9760_v35 = vld [vmem:[#allocation2 + $0x18] sm:$0xf]  ;;  %v8702_v37 = vpack.c.bf16 %v517_v19, %v517_v19  ;;  %v1437_v48 = vrot.slane %v1435_v20, 7 }
  0x58   : > { %2761 = vrot.lane.b32.xlu0 %v8231_v26, %s14995_s26  ;;  %v1404_v38 = vshrl.u32 %v9758_v34, 16  ;;  %v1413_v40 = vshrl.u32 %v9760_v35, 16  ;;  %v8278_v41 = vcombine.low %v9758_v34, %v9760_v35  ;;  %v1431_v42 = vor.u32 %v1429_v16, %v1428_v29  ;;  %v9775_v43 = vld [vmem:[#allocation2 + $0x28] sm:$0xf]  ;;  %678 = vst.msk [vmem:[#allocation2 + $0x44] sm:$0xf] %vm671_vm6, %v8701_v30 }
  0x59   : > { %v1433_v47 = vrot.slane %v1428_v29, 4  ;;  %v1438_v49 = vshll.u32 %v9727_v13, 16  ;;  %v2045_v51 = vshrl.u32 %v9733_v17, 16  ;;  %679 = vst.msk [vmem:[#allocation2 + $0x48] sm:$0xf] %vm671_vm6, %v8702_v37  ;;  %v2054_v0 = vshrl.u32 %v9775_v43, 16 }
  0x5a   : > { %v1432_v63 = vsel %vm9764_vm10, %v9691_v45, %v1431_v42  ;;  %v8326_v3 = vcombine.low %v9733_v17, %v9775_v43  ;;  %v2069_v4 = vrot.slane %v2067_v31, 7  ;;  %3305 = vrot.lane.b32.xlu1 %v8327_v33, %s9418_s21  ;;  %v2070_v7 = vshll.u32 %v9747_v27, 16  ;;  %v9884_v27 = vld [vmem:[#allocation2 + $0x34] sm:$0xf] }
  0x5b   : > { %v1440_v5 = vor.u32 %v1438_v49, %v1437_v48  ;;  %v2078_v18 = vrot.slane %v2076_v32, 7  ;;  %v2079_v45 = vshll.u32 %v9749_v28, 16  ;;  %v1406_v21 = vrot.slane %v1404_v38, 7 }
  0x5c   : > { %3031 = vrot.lane.b32.xlu0 %v8278_v41, %s14961_s20  ;;  %v2074_v19 = vrot.slane %v2069_v4, 4  ;;  %v1407_v26 = vshll.u32 %v9758_v34, 16  ;;  %v1415_v29 = vrot.slane %v1413_v40, 7  ;;  %v2072_v33 = vor.u32 %v2070_v7, %v2069_v4 }
  0x5d   : > { %v1441_v30 = vsel %vm9764_vm10, %v1433_v47, %v1440_v5  ;;  %v2081_v37 = vor.u32 %v2079_v45, %v2078_v18  ;;  %v1416_v42 = vshll.u32 %v9760_v35, 16  ;;  %v1411_v2 = vrot.slane %v1406_v21, 4 }
  0x5e   : > { %v8263_v48 = vcombine.low %v1432_v63, %v1441_v30  ;;  %v1409_v59 = vor.u32 %v1407_v26, %v1406_v21  ;;  %v2047_v41 = vrot.slane %v2045_v51, 7  ;;  %v2073_v34 = vsel %vm9764_vm10, %v9693_v46, %v2072_v33 }
  0x5f   : > { %v2082_v47 = vsel %vm9764_vm10, %v2074_v19, %v2081_v37  ;;  %v1418_v5 = vor.u32 %v1416_v42, %v1415_v29  ;;  %v2048_v4 = vshll.u32 %v9733_v17, 16  ;;  %v2056_v46 = vrot.slane %v2054_v0, 7 }
  0x60   : > { %2921 = vrot.lane.b32.xlu1 %v8263_v48, %s9419_s22  ;;  %3303 = vrot.lane.b32.xlu0 %v8326_v3, %s9418_s21  ;;  %v8311_v35 = vcombine.low %v2073_v34, %v2082_v47  ;;  %v1410_v63 = vsel %vm9764_vm10, %v9697_v52, %v1409_v59  ;;  %v2052_v18 = vrot.slane %v2047_v41, 4  ;;  %v2057_v29 = vshll.u32 %v9775_v43, 16 }
  0x61   : > { %v1419_v19 = vsel %vm9764_vm10, %v1411_v2, %v1418_v5  ;;  %v2050_v21 = vor.u32 %v2048_v4, %v2047_v41  ;;  %v14960_v30 = vshll.u32 %v9740_v22, 16  ;;  %v1140_v3 = vrot.slane %v14959_v23, 4 }
  0x62   : > { %v8262_v33 = vcombine.low %v1410_v63, %v1419_v19  ;;  %v1141_v37 = vrot.slane %v14958_v24, 5  ;;  %v1146_v59 = vrot.slane %v792_v25, 4  ;;  %v2059_v2 = vor.u32 %v2057_v29, %v2056_v46 }
  0x63   : > { %v2051_v52 = vsel %vm9764_vm10, %v9699_v53, %v2050_v21  ;;  %v1144_v48 = vrot.slane %v14960_v30, 5  ;;  %v1766_v41 = vrot.slane %v1404_v38, 4  ;;  %v1767_v47 = vrot.slane %v1407_v26, 5 }
  0x64   : > { %3193 = vrot.lane.b32.xlu1 %v8311_v35, %s15002_s10  ;;  %2919 = vrot.lane.b32.xlu0 %v8262_v33, %s9419_s22  ;;  %v1142_v34 = vor.u32 %v1141_v37, %v1140_v3  ;;  %v1770_v5 = vrot.slane %v1416_v42, 5  ;;  %v1772_v63 = vrot.slane %v1413_v40, 4  ;;  %v2060_v19 = vsel %vm9764_vm10, %v2052_v18, %v2059_v2  ;;  %v9875_v2 = vld [vmem:[#allocation2 + $0x28] sm:$0xf] }
  0x65   : > { %v1147_v24 = vor.u32 %v1146_v59, %v1144_v48  ;;  %v1780_v53 = vrot.slane %v1426_v14, 4  ;;  %v1781_v46 = vrot.slane %v1429_v16, 5  ;;  %v8310_v38 = vcombine.low %v2051_v52, %v2060_v19  ;;  %v9862_v59 = vld [vmem:[#allocation2 + $0x24] sm:$0xf] }
  0x66   : > { %v1143_v21 = vrot.slane %v1142_v34, 4  ;;  %v1768_v23 = vor.u32 %v1767_v47, %v1766_v41  ;;  %v1773_v35 = vor.u32 %v1772_v63, %v1770_v5  ;;  %v1784_v26 = vrot.slane %v1438_v49, 5  ;;  %v9887_v47 = vld [vmem:[#allocation2 + $0x38] sm:$0xf] }
  0x67   : > { %v1148_v30 = vrot.slane %v1147_v24, 4  ;;  %v1782_v33 = vor.u32 %v1781_v46, %v1780_v53  ;;  %v1786_v40 = vrot.slane %v1435_v20, 4  ;;  %v2407_v16 = vrot.slane %v2045_v51, 4 }
  0x68   : > { %3191 = vrot.lane.b32.xlu0 %v8310_v38, %s15002_s10  ;;  %v1145_v14 = vsel %vm9663_vm7, %v1143_v21, %v1144_v48  ;;  %v1769_v42 = vrot.slane %v1768_v23, 4  ;;  %v1774_v8 = vrot.slane %v1773_v35, 4  ;;  %v2408_v49 = vrot.slane %v2048_v4, 5 }
  0x69   : > { %v1153_v24 = vsel %vm9663_vm7, %v1148_v30, %v9701_v54  ;;  %v1783_v18 = vrot.slane %v1782_v33, 4  ;;  %v1787_v3 = vor.u32 %v1786_v40, %v1784_v26  ;;  %v2411_v23 = vrot.slane %v2057_v29, 5 }
  0x6a   : > { %v8247_v37 = vcombine.low %v1145_v14, %v1153_v24  ;;  %v1771_v13 = vsel %vm9663_vm7, %v1769_v42, %v1770_v5  ;;  %v1779_v20 = vsel %vm9663_vm7, %v1774_v8, %v9703_v55  ;;  %v2409_v54 = vor.u32 %v2408_v49, %v2407_v16 }
  0x6b   : > { %v8294_v17 = vcombine.low %v1771_v13, %v1779_v20  ;;  %v1785_v51 = vsel %vm9663_vm7, %v1783_v18, %v1784_v26  ;;  %v1788_v52 = vrot.slane %v1787_v3, 4  ;;  %v2413_v4 = vrot.slane %v2054_v0, 4  ;;  %v9901_v26 = vld [vmem:[#allocation2 + $0x34] sm:$0xf]  ;;  %v9922_v20 = vld [vmem:[#allocation2 + $0x38] sm:$0xf] }
  0x6c   : > { %2841 = vrot.lane.b32.xlu1 %v8247_v37, %s15014_s19  ;;  %v2421_v30 = vrot.slane %v2067_v31, 4  ;;  %v2422_v55 = vrot.slane %v2070_v7, 5  ;;  %v2425_v29 = vrot.slane %v2079_v45, 5  ;;  %v2410_v43 = vrot.slane %v2409_v54, 4 }
  0x6d   : > { %3111 = vrot.lane.b32.xlu0 %v8294_v17, %s9421_s12  ;;  %v1793_v48 = vsel %vm9663_vm7, %v1788_v52, %v9705_v60  ;;  %v2427_v0 = vrot.slane %v2076_v32, 4  ;;  %v14994_v31 = vshrl.u32 %v9862_v59, 16  ;;  %v2414_v41 = vor.u32 %v2413_v4, %v2411_v23 }
  0x6e   : > { %v8295_v7 = vcombine.low %v1785_v51, %v1793_v48  ;;  %v2423_v45 = vor.u32 %v2422_v55, %v2421_v30  ;;  %v14986_v34 = vshll.u32 %v9862_v59, 16  ;;  %v2412_v5 = vsel %vm9663_vm7, %v2410_v43, %v2411_v23  ;;  %v1359_v23 = vld [vmem:[#allocation2 + $0x40] sm:$0x8]  ;;  %v9937_v48 = vld [vmem:[#allocation2 + $0x44] sm:$0xf] }
  0x6f   : > { %v2428_v63 = vor.u32 %v2427_v0, %v2425_v29  ;;  %v14984_v60 = vshrl.u32 %v9875_v2, 16  ;;  %v8232_v28 = vcombine.low %v9862_v59, %v9875_v2  ;;  %v2415_v32 = vrot.slane %v2414_v41, 4 }
  0x70   : > { %3113 = vrot.lane.b32.xlu1 %v8295_v7, %s9421_s12  ;;  %v2424_v19 = vrot.slane %v2423_v45, 4  ;;  %v14983_v53 = vshrl.u32 %v9884_v27, 16  ;;  %v14980_v46 = vshll.u32 %v9884_v27, 16  ;;  %v14981_v21 = vshrl.u32 %v9887_v47, 16 }
  0x71   : > { %v2429_v38 = vrot.slane %v2428_v63, 4  ;;  %v8233_v35 = vcombine.low %v9884_v27, %v9887_v47  ;;  %v14982_v33 = vshll.u32 %v9875_v2, 16  ;;  %v2420_v40 = vsel %vm9663_vm7, %v2415_v32, %v9707_v62  ;;  %v9944_v63 = vld [vmem:[#allocation2 + $0x48] sm:$0xf] }
  0x72   : > { %v2426_v14 = vsel %vm9663_vm7, %v2424_v19, %v2425_v29  ;;  %v1154_v42 = vrot.slane %v14994_v31, 4  ;;  %v1155_v8 = vrot.slane %v14986_v34, 5  ;;  %v8342_v16 = vcombine.low %v2412_v5, %v2420_v40  ;;  %v1374_v34 = vld [vmem:[#allocation2 + $0x90] sm:$0x8] }
  0x73   : > { %v2434_v24 = vsel %vm9663_vm7, %v2429_v38, %v9717_v9  ;;  %v1158_v18 = vrot.slane %v14982_v33, 5  ;;  %v1160_v62 = vrot.slane %v14984_v60, 4  ;;  %v14979_v37 = vshll.u32 %v9887_v47, 16 }
  0x74   : > { %v8343_v3 = vcombine.low %v2426_v14, %v2434_v24  ;;  %v1156_v49 = vor.u32 %v1155_v8, %v1154_v42  ;;  %v1168_v13 = vrot.slane %v14983_v53, 4  ;;  %3383 = vrot.lane.b32.xlu0 %v8342_v16, %s9422_s13  ;;  %v1169_v17 = vrot.slane %v14980_v46, 5 }
  0x75   : > { %v1161_v9 = vor.u32 %v1160_v62, %v1158_v18  ;;  %v1174_v51 = vrot.slane %v14981_v21, 4  ;;  %v1180_v52 = vrot.slane %v1178_v1, 5  ;;  %v1172_v4 = vrot.slane %v14979_v37, 5  ;;  %v1752_v62 = vld [vmem:[#allocation2 + $0x3c] sm:$0x1] }
  0x76   : > { %3385 = vrot.lane.b32.xlu1 %v8343_v3, %s9422_s13  ;;  %v1157_v54 = vrot.slane %v1156_v49, 4  ;;  %v15123_v30 = vshrl.u32 %v9689_v44, 16  ;;  %v1448_v29 = vshrl.u32 %v9901_v26, 16  ;;  %v1170_v0 = vor.u32 %v1169_v17, %v1168_v13 }
  0x77   : > { %v1162_v43 = vrot.slane %v1161_v9, 4  ;;  %v1451_v7 = vshll.u32 %v9901_v26, 16  ;;  %v1457_v39 = vshrl.u32 %v9922_v20, 16  ;;  %v1175_v41 = vor.u32 %v1174_v51, %v1172_v4 }
  0x78   : > { %v8184_v55 = vrot.slane %v15123_v30, 11  ;;  %v1159_v1 = vsel %vm9663_vm7, %v1157_v54, %v1158_v18  ;;  %v1450_v45 = vrot.slane %v1448_v29, 7  ;;  %v1460_v5 = vshll.u32 %v9922_v20, 16  ;;  %2763 = vrot.lane.b32.xlu0 %v8232_v28, %s14995_s26 }
  0x79   : > { %v1167_v44 = vsel %vm9663_vm7, %v1162_v43, %v9719_v10  ;;  %v1171_v32 = vrot.slane %v1170_v0, 4  ;;  %v1459_v19 = vrot.slane %v1457_v39, 7  ;;  %v1465_v38 = vshrl.u32 %v1359_v23, 16 }
  0x7a   : > { %2765 = vrot.lane.b32.xlu1 %v8233_v35, %s14995_s26  ;;  %v8248_v40 = vcombine.low %v1159_v1, %v1167_v44  ;;  %v1176_v14 = vrot.slane %v1175_v41, 4  ;;  %v1453_v42 = vor.u32 %v1451_v7, %v1450_v45  ;;  %v1455_v8 = vrot.slane %v1450_v45, 4  ;;  %v1753_v1 = vld [vmem:[#allocation2 + $0x4c] sm:$0x1]  ;;  %v1997_v41 = vld [vmem:[#allocation2 + $0x40] sm:$0x8] }
  0x7b   : > { %v1173_v16 = vsel %vm9663_vm7, %v1171_v32, %v1172_v4  ;;  %v1462_v24 = vor.u32 %v1460_v5, %v1459_v19  ;;  %v8185_v18 = vrot.slane %v1465_v38, 11  ;;  %v1470_v28 = vshrl.u32 %v9937_v48, 16 }
  0x7c   : > { %v1181_v10 = vsel %vm9663_vm7, %v1176_v14, %v1180_v52  ;;  %v1454_v3 = vsel %vm9764_vm10, %v8184_v55, %v1453_v42  ;;  %v1473_v35 = vshll.u32 %v9937_v48, 16  ;;  %v1479_v49 = vshrl.u32 %v9944_v63, 16  ;;  %2843 = vrot.lane.b32.xlu0 %v8248_v40, %s15014_s19  ;;  %v9976_v42 = vld [vmem:[#allocation2 + $0x48] sm:$0xf] }
  0x7d   : > { %v8249_v13 = vcombine.low %v1173_v16, %v1181_v10  ;;  %v1463_v23 = vsel %vm9764_vm10, %v1455_v8, %v1462_v24  ;;  %v1472_v9 = vrot.slane %v1470_v28, 7  ;;  %v1482_v17 = vshll.u32 %v9944_v63, 16  ;;  %v2000_v10 = vld [vmem:[#allocation2 + $0x50] sm:$0x8] }
  0x7e   : > { %v8264_v51 = vcombine.low %v1454_v3, %v1463_v23  ;;  %v1481_v54 = vrot.slane %v1479_v49, 7  ;;  %v8280_v52 = vcombine.low %v9901_v26, %v9922_v20  ;;  %v8281_v4 = vcombine.low %v9937_v48, %v9944_v63  ;;  %v9972_v63 = vld [vmem:[#allocation2 + $0x44] sm:$0xf] }
  0x7f   : > { %2845 = vrot.lane.b32.xlu1 %v8249_v13, %s15014_s19  ;;  %v1475_v30 = vor.u32 %v1473_v35, %v1472_v9  ;;  %v1477_v55 = vrot.slane %v1472_v9, 4  ;;  %v1794_v43 = vrot.slane %v1448_v29, 4  ;;  %v1795_v0 = vrot.slane %v1451_v7, 5 }
  0x80   : > { %v1484_v45 = vor.u32 %v1482_v17, %v1481_v54  ;;  %v1798_v44 = vrot.slane %v1460_v5, 5  ;;  %v1800_v32 = vrot.slane %v1457_v39, 4  ;;  %v1804_v19 = vshll.u32 %v1752_v62, 16  ;;  %2923 = vrot.lane.b32.xlu0 %v8264_v51, %s9419_s22 }
  0x81   : > { %v1476_v26 = vsel %vm9764_vm10, %v8185_v18, %v1475_v30  ;;  %v1796_v20 = vor.u32 %v1795_v0, %v1794_v43  ;;  %v1808_v38 = vrot.slane %v1470_v28, 4  ;;  %v1809_v48 = vrot.slane %v1473_v35, 5  ;;  %v2393_v43 = vld [vmem:[#allocation2 + $0x4c] sm:$0x1] }
  0x82   : > { %v1485_v29 = vsel %vm9764_vm10, %v1477_v55, %v1484_v45  ;;  %v1801_v7 = vor.u32 %v1800_v32, %v1798_v44  ;;  %v1806_v40 = vrot.slane %v1804_v19, 5  ;;  %v1812_v14 = vrot.slane %v1482_v17, 5  ;;  %v9992_v32 = vld [vmem:[#allocation2 + $0x44] sm:$0xf] }
  0x83   : > { %v8265_v39 = vcombine.low %v1476_v26, %v1485_v29  ;;  %v1797_v5 = vrot.slane %v1796_v20, 4  ;;  %v1810_v8 = vor.u32 %v1809_v48, %v1808_v38  ;;  %v1814_v16 = vrot.slane %v1479_v49, 4 }
  0x84   : > { %v1802_v24 = vrot.slane %v1801_v7, 4  ;;  %v1818_v62 = vshll.u32 %v1753_v1, 16  ;;  %v2084_v18 = vshrl.u32 %v1997_v41, 16  ;;  %v2089_v28 = vshrl.u32 %v9972_v63, 16  ;;  %3035 = vrot.lane.b32.xlu0 %v8280_v52, %s14961_s20 }
  0x85   : > { %2925 = vrot.lane.b32.xlu1 %v8265_v39, %s9419_s22  ;;  %v1799_v3 = vsel %vm9663_vm7, %v1797_v5, %v1798_v44  ;;  %v1811_v35 = vrot.slane %v1810_v8, 4  ;;  %v1815_v13 = vor.u32 %v1814_v16, %v1812_v14  ;;  %v2092_v23 = vshll.u32 %v9972_v63, 16  ;;  %v2394_v44 = vld [vmem:[#allocation2 + $0x5c] sm:$0x1] }
  0x86   : > { %v1807_v49 = vsel %vm9663_vm7, %v1802_v24, %v1806_v40  ;;  %v1820_v9 = vrot.slane %v1818_v62, 5  ;;  %v8200_v17 = vrot.slane %v2084_v18, 11  ;;  %v2091_v51 = vrot.slane %v2089_v28, 7  ;;  %v10004_v40 = vld [vmem:[#allocation2 + $0x48] sm:$0xf]  ;;  %v9215_v24 = vld [vmem:[%s14952_s3] sm:$0xff]  }
  0x87   : > { %v8296_v54 = vcombine.low %v1799_v3, %v1807_v49  ;;  %v1813_v30 = vsel %vm9663_vm7, %v1811_v35, %v1812_v14  ;;  %v1816_v55 = vrot.slane %v1815_v13, 4  ;;  %v2098_v52 = vshrl.u32 %v9976_v42, 16  ;;  %v10018_v49 = vld [vmem:[#allocation2 + $0x50] sm:$0x8]  ;;  %9055 = vmatprep.subr.bf16.mxu0 %v9215_v24 }
  0x88   : > { %v2094_v0 = vor.u32 %v2092_v23, %v2091_v51  ;;  %v2096_v1 = vrot.slane %v2091_v51, 4  ;;  %v2101_v41 = vshll.u32 %v9976_v42, 16  ;;  %v518_v45 = vadd.f32 %v9653_v61, %v9722_v11  ;;  %9056 = vmatpush3.bf16.msra.mxu0 %v9215_v24 }
  0x89   : > { %3037 = vrot.lane.b32.xlu1 %v8281_v4, %s14961_s20  ;;  %3115 = vrot.lane.b32.xlu0 %v8296_v54, %s9421_s12  ;;  %v1821_v19 = vsel %vm9663_vm7, %v1816_v55, %v1820_v9  ;;  %v2100_v26 = vrot.slane %v2098_v52, 7  ;;  %v519_v20 = vadd.f32 %v9653_v61, %v9725_v12  ;;  %v2106_v38 = vshrl.u32 %v2000_v10, 16  ;;  %s15124_s20 = smov 12  }
  0x8a   : > { %v8297_v48 = vcombine.low %v1813_v30, %v1821_v19  ;;  %v2095_v29 = vsel %vm9764_vm10, %v8200_v17, %v2094_v0  ;;  %v8703_v11 = vpack.c.bf16 %v518_v45, %v518_v45  ;;  %v8328_v7 = vcombine.low %v9972_v63, %v9976_v42  ;;  %v443_v19 = vld [vmem:[%s9530_s23 + $0x58] sm:$0xff] }
  0x8b   : > { %v2103_v4 = vor.u32 %v2101_v41, %v2100_v26  ;;  %v8704_v14 = vpack.c.bf16 %v519_v20, %v519_v20  ;;  %v10006_v39 = vrot.slane %v2106_v38, 11  ;;  %v2435_v5 = vrot.slane %v2089_v28, 4  ;;  %v1111_v28 = vld [vmem:[#allocation2 + $0x4c] sm:$0x1] }
  0x8c   : > { %680 = vst.msk [vmem:[#allocation2 + $0x54] sm:$0xf] %vm671_vm6, %v8703_v11  ;;  %v2436_v8 = vrot.slane %v2092_v23, 5  ;;  %v2439_v61 = vrot.slane %v2101_v41, 5  ;;  %v2441_v12 = vrot.slane %v2098_v52, 4  ;;  %v2445_v16 = vshll.u32 %v2393_v43, 16 }
  0x8d   : > { %3117 = vrot.lane.b32.xlu1 %v8297_v48, %s9421_s12  ;;  %v2104_v63 = vsel %vm9764_vm10, %v2096_v1, %v2103_v4  ;;  %681 = vst.msk [vmem:[#allocation2 + $0x58] sm:$0xf] %vm671_vm6, %v8704_v14  ;;  %v2459_v42 = vshll.u32 %v2394_v44, 16  ;;  %v14978_v62 = vshrl.u32 %v9992_v32, 16  ;;  %v14968_v18 = vshll.u32 %v9992_v32, 16  ;;  %v442_v44 = vld [vmem:[%s9530_s23 + $0x50] sm:$0xff] }
  0x8e   : > { %v8312_v10 = vcombine.low %v2095_v29, %v2104_v63  ;;  %v2437_v3 = vor.u32 %v2436_v8, %v2435_v5  ;;  %v2442_v35 = vor.u32 %v2441_v12, %v2439_v61  ;;  %v2447_v13 = vrot.slane %v2445_v16, 5  ;;  %v1112_v23 = vld [vmem:[#allocation2 + $0x5c] sm:$0x1] }
  0x8f   : > { %v10020_v9 = vrot.slane %v2459_v42, 5  ;;  %v14969_v17 = vshrl.u32 %v10004_v40, 16  ;;  %v8234_v51 = vcombine.low %v9992_v32, %v10004_v40  ;;  %v14967_v54 = vshll.u32 %v10004_v40, 16 }
  0x90   : > { %3195 = vrot.lane.b32.xlu0 %v8312_v10, %s15002_s10  ;;  %v2438_v30 = vrot.slane %v2437_v3, 4  ;;  %v2443_v55 = vrot.slane %v2442_v35, 4  ;;  %v1182_v52 = vrot.slane %v14978_v62, 4  ;;  %v1183_v43 = vrot.slane %v14968_v18, 5 }
  0x91   : > { %v1186_v0 = vrot.slane %v14967_v54, 5  ;;  %v1188_v1 = vrot.slane %v14969_v17, 4  ;;  %v1192_v41 = vshll.u32 %v1111_v28, 16  ;;  %v1206_v45 = vshll.u32 %v1112_v23, 16 }
  0x92   : > { %v2440_v26 = vsel %vm9663_vm7, %v2438_v30, %v2439_v61  ;;  %v2448_v20 = vsel %vm9663_vm7, %v2443_v55, %v2447_v13  ;;  %v1184_v38 = vor.u32 %v1183_v43, %v1182_v52  ;;  %v1487_v48 = vshrl.u32 %v10018_v49, 16 }
  0x93   : > { %v10042_v29 = vld [vmem:[#allocation2 + $0x54] sm:$0xf]  ;;  %v8344_v11 = vcombine.low %v2440_v26, %v2448_v20  ;;  %v1189_v14 = vor.u32 %v1188_v1, %v1186_v0  ;;  %v1194_v5 = vrot.slane %v1192_v41, 5  ;;  %v10046_v8 = vrot.slane %v1206_v45, 5 }
  0x94   : > { %v10044_v4 = vld [vmem:[#allocation2 + $0x54] sm:$0xf]  ;;  %v10048_v12 = vld [vmem:[#allocation2 + $0x58] sm:$0xf]  ;;  %v2111_v16 = vshrl.u32 %v10042_v29, 16  ;;  %v2114_v61 = vshll.u32 %v10042_v29, 16  ;;  %3307 = vrot.lane.b32.xlu0 %v8328_v7, %s9418_s21  ;;  %v481_v63 = vmul.f32 %v9641_v56, %v442_v44  ;;  %v482_v42 = vmul.f32 %v9641_v56, %v443_v19 }
  0x95   : > { %v10053_v24 = vld [vmem:[#allocation2 + $0x58] sm:$0xf]  ;;  %v2120_v28 = vshrl.u32 %v10048_v12, 16  ;;  %v2123_v10 = vshll.u32 %v10048_v12, 16  ;;  %v8329_v3 = vcombine.low %v10042_v29, %v10048_v12  ;;  %v14966_v35 = vshrl.u32 %v10044_v4, 16 }
  0x96   : > { %v2113_v13 = vrot.slane %v2111_v16, 7  ;;  %v2449_v23 = vrot.slane %v2111_v16, 4  ;;  %v2450_v49 = vrot.slane %v2114_v61, 5  ;;  %v14964_v7 = vshll.u32 %v10044_v4, 16  ;;  %v10067_v29 = vld [vmem:[#allocation2 + $0x54] sm:$0xf] }
  0x97   : > { %v2122_v30 = vrot.slane %v2120_v28, 7  ;;  %v2453_v55 = vrot.slane %v2123_v10, 5  ;;  %v2455_v52 = vrot.slane %v2120_v28, 4  ;;  %v14965_v43 = vshrl.u32 %v10053_v24, 16  ;;  %v10075_v28 = vld [vmem:[#allocation2 + $0x58] sm:$0xf] }
  0x98   : > { %v2116_v56 = vor.u32 %v2114_v61, %v2113_v13  ;;  %v2118_v1 = vrot.slane %v2113_v13, 4  ;;  %3387 = vrot.lane.b32.xlu0 %v8344_v11, %s9422_s13  ;;  %v2451_v41 = vor.u32 %v2450_v49, %v2449_v23  ;;  %v8235_v45 = vcombine.low %v10044_v4, %v10053_v24  ;;  %v1365_v23 = vld [vmem:[#allocation2 + $0x60] sm:$0x8] }
  0x99   : > { %v2125_v44 = vor.u32 %v2123_v10, %v2122_v30  ;;  %v2456_v19 = vor.u32 %v2455_v52, %v2453_v55  ;;  %v1185_v26 = vrot.slane %v1184_v38, 4  ;;  %v1190_v20 = vrot.slane %v1189_v14, 4 }
  0x9a   : > { %v2117_v12 = vsel %vm9764_vm10, %v10006_v39, %v2116_v56  ;;  %v2452_v16 = vrot.slane %v2451_v41, 4  ;;  %v14963_v61 = vshll.u32 %v10053_v24, 16  ;;  %v1196_v11 = vrot.slane %v14966_v35, 4 }
  0x9b   : > { %v2126_v10 = vsel %vm9764_vm10, %v2118_v1, %v2125_v44  ;;  %v2457_v13 = vrot.slane %v2456_v19, 4  ;;  %v1187_v38 = vsel %vm9663_vm7, %v1185_v26, %v1186_v0  ;;  %v1195_v14 = vsel %vm9663_vm7, %v1190_v20, %v1194_v5  ;;  %v10106_v20 = vld [vmem:[%s14951_s2] ss:$0 sm:$0xff] }
  0x9c   : > { %v8313_v39 = vcombine.low %v2117_v12, %v2126_v10  ;;  %v2454_v49 = vsel %vm9663_vm7, %v2452_v16, %v2453_v55  ;;  %2767 = vrot.lane.b32.xlu0 %v8234_v51, %s14995_s26  ;;  %v8250_v30 = vcombine.low %v1187_v38, %v1195_v14  ;;  %v1197_v52 = vrot.slane %v14964_v7, 5  ;;  %v1755_v38 = vld [vmem:[#allocation2 + $0x6c] sm:$0x1] }
  0x9d   : > { %v2462_v0 = vsel %vm9663_vm7, %v2457_v13, %v10020_v9  ;;  %v1200_v5 = vrot.slane %v14963_v61, 5  ;;  %v1202_v56 = vrot.slane %v14965_v43, 4  ;;  %v8186_v55 = vrot.slane %v1487_v48, 11  ;;  %v1754_v13 = vld [vmem:[#allocation2 + $0x5c] sm:$0x1] }
  0x9e   : > { %3197 = vrot.lane.b32.xlu1 %v8313_v39, %s15002_s10  ;;  %v8345_v1 = vcombine.low %v2454_v49, %v2462_v0  ;;  %v1198_v41 = vor.u32 %v1197_v52, %v1196_v11  ;;  %v1492_v51 = vshrl.u32 %v10067_v29, 16  ;;  %v1495_v44 = vshll.u32 %v10067_v29, 16  ;;  %v444_v0 = vld [vmem:[%s9530_s23 + $0x60] sm:$0xff] }
  0x9f   : > { %v1203_v19 = vor.u32 %v1202_v56, %v1200_v5  ;;  %v1501_v26 = vshrl.u32 %v10075_v28, 16  ;;  %v1504_v9 = vshll.u32 %v10075_v28, 16  ;;  %v520_v48 = vadd.f32 %v10106_v20, %v481_v63  ;;  %v2003_v61 = vld [vmem:[#allocation2 + $0x60] sm:$0x8] }
  0xa0   : > { %2847 = vrot.lane.b32.xlu0 %v8250_v30, %s15014_s19  ;;  %v1199_v12 = vrot.slane %v1198_v41, 4  ;;  %v1494_v16 = vrot.slane %v1492_v51, 7  ;;  %v521_v11 = vadd.f32 %v10106_v20, %v482_v42  ;;  %v1509_v10 = vshrl.u32 %v1365_v23, 16  ;;  %v445_v42 = vld [vmem:[%s9530_s23 + $0x68] sm:$0xff] }
  0xa1   : > { %v1204_v14 = vrot.slane %v1203_v19, 4  ;;  %v1503_v39 = vrot.slane %v1501_v26, 7  ;;  %v8705_v49 = vpack.c.bf16 %v520_v48, %v520_v48  ;;  %v8282_v52 = vcombine.low %v10067_v29, %v10075_v28  ;;  %v2006_v28 = vld [vmem:[#allocation2 + $0x70] sm:$0x8] }
  0xa2   : > { %3309 = vrot.lane.b32.xlu1 %v8329_v3, %s9418_s21  ;;  %v1201_v63 = vsel %vm9663_vm7, %v1199_v12, %v1200_v5  ;;  %v1497_v30 = vor.u32 %v1495_v44, %v1494_v16  ;;  %v1499_v56 = vrot.slane %v1494_v16, 4  ;;  %v8706_v41 = vpack.c.bf16 %v521_v11, %v521_v11  ;;  %v10127_v11 = vld [vmem:[#allocation2 + $0x6c] sm:$0x1] }
  0xa3   : > { %v1209_v23 = vsel %vm9663_vm7, %v1204_v14, %v10046_v8  ;;  %v1506_v19 = vor.u32 %v1504_v9, %v1503_v39  ;;  %682 = vst.msk [vmem:[#allocation2 + $0x64] sm:$0xf] %vm671_vm6, %v8705_v49  ;;  %v10122_v48 = vrot.slane %v1509_v10, 11  ;;  %v1822_v29 = vrot.slane %v1492_v51, 4 }
  0xa4   : > { %v8251_v3 = vcombine.low %v1201_v63, %v1209_v23  ;;  %v1498_v5 = vsel %vm9764_vm10, %v8186_v55, %v1497_v30  ;;  %683 = vst.msk [vmem:[#allocation2 + $0x68] sm:$0xf] %vm671_vm6, %v8706_v41  ;;  %v1823_v12 = vrot.slane %v1495_v44, 5  ;;  %v1826_v16 = vrot.slane %v1504_v9, 5  ;;  %v10135_v55 = vld [vmem:[%s14950_s1] ss:$0 sm:$0xff] }
  0xa5   : > { %v1507_v8 = vsel %vm9764_vm10, %v1499_v56, %v1506_v19  ;;  %v1828_v14 = vrot.slane %v1501_v26, 4  ;;  %v1832_v39 = vshll.u32 %v1754_v13, 16  ;;  %v1846_v49 = vshll.u32 %v1755_v38, 16  ;;  %v10138_v9 = vld [vmem:[#allocation2 + $0x7c] sm:$0x1] }
  0xa6   : > { %3389 = vrot.lane.b32.xlu1 %v8345_v1, %s9422_s13  ;;  %v8266_v51 = vcombine.low %v1498_v5, %v1507_v8  ;;  %v1824_v10 = vor.u32 %v1823_v12, %v1822_v29  ;;  %v2128_v63 = vshrl.u32 %v2003_v61, 16  ;;  %v483_v44 = vmul.f32 %v10135_v55, %v444_v0  ;;  %v10140_v30 = vld [vmem:[#allocation2 + $0x6c] sm:$0x1] }
  0xa7   : > { %v1829_v56 = vor.u32 %v1828_v14, %v1826_v16  ;;  %v1834_v26 = vrot.slane %v1832_v39, 5  ;;  %v10142_v13 = vrot.slane %v1846_v49, 5  ;;  %v484_v1 = vmul.f32 %v10135_v55, %v445_v42 }
  0xa8   : > { %2927 = vrot.lane.b32.xlu0 %v8266_v51, %s9419_s22  ;;  %v1825_v61 = vrot.slane %v1824_v10, 4  ;;  %v10146_v38 = vrot.slane %v2128_v63, 11  ;;  %v522_v41 = vadd.f32 %v10106_v20, %v483_v44  ;;  %v2150_v23 = vshrl.u32 %v2006_v28, 16 }
  0xa9   : > { %v1830_v19 = vrot.slane %v1829_v56, 4  ;;  %v523_v0 = vadd.f32 %v10106_v20, %v484_v1  ;;  %v2473_v29 = vshll.u32 %v10127_v11, 16  ;;  %v2487_v5 = vshll.u32 %v10138_v9, 16 }
  0xaa   : > { %2769 = vrot.lane.b32.xlu1 %v8235_v45, %s14995_s26  ;;  %v10156_v42 = vld [vmem:[#allocation2 + $0x64] sm:$0xf]  ;;  %v1827_v12 = vsel %vm9663_vm7, %v1825_v61, %v1826_v16  ;;  %v8707_v28 = vpack.c.bf16 %v522_v41, %v522_v41  ;;  %v10162_v14 = vrot.slane %v2150_v23, 11  ;;  %v1220_v39 = vshll.u32 %v10140_v30, 16 }
  0xab   : > { %v10160_v8 = vld [vmem:[#allocation2 + $0x64] sm:$0xf]  ;;  %v10165_v49 = vld [vmem:[#allocation2 + $0x68] sm:$0xf]  ;;  %v1514_v51 = vshrl.u32 %v10156_v42, 16  ;;  %v1517_v10 = vshll.u32 %v10156_v42, 16  ;;  %v1835_v45 = vsel %vm9663_vm7, %v1830_v19, %v1834_v26  ;;  %v8708_v63 = vpack.c.bf16 %v523_v0, %v523_v0 }
  0xac   : > { %v1523_v44 = vshrl.u32 %v10165_v49, 16  ;;  %v1526_v16 = vshll.u32 %v10165_v49, 16  ;;  %3039 = vrot.lane.b32.xlu0 %v8282_v52, %s15124_s20  ;;  %v8283_v56 = vcombine.low %v10156_v42, %v10165_v49  ;;  %v8298_v1 = vcombine.low %v1827_v12, %v1835_v45  ;;  %v10176_v61 = vld [vmem:[#allocation2 + $0x68] sm:$0xf]  ;;  %684 = vst.msk [vmem:[#allocation2 + $0x74] sm:$0xf] %vm671_vm6, %v8707_v28 }
  0xad   : > { %v1516_v41 = vrot.slane %v1514_v51, 7  ;;  %v1836_v23 = vrot.slane %v1514_v51, 4  ;;  %v1837_v7 = vrot.slane %v1517_v10, 5  ;;  %v2133_v26 = vshrl.u32 %v10160_v8, 16  ;;  %685 = vst.msk [vmem:[#allocation2 + $0x78] sm:$0xf] %vm671_vm6, %v8708_v63 }
  0xae   : > { %2849 = vrot.lane.b32.xlu1 %v8251_v3, %s15014_s19  ;;  %v1525_v19 = vrot.slane %v1523_v44, 7  ;;  %v1840_v0 = vrot.slane %v1526_v16, 5  ;;  %v1842_v52 = vrot.slane %v1523_v44, 4  ;;  %v2136_v43 = vshll.u32 %v10160_v8, 16  ;;  %v10216_v17 = vld [vmem:[#allocation2 + $0x64] sm:$0xf] }
  0xaf   : > { %v1519_v42 = vor.u32 %v1517_v10, %v1516_v41  ;;  %v1521_v12 = vrot.slane %v1516_v41, 4  ;;  %v1838_v49 = vor.u32 %v1837_v7, %v1836_v23  ;;  %v2135_v45 = vrot.slane %v2133_v26, 7 }
  0xb0   : > { %v1528_v35 = vor.u32 %v1526_v16, %v1525_v19  ;;  %3119 = vrot.lane.b32.xlu0 %v8298_v1, %s9421_s12  ;;  %v1843_v28 = vor.u32 %v1842_v52, %v1840_v0  ;;  %v2142_v51 = vshrl.u32 %v10176_v61, 16  ;;  %v2145_v54 = vshll.u32 %v10176_v61, 16 }
  0xb1   : > { %v1520_v3 = vsel %vm9764_vm10, %v10122_v48, %v1519_v42  ;;  %v1839_v63 = vrot.slane %v1838_v49, 4  ;;  %v2138_v44 = vor.u32 %v2136_v43, %v2135_v45  ;;  %v2140_v18 = vrot.slane %v2135_v45, 4 }
  0xb2   : > { %v1529_v10 = vsel %vm9764_vm10, %v1521_v12, %v1528_v35  ;;  %v1844_v7 = vrot.slane %v1843_v28, 4  ;;  %v2144_v41 = vrot.slane %v2142_v51, 7  ;;  %v8330_v16 = vcombine.low %v10160_v8, %v10176_v61 }
  0xb3   : > { %v8267_v1 = vcombine.low %v1520_v3, %v1529_v10  ;;  %v1841_v23 = vsel %vm9663_vm7, %v1839_v63, %v1840_v0  ;;  %v2139_v19 = vsel %vm9764_vm10, %v10146_v38, %v2138_v44  ;;  %v10198_v48 = vld [vmem:[#allocation2 + $0x74] sm:$0xf]  ;;  %v2463_v52 = vrot.slane %v2133_v26, 4 }
  0xb4   : > { %v1849_v35 = vsel %vm9663_vm7, %v1844_v7, %v10142_v13  ;;  %v2147_v42 = vor.u32 %v2145_v54, %v2144_v41  ;;  %v10203_v12 = vld [vmem:[#allocation2 + $0x78] sm:$0xf]  ;;  %v2155_v8 = vshrl.u32 %v10198_v48, 16  ;;  %v2158_v61 = vshll.u32 %v10198_v48, 16 }
  0xb5   : > { %2929 = vrot.lane.b32.xlu1 %v8267_v1, %s9419_s22  ;;  %v8299_v0 = vcombine.low %v1841_v23, %v1849_v35  ;;  %v2164_v49 = vshrl.u32 %v10203_v12, 16  ;;  %v2167_v38 = vshll.u32 %v10203_v12, 16  ;;  %v8331_v26 = vcombine.low %v10198_v48, %v10203_v12  ;;  %v10235_v9 = vld [vmem:[#allocation2 + $0x78] sm:$0xf] }
  0xb6   : > { %v2148_v13 = vsel %vm9764_vm10, %v2140_v18, %v2147_v42  ;;  %v2157_v45 = vrot.slane %v2155_v8, 7  ;;  %v2464_v28 = vrot.slane %v2136_v43, 5  ;;  %v2467_v3 = vrot.slane %v2145_v54, 5 }
  0xb7   : > { %v8314_v63 = vcombine.low %v2139_v19, %v2148_v13  ;;  %v2166_v44 = vrot.slane %v2164_v49, 7  ;;  %v2469_v10 = vrot.slane %v2142_v51, 4  ;;  %v2475_v7 = vrot.slane %v2473_v29, 5 }
  0xb8   : > { %v2160_v41 = vor.u32 %v2158_v61, %v2157_v45  ;;  %v2162_v1 = vrot.slane %v2157_v45, 4  ;;  %v2465_v23 = vor.u32 %v2464_v28, %v2463_v52  ;;  %v2477_v35 = vrot.slane %v2155_v8, 4  ;;  %v10225_v52 = vld [vmem:[#allocation2 + $0x68] sm:$0xf] }
  0xb9   : > { %3041 = vrot.lane.b32.xlu1 %v8283_v56, %s15124_s20  ;;  %3199 = vrot.lane.b32.xlu0 %v8314_v63, %s15002_s10  ;;  %v2169_v18 = vor.u32 %v2167_v38, %v2166_v44  ;;  %v2470_v42 = vor.u32 %v2469_v10, %v2467_v3  ;;  %v2478_v43 = vrot.slane %v2158_v61, 5  ;;  %v2481_v54 = vrot.slane %v2167_v38, 5  ;;  %v10230_v61 = vld [vmem:[#allocation2 + $0x74] sm:$0xf] }
  0xba   : > { %v2161_v51 = vsel %vm9764_vm10, %v10162_v14, %v2160_v41  ;;  %v2466_v11 = vrot.slane %v2465_v23, 4  ;;  %v2483_v29 = vrot.slane %v2164_v49, 4  ;;  %v2489_v19 = vrot.slane %v2487_v5, 5 }
  0xbb   : > { %v2170_v56 = vsel %vm9764_vm10, %v2162_v1, %v2169_v18  ;;  %v2471_v8 = vrot.slane %v2470_v42, 4  ;;  %v2479_v13 = vor.u32 %v2478_v43, %v2477_v35  ;;  %v14977_v45 = vshrl.u32 %v10216_v17, 16  ;;  %v1114_v18 = vld [vmem:[#allocation2 + $0x7c] sm:$0x1] }
  0xbc   : > { %v8315_v38 = vcombine.low %v2161_v51, %v2170_v56  ;;  %v2468_v14 = vsel %vm9663_vm7, %v2466_v11, %v2467_v3  ;;  %v2484_v28 = vor.u32 %v2483_v29, %v2481_v54  ;;  %v14975_v49 = vshll.u32 %v10216_v17, 16  ;;  %v1368_v11 = vld [vmem:[#allocation2 + $0x70] sm:$0x8] }
  0xbd   : > { %3121 = vrot.lane.b32.xlu1 %v8299_v0, %s9421_s12  ;;  %3311 = vrot.lane.b32.xlu0 %v8330_v16, %s9418_s21  ;;  %v2476_v5 = vsel %vm9663_vm7, %v2471_v8, %v2475_v7  ;;  %v2480_v63 = vrot.slane %v2479_v13, 4  ;;  %v14976_v44 = vshrl.u32 %v10225_v52, 16  ;;  %v8236_v10 = vcombine.low %v10216_v17, %v10225_v52  ;;  %v10267_v13 = vld [vmem:[#allocation2 + $0x74] sm:$0xf] }
  0xbe   : > { %v8346_v41 = vcombine.low %v2468_v14, %v2476_v5  ;;  %v2485_v3 = vrot.slane %v2484_v28, 4  ;;  %v14971_v1 = vshrl.u32 %v10230_v61, 16  ;;  %v14970_v23 = vshll.u32 %v10230_v61, 16 }
  0xbf   : > { %v2482_v0 = vsel %vm9663_vm7, %v2480_v63, %v2481_v54  ;;  %v14974_v16 = vshrl.u32 %v10235_v9, 16  ;;  %v8237_v7 = vcombine.low %v10230_v61, %v10235_v9  ;;  %v14972_v35 = vshll.u32 %v10225_v52, 16 }
  0xc0   : > { %v2490_v42 = vsel %vm9663_vm7, %v2485_v3, %v2489_v19  ;;  %v1210_v43 = vrot.slane %v14977_v45, 4  ;;  %v1211_v51 = vrot.slane %v14975_v49, 5  ;;  %v1216_v54 = vrot.slane %v14976_v44, 4  ;;  %v447_v49 = vld [vmem:[%s9530_s23 + $0x78] sm:$0xff] }
  0xc1   : > { %3201 = vrot.lane.b32.xlu1 %v8315_v38, %s15002_s10  ;;  %3391 = vrot.lane.b32.xlu0 %v8346_v41, %s9422_s13  ;;  %v8347_v29 = vcombine.low %v2482_v0, %v2490_v42  ;;  %v1214_v56 = vrot.slane %v14972_v35, 5  ;;  %v1222_v19 = vrot.slane %v1220_v39, 5  ;;  %v14973_v8 = vshll.u32 %v10235_v9, 16  ;;  %v10277_v41 = vld [vmem:[#allocation2 + $0x78] sm:$0xf]  ;;  %v10279_v0 = vpop.permute.xlu1 %2839  ;;  %v10284_v35 = vpop.permute.xlu0 %2759 }
  0xc2   : > { %v1212_v14 = vor.u32 %v1211_v51, %v1210_v43  ;;  %v1224_v28 = vrot.slane %v14971_v1, 4  ;;  %v1225_v38 = vrot.slane %v14970_v23, 5  ;;  %v1230_v5 = vrot.slane %v14974_v16, 4  ;;  %v446_v1 = vld [vmem:[%s9530_s23 + $0x70] sm:$0xff] }
  0xc3   : > { %v1217_v63 = vor.u32 %v1216_v54, %v1214_v56  ;;  %v1228_v30 = vrot.slane %v14973_v8, 5  ;;  %v1234_v39 = vshll.u32 %v1114_v18, 16  ;;  %v1531_v3 = vshrl.u32 %v1368_v11, 16 }
  0xc4   : > { %v1213_v42 = vrot.slane %v1212_v14, 4  ;;  %v1226_v43 = vor.u32 %v1225_v38, %v1224_v28  ;;  %v1536_v51 = vshrl.u32 %v10267_v13, 16  ;;  %v1539_v23 = vshll.u32 %v10267_v13, 16 }
  0xc5   : > { %3313 = vrot.lane.b32.xlu1 %v8331_v26, %s9418_s21  ;;  %2771 = vrot.lane.b32.xlu0 %v8236_v10, %s14995_s26  ;;  %v1218_v18 = vrot.slane %v1217_v63, 4  ;;  %v1231_v54 = vor.u32 %v1230_v5, %v1228_v30  ;;  %v1236_v11 = vrot.slane %v1234_v39, 5  ;;  %v8188_v14 = vrot.slane %v1531_v3, 11  ;;  %v1371_v26 = vld [vmem:[#allocation2 + $0x80] sm:$0x8] }
  0xc6   : > { %v1215_v28 = vsel %vm9663_vm7, %v1213_v42, %v1214_v56  ;;  %v1227_v38 = vrot.slane %v1226_v43, 4  ;;  %v1538_v8 = vrot.slane %v1536_v51, 7  ;;  %v1545_v16 = vshrl.u32 %v10277_v41, 16 }
  0xc7   : > { %v1223_v44 = vsel %vm9663_vm7, %v1218_v18, %v1222_v19  ;;  %v1232_v45 = vrot.slane %v1231_v54, 4  ;;  %v1548_v48 = vshll.u32 %v10277_v41, 16  ;;  %v485_v12 = vmul.f32 %v10135_v55, %v446_v1  ;;  %v1757_v18 = vld [vmem:[#allocation2 + $0x8c] sm:$0x1] }
  0xc8   : > { %v8252_v10 = vcombine.low %v1215_v28, %v1223_v44  ;;  %v1229_v5 = vsel %vm9663_vm7, %v1227_v38, %v1228_v30  ;;  %v1541_v63 = vor.u32 %v1539_v23, %v1538_v8  ;;  %v1543_v56 = vrot.slane %v1538_v8, 4  ;;  %v10306_v43 = vpop.permute.xlu1 %3033  ;;  %v1756_v8 = vld [vmem:[#allocation2 + $0x7c] sm:$0x1] }
  0xc9   : > { %3393 = vrot.lane.b32.xlu1 %v8347_v29, %s9422_s13  ;;  %v1237_v39 = vsel %vm9663_vm7, %v1232_v45, %v1236_v11  ;;  %v1547_v3 = vrot.slane %v1545_v16, 7  ;;  %v486_v19 = vmul.f32 %v10135_v55, %v447_v49  ;;  %v524_v42 = vadd.f32 %v10106_v20, %v485_v12 }
  0xca   : > { %2851 = vrot.lane.b32.xlu0 %v8252_v10, %s15014_s19  ;;  %v8253_v44 = vcombine.low %v1229_v5, %v1237_v39  ;;  %v1542_v1 = vsel %vm9764_vm10, %v8188_v14, %v1541_v63  ;;  %v1553_v30 = vshrl.u32 %v1371_v26, 16  ;;  %v8284_v29 = vcombine.low %v10267_v13, %v10277_v41  ;;  %v10313_v45 = vpop.permute.xlu0 %2761  ;;  %v704_v26 = vld [vmem:[#allocation2] sm:$0x8] }
  0xcb   : > { %v1550_v54 = vor.u32 %v1548_v48, %v1547_v3  ;;  %v525_v49 = vadd.f32 %v10106_v20, %v486_v19  ;;  %v8709_v11 = vpack.c.bf16 %v524_v42, %v524_v42  ;;  %v1850_v28 = vrot.slane %v1536_v51, 4  ;;  %v2009_v63 = vld [vmem:[#allocation2 + $0x80] sm:$0x8]  ;;  %v2012_v19 = vld [vmem:[#allocation2 + $0x90] sm:$0x8] }
  0xcc   : > { %v10316_v38 = vrot.slane %v1553_v30, 11  ;;  %v1851_v12 = vrot.slane %v1539_v23, 5  ;;  %v1854_v10 = vrot.slane %v1548_v48, 5  ;;  %v1856_v14 = vrot.slane %v1545_v16, 4  ;;  %v448_v16 = vld [vmem:[%s9530_s23 + $0x80] sm:$0xff]  ;;  %v449_v48 = vld [vmem:[%s9530_s23 + $0x88] sm:$0xff]  ;;  %v10327_v42 = vpop.permute.xlu1 %3305 }
  0xcd   : > { %2773 = vrot.lane.b32.xlu1 %v8237_v7, %s14995_s26  ;;  %v1551_v13 = vsel %vm9764_vm10, %v1543_v56, %v1550_v54  ;;  %v8710_v41 = vpack.c.bf16 %v525_v49, %v525_v49  ;;  %686 = vst.msk [vmem:[#allocation2 + $0x84] sm:$0xf] %vm671_vm6, %v8709_v11  ;;  %v1860_v51 = vshll.u32 %v1756_v8, 16  ;;  %v1874_v5 = vshll.u32 %v1757_v18, 16  ;;  %v707_v54 = vld [vmem:[#allocation2 + $0x10] sm:$0x8] }
  0xce   : > { %v8268_v39 = vcombine.low %v1542_v1, %v1551_v13  ;;  %v1852_v23 = vor.u32 %v1851_v12, %v1850_v28  ;;  %v1857_v3 = vor.u32 %v1856_v14, %v1854_v10  ;;  %vm3415_vm11 = vcmask 23552   ;;  %v10329_v30 = vpop.permute.xlu0 %3031 }
  0xcf   : > { %687 = vst.msk [vmem:[#allocation2 + $0x88] sm:$0xf] %vm671_vm6, %v8710_v41  ;;  %v1862_v7 = vrot.slane %v1860_v51, 5  ;;  %v10332_v56 = vrot.slane %v1874_v5, 5  ;;  %v756_v8 = vshrl.u32 %v704_v26, 16  ;;  %v15125_v1 = vrot.slane %v9635_v50, 4 }
  0xd0   : > { %2931 = vrot.lane.b32.xlu0 %v8268_v39, %s9419_s22  ;;  %v1853_v49 = vrot.slane %v1852_v23, 4  ;;  %v1858_v11 = vrot.slane %v1857_v3, 4  ;;  %vm3464_vm12 = vcmask 48128   ;;  %v2172_v28 = vshrl.u32 %v2009_v63, 16  ;;  %v450_v41 = vld [vmem:[%s9530_s23 + $0x90] sm:$0xff] }
  0xd1   : > { %v776_v18 = vsel %vm9764_vm10, %v15125_v1, %v9643_v57  ;;  %2853 = vrot.lane.b32.xlu1 %v8253_v44, %s15014_s19  ;;  %v8166_v12 = vrot.slane %v756_v8, 11  ;;  %v487_v14 = vmul.f32 %v10135_v55, %v448_v16  ;;  %v488_v26 = vmul.f32 %v10135_v55, %v449_v48 }
  0xd2   : > { %v2194_v13 = vshrl.u32 %v2012_v19, 16  ;;  %v1855_v50 = vsel %vm9663_vm7, %v1853_v49, %v1854_v10  ;;  %v1863_v57 = vsel %vm9663_vm7, %v1858_v11, %v1862_v7  ;;  %v10348_v51 = vrot.slane %v2172_v28, 11  ;;  %v10350_v39 = vpop.permute.xlu0 %3303  ;;  %v10366_v8 = vpop.permute.xlu1 %2921 }
  0xd3   : > { %v778_v5 = vshrl.u32 %v707_v54, 16  ;;  %v8300_v63 = vcombine.low %v1855_v50, %v1863_v57  ;;  %v767_v44 = vsel %vm9764_vm10, %v8166_v12, %v9646_v58  ;;  %v526_v23 = vadd.f32 %v10106_v20, %v487_v14 }
  0xd4   : > { %v527_v3 = vadd.f32 %v10106_v20, %v488_v26  ;;  %v10357_v16 = vld [vmem:[#allocation2 + $0x84] sm:$0xf]  ;;  %3043 = vrot.lane.b32.xlu0 %v8284_v29, %s15124_s20  ;;  %v8214_v10 = vcombine.low %v767_v44, %v776_v18  ;;  %v10362_v19 = vrot.slane %v2194_v13, 11  ;;  %v10369_v1 = vmul.f32 %v10135_v55, %v450_v41 }
  0xd5   : > { %v10360_v48 = vld [vmem:[#allocation2 + $0x84] sm:$0xf]  ;;  %v10364_v7 = vrot.slane %v778_v5, 11  ;;  %v1558_v58 = vshrl.u32 %v10357_v16, 16  ;;  %v1561_v54 = vshll.u32 %v10357_v16, 16  ;;  %v8711_v28 = vpack.c.bf16 %v526_v23, %v526_v23 }
  0xd6   : > { %v2177_v49 = vshrl.u32 %v10360_v48, 16  ;;  %v2180_v29 = vshll.u32 %v10360_v48, 16  ;;  %v10375_v18 = vld [vmem:[#allocation2 + $0x88] sm:$0xf]  ;;  %v3418_v11 = vsel %vm3415_vm11, %v8214_v10, %v10284_v35  ;;  %v8712_v12 = vpack.c.bf16 %v527_v3, %v527_v3  ;;  %v10381_v26 = vpop.permute.xlu0 %2919  ;;  %v10396_v46 = vpop.permute.xlu1 %3193 }
  0xd7   : > { %v794_v14 = vrot.slane %v792_v25, 7  ;;  %v1560_v13 = vrot.slane %v1558_v58, 7  ;;  %v1567_v41 = vshrl.u32 %v10375_v18, 16  ;;  %v1570_v50 = vshll.u32 %v10375_v18, 16  ;;  %v10392_v23 = vld [vmem:[#allocation2 + $0x88] sm:$0xf] }
  0xd8   : > { %v8285_v57 = vcombine.low %v10357_v16, %v10375_v18  ;;  %3123 = vrot.lane.b32.xlu0 %v8300_v63, %s9421_s12  ;;  %v1864_v5 = vrot.slane %v1558_v58, 4  ;;  %v1865_v44 = vrot.slane %v1561_v54, 5  ;;  %v10390_v35 = vsel %vm3464_vm12, %v3418_v11, %v10279_v0  ;;  %688 = vst.msk [vmem:[#allocation2 + $0x94] sm:$0xf] %vm671_vm6, %v8711_v28  ;;  %689 = vst.msk [vmem:[#allocation2 + $0x98] sm:$0xf] %vm671_vm6, %v8712_v12 }
  0xd9   : > { %v2179_v25 = vrot.slane %v2177_v49, 7  ;;  %v1563_v3 = vor.u32 %v1561_v54, %v1560_v13  ;;  %v1565_v10 = vrot.slane %v1560_v13, 4  ;;  %v1569_v62 = vrot.slane %v1567_v41, 7 }
  0xda   : > { %v1868_v37 = vrot.slane %v1570_v50, 5  ;;  %v1866_v16 = vor.u32 %v1865_v44, %v1864_v5  ;;  %v1870_v18 = vrot.slane %v1567_v41, 4  ;;  %v2186_v21 = vshrl.u32 %v10392_v23, 16  ;;  %v10403_v12 = vpop.permute.xlu0 %3191 }
  0xdb   : > { %v2182_v63 = vor.u32 %v2180_v29, %v2179_v25  ;;  %v2184_v58 = vrot.slane %v2179_v25, 4  ;;  %v1564_v0 = vsel %vm9764_vm10, %v10316_v38, %v1563_v3  ;;  %v1572_v11 = vor.u32 %v1570_v50, %v1569_v62 }
  0xdc   : > { %v2189_v28 = vshll.u32 %v10392_v23, 16  ;;  %v1867_v54 = vrot.slane %v1866_v16, 4  ;;  %v1871_v13 = vor.u32 %v1870_v18, %v1868_v37  ;;  %v15126_v5 = vshll.u32 %v9740_v22, 16 }
  0xdd   : > { %v2183_v41 = vsel %vm9764_vm10, %v10348_v51, %v2182_v63  ;;  %v1573_v25 = vsel %vm9764_vm10, %v1565_v10, %v1572_v11  ;;  %v2188_v38 = vrot.slane %v2186_v21, 7  ;;  %v15127_v62 = vshrl.u32 %v9730_v15, 16 }
  0xde   : > { %v797_v44 = vor.u32 %v15126_v5, %v794_v14  ;;  %v8332_v3 = vcombine.low %v10360_v48, %v10392_v23  ;;  %v8269_v33 = vcombine.low %v1564_v0, %v1573_v25  ;;  %v1869_v16 = vsel %vm9663_vm7, %v1867_v54, %v1868_v37  ;;  %v10431_v0 = vpop.permute.xlu1 %2841 }
  0xdf   : > { %v785_v50 = vrot.slane %v15127_v62, 7  ;;  %v1872_v18 = vrot.slane %v1871_v13, 4  ;;  %v2491_v53 = vrot.slane %v2177_v49, 4  ;;  %v2191_v51 = vor.u32 %v2189_v28, %v2188_v38  ;;  %v10418_v63 = vld [vmem:[#allocation2 + $0x94] sm:$0xf]  ;;  %v10439_v13 = vpop.permute.xlu0 %3111 }
  0xe0   : > { %v10420_v22 = vld [vmem:[#allocation2 + $0x98] sm:$0xf]  ;;  %v15128_v14 = vshll.u32 %v9730_v15, 16  ;;  %v2492_v5 = vrot.slane %v2180_v29, 5  ;;  %2933 = vrot.lane.b32.xlu1 %v8269_v33, %s9419_s22  ;;  %v2199_v37 = vshrl.u32 %v10418_v63, 16  ;;  %v2202_v49 = vshll.u32 %v10418_v63, 16 }
  0xe1   : > { %v790_v11 = vrot.slane %v785_v50, 4  ;;  %v1877_v48 = vsel %vm9663_vm7, %v1872_v18, %v10332_v56  ;;  %v2208_v23 = vshrl.u32 %v10420_v22, 16  ;;  %v2192_v15 = vsel %vm9764_vm10, %v2184_v58, %v2191_v51 }
  0xe2   : > { %v788_v10 = vor.u32 %v15128_v14, %v785_v50  ;;  %v8301_v54 = vcombine.low %v1869_v16, %v1877_v48  ;;  %v2211_v29 = vshll.u32 %v10420_v22, 16  ;;  %v8316_v56 = vcombine.low %v2183_v41, %v2192_v15  ;;  %v2397_v50 = vld [vmem:[#allocation2 + $0x8c] sm:$0x1]  ;;  %v2398_v15 = vld [vmem:[#allocation2 + $0x9c] sm:$0x1] }
  0xe3   : > { %v2201_v25 = vrot.slane %v2199_v37, 7  ;;  %v2210_v38 = vrot.slane %v2208_v23, 7  ;;  %v798_v62 = vsel %vm9764_vm10, %v790_v11, %v797_v44  ;;  %v8333_v16 = vcombine.low %v10418_v63, %v10420_v22 }
  0xe4   : > { %v789_v33 = vsel %vm9764_vm10, %v10364_v7, %v788_v10  ;;  %v2493_v58 = vor.u32 %v2492_v5, %v2491_v53  ;;  %v2495_v51 = vrot.slane %v2189_v28, 5  ;;  %3045 = vrot.lane.b32.xlu1 %v8285_v57, %s15124_s20  ;;  %3203 = vrot.lane.b32.xlu0 %v8316_v56, %s15002_s10  ;;  %v2497_v41 = vrot.slane %v2186_v21, 4  ;;  %v10456_v56 = vld [vmem:[#allocation2 + $0x84] sm:$0xf]  ;;  %v10458_v21 = vld [vmem:[#allocation2 + $0x88] sm:$0xf] }
  0xe5   : > { %v8215_v18 = vcombine.low %v789_v33, %v798_v62  ;;  %v2204_v7 = vor.u32 %v2202_v49, %v2201_v25  ;;  %v2206_v14 = vrot.slane %v2201_v25, 4  ;;  %v2213_v10 = vor.u32 %v2211_v29, %v2210_v38  ;;  %v10460_v25 = vpop.permute.xlu1 %3113 }
  0xe6   : > { %v2494_v44 = vrot.slane %v2493_v58, 4  ;;  %v2501_v11 = vshll.u32 %v2397_v50, 16  ;;  %v2505_v33 = vrot.slane %v2199_v37, 4  ;;  %v2498_v28 = vor.u32 %v2497_v41, %v2495_v51  ;;  %v10464_v50 = vld [vmem:[#allocation2 + $0x94] sm:$0xf] }
  0xe7   : > { %v10449_v48 = vsel %vm3415_vm11, %v8215_v18, %v10313_v45  ;;  %v2205_v53 = vsel %vm9764_vm10, %v10362_v19, %v2204_v7  ;;  %v2214_v57 = vsel %vm9764_vm10, %v2206_v14, %v2213_v10  ;;  %v2506_v5 = vrot.slane %v2202_v49, 5  ;;  %v10466_v19 = vpop.permute.xlu0 %3383  ;;  %v10470_v14 = vld [vmem:[#allocation2 + $0x98] sm:$0xf] }
  0xe8   : > { %v8317_v45 = vcombine.low %v2205_v53, %v2214_v57  ;;  %v2496_v38 = vsel %vm9663_vm7, %v2494_v44, %v2495_v51  ;;  %v2503_v37 = vrot.slane %v2501_v11, 5  ;;  %v2509_v62 = vrot.slane %v2211_v29, 5  ;;  %3125 = vrot.lane.b32.xlu1 %v8301_v54, %s9421_s12  ;;  %3315 = vrot.lane.b32.xlu0 %v8332_v3, %s9418_s21  ;;  %v1115_v57 = vld [vmem:[#allocation2 + $0x8c] sm:$0x1] }
  0xe9   : > { %v2499_v49 = vrot.slane %v2498_v28, 4  ;;  %v2507_v18 = vor.u32 %v2506_v5, %v2505_v33  ;;  %v2511_v58 = vrot.slane %v2208_v23, 4  ;;  %v2515_v7 = vshll.u32 %v2398_v15, 16 }
  0xea   : > { %v14985_v10 = vshrl.u32 %v10456_v56, 16  ;;  %v14987_v51 = vshll.u32 %v10456_v56, 16  ;;  %v14993_v29 = vshrl.u32 %v10458_v21, 16  ;;  %v8238_v41 = vcombine.low %v10456_v56, %v10458_v21 }
  0xeb   : > { %v2504_v54 = vsel %vm9663_vm7, %v2499_v49, %v2503_v37  ;;  %v2508_v44 = vrot.slane %v2507_v18, 4  ;;  %v2512_v3 = vor.u32 %v2511_v58, %v2509_v62  ;;  %v2517_v11 = vrot.slane %v2515_v7, 5  ;;  %v10482_v28 = vpop.permute.xlu0 %2763 }
  0xec   : > { %v8348_v33 = vcombine.low %v2496_v38, %v2504_v54  ;;  %v14988_v23 = vshrl.u32 %v10464_v50, 16  ;;  %v14990_v15 = vshll.u32 %v10464_v50, 16  ;;  %v14991_v53 = vshrl.u32 %v10470_v14, 16  ;;  %3205 = vrot.lane.b32.xlu1 %v8317_v45, %s15002_s10  ;;  %v10489_v38 = vpop.permute.xlu1 %3385 }
  0xed   : > { %v2510_v5 = vsel %vm9663_vm7, %v2508_v44, %v2509_v62  ;;  %v2513_v60 = vrot.slane %v2512_v3, 4  ;;  %v8239_v37 = vcombine.low %v10464_v50, %v10470_v14  ;;  %vm3497_vm13 = vcmask 72704   ;;  %v1116_v3 = vld [vmem:[#allocation2 + $0x9c] sm:$0x1] }
  0xee   : > { %3395 = vrot.lane.b32.xlu0 %v8348_v33, %s9422_s13  ;;  %v10495_v49 = vsel %vm3497_vm13, %v10390_v35, %v10381_v26  ;;  %v14992_v18 = vshll.u32 %v10458_v21, 16  ;;  %v1238_v45 = vrot.slane %v14985_v10, 4  ;;  %v1239_v62 = vrot.slane %v14987_v51, 5 }
  0xef   : > { %v2518_v58 = vsel %vm9663_vm7, %v2513_v60, %v2517_v11  ;;  %v1244_v7 = vrot.slane %v14993_v29, 4  ;;  %v1248_v54 = vshll.u32 %v1115_v57, 16  ;;  %v14989_v44 = vshll.u32 %v10470_v14, 16  ;;  %v10511_v51 = vpop.permute.xlu0 %2843 }
  0xf0   : > { %v8349_v26 = vcombine.low %v2510_v5, %v2518_v58  ;;  %v1240_v35 = vor.u32 %v1239_v62, %v1238_v45  ;;  %v1242_v33 = vrot.slane %v14992_v18, 5  ;;  %v1252_v10 = vrot.slane %v14988_v23, 4  ;;  %3317 = vrot.lane.b32.xlu1 %v8333_v16, %s9418_s21  ;;  %v10523_v45 = vld [vmem:[#allocation2 + $0x94] sm:$0xf]  ;;  %v451_v18 = vld [vmem:[%s9530_s23 + $0x98] sm:$0xff] }
  0xf1   : > { %v1250_v60 = vrot.slane %v1248_v54, 5  ;;  %v1253_v11 = vrot.slane %v14990_v15, 5  ;;  %v1256_v57 = vrot.slane %v14989_v44, 5  ;;  %v1258_v5 = vrot.slane %v14991_v53, 4  ;;  %v10531_v44 = vld [vmem:[#allocation2 + $0x98] sm:$0xf]  ;;  %v10533_v53 = vpop.permute.xlu1 %2765 }
  0xf2   : > { %2775 = vrot.lane.b32.xlu0 %v8238_v41, %s14995_s26  ;;  %v1241_v62 = vrot.slane %v1240_v35, 4  ;;  %v1245_v58 = vor.u32 %v1244_v7, %v1242_v33  ;;  %v1262_v23 = vshll.u32 %v1116_v3, 16  ;;  %v3468_v63 = vsel %vm3464_vm12, %v10449_v48, %v10431_v0 }
  0xf3   : > { %v1254_v22 = vor.u32 %v1253_v11, %v1252_v10  ;;  %v1259_v16 = vor.u32 %v1258_v5, %v1256_v57  ;;  %v3501_v54 = vsel %vm3497_vm13, %v3468_v63, %v10366_v8  ;;  %v1575_v15 = vshrl.u32 %v1374_v34, 16  ;;  %v10539_v29 = vpop.permute.xlu0 %2923  ;;  %v1377_v5 = vld [vmem:[#allocation2 + $0xa0] sm:$0x8] }
  0xf4   : > { %v1243_v41 = vsel %vm9663_vm7, %v1241_v62, %v1242_v33  ;;  %v1246_v35 = vrot.slane %v1245_v58, 4  ;;  %v1264_v7 = vrot.slane %v1262_v23, 5  ;;  %v1580_v3 = vshrl.u32 %v10523_v45, 16  ;;  %3397 = vrot.lane.b32.xlu1 %v8349_v26, %s9422_s13 }
  0xf5   : > { %v1255_v0 = vrot.slane %v1254_v22, 4  ;;  %v1260_v48 = vrot.slane %v1259_v16, 4  ;;  %v8190_v8 = vrot.slane %v1575_v15, 11  ;;  %v1583_v10 = vshll.u32 %v10523_v45, 16 }
  0xf6   : > { %v1251_v34 = vsel %vm9663_vm7, %v1246_v35, %v1250_v60  ;;  %v1582_v11 = vrot.slane %v1580_v3, 7  ;;  %v1589_v33 = vshrl.u32 %v10531_v44, 16  ;;  %v1592_v23 = vshll.u32 %v10531_v44, 16 }
  0xf7   : > { %v8254_v62 = vcombine.low %v1243_v41, %v1251_v34  ;;  %v1257_v58 = vsel %vm9663_vm7, %v1255_v0, %v1256_v57  ;;  %v1265_v26 = vsel %vm9663_vm7, %v1260_v48, %v1264_v7  ;;  %v490_v15 = vmul.f32 %v10135_v55, %v451_v18  ;;  %v10552_v60 = vpop.permute.xlu0 %3035  ;;  %v10559_v7 = vpop.permute.xlu1 %2845 }
  0xf8   : > { %v8255_v63 = vcombine.low %v1257_v58, %v1265_v26  ;;  %v1585_v22 = vor.u32 %v1583_v10, %v1582_v11  ;;  %v1587_v16 = vrot.slane %v1582_v11, 4  ;;  %v1591_v31 = vrot.slane %v1589_v33, 7  ;;  %2777 = vrot.lane.b32.xlu1 %v8239_v37, %s14995_s26  ;;  %v1759_v58 = vld [vmem:[#allocation2 + $0xac] sm:$0x1]  ;;  %s15137_s26 = smov 3  }
  0xf9   : > { %2855 = vrot.lane.b32.xlu0 %v8254_v62, %s15014_s19  ;;  %v528_v41 = vadd.f32 %v10106_v20, %v10369_v1  ;;  %v529_v57 = vadd.f32 %v10106_v20, %v490_v15  ;;  %v1597_v35 = vshrl.u32 %v1377_v5, 16  ;;  %vm3530_vm14 = vcmask 97280  }
  0xfa   : > { %v1586_v18 = vsel %vm9764_vm10, %v8190_v8, %v1585_v22  ;;  %v1594_v0 = vor.u32 %v1592_v23, %v1591_v31  ;;  %v3532_v48 = vsel %vm3530_vm14, %v10495_v49, %v10329_v30  ;;  %vm3563_vm15 = vcmask 121856  }
  0xfb   : > { %v8713_v37 = vpack.c.bf16 %v528_v41, %v528_v41  ;;  %v8714_v34 = vpack.c.bf16 %v529_v57, %v529_v57  ;;  %v10566_v11 = vrot.slane %v1597_v35, 11  ;;  %vm3596_vm0 = vcmask 146432   ;;  %v10593_v26 = vpop.permute.xlu1 %2925 }
  0xfc   : > { %v1595_v20 = vsel %vm9764_vm10, %v1587_v16, %v1594_v0  ;;  %v3565_v1 = vsel %vm3563_vm15, %v3532_v48, %v10439_v13  ;;  %v3534_v8 = vsel %vm3530_vm14, %v3501_v54, %v10306_v43  ;;  %v8286_v31 = vcombine.low %v10523_v45, %v10531_v44  ;;  %2857 = vrot.lane.b32.xlu1 %v8255_v63, %s15014_s19  ;;  %v9217_v43 = vld [vmem:[%s14952_s3 + $0x8] sm:$0x3f]   ;;  %v10586_v13 = vpop.permute.xlu0 %3115  ;;  %v1758_v45 = vld [vmem:[#allocation2 + $0x9c] sm:$0x1]  ;;  %v710_v16 = vld [vmem:[#allocation2 + $0x20] sm:$0x8] }
  0xfd   : > { %v8270_v30 = vcombine.low %v1586_v18, %v1595_v20  ;;  %690 = vst.msk [vmem:[#allocation2 + $0xa4] sm:$0xf] %vm671_vm6, %v8713_v37  ;;  %691 = vst.msk [vmem:[#allocation2 + $0xa8] sm:$0xf] %vm671_vm6, %v8714_v34  ;;  %v3598_v49 = vsel %vm3596_vm0, %v3565_v1, %v10403_v12  ;;  %v3567_v5 = vsel %vm3563_vm15, %v3534_v8, %v10460_v25  ;;  %vm3750_vm1 = vcmask 1044480   ;;  %v452_v0 = vld [vmem:[%s9530_s23 + $0xa0] sm:$0xff] }
  0xfe   : > { %v3600_v44 = vsel %vm3596_vm0, %v3567_v5, %v10396_v46  ;;  %vm3751_vm2 = vcmask 1045504   ;;  %vm3629_vm3 = vcmask 171008   ;;  %v9423_v54 = vmov 65535   ;;  %v453_v48 = vld [vmem:[%s9530_s23 + $0xa8] sm:$0xff] }
  0xff   : > { %2935 = vrot.lane.b32.xlu0 %v8270_v30, %s9419_s22  ;;  %v3752_v12 = vsel %vm3750_vm1, 4294967295, %v9423_v54  ;;  %vm3662_vm4 = vcmask 195584   ;;  %v3633_v25 = vsel %vm3629_vm3, %v3600_v44, %v10327_v42  ;;  %v1878_v62 = vrot.slane %v1580_v3, 4 }
 0x100   : > { %v3753_v15 = vsel %vm3751_vm2, %v3752_v12, 0  ;;  %v3666_v46 = vsel %vm3662_vm4, %v3633_v25, %v10489_v38  ;;  %v1879_v63 = vrot.slane %v1583_v10, 5  ;;  %v1882_v22 = vrot.slane %v1592_v23, 5 }
 0x101   : > { %v3755_v41 = vand.u32 %v9217_v43, %v3753_v15  ;;  %v1884_v57 = vrot.slane %v1589_v33, 4  ;;  %v1888_v35 = vshll.u32 %v1758_v45, 16  ;;  %v3631_v18 = vsel %vm3629_vm3, %v3598_v49, %v10350_v39  ;;  %v10625_v45 = vpop.permute.xlu1 %3037 }
 0x102   : > { %v1880_v42 = vor.u32 %v1879_v63, %v1878_v62  ;;  %v3664_v3 = vsel %vm3662_vm4, %v3631_v18, %v10466_v19  ;;  %vm3717_vm5 = vcmask 220160   ;;  %v1902_v37 = vshll.u32 %v1759_v58, 16  ;;  %v10608_v20 = vpop.permute.xlu0 %3195 }
 0x103   : > { %3047 = vrot.lane.b32.xlu0 %v8286_v31, %s15124_s20  ;;  %9057 = vmatprep.subr.bf16.mxu0 %v3755_v41  ;;  %v1885_v38 = vor.u32 %v1884_v57, %v1882_v22  ;;  %v1890_v10 = vrot.slane %v1888_v35, 5  ;;  %v800_v23 = vshrl.u32 %v710_v16, 16  ;;  %v15129_v33 = vshrl.u32 %v9862_v59, 16 }
 0x104   : > { %v10610_v39 = vld [vmem:[#allocation2 + $0xa4] sm:$0xf]  ;;  %v10612_v1 = vld [vmem:[#allocation2 + $0xa8] sm:$0xf]  ;;  %9058 = vmatpush3.bf16.msra.mxu0 %v3755_v41  ;;  %v1881_v19 = vrot.slane %v1880_v42, 4  ;;  %9059 = vmatprep.mubr.msk.bf16.mxu0 %vm3717_vm5, %v3664_v3  ;;  %v1904_v8 = vrot.slane %v1902_v37, 5  ;;  %v10616_v31 = vmul.f32 %v10135_v55, %v452_v0  ;;  %v10619_v30 = vmul.f32 %v10135_v55, %v453_v48 }
 0x105   : > { %v10606_v34 = vrot.slane %v15129_v33, 7  ;;  %v1602_v49 = vshrl.u32 %v10610_v39, 16  ;;  %v1605_v5 = vshll.u32 %v10610_v39, 16  ;;  %v1611_v43 = vshrl.u32 %v10612_v1, 16 }
 0x106   : > { %v1614_v44 = vshll.u32 %v10612_v1, 16  ;;  %v8287_v54 = vcombine.low %v10610_v39, %v10612_v1  ;;  %v1883_v12 = vsel %vm9663_vm7, %v1881_v19, %v1882_v22  ;;  %v1886_v25 = vrot.slane %v1885_v38, 4  ;;  %v10632_v16 = vpop.permute.xlu0 %3307  ;;  %v713_v22 = vld [vmem:[#allocation2 + $0x30] sm:$0x8]  ;;  %v2015_v39 = vld [vmem:[#allocation2 + $0xa0] sm:$0x8] }
 0x107   : > { %v8168_v62 = vrot.slane %v800_v23, 11  ;;  %v1604_v55 = vrot.slane %v1602_v49, 7  ;;  %v1613_v58 = vrot.slane %v1611_v43, 7  ;;  %v1892_v15 = vrot.slane %v1602_v49, 4  ;;  %9060 = vmatmul.mubr.msk.bf16.vlgmr.msra.gmra.mrb[0].mxu0 %vm3717_vm5, %v3666_v46 }
 0x108   : > { %v1893_v63 = vrot.slane %v1605_v5, 5  ;;  %v1891_v41 = vsel %vm9663_vm7, %v1886_v25, %v1890_v10  ;;  %v1896_v57 = vrot.slane %v1614_v44, 5  ;;  %v1898_v35 = vrot.slane %v1611_v43, 4 }
 0x109   : > { %v15130_v18 = vshll.u32 %v9862_v59, 16  ;;  %v1607_v48 = vor.u32 %v1605_v5, %v1604_v55  ;;  %v1609_v42 = vrot.slane %v1604_v55, 4  ;;  %v1616_v3 = vor.u32 %v1614_v44, %v1613_v58  ;;  %v10650_v5 = vpop.permute.xlu1 %3117 }
 0x10a   : > { %v8302_v37 = vcombine.low %v1883_v12, %v1891_v41  ;;  %v1894_v38 = vor.u32 %v1893_v63, %v1892_v15  ;;  %v1899_v23 = vor.u32 %v1898_v35, %v1896_v57  ;;  %v812_v33 = vrot.slane %v10606_v34, 4  ;;  %v10652_v43 = vpop.permute.xlu0 %3387  ;;  %v10660_v41 = vld [vmem:[#allocation2 + $0xa4] sm:$0xf] }
 0x10b   : > { %v810_v0 = vor.u32 %v15130_v18, %v10606_v34  ;;  %v1608_v10 = vsel %vm9764_vm10, %v10566_v11, %v1607_v48  ;;  %v1617_v59 = vsel %vm9764_vm10, %v1609_v42, %v1616_v3  ;;  %v15131_v1 = vshrl.u32 %v9875_v2, 16  ;;  %v10669_v42 = vld [vmem:[#allocation2 + $0xa8] sm:$0xf] }
 0x10c   : > { %3127 = vrot.lane.b32.xlu0 %v8302_v37, %s9421_s12  ;;  %v822_v49 = vshrl.u32 %v713_v22, 16  ;;  %v8271_v44 = vcombine.low %v1608_v10, %v1617_v59  ;;  %v1895_v34 = vrot.slane %v1894_v38, 4  ;;  %v1900_v12 = vrot.slane %v1899_v23, 4 }
 0x10d   : > { %v811_v46 = vsel %vm9764_vm10, %v8168_v62, %v810_v0  ;;  %v816_v19 = vrot.slane %v15131_v1, 7  ;;  %v15132_v25 = vshrl.u32 %v9884_v27, 16  ;;  %v15133_v11 = vshll.u32 %v9875_v2, 16  ;;  %v2018_v1 = vld [vmem:[#allocation2 + $0xb0] sm:$0x8] }
 0x10e   : > { %v8169_v58 = vrot.slane %v822_v49, 11  ;;  %v15134_v15 = vshrl.u32 %v9887_v47, 16  ;;  %v2216_v35 = vshrl.u32 %v2015_v39, 16  ;;  %2937 = vrot.lane.b32.xlu1 %v8271_v44, %s9419_s22  ;;  %v1897_v18 = vsel %vm9663_vm7, %v1895_v34, %v1896_v57  ;;  %v10675_v10 = vpop.permute.xlu0 %2767  ;;  %v10688_v49 = vld [vmem:[%s14951_s2] ss:$0 sm:$0xff] }
 0x10f   : > { %v829_v62 = vrot.slane %v15132_v25, 7  ;;  %v819_v55 = vor.u32 %v15133_v11, %v816_v19  ;;  %v1905_v0 = vsel %vm9663_vm7, %v1900_v12, %v1904_v8  ;;  %v15135_v22 = vshll.u32 %v9884_v27, 16 }
 0x110   : > { %v838_v63 = vrot.slane %v15134_v15, 7  ;;  %v8303_v3 = vcombine.low %v1897_v18, %v1905_v0  ;;  %v15136_v38 = vshll.u32 %v9887_v47, 16  ;;  %v8206_v39 = vrot.slane %v2216_v35, 11  ;;  %v10692_v44 = vpop.permute.xlu1 %3197 }
 0x111   : > { %v832_v48 = vor.u32 %v15135_v22, %v829_v62  ;;  %v834_v2 = vrot.slane %v829_v62, 4  ;;  %v820_v37 = vsel %vm9764_vm10, %v812_v33, %v819_v55  ;;  %v2221_v27 = vshrl.u32 %v10660_v41, 16  ;;  %v2399_v22 = vld [vmem:[#allocation2 + $0xac] sm:$0x1] }
 0x112   : > { %v841_v23 = vor.u32 %v15136_v38, %v838_v63  ;;  %v8216_v57 = vcombine.low %v811_v46, %v820_v37  ;;  %v2224_v59 = vshll.u32 %v10660_v41, 16  ;;  %v2230_v33 = vshrl.u32 %v10669_v42, 16  ;;  %3049 = vrot.lane.b32.xlu1 %v8287_v54, %s15124_s20 }
 0x113   : > { %v833_v8 = vsel %vm9764_vm10, %v8169_v58, %v832_v48  ;;  %v2233_v47 = vshll.u32 %v10669_v42, 16  ;;  %v530_v46 = vadd.f32 %v10688_v49, %v10616_v31  ;;  %v2223_v25 = vrot.slane %v2221_v27, 7  ;;  %v2400_v48 = vld [vmem:[#allocation2 + $0xbc] sm:$0x1] }
 0x114   : > { %v842_v19 = vsel %vm9764_vm10, %v834_v2, %v841_v23  ;;  %v3424_v34 = vsel %vm3415_vm11, %v8216_v57, %v10482_v28  ;;  %v531_v62 = vadd.f32 %v10688_v49, %v10619_v30  ;;  %v2232_v11 = vrot.slane %v2230_v33, 7  ;;  %v10712_v2 = vpop.permute.xlu0 %2847 }
 0x115   : > { %v8217_v12 = vcombine.low %v833_v8, %v842_v19  ;;  %v8715_v55 = vpack.c.bf16 %v530_v46, %v530_v46  ;;  %v2238_v58 = vshrl.u32 %v2018_v1, 16  ;;  %v3470_v15 = vsel %vm3464_vm12, %v3424_v34, %v10511_v51  ;;  %v10710_v51 = vpop.permute.xlu1 %3309  ;;  %v10726_v8 = vld [vmem:[#allocation2 + $0xa8] sm:$0xf] }
 0x116   : > { %v2226_v63 = vor.u32 %v2224_v59, %v2223_v25  ;;  %v2228_v35 = vrot.slane %v2223_v25, 4  ;;  %v8716_v54 = vpack.c.bf16 %v531_v62, %v531_v62  ;;  %v2235_v18 = vor.u32 %v2233_v47, %v2232_v11  ;;  %3129 = vrot.lane.b32.xlu1 %v8303_v3, %s9421_s12 }
 0x117   : > { %v3427_v31 = vsel %vm3415_vm11, %v8217_v12, %v10533_v53  ;;  %692 = vst.msk [vmem:[#allocation2 + $0xb4] sm:$0xf] %vm671_vm6, %v8715_v55  ;;  %v10704_v28 = vrot.slane %v2238_v58, 11  ;;  %v8334_v0 = vcombine.low %v10660_v41, %v10669_v42  ;;  %v3503_v37 = vsel %vm3497_vm13, %v3470_v15, %v10539_v29  ;;  %v10722_v42 = vld [vmem:[#allocation2 + $0xa4] sm:$0xf] }
 0x118   : > { %v3472_v30 = vsel %vm3464_vm12, %v3427_v31, %v10559_v7  ;;  %v2227_v53 = vsel %vm9764_vm10, %v8206_v39, %v2226_v63  ;;  %693 = vst.msk [vmem:[#allocation2 + $0xb8] sm:$0xf] %vm671_vm6, %v8716_v54  ;;  %v2519_v41 = vrot.slane %v2221_v27, 4  ;;  %v2236_v38 = vsel %vm9764_vm10, %v2228_v35, %v2235_v18 }
 0x119   : > { %v3505_v7 = vsel %vm3497_vm13, %v3472_v30, %v10593_v26  ;;  %v2520_v23 = vrot.slane %v2224_v59, 5  ;;  %v2523_v57 = vrot.slane %v2233_v47, 5  ;;  %v2525_v3 = vrot.slane %v2230_v33, 4  ;;  %v10733_v12 = vpop.permute.xlu1 %3389 }
 0x11a   : > { %v8318_v39 = vcombine.low %v2227_v53, %v2236_v38  ;;  %v2529_v1 = vshll.u32 %v2399_v22, 16  ;;  %v2543_v19 = vshll.u32 %v2400_v48, 16  ;;  %v3536_v29 = vsel %vm3530_vm14, %v3503_v37, %v10552_v60  ;;  %v10744_v55 = vpop.permute.xlu0 %2927 }
 0x11b   : > { %v2521_v46 = vor.u32 %v2520_v23, %v2519_v41  ;;  %v2526_v34 = vor.u32 %v2525_v3, %v2523_v57  ;;  %v3538_v26 = vsel %vm3530_vm14, %v3505_v7, %v10625_v45  ;;  %v14998_v27 = vshrl.u32 %v10722_v42, 16 }
 0x11c   : > { %3207 = vrot.lane.b32.xlu0 %v8318_v39, %s15002_s10  ;;  %v2531_v59 = vrot.slane %v2529_v1, 5  ;;  %v10736_v33 = vrot.slane %v2543_v19, 5  ;;  %v14997_v47 = vshll.u32 %v10722_v42, 16  ;;  %v15006_v25 = vshrl.u32 %v10726_v8, 16 }
 0x11d   : > { %v2522_v62 = vrot.slane %v2521_v46, 4  ;;  %v2527_v60 = vrot.slane %v2526_v34, 4  ;;  %v8240_v11 = vcombine.low %v10722_v42, %v10726_v8  ;;  %v3569_v45 = vsel %vm3563_vm15, %v3536_v29, %v10586_v13  ;;  %v10777_v3 = vpop.permute.xlu1 %2769 }
 0x11e   : > { %v10746_v58 = vld [vmem:[#allocation2 + $0xb4] sm:$0xf]  ;;  %v10752_v31 = vsel %vm3563_vm15, %v3538_v26, %v10650_v5  ;;  %v14999_v63 = vshll.u32 %v10726_v8, 16  ;;  %v1266_v35 = vrot.slane %v14998_v27, 4  ;;  %v10759_v54 = vsel %vm3596_vm0, %v3569_v45, %v10608_v20  ;;  %v10780_v46 = vpop.permute.xlu0 %3039 }
 0x11f   : > { %v10748_v15 = vld [vmem:[#allocation2 + $0xb4] sm:$0xf]  ;;  %v10761_v13 = vld [vmem:[#allocation2 + $0xb8] sm:$0xf]  ;;  %v2243_v18 = vshrl.u32 %v10746_v58, 16  ;;  %v2246_v30 = vshll.u32 %v10746_v58, 16  ;;  %v2524_v22 = vsel %vm9663_vm7, %v2522_v62, %v2523_v57  ;;  %v2532_v5 = vsel %vm9663_vm7, %v2527_v60, %v2531_v59 }
 0x120   : > { %v2252_v48 = vshrl.u32 %v10761_v13, 16  ;;  %v2255_v53 = vshll.u32 %v10761_v13, 16  ;;  %3319 = vrot.lane.b32.xlu0 %v8334_v0, %s9418_s21  ;;  %v8335_v20 = vcombine.low %v10746_v58, %v10761_v13  ;;  %v8350_v37 = vcombine.low %v2524_v22, %v2532_v5  ;;  %v10774_v7 = vld [vmem:[#allocation2 + $0xb8] sm:$0xf]  ;;  %v1117_v62 = vld [vmem:[#allocation2 + $0xac] sm:$0x1] }
 0x121   : > { %v2245_v41 = vrot.slane %v2243_v18, 7  ;;  %v2533_v38 = vrot.slane %v2243_v18, 4  ;;  %v2534_v23 = vrot.slane %v2246_v30, 5  ;;  %v15005_v57 = vshrl.u32 %v10748_v15, 16  ;;  %v10800_v27 = vpop.permute.xlu1 %2849 }
 0x122   : > { %v2254_v39 = vrot.slane %v2252_v48, 7  ;;  %v2537_v1 = vrot.slane %v2255_v53, 5  ;;  %v2539_v19 = vrot.slane %v2252_v48, 4  ;;  %v15001_v29 = vshll.u32 %v10748_v15, 16 }
 0x123   : > { %v2248_v0 = vor.u32 %v2246_v30, %v2245_v41  ;;  %v2250_v34 = vrot.slane %v2245_v41, 4  ;;  %v2535_v26 = vor.u32 %v2534_v23, %v2533_v38  ;;  %v15004_v59 = vshrl.u32 %v10774_v7, 16 }
 0x124   : > { %v2257_v60 = vor.u32 %v2255_v53, %v2254_v39  ;;  %3399 = vrot.lane.b32.xlu0 %v8350_v37, %s9422_s13  ;;  %v2540_v45 = vor.u32 %v2539_v19, %v2537_v1  ;;  %v8241_v18 = vcombine.low %v10748_v15, %v10774_v7  ;;  %v1267_v22 = vrot.slane %v14997_v47, 5 }
 0x125   : > { %v2249_v5 = vsel %vm9764_vm10, %v10704_v28, %v2248_v0  ;;  %v2536_v30 = vrot.slane %v2535_v26, 4  ;;  %v1270_v48 = vrot.slane %v14999_v63, 5  ;;  %v1272_v53 = vrot.slane %v15006_v25, 4  ;;  %v1118_v0 = vld [vmem:[#allocation2 + $0xbc] sm:$0x1] }
 0x126   : > { %v2258_v37 = vsel %vm9764_vm10, %v2250_v34, %v2257_v60  ;;  %v2541_v41 = vrot.slane %v2540_v45, 4  ;;  %v1268_v38 = vor.u32 %v1267_v22, %v1266_v35  ;;  %v1276_v23 = vshll.u32 %v1117_v62, 16  ;;  %v1380_v26 = vld [vmem:[#allocation2 + $0xb0] sm:$0x8]  ;;  %v10808_v60 = vld [vmem:[#allocation2 + $0xb4] sm:$0xf] }
 0x127   : > { %v8319_v39 = vcombine.low %v2249_v5, %v2258_v37  ;;  %v2538_v19 = vsel %vm9663_vm7, %v2536_v30, %v2537_v1  ;;  %v1273_v47 = vor.u32 %v1272_v53, %v1270_v48  ;;  %v15000_v28 = vshll.u32 %v10774_v7, 16  ;;  %v10810_v1 = vpop.permute.xlu0 %3119 }
 0x128   : > { %v2546_v63 = vsel %vm9663_vm7, %v2541_v41, %v10736_v33  ;;  %2779 = vrot.lane.b32.xlu0 %v8240_v11, %s15137_s26  ;;  %v1269_v34 = vrot.slane %v1268_v38, 4  ;;  %v1278_v35 = vrot.slane %v1276_v23, 5  ;;  %v1280_v62 = vrot.slane %v15005_v57, 4  ;;  %v10824_v41 = vld [vmem:[#allocation2 + $0xb8] sm:$0xf] }
 0x129   : > { %3209 = vrot.lane.b32.xlu1 %v8319_v39, %s15002_s10  ;;  %v8351_v45 = vcombine.low %v2538_v19, %v2546_v63  ;;  %v1274_v22 = vrot.slane %v1273_v47, 4  ;;  %v1281_v33 = vrot.slane %v15001_v29, 5  ;;  %v1284_v11 = vrot.slane %v15000_v28, 5  ;;  %v454_v39 = vld [vmem:[%s9530_s23 + $0xb0] sm:$0xff]  ;;  %v455_v19 = vld [vmem:[%s9530_s23 + $0xb8] sm:$0xff]  ;;  %s15146_s10 = smov 18  }
 0x12a   : > { %v1271_v5 = vsel %vm9663_vm7, %v1269_v34, %v1270_v48  ;;  %v1286_v30 = vrot.slane %v15004_v59, 4  ;;  %v1290_v53 = vshll.u32 %v1118_v0, 16  ;;  %v3604_v37 = vsel %vm3596_vm0, %v10752_v31, %v10692_v44 }
 0x12b   : > { %v1279_v47 = vsel %vm9663_vm7, %v1274_v22, %v1278_v35  ;;  %v1282_v63 = vor.u32 %v1281_v33, %v1280_v62  ;;  %v1619_v38 = vshrl.u32 %v1380_v26, 16  ;;  %v1624_v23 = vshrl.u32 %v10808_v60, 16  ;;  %v1383_v26 = vld [vmem:[#allocation2 + $0xc0] sm:$0x8]  ;;  %v10837_v62 = vpop.permute.xlu1 %2929 }
 0x12c   : > { %v8256_v48 = vcombine.low %v1271_v5, %v1279_v47  ;;  %v1287_v34 = vor.u32 %v1286_v30, %v1284_v11  ;;  %v1292_v28 = vrot.slane %v1290_v53, 5  ;;  %v1627_v0 = vshll.u32 %v10808_v60, 16  ;;  %v10844_v5 = vld [vmem:[%s14950_s1] ss:$0 sm:$0xff] }
 0x12d   : > { %3321 = vrot.lane.b32.xlu1 %v8335_v20, %s9418_s21  ;;  %v1283_v44 = vrot.slane %v1282_v63, 4  ;;  %v8192_v31 = vrot.slane %v1619_v38, 11  ;;  %v1626_v29 = vrot.slane %v1624_v23, 7  ;;  %v1633_v35 = vshrl.u32 %v10824_v41, 16  ;;  %v10848_v20 = vpop.permute.xlu0 %3199 }
 0x12e   : > { %2859 = vrot.lane.b32.xlu0 %v8256_v48, %s15014_s19  ;;  %v1288_v22 = vrot.slane %v1287_v34, 4  ;;  %v1636_v33 = vshll.u32 %v10824_v41, 16  ;;  %v493_v58 = vmul.f32 %v10844_v5, %v454_v39  ;;  %v494_v13 = vmul.f32 %v10844_v5, %v455_v19 }
 0x12f   : > { %v1285_v30 = vsel %vm9663_vm7, %v1283_v44, %v1284_v11  ;;  %v1629_v53 = vor.u32 %v1627_v0, %v1626_v29  ;;  %v1631_v47 = vrot.slane %v1626_v29, 4  ;;  %v1635_v63 = vrot.slane %v1633_v35, 7  ;;  %v1760_v11 = vld [vmem:[#allocation2 + $0xbc] sm:$0x1] }
 0x130   : > { %v1293_v38 = vsel %vm9663_vm7, %v1288_v22, %v1292_v28  ;;  %v532_v48 = vadd.f32 %v10688_v49, %v493_v58  ;;  %v533_v34 = vadd.f32 %v10688_v49, %v494_v13  ;;  %v1641_v59 = vshrl.u32 %v1383_v26, 16  ;;  %v1761_v26 = vld [vmem:[#allocation2 + $0xcc] sm:$0x1]  ;;  %v716_v58 = vld [vmem:[#allocation2 + $0x40] sm:$0x8] }
 0x131   : > { %3401 = vrot.lane.b32.xlu1 %v8351_v45, %s9422_s13  ;;  %v8257_v39 = vcombine.low %v1285_v30, %v1293_v38  ;;  %v1630_v19 = vsel %vm9764_vm10, %v8192_v31, %v1629_v53  ;;  %v1638_v57 = vor.u32 %v1636_v33, %v1635_v63  ;;  %v3635_v29 = vsel %vm3629_vm3, %v10759_v54, %v10632_v16  ;;  %v719_v54 = vld [vmem:[#allocation2 + $0x50] sm:$0x8] }
 0x132   : > { %v8717_v44 = vpack.c.bf16 %v532_v48, %v532_v48  ;;  %v8718_v25 = vpack.c.bf16 %v533_v34, %v533_v34  ;;  %v10862_v28 = vrot.slane %v1641_v59, 11  ;;  %v3637_v22 = vsel %vm3629_vm3, %v3604_v37, %v10710_v51  ;;  %v10874_v59 = vpop.permute.xlu1 %3041 }
 0x133   : > { %v1639_v45 = vsel %vm9764_vm10, %v1631_v47, %v1638_v57  ;;  %v8288_v31 = vcombine.low %v10808_v60, %v10824_v41  ;;  %v3668_v13 = vsel %vm3662_vm4, %v3635_v29, %v10652_v43  ;;  %v3670_v16 = vsel %vm3662_vm4, %v3637_v22, %v10733_v12  ;;  %v10879_v60 = vpop.permute.xlu0 %3311 }
 0x134   : > { %v8272_v30 = vcombine.low %v1630_v19, %v1639_v45  ;;  %694 = vst.msk [vmem:[#allocation2 + $0xc4] sm:$0xf] %vm671_vm6, %v8717_v44  ;;  %695 = vst.msk [vmem:[#allocation2 + $0xc8] sm:$0xf] %vm671_vm6, %v8718_v25  ;;  %v1906_v51 = vrot.slane %v1624_v23, 4  ;;  %v1907_v37 = vrot.slane %v1627_v0, 5  ;;  %9063 = vmatprep.mubr.msk.bf16.mxu0 %vm3717_vm5, %v3668_v13 }
 0x135   : > { %v1910_v57 = vrot.slane %v1636_v33, 5  ;;  %2781 = vrot.lane.b32.xlu1 %v8241_v18, %s15137_s26  ;;  %v1912_v43 = vrot.slane %v1633_v35, 4  ;;  %v1916_v12 = vshll.u32 %v1760_v11, 16  ;;  %v1930_v41 = vshll.u32 %v1761_v26, 16  ;;  %9064 = vmatmul.mubr.msk.bf16.gmra.mrb[4].mxu0 %vm3717_vm5, %v3670_v16  ;;  %v2021_v35 = vld [vmem:[#allocation2 + $0xc0] sm:$0x8] }
 0x136   : > { %v844_v53 = vshrl.u32 %v716_v58, 16  ;;  %2939 = vrot.lane.b32.xlu0 %v8272_v30, %s9419_s22  ;;  %v1908_v25 = vor.u32 %v1907_v37, %v1906_v51  ;;  %v15138_v23 = vshrl.u32 %v9992_v32, 16  ;;  %v15139_v33 = vshrl.u32 %v10004_v40, 16  ;;  %v10902_v51 = vpop.permute.xlu1 %3121 }
 0x137   : > { %v866_v63 = vshrl.u32 %v719_v54, 16  ;;  %v1913_v38 = vor.u32 %v1912_v43, %v1910_v57  ;;  %v1918_v48 = vrot.slane %v1916_v12, 5  ;;  %v10891_v34 = vrot.slane %v1930_v41, 5  ;;  %v10911_v43 = vpop.permute.xlu0 %3391 }
 0x138   : > { %v851_v0 = vrot.slane %v15138_v23, 7  ;;  %v860_v47 = vrot.slane %v15139_v33, 7  ;;  %v8170_v18 = vrot.slane %v844_v53, 11  ;;  %v1909_v19 = vrot.slane %v1908_v25, 4 }
 0x139   : > { %v15140_v29 = vshll.u32 %v9992_v32, 16  ;;  %v15141_v22 = vshll.u32 %v10004_v40, 16  ;;  %2861 = vrot.lane.b32.xlu1 %v8257_v39, %s15014_s19  ;;  %v1914_v58 = vrot.slane %v1913_v38, 4  ;;  %v8171_v45 = vrot.slane %v866_v63, 11 }
 0x13a   : > { %v856_v44 = vrot.slane %v851_v0, 4  ;;  %v15142_v13 = vshrl.u32 %v10044_v4, 16  ;;  %v15143_v54 = vshrl.u32 %v10053_v24, 16  ;;  %3051 = vrot.lane.b32.xlu0 %v8288_v31, %s15124_s20  ;;  %v1911_v32 = vsel %vm9663_vm7, %v1909_v19, %v1910_v57 }
 0x13b   : > { %v854_v11 = vor.u32 %v15140_v29, %v851_v0  ;;  %v863_v26 = vor.u32 %v15141_v22, %v860_v47  ;;  %v2260_v37 = vshrl.u32 %v2021_v35, 16  ;;  %v10913_v12 = vld [vmem:[#allocation2 + $0xc4] sm:$0xf]  ;;  %v10915_v41 = vld [vmem:[#allocation2 + $0xc8] sm:$0xf]  ;;  %v1919_v53 = vsel %vm9663_vm7, %v1914_v58, %v1918_v48 }
 0x13c   : > { %v873_v16 = vrot.slane %v15142_v13, 7  ;;  %v882_v30 = vrot.slane %v15143_v54, 7  ;;  %v15144_v25 = vshll.u32 %v10044_v4, 16  ;;  %v1646_v0 = vshrl.u32 %v10913_v12, 16  ;;  %v10936_v54 = vpop.permute.xlu1 %3201 }
 0x13d   : > { %v855_v40 = vsel %vm9764_vm10, %v8170_v18, %v854_v11  ;;  %v864_v39 = vsel %vm9764_vm10, %v856_v44, %v863_v26  ;;  %v1649_v33 = vshll.u32 %v10913_v12, 16  ;;  %v1655_v47 = vshrl.u32 %v10915_v41, 16  ;;  %v10931_v44 = vld [vmem:[#allocation2 + $0xc4] sm:$0xf] }
 0x13e   : > { %v8218_v31 = vcombine.low %v855_v40, %v864_v39  ;;  %v876_v57 = vor.u32 %v15144_v25, %v873_v16  ;;  %v878_v23 = vrot.slane %v873_v16, 4  ;;  %v1658_v63 = vshll.u32 %v10915_v41, 16  ;;  %v10938_v39 = vld [vmem:[#allocation2 + $0xc8] sm:$0xf] }
 0x13f   : > { %v8289_v38 = vcombine.low %v10913_v12, %v10915_v41  ;;  %v8304_v18 = vcombine.low %v1911_v32, %v1919_v53  ;;  %v1648_v35 = vrot.slane %v1646_v0, 7  ;;  %v1657_v19 = vrot.slane %v1655_v47, 7  ;;  %v10940_v12 = vpop.permute.xlu0 %2771 }
 0x140   : > { %v3430_v48 = vsel %vm3415_vm11, %v8218_v31, %v10675_v10  ;;  %v877_v4 = vsel %vm9764_vm10, %v8171_v45, %v876_v57  ;;  %v1920_v29 = vrot.slane %v1646_v0, 4  ;;  %v1921_v11 = vrot.slane %v1649_v33, 5 }
 0x141   : > { %3131 = vrot.lane.b32.xlu0 %v8304_v18, %s9421_s12  ;;  %v1924_v22 = vrot.slane %v1658_v63, 5  ;;  %v1926_v26 = vrot.slane %v1655_v47, 4  ;;  %v15145_v58 = vshll.u32 %v10053_v24, 16  ;;  %v8208_v16 = vrot.slane %v2260_v37, 11 }
 0x142   : > { %v1651_v10 = vor.u32 %v1649_v33, %v1648_v35  ;;  %v1653_v32 = vrot.slane %v1648_v35, 4  ;;  %v1660_v45 = vor.u32 %v1658_v63, %v1657_v19  ;;  %v1922_v40 = vor.u32 %v1921_v11, %v1920_v29  ;;  %v2024_v35 = vld [vmem:[#allocation2 + $0xd0] sm:$0x8] }
 0x143   : > { %v885_v13 = vor.u32 %v15145_v58, %v882_v30  ;;  %v1927_v41 = vor.u32 %v1926_v26, %v1924_v22  ;;  %v2265_v31 = vshrl.u32 %v10931_v44, 16  ;;  %v2268_v24 = vshll.u32 %v10931_v44, 16  ;;  %v456_v30 = vld [vmem:[%s9530_s23 + $0xc0] sm:$0xff] }
 0x144   : > { %v1652_v37 = vsel %vm9764_vm10, %v10862_v28, %v1651_v10  ;;  %v1661_v25 = vsel %vm9764_vm10, %v1653_v32, %v1660_v45  ;;  %v1923_v57 = vrot.slane %v1922_v40, 4  ;;  %v2274_v18 = vshrl.u32 %v10938_v39, 16  ;;  %v10964_v10 = vpop.permute.xlu1 %3313  ;;  %v10968_v40 = vpop.permute.xlu0 %2851 }
 0x145   : > { %v886_v53 = vsel %vm9764_vm10, %v878_v23, %v885_v13  ;;  %v8273_v33 = vcombine.low %v1652_v37, %v1661_v25  ;;  %v1928_v47 = vrot.slane %v1927_v41, 4  ;;  %v2267_v63 = vrot.slane %v2265_v31, 7  ;;  %v457_v23 = vld [vmem:[%s9530_s23 + $0xc8] sm:$0xff] }
 0x146   : > { %v8219_v0 = vcombine.low %v877_v4, %v886_v53  ;;  %v1925_v19 = vsel %vm9663_vm7, %v1923_v57, %v1924_v22  ;;  %v2277_v28 = vshll.u32 %v10938_v39, 16  ;;  %v495_v11 = vmul.f32 %v10844_v5, %v456_v30 }
 0x147   : > { %2941 = vrot.lane.b32.xlu1 %v8273_v33, %s9419_s22  ;;  %v1933_v4 = vsel %vm9663_vm7, %v1928_v47, %v10891_v34  ;;  %v2270_v26 = vor.u32 %v2268_v24, %v2267_v63  ;;  %v2272_v58 = vrot.slane %v2267_v63, 4  ;;  %v2276_v13 = vrot.slane %v2274_v18, 7  ;;  %v2401_v33 = vld [vmem:[#allocation2 + $0xcc] sm:$0x1]  ;;  %v2402_v47 = vld [vmem:[#allocation2 + $0xdc] sm:$0x1] }
 0x148   : > { %v3433_v29 = vsel %vm3415_vm11, %v8219_v0, %v10777_v3  ;;  %v8305_v32 = vcombine.low %v1925_v19, %v1933_v4  ;;  %v496_v22 = vmul.f32 %v10844_v5, %v457_v23  ;;  %v534_v3 = vadd.f32 %v10688_v49, %v495_v11  ;;  %v10988_v63 = vld [vmem:[#allocation2 + $0xc4] sm:$0xf]  ;;  %v10991_v19 = vld [vmem:[#allocation2 + $0xc8] sm:$0xf]  ;;  %v10995_v4 = vpop.permute.xlu1 %3393 }
 0x149   : > { %v2282_v45 = vshrl.u32 %v2024_v35, 16  ;;  %v2271_v41 = vsel %vm9764_vm10, %v8208_v16, %v2270_v26  ;;  %v2279_v53 = vor.u32 %v2277_v28, %v2276_v13  ;;  %v3474_v34 = vsel %vm3464_vm12, %v3430_v48, %v10712_v2 }
 0x14a   : > { %v3476_v30 = vsel %vm3464_vm12, %v3433_v29, %v10800_v27  ;;  %v535_v37 = vadd.f32 %v10688_v49, %v496_v22  ;;  %v8719_v25 = vpack.c.bf16 %v534_v3, %v534_v3  ;;  %v8336_v0 = vcombine.low %v10931_v44, %v10938_v39  ;;  %v11009_v22 = vld [vmem:[#allocation2 + $0xcc] sm:$0x1] }
 0x14b   : > { %v10977_v57 = vrot.slane %v2282_v45, 11  ;;  %3053 = vrot.lane.b32.xlu1 %v8289_v38, %s15124_s20  ;;  %v2280_v16 = vsel %vm9764_vm10, %v2272_v58, %v2279_v53  ;;  %v3507_v2 = vsel %vm3497_vm13, %v3474_v34, %v10744_v55  ;;  %v3509_v27 = vsel %vm3497_vm13, %v3476_v30, %v10837_v62  ;;  %v11016_v53 = vld [vmem:[#allocation2 + $0xdc] sm:$0x1] }
 0x14c   : > { %v2547_v48 = vrot.slane %v2265_v31, 4  ;;  %v8320_v23 = vcombine.low %v2271_v41, %v2280_v16  ;;  %v8720_v35 = vpack.c.bf16 %v535_v37, %v535_v37  ;;  %696 = vst.msk [vmem:[#allocation2 + $0xd4] sm:$0xf] %vm671_vm6, %v8719_v25  ;;  %v2548_v44 = vrot.slane %v2268_v24, 5 }
 0x14d   : > { %v2551_v39 = vrot.slane %v2277_v28, 5  ;;  %v2553_v38 = vrot.slane %v2274_v18, 4  ;;  %v2557_v29 = vshll.u32 %v2401_v33, 16  ;;  %v2571_v11 = vshll.u32 %v2402_v47, 16  ;;  %v11003_v18 = vpop.permute.xlu0 %2931 }
 0x14e   : > { %v3540_v55 = vsel %vm3530_vm14, %v3507_v2, %v10780_v46  ;;  %3211 = vrot.lane.b32.xlu0 %v8320_v23, %s15146_s10  ;;  %697 = vst.msk [vmem:[#allocation2 + $0xd8] sm:$0xf] %vm671_vm6, %v8720_v35  ;;  %v2549_v62 = vor.u32 %v2548_v44, %v2547_v48  ;;  %v3542_v31 = vsel %vm3530_vm14, %v3509_v27, %v10874_v59  ;;  %v15013_v24 = vshrl.u32 %v10988_v63, 16 }
 0x14f   : > { %v15008_v28 = vshll.u32 %v10988_v63, 16  ;;  %3133 = vrot.lane.b32.xlu1 %v8305_v32, %s9421_s12  ;;  %v2554_v26 = vor.u32 %v2553_v38, %v2551_v39  ;;  %v2559_v46 = vrot.slane %v2557_v29, 5  ;;  %v11006_v58 = vrot.slane %v2571_v11, 5 }
 0x150   : > { %v15009_v13 = vshrl.u32 %v10991_v19, 16  ;;  %v2550_v3 = vrot.slane %v2549_v62, 4  ;;  %v15007_v45 = vshll.u32 %v10991_v19, 16  ;;  %v1294_v59 = vrot.slane %v15013_v24, 4 }
 0x151   : > { %v1295_v41 = vrot.slane %v15008_v28, 5  ;;  %v2555_v32 = vrot.slane %v2554_v26, 4  ;;  %v8242_v30 = vcombine.low %v10988_v63, %v10991_v19  ;;  %v3573_v37 = vsel %vm3563_vm15, %v3540_v55, %v10810_v1  ;;  %v11050_v29 = vpop.permute.xlu0 %3043 }
 0x152   : > { %v1300_v34 = vrot.slane %v15009_v13, 4  ;;  %3323 = vrot.lane.b32.xlu0 %v8336_v0, %s9418_s21  ;;  %v2552_v25 = vsel %vm9663_vm7, %v2550_v3, %v2551_v39  ;;  %v3575_v33 = vsel %vm3563_vm15, %v3542_v31, %v10902_v51  ;;  %v11031_v16 = vrot.slane %v15007_v45, 5  ;;  %v11045_v51 = vpop.permute.xlu1 %2773 }
 0x153   : > { %v1296_v47 = vor.u32 %v1295_v41, %v1294_v59  ;;  %v11033_v2 = vld [vmem:[#allocation2 + $0xd4] sm:$0xf]  ;;  %v2560_v27 = vsel %vm9663_vm7, %v2555_v32, %v2559_v46  ;;  %v1304_v1 = vshll.u32 %v11009_v22, 16  ;;  %v1318_v0 = vshll.u32 %v11016_v53, 16 }
 0x154   : > { %v11037_v48 = vld [vmem:[#allocation2 + $0xd4] sm:$0xf]  ;;  %v11043_v23 = vsel %vm3596_vm0, %v3573_v37, %v10848_v20  ;;  %v2287_v35 = vshrl.u32 %v11033_v2, 16  ;;  %v2290_v44 = vshll.u32 %v11033_v2, 16  ;;  %v8352_v39 = vcombine.low %v2552_v25, %v2560_v27 }
 0x155   : > { %v15011_v38 = vshrl.u32 %v11037_v48, 16  ;;  %v11052_v11 = vld [vmem:[#allocation2 + $0xd8] sm:$0xf]  ;;  %v15010_v62 = vshll.u32 %v11037_v48, 16  ;;  %v1297_v31 = vrot.slane %v1296_v47, 4  ;;  %v1301_v20 = vor.u32 %v1300_v34, %v11031_v16 }
 0x156   : > { %v11054_v55 = vld [vmem:[#allocation2 + $0xd8] sm:$0xf]  ;;  %v11060_v26 = vsel %vm3596_vm0, %v3575_v33, %v10936_v54  ;;  %v2289_v46 = vrot.slane %v2287_v35, 7  ;;  %v2296_v22 = vshrl.u32 %v11052_v11, 16  ;;  %v2299_v3 = vshll.u32 %v11052_v11, 16  ;;  %3403 = vrot.lane.b32.xlu0 %v8352_v39, %s9422_s13  ;;  %v11073_v13 = vpop.permute.xlu1 %2853 }
 0x157   : > { %v8337_v59 = vcombine.low %v11033_v2, %v11052_v11  ;;  %v2561_v41 = vrot.slane %v2287_v35, 4  ;;  %v2562_v53 = vrot.slane %v2290_v44, 5  ;;  %v15012_v32 = vshrl.u32 %v11054_v55, 16 }
 0x158   : > { %v15016_v34 = vshll.u32 %v11054_v55, 16  ;;  %v2292_v37 = vor.u32 %v2290_v44, %v2289_v46  ;;  %v2294_v25 = vrot.slane %v2289_v46, 4  ;;  %v2298_v54 = vrot.slane %v2296_v22, 7 }
 0x159   : > { %v2565_v33 = vrot.slane %v2299_v3, 5  ;;  %v2563_v47 = vor.u32 %v2562_v53, %v2561_v41  ;;  %v2567_v27 = vrot.slane %v2296_v22, 4  ;;  %v1308_v45 = vrot.slane %v15011_v38, 4  ;;  %v11083_v22 = vpop.permute.xlu0 %3123 }
 0x15a   : > { %v1309_v28 = vrot.slane %v15010_v62, 5  ;;  %v2293_v35 = vsel %vm9764_vm10, %v10977_v57, %v2292_v37  ;;  %v2301_v39 = vor.u32 %v2299_v3, %v2298_v54  ;;  %2783 = vrot.lane.b32.xlu0 %v8242_v30, %s15137_s26  ;;  %v1314_v44 = vrot.slane %v15012_v32, 4  ;;  %v1386_v57 = vld [vmem:[#allocation2 + $0xd0] sm:$0x8]  ;;  %v11092_v32 = vld [vmem:[#allocation2 + $0xd4] sm:$0xf] }
 0x15b   : > { %v2564_v41 = vrot.slane %v2563_v47, 4  ;;  %v2568_v53 = vor.u32 %v2567_v27, %v2565_v33  ;;  %v1299_v62 = vsel %vm9663_vm7, %v1297_v31, %v11031_v16  ;;  %v1302_v38 = vrot.slane %v1301_v20, 4 }
 0x15c   : > { %v2302_v30 = vsel %vm9764_vm10, %v2294_v25, %v2301_v39  ;;  %v1306_v3 = vrot.slane %v1304_v1, 5  ;;  %v1310_v37 = vor.u32 %v1309_v28, %v1308_v45  ;;  %v1312_v54 = vrot.slane %v15016_v34, 5  ;;  %v11098_v25 = vld [vmem:[#allocation2 + $0xd8] sm:$0xf]  ;;  %v458_v45 = vld [vmem:[%s9530_s23 + $0xd0] sm:$0xff] }
 0x15d   : > { %v8321_v47 = vcombine.low %v2293_v35, %v2302_v30  ;;  %v2566_v27 = vsel %vm9663_vm7, %v2564_v41, %v2565_v33  ;;  %v2569_v24 = vrot.slane %v2568_v53, 4  ;;  %v1320_v16 = vrot.slane %v1318_v0, 5  ;;  %v459_v39 = vld [vmem:[%s9530_s23 + $0xd8] sm:$0xff]  ;;  %v1389_v41 = vld [vmem:[#allocation2 + $0xe0] sm:$0x8] }
 0x15e   : > { %v1307_v31 = vsel %vm9663_vm7, %v1302_v38, %v1306_v3  ;;  %v1311_v20 = vrot.slane %v1310_v37, 4  ;;  %v1315_v46 = vor.u32 %v1314_v44, %v1312_v54  ;;  %v1663_v28 = vshrl.u32 %v1386_v57, 16  ;;  %v11108_v38 = vpop.permute.xlu1 %2933  ;;  %v11112_v3 = vpop.permute.xlu0 %3203  ;;  %v2403_v34 = vld [vmem:[#allocation2 + $0xec] sm:$0x1] }
 0x15f   : > { %3213 = vrot.lane.b32.xlu1 %v8321_v47, %s15146_s10  ;;  %v2574_v1 = vsel %vm9663_vm7, %v2569_v24, %v11006_v58  ;;  %v8258_v35 = vcombine.low %v1299_v62, %v1307_v31  ;;  %v1668_v33 = vshrl.u32 %v11092_v32, 16  ;;  %v1671_v0 = vshll.u32 %v11092_v32, 16 }
 0x160   : > { %v8353_v44 = vcombine.low %v2566_v27, %v2574_v1  ;;  %v1313_v53 = vsel %vm9663_vm7, %v1311_v20, %v1312_v54  ;;  %v1316_v57 = vrot.slane %v1315_v46, 4  ;;  %v8194_v30 = vrot.slane %v1663_v28, 11 }
 0x161   : > { %2863 = vrot.lane.b32.xlu0 %v8258_v35, %s15014_s19  ;;  %v1670_v24 = vrot.slane %v1668_v33, 7  ;;  %v1677_v58 = vshrl.u32 %v11098_v25, 16  ;;  %v1680_v62 = vshll.u32 %v11098_v25, 16  ;;  %v497_v37 = vmul.f32 %v10844_v5, %v458_v45 }
 0x162   : > { %v1321_v47 = vsel %vm9663_vm7, %v1316_v57, %v1320_v16  ;;  %v498_v27 = vmul.f32 %v10844_v5, %v459_v39  ;;  %v1685_v31 = vshrl.u32 %v1389_v41, 16  ;;  %v3639_v46 = vsel %vm3629_vm3, %v11043_v23, %v10879_v60  ;;  %v1762_v39 = vld [vmem:[#allocation2 + $0xdc] sm:$0x1]  ;;  %v1763_v41 = vld [vmem:[#allocation2 + $0xec] sm:$0x1] }
 0x163   : > { %3325 = vrot.lane.b32.xlu1 %v8337_v59, %s9418_s21  ;;  %v11128_v54 = vcombine.low %v1313_v53, %v1321_v47  ;;  %v1673_v20 = vor.u32 %v1671_v0, %v1670_v24  ;;  %v1675_v28 = vrot.slane %v1670_v24, 4  ;;  %v1679_v45 = vrot.slane %v1677_v58, 7  ;;  %v722_v53 = vld [vmem:[#allocation2 + $0x60] sm:$0x8]  ;;  %v725_v47 = vld [vmem:[#allocation2 + $0x70] sm:$0x8] }
 0x164   : > { %v536_v1 = vadd.f32 %v10688_v49, %v497_v37  ;;  %v537_v16 = vadd.f32 %v10688_v49, %v498_v27  ;;  %v11132_v35 = vrot.slane %v1685_v31, 11  ;;  %v3641_v60 = vsel %vm3629_vm3, %v11060_v26, %v10964_v10  ;;  %v11143_v49 = vpop.permute.xlu1 %3045 }
 0x165   : > { %v1674_v23 = vsel %vm9764_vm10, %v8194_v30, %v1673_v20  ;;  %v1682_v2 = vor.u32 %v1680_v62, %v1679_v45  ;;  %v8290_v11 = vcombine.low %v11092_v32, %v11098_v25  ;;  %v3672_v59 = vsel %vm3662_vm4, %v3639_v46, %v10911_v43  ;;  %v11148_v30 = vpop.permute.xlu0 %3315 }
 0x166   : > { %v8721_v57 = vpack.c.bf16 %v536_v1, %v536_v1  ;;  %v8722_v24 = vpack.c.bf16 %v537_v16, %v537_v16  ;;  %v3674_v10 = vsel %vm3662_vm4, %v3641_v60, %v10995_v4  ;;  %v1934_v26 = vrot.slane %v1668_v33, 4  ;;  %9067 = vmatprep.mubr.msk.bf16.mxu0 %vm3717_vm5, %v3672_v59  ;;  %v2027_v60 = vld [vmem:[#allocation2 + $0xe0] sm:$0x8] }
 0x167   : > { %3405 = vrot.lane.b32.xlu1 %v8353_v44, %s9422_s13  ;;  %v1683_v43 = vsel %vm9764_vm10, %v1675_v28, %v1682_v2  ;;  %v1935_v32 = vrot.slane %v1671_v0, 5  ;;  %v1938_v25 = vrot.slane %v1680_v62, 5  ;;  %v1940_v37 = vrot.slane %v1677_v58, 4  ;;  %9068 = vmatmul.mubr.msk.bf16.gmra.mrb[8].mxu0 %vm3717_vm5, %v3674_v10 }
 0x168   : > { %v8274_v27 = vcombine.low %v1674_v23, %v1683_v43  ;;  %698 = vst.msk [vmem:[#allocation2 + $0xe4] sm:$0xf] %vm671_vm6, %v8721_v57  ;;  %699 = vst.msk [vmem:[#allocation2 + $0xe8] sm:$0xf] %vm671_vm6, %v8722_v24  ;;  %v1944_v4 = vshll.u32 %v1762_v39, 16  ;;  %v1958_v33 = vshll.u32 %v1763_v41, 16  ;;  %v15149_v23 = vcombine.low %v11037_v48, %v11054_v55  ;;  %v11169_v57 = vpop.permute.xlu1 %3125 }
 0x169   : > { %v888_v31 = vshrl.u32 %v722_v53, 16  ;;  %v1936_v46 = vor.u32 %v1935_v32, %v1934_v26  ;;  %v1941_v20 = vor.u32 %v1940_v37, %v1938_v25  ;;  %v15147_v44 = vshrl.u32 %v10216_v17, 16 }
 0x16a   : > { %v15148_v0 = vshrl.u32 %v10225_v52, 16  ;;  %2943 = vrot.lane.b32.xlu0 %v8274_v27, %s9419_s22  ;;  %v1946_v58 = vrot.slane %v1944_v4, 5  ;;  %v11161_v28 = vrot.slane %v1958_v33, 5  ;;  %v910_v16 = vshrl.u32 %v725_v47, 16  ;;  %v460_v27 = vld [vmem:[%s9530_s23 + $0xe0] sm:$0xff]  ;;  %v461_v4 = vld [vmem:[%s9530_s23 + $0xe8] sm:$0xff]  ;;  %v11179_v33 = vpop.permute.xlu0 %3395 }
 0x16b   : > { %v895_v45 = vrot.slane %v15147_v44, 7  ;;  %v8172_v1 = vrot.slane %v888_v31, 11  ;;  %2785 = vrot.lane.b32.xlu1 %v15149_v23, %s15137_s26  ;;  %v1937_v2 = vrot.slane %v1936_v46, 4  ;;  %v1942_v59 = vrot.slane %v1941_v20, 4 }
 0x16c   : > { %v904_v62 = vrot.slane %v15148_v0, 7  ;;  %v15150_v39 = vshll.u32 %v10216_v17, 16  ;;  %v15151_v24 = vshll.u32 %v10225_v52, 16  ;;  %v8173_v26 = vrot.slane %v910_v16, 11 }
 0x16d   : > { %v900_v53 = vrot.slane %v895_v45, 4  ;;  %v15152_v43 = vshrl.u32 %v10230_v61, 16  ;;  %v15153_v37 = vshrl.u32 %v10235_v9, 16  ;;  %v1939_v17 = vsel %vm9663_vm7, %v1937_v2, %v1938_v25 }
 0x16e   : > { %v898_v41 = vor.u32 %v15150_v39, %v895_v45  ;;  %v907_v10 = vor.u32 %v15151_v24, %v904_v62  ;;  %v1947_v31 = vsel %vm9663_vm7, %v1942_v59, %v1946_v58  ;;  %v2304_v46 = vshrl.u32 %v2027_v60, 16  ;;  %3055 = vrot.lane.b32.xlu0 %v8290_v11, %s15124_s20  ;;  %v11214_v24 = vpop.permute.xlu1 %3205 }
 0x16f   : > { %v917_v32 = vrot.slane %v15152_v43, 7  ;;  %v926_v47 = vrot.slane %v15153_v37, 7  ;;  %v8306_v20 = vcombine.low %v1939_v17, %v1947_v31  ;;  %v15154_v45 = vshll.u32 %v10230_v61, 16  ;;  %2865 = vrot.lane.b32.xlu1 %v11128_v54, %s15014_s19  ;;  %v11194_v25 = vld [vmem:[#allocation2 + $0xe4] sm:$0xf]  ;;  %s15156_s19 = smov 6  }
 0x170   : > { %v899_v52 = vsel %vm9764_vm10, %v8172_v1, %v898_v41  ;;  %v908_v44 = vsel %vm9764_vm10, %v900_v53, %v907_v10  ;;  %v11196_v58 = vld [vmem:[#allocation2 + $0xe8] sm:$0xf]  ;;  %v15155_v1 = vshll.u32 %v10235_v9, 16  ;;  %v499_v11 = vmul.f32 %v10844_v5, %v460_v27  ;;  %v11219_v27 = vpop.permute.xlu0 %2775 }
 0x171   : > { %v920_v0 = vor.u32 %v15154_v45, %v917_v32  ;;  %v922_v62 = vrot.slane %v917_v32, 4  ;;  %v8220_v16 = vcombine.low %v899_v52, %v908_v44  ;;  %v500_v23 = vmul.f32 %v10844_v5, %v461_v4  ;;  %v11221_v31 = vld [vmem:[#allocation2 + $0xe8] sm:$0xf] }
 0x172   : > { %v929_v60 = vor.u32 %v15155_v1, %v926_v47  ;;  %v1690_v2 = vshrl.u32 %v11194_v25, 16  ;;  %v1693_v61 = vshll.u32 %v11194_v25, 16  ;;  %v1699_v59 = vshrl.u32 %v11196_v58, 16  ;;  %3135 = vrot.lane.b32.xlu0 %v8306_v20, %s9421_s12  ;;  %v11217_v47 = vld [vmem:[#allocation2 + $0xe4] sm:$0xf] }
 0x173   : > { %v1702_v54 = vshll.u32 %v11196_v58, 16  ;;  %v8291_v39 = vcombine.low %v11194_v25, %v11196_v58  ;;  %v3436_v41 = vsel %vm3415_vm11, %v8220_v16, %v10940_v12  ;;  %v921_v9 = vsel %vm9764_vm10, %v8173_v26, %v920_v0 }
 0x174   : > { %v930_v53 = vsel %vm9764_vm10, %v922_v62, %v929_v60  ;;  %v1692_v10 = vrot.slane %v1690_v2, 7  ;;  %v1701_v43 = vrot.slane %v1699_v59, 7  ;;  %v1948_v32 = vrot.slane %v1690_v2, 4 }
 0x175   : > { %v1949_v37 = vrot.slane %v1693_v61, 5  ;;  %v1952_v4 = vrot.slane %v1702_v54, 5  ;;  %v1954_v12 = vrot.slane %v1699_v59, 4  ;;  %v8221_v17 = vcombine.low %v921_v9, %v930_v53  ;;  %v2030_v59 = vld [vmem:[#allocation2 + $0xf0] sm:$0x8] }
 0x176   : > { %v8210_v26 = vrot.slane %v2304_v46, 11  ;;  %v1695_v52 = vor.u32 %v1693_v61, %v1692_v10  ;;  %v1697_v44 = vrot.slane %v1692_v10, 4  ;;  %v1704_v45 = vor.u32 %v1702_v54, %v1701_v43  ;;  %v11234_v10 = vpop.permute.xlu1 %3317 }
 0x177   : > { %v1950_v0 = vor.u32 %v1949_v37, %v1948_v32  ;;  %v1955_v62 = vor.u32 %v1954_v12, %v1952_v4  ;;  %v3439_v20 = vsel %vm3415_vm11, %v8221_v17, %v11045_v51  ;;  %v2309_v16 = vshrl.u32 %v11217_v47, 16  ;;  %v11245_v17 = vpop.permute.xlu0 %2855 }
 0x178   : > { %v2312_v1 = vshll.u32 %v11217_v47, 16  ;;  %v1696_v60 = vsel %vm9764_vm10, %v11132_v35, %v1695_v52  ;;  %v1705_v2 = vsel %vm9764_vm10, %v1697_v44, %v1704_v45  ;;  %v2318_v61 = vshrl.u32 %v11221_v31, 16  ;;  %v11241_v35 = vld [vmem:[%s14951_s2] ss:$0 sm:$0xff] }
 0x179   : > { %v1951_v46 = vrot.slane %v1950_v0, 4  ;;  %v8275_v54 = vcombine.low %v1696_v60, %v1705_v2  ;;  %v1956_v9 = vrot.slane %v1955_v62, 4  ;;  %v2311_v53 = vrot.slane %v2309_v16, 7 }
 0x17a   : > { %v2321_v51 = vshll.u32 %v11221_v31, 16  ;;  %v2320_v32 = vrot.slane %v2318_v61, 7  ;;  %v538_v37 = vadd.f32 %v11241_v35, %v499_v11  ;;  %v539_v12 = vadd.f32 %v11241_v35, %v500_v23 }
 0x17b   : > { %v1953_v43 = vsel %vm9663_vm7, %v1951_v46, %v1952_v4  ;;  %2945 = vrot.lane.b32.xlu1 %v8275_v54, %s9419_s22  ;;  %v1961_v52 = vsel %vm9663_vm7, %v1956_v9, %v11161_v28  ;;  %v2314_v44 = vor.u32 %v2312_v1, %v2311_v53  ;;  %v2316_v4 = vrot.slane %v2311_v53, 4  ;;  %v2404_v28 = vld [vmem:[#allocation2 + $0xfc] sm:$0x1] }
 0x17c   : > { %v2326_v45 = vshrl.u32 %v2030_v59, 16  ;;  %v8307_v0 = vcombine.low %v1953_v43, %v1961_v52  ;;  %v2323_v62 = vor.u32 %v2321_v51, %v2320_v32  ;;  %v8723_v60 = vpack.c.bf16 %v538_v37, %v538_v37  ;;  %v11275_v32 = vld [vmem:[#allocation2 + $0xe8] sm:$0xf]  ;;  %v462_v52 = vld [vmem:[%s9530_s23 + $0xf0] sm:$0xff] }
 0x17d   : > { %v8724_v2 = vpack.c.bf16 %v539_v12, %v539_v12  ;;  %v2315_v11 = vsel %vm9764_vm10, %v8210_v26, %v2314_v44  ;;  %v3478_v23 = vsel %vm3464_vm12, %v3436_v41, %v10968_v40  ;;  %v3480_v54 = vsel %vm3464_vm12, %v3439_v20, %v11073_v13  ;;  %v11269_v41 = vld [vmem:[#allocation2 + $0xe4] sm:$0xf]  ;;  %v11281_v12 = vpop.permute.xlu0 %2935 }
 0x17e   : > { %v11253_v46 = vrot.slane %v2326_v45, 11  ;;  %v2324_v59 = vsel %vm9764_vm10, %v2316_v4, %v2323_v62  ;;  %700 = vst.msk [vmem:[#allocation2 + $0xf4] sm:$0xf] %vm671_vm6, %v8723_v60  ;;  %v8338_v26 = vcombine.low %v11217_v47, %v11221_v31  ;;  %v3511_v9 = vsel %vm3497_vm13, %v3478_v23, %v11003_v18  ;;  %v11277_v47 = vpop.permute.xlu1 %3397 }
 0x17f   : > { %701 = vst.msk [vmem:[#allocation2 + $0xf8] sm:$0xf] %vm671_vm6, %v8724_v2  ;;  %v3513_v40 = vsel %vm3497_vm13, %v3480_v54, %v11108_v38  ;;  %3057 = vrot.lane.b32.xlu1 %v8291_v39, %s15124_s20  ;;  %v8322_v13 = vcombine.low %v2315_v11, %v2324_v59  ;;  %v2575_v20 = vrot.slane %v2309_v16, 4  ;;  %v2576_v53 = vrot.slane %v2312_v1, 5 }
 0x180   : > { %v2579_v43 = vrot.slane %v2321_v51, 5  ;;  %v2581_v18 = vrot.slane %v2318_v61, 4  ;;  %v2585_v31 = vshll.u32 %v2403_v34, 16  ;;  %v2599_v37 = vshll.u32 %v2404_v28, 16 }
 0x181   : > { %v3544_v38 = vsel %vm3530_vm14, %v3511_v9, %v11050_v29  ;;  %3215 = vrot.lane.b32.xlu0 %v8322_v13, %s15146_s10  ;;  %v2577_v25 = vor.u32 %v2576_v53, %v2575_v20  ;;  %v3546_v58 = vsel %vm3530_vm14, %v3513_v40, %v11143_v49  ;;  %v15018_v39 = vshrl.u32 %v11269_v41, 16 }
 0x182   : > { %v15017_v16 = vshll.u32 %v11269_v41, 16  ;;  %v2582_v1 = vor.u32 %v2581_v18, %v2579_v43  ;;  %v2587_v51 = vrot.slane %v2585_v31, 5  ;;  %v11288_v61 = vrot.slane %v2599_v37, 5  ;;  %v11324_v59 = vpop.permute.xlu1 %2777 }
 0x183   : > { %v15024_v34 = vshrl.u32 %v11275_v32, 16  ;;  %3137 = vrot.lane.b32.xlu1 %v8307_v0, %s9421_s12  ;;  %v2578_v29 = vrot.slane %v2577_v25, 4  ;;  %v8244_v44 = vcombine.low %v11269_v41, %v11275_v32  ;;  %v3577_v49 = vsel %vm3563_vm15, %v3544_v38, %v11083_v22 }
 0x184   : > { %v3579_v4 = vsel %vm3563_vm15, %v3546_v58, %v11169_v57  ;;  %v2583_v45 = vrot.slane %v2582_v1, 4  ;;  %v15022_v62 = vshll.u32 %v11275_v32, 16  ;;  %v1322_v60 = vrot.slane %v15018_v39, 4 }
 0x185   : > { %v1323_v2 = vrot.slane %v15017_v16, 5  ;;  %v11304_v0 = vld [vmem:[#allocation2 + $0xf4] sm:$0xf]  ;;  %3327 = vrot.lane.b32.xlu0 %v8338_v26, %s9418_s21  ;;  %v2580_v22 = vsel %vm9663_vm7, %v2578_v29, %v2579_v43  ;;  %v11315_v57 = vsel %vm3596_vm0, %v3577_v49, %v11112_v3  ;;  %v11319_v54 = vsel %vm3596_vm0, %v3579_v4, %v11214_v24  ;;  %v11332_v3 = vpop.permute.xlu0 %3047  ;;  %v1121_v29 = vld [vmem:[#allocation2 + $0xec] sm:$0x1] }
 0x186   : > { %v11306_v11 = vld [vmem:[#allocation2 + $0xf8] sm:$0xf]  ;;  %v11311_v23 = vld [vmem:[#allocation2 + $0xf4] sm:$0xf]  ;;  %v11322_v28 = vmul.f32 %v10844_v5, %v462_v52  ;;  %v2331_v26 = vshrl.u32 %v11304_v0, 16  ;;  %v2334_v9 = vshll.u32 %v11304_v0, 16  ;;  %v2588_v5 = vsel %vm9663_vm7, %v2583_v45, %v2587_v51 }
 0x187   : > { %v2340_v40 = vshrl.u32 %v11306_v11, 16  ;;  %v2343_v13 = vshll.u32 %v11306_v11, 16  ;;  %v11330_v20 = vld [vmem:[#allocation2 + $0xf8] sm:$0xf]  ;;  %v8339_v24 = vcombine.low %v11304_v0, %v11306_v11  ;;  %v15023_v53 = vshrl.u32 %v11311_v23, 16 }
 0x188   : > { %v15020_v43 = vshll.u32 %v11311_v23, 16  ;;  %v2333_v18 = vrot.slane %v2331_v26, 7  ;;  %v8354_v37 = vcombine.low %v2580_v22, %v2588_v5  ;;  %v2589_v38 = vrot.slane %v2331_v26, 4  ;;  %v11346_v26 = vpop.permute.xlu1 %2857 }
 0x189   : > { %v2342_v31 = vrot.slane %v2340_v40, 7  ;;  %v2590_v25 = vrot.slane %v2334_v9, 5  ;;  %v2593_v58 = vrot.slane %v2343_v13, 5  ;;  %v2595_v1 = vrot.slane %v2340_v40, 4 }
 0x18a   : > { %v15021_v52 = vshrl.u32 %v11330_v20, 16  ;;  %v2336_v49 = vor.u32 %v2334_v9, %v2333_v18  ;;  %v2338_v4 = vrot.slane %v2333_v18, 4  ;;  %3407 = vrot.lane.b32.xlu0 %v8354_v37, %s9422_s13  ;;  %v8245_v51 = vcombine.low %v11311_v23, %v11330_v20  ;;  %v1122_v18 = vld [vmem:[#allocation2 + $0xfc] sm:$0x1] }
 0x18b   : > { %v2345_v0 = vor.u32 %v2343_v13, %v2342_v31  ;;  %v2591_v45 = vor.u32 %v2590_v25, %v2589_v38  ;;  %v2596_v11 = vor.u32 %v2595_v1, %v2593_v58  ;;  %v1324_v16 = vor.u32 %v1323_v2, %v1322_v60  ;;  %v11355_v31 = vpop.permute.xlu0 %3127  ;;  %v1392_v25 = vld [vmem:[#allocation2 + $0xf0] sm:$0x8] }
 0x18c   : > { %v1326_v22 = vrot.slane %v15022_v62, 5  ;;  %v2337_v40 = vsel %vm9764_vm10, %v11253_v46, %v2336_v49  ;;  %v1328_v13 = vrot.slane %v15024_v34, 4  ;;  %v1332_v5 = vshll.u32 %v1121_v29, 16 }
 0x18d   : > { %v2346_v9 = vsel %vm9764_vm10, %v2338_v4, %v2345_v0  ;;  %v2592_v2 = vrot.slane %v2591_v45, 4  ;;  %v2597_v37 = vrot.slane %v2596_v11, 4  ;;  %v1325_v38 = vrot.slane %v1324_v16, 4  ;;  %v11361_v4 = vld [vmem:[#allocation2 + $0xf4] sm:$0xf] }
 0x18e   : > { %v8323_v60 = vcombine.low %v2337_v40, %v2346_v9  ;;  %2787 = vrot.lane.b32.xlu0 %v8244_v44, %s15137_s26  ;;  %v1329_v1 = vor.u32 %v1328_v13, %v1326_v22  ;;  %v1334_v39 = vrot.slane %v1332_v5, 5  ;;  %v15019_v46 = vshll.u32 %v11330_v20, 16  ;;  %v11373_v45 = vld [vmem:[#allocation2 + $0xf8] sm:$0xf] }
 0x18f   : > { %v1336_v49 = vrot.slane %v15023_v53, 4  ;;  %v2594_v29 = vsel %vm9663_vm7, %v2592_v2, %v2593_v58  ;;  %v2602_v16 = vsel %vm9663_vm7, %v2597_v37, %v11288_v61  ;;  %v1327_v44 = vsel %vm9663_vm7, %v1325_v38, %v1326_v22  ;;  %v11380_v22 = vpop.permute.xlu1 %2937 }
 0x190   : > { %3217 = vrot.lane.b32.xlu1 %v8323_v60, %s15146_s10  ;;  %v1337_v0 = vrot.slane %v15020_v43, 5  ;;  %v8355_v11 = vcombine.low %v2594_v29, %v2602_v16  ;;  %v1330_v40 = vrot.slane %v1329_v1, 4  ;;  %v1340_v9 = vrot.slane %v15019_v46, 5  ;;  %v463_v29 = vld [vmem:[%s9530_s23 + $0xf8] sm:$0xff]  ;;  %v1395_v16 = vld [vmem:[#allocation2 + $0x100] sm:$0x8]  ;;  %v11387_v46 = vpop.permute.xlu0 %3207 }
 0x191   : > { %v1342_v58 = vrot.slane %v15021_v52, 4  ;;  %v1346_v5 = vshll.u32 %v1122_v18, 16  ;;  %v1707_v61 = vshrl.u32 %v1392_v25, 16  ;;  %v1712_v60 = vshrl.u32 %v11361_v4, 16 }
 0x192   : > { %v1338_v13 = vor.u32 %v1337_v0, %v1336_v49  ;;  %v1335_v2 = vsel %vm9663_vm7, %v1330_v40, %v1334_v39  ;;  %v1715_v38 = vshll.u32 %v11361_v4, 16  ;;  %v1721_v1 = vshrl.u32 %v11373_v45, 16 }
 0x193   : > { %v1343_v37 = vor.u32 %v1342_v58, %v1340_v9  ;;  %v8260_v18 = vcombine.low %v1327_v44, %v1335_v2  ;;  %v1348_v49 = vrot.slane %v1346_v5, 5  ;;  %v8196_v0 = vrot.slane %v1707_v61, 11  ;;  %v9307_v58 = vld [vmem:[%s14950_s1] ss:$0 sm:$0xff]  ;;  %v11405_v34 = vpop.permute.xlu1 %3049 }
 0x194   : > { %3329 = vrot.lane.b32.xlu1 %v8339_v24, %s9418_s21  ;;  %v1339_v25 = vrot.slane %v1338_v13, 4  ;;  %v1714_v52 = vrot.slane %v1712_v60, 7  ;;  %v1723_v62 = vrot.slane %v1721_v1, 7  ;;  %v1724_v39 = vshll.u32 %v11373_v45, 16 }
 0x195   : > { %v1344_v43 = vrot.slane %v1343_v37, 4  ;;  %2867 = vrot.lane.b32.xlu0 %v8260_v18, %s15156_s19  ;;  %v502_v53 = vmul.f32 %v9307_v58, %v463_v29  ;;  %v540_v24 = vadd.f32 %v11241_v35, %v11322_v28  ;;  %v1729_v44 = vshrl.u32 %v1395_v16, 16 }
 0x196   : > { %v1341_v40 = vsel %vm9663_vm7, %v1339_v25, %v1340_v9  ;;  %v1717_v5 = vor.u32 %v1715_v38, %v1714_v52  ;;  %v1719_v61 = vrot.slane %v1714_v52, 4  ;;  %v1726_v2 = vor.u32 %v1724_v39, %v1723_v62  ;;  %v728_v52 = vld [vmem:[#allocation2 + $0x80] sm:$0x8] }
 0x197   : > { %v1349_v13 = vsel %vm9663_vm7, %v1344_v43, %v1348_v49  ;;  %v541_v9 = vadd.f32 %v11241_v35, %v502_v53  ;;  %v8725_v18 = vpack.c.bf16 %v540_v24, %v540_v24  ;;  %v11403_v25 = vrot.slane %v1729_v44, 11  ;;  %v1764_v35 = vld [vmem:[#allocation2 + $0xfc] sm:$0x1]  ;;  %v1765_v53 = vld [vmem:[#allocation2 + $0x10c] sm:$0x1] }
 0x198   : > { %3409 = vrot.lane.b32.xlu1 %v8355_v11, %s9422_s13  ;;  %v8261_v37 = vcombine.low %v1341_v40, %v1349_v13  ;;  %v1718_v28 = vsel %vm9764_vm10, %v8196_v0, %v1717_v5  ;;  %v1727_v29 = vsel %vm9764_vm10, %v1719_v61, %v1726_v2  ;;  %v3643_v62 = vsel %vm3629_vm3, %v11315_v57, %v11148_v30  ;;  %v11417_v11 = vpop.permute.xlu0 %3319  ;;  %v731_v30 = vld [vmem:[#allocation2 + $0x90] sm:$0x8] }
 0x199   : > { %v3645_v43 = vsel %vm3629_vm3, %v11319_v54, %v11234_v10  ;;  %v8276_v16 = vcombine.low %v1718_v28, %v1727_v29  ;;  %v8726_v49 = vpack.c.bf16 %v541_v9, %v541_v9  ;;  %702 = vst.msk [vmem:[#allocation2 + $0x104] sm:$0xf] %vm671_vm6, %v8725_v18  ;;  %v8292_v0 = vcombine.low %v11361_v4, %v11373_v45  ;;  %v2033_v9 = vld [vmem:[#allocation2 + $0x100] sm:$0x8] }
 0x19a   : > { %v3676_v40 = vsel %vm3662_vm4, %v3643_v62, %v11179_v33  ;;  %v3678_v57 = vsel %vm3662_vm4, %v3645_v43, %v11277_v47  ;;  %v1962_v10 = vrot.slane %v1712_v60, 4  ;;  %v1963_v54 = vrot.slane %v1715_v38, 5 }
 0x19b   : > { %v1966_v58 = vrot.slane %v1724_v39, 5  ;;  %9071 = vmatprep.mubr.msk.bf16.mxu0 %vm3717_vm5, %v3676_v40  ;;  %2947 = vrot.lane.b32.xlu0 %v8276_v16, %s9419_s22  ;;  %703 = vst.msk [vmem:[#allocation2 + $0x108] sm:$0xf] %vm671_vm6, %v8726_v49  ;;  %v1968_v4 = vrot.slane %v1721_v1, 4  ;;  %v1972_v33 = vshll.u32 %v1764_v35, 16  ;;  %v1986_v45 = vshll.u32 %v1765_v53, 16  ;;  %v11440_v1 = vpop.permute.xlu1 %3129 }
 0x19c   : > { %2789 = vrot.lane.b32.xlu1 %v8245_v51, %s15137_s26  ;;  %v932_v24 = vshrl.u32 %v728_v52, 16  ;;  %v1964_v44 = vor.u32 %v1963_v54, %v1962_v10  ;;  %9072 = vmatmul.mubr.msk.bf16.gmra.mrb[12].mxu0 %vm3717_vm5, %v3678_v57  ;;  %v15157_v47 = vshrl.u32 %v10456_v56, 16  ;;  %v15158_v38 = vshrl.u32 %v10458_v21, 16  ;;  %v11446_v53 = vpop.permute.xlu0 %3399  ;;  %s7995_s26 = scalar_lea.sflag [#allocation4], %s9522_s17 }
 0x19d   : > { %v954_v13 = vshrl.u32 %v731_v30, 16  ;;  %v1969_v5 = vor.u32 %v1968_v4, %v1966_v58  ;;  %v1974_v51 = vrot.slane %v1972_v33, 5  ;;  %v11438_v61 = vrot.slane %v1986_v45, 5 }
 0x19e   : > { %v939_v60 = vrot.slane %v15157_v47, 7  ;;  %v948_v39 = vrot.slane %v15158_v38, 7  ;;  %v8174_v2 = vrot.slane %v932_v24, 11  ;;  %v1965_v18 = vrot.slane %v1964_v44, 4 }
 0x19f   : > { %v15159_v28 = vshll.u32 %v10456_v56, 16  ;;  %v15160_v43 = vshll.u32 %v10458_v21, 16  ;;  %3059 = vrot.lane.b32.xlu0 %v8292_v0, %s15124_s20  ;;  %v1970_v52 = vrot.slane %v1969_v5, 4  ;;  %v8175_v16 = vrot.slane %v954_v13, 11 }
 0x1a0   : > { %v944_v62 = vrot.slane %v939_v60, 4  ;;  %2869 = vrot.lane.b32.xlu1 %v8261_v37, %s15156_s19  ;;  %v15161_v49 = vshrl.u32 %v10464_v50, 16  ;;  %v15162_v30 = vshrl.u32 %v10470_v14, 16  ;;  %v11454_v56 = vld [vmem:[#allocation2 + $0x104] sm:$0xf]  ;;  %v1967_v21 = vsel %vm9663_vm7, %v1965_v18, %v1966_v58  ;;  %s9425_s19 = smov [#allocation3]  }
 0x1a1   : > { %v942_v29 = vor.u32 %v15159_v28, %v939_v60  ;;  %v951_v35 = vor.u32 %v15160_v43, %v948_v39  ;;  %v2348_v0 = vshrl.u32 %v2033_v9, 16  ;;  %v1734_v54 = vshrl.u32 %v11454_v56, 16  ;;  %s9322_s23 = sshll.u32 %s9425_s19, 4  ;;  %s9323_s23 = int_to_ptr.vmem [resolvable:$false] %s9322_s23 }
 0x1a2   : > { %v961_v40 = vrot.slane %v15161_v49, 7  ;;  %v970_v57 = vrot.slane %v15162_v30, 7  ;;  %v1737_v4 = vshll.u32 %v11454_v56, 16  ;;  %v1975_v33 = vsel %vm9663_vm7, %v1970_v52, %v1974_v51  ;;  %v11466_v24 = vld [vmem:[#allocation2 + $0x108] sm:$0xf]  ;;  %v11476_v51 = vpop.permute.xlu1 %3209 }
 0x1a3   : > { %v943_v10 = vsel %vm9764_vm10, %v8174_v2, %v942_v29  ;;  %v952_v37 = vsel %vm9764_vm10, %v944_v62, %v951_v35  ;;  %v8308_v44 = vcombine.low %v1967_v21, %v1975_v33  ;;  %v15163_v58 = vshll.u32 %v10464_v50, 16  ;;  %v11483_v29 = vld [vmem:[#allocation2 + $0x104] sm:$0xf]  ;;  %v11485_v62 = vpop.permute.xlu0 %2779 }
 0x1a4   : > { %v8222_v45 = vcombine.low %v943_v10, %v952_v37  ;;  %v966_v60 = vrot.slane %v961_v40, 4  ;;  %v15164_v38 = vshll.u32 %v10470_v14, 16  ;;  %v1736_v13 = vrot.slane %v1734_v54, 7 }
 0x1a5   : > { %v964_v47 = vor.u32 %v15163_v58, %v961_v40  ;;  %v1743_v5 = vshrl.u32 %v11466_v24, 16  ;;  %v1746_v2 = vshll.u32 %v11466_v24, 16  ;;  %v8293_v9 = vcombine.low %v11454_v56, %v11466_v24  ;;  %3139 = vrot.lane.b32.xlu0 %v8308_v44, %s9421_s12  ;;  %v11487_v40 = vld [vmem:[#allocation2 + $0x108] sm:$0xf]  ;;  %v2036_v44 = vld [vmem:[#allocation2 + $0x110] sm:$0x8] }
 0x1a6   : > { %v973_v39 = vor.u32 %v15164_v38, %v970_v57  ;;  %v1976_v18 = vrot.slane %v1734_v54, 4  ;;  %v1977_v28 = vrot.slane %v1737_v4, 5  ;;  %v3442_v50 = vsel %vm3415_vm11, %v8222_v45, %v11219_v27  ;;  %v11495_v54 = vld [vmem:[#allocation2 + $0x114] sm:$0xf]  ;;  %v11506_v38 = vpop.permute.xlu1 %3321 }
 0x1a7   : > { %v965_v14 = vsel %vm9764_vm10, %v8175_v16, %v964_v47  ;;  %v1739_v43 = vor.u32 %v1737_v4, %v1736_v13  ;;  %v1741_v35 = vrot.slane %v1736_v13, 4  ;;  %v1745_v52 = vrot.slane %v1743_v5, 7 }
 0x1a8   : > { %v1980_v49 = vrot.slane %v1746_v2, 5  ;;  %v1978_v30 = vor.u32 %v1977_v28, %v1976_v18  ;;  %v1982_v57 = vrot.slane %v1743_v5, 4  ;;  %v974_v56 = vsel %vm9764_vm10, %v966_v60, %v973_v39  ;;  %v11504_v60 = vld [vmem:[#allocation2 + $0x118] sm:$0xf]  ;;  %v11510_v18 = vpop.permute.xlu0 %2859 }
 0x1a9   : > { %v8212_v21 = vrot.slane %v2348_v0, 11  ;;  %v1740_v27 = vsel %vm9764_vm10, %v11403_v25, %v1739_v43  ;;  %v1748_v16 = vor.u32 %v1746_v2, %v1745_v52  ;;  %v8223_v10 = vcombine.low %v965_v14, %v974_v56 }
 0x1aa   : > { %v2353_v37 = vshrl.u32 %v11483_v29, 16  ;;  %v1979_v4 = vrot.slane %v1978_v30, 4  ;;  %v1983_v33 = vor.u32 %v1982_v57, %v1980_v49  ;;  %v2356_v45 = vshll.u32 %v11483_v29, 16 }
 0x1ab   : > { %v2362_v24 = vshrl.u32 %v11487_v40, 16  ;;  %v1749_v0 = vsel %vm9764_vm10, %v1741_v35, %v1748_v16  ;;  %v3445_v58 = vsel %vm3415_vm11, %v8223_v10, %v11324_v59  ;;  %v2365_v47 = vshll.u32 %v11487_v40, 16 }
 0x1ac   : > { %v2355_v25 = vrot.slane %v2353_v37, 7  ;;  %v8277_v39 = vcombine.low %v1740_v27, %v1749_v0  ;;  %v1981_v13 = vsel %vm9663_vm7, %v1979_v4, %v1980_v49  ;;  %v1984_v5 = vrot.slane %v1983_v33, 4 }
 0x1ad   : > { %v2364_v2 = vrot.slane %v2362_v24, 7  ;;  %v2370_v43 = vshrl.u32 %v2036_v44, 16  ;;  %v2375_v59 = vshrl.u32 %v11495_v54, 16  ;;  %v2378_v30 = vshll.u32 %v11495_v54, 16 }
 0x1ae   : > { %v2358_v28 = vor.u32 %v2356_v45, %v2355_v25  ;;  %v2360_v14 = vrot.slane %v2355_v25, 4  ;;  %2949 = vrot.lane.b32.xlu1 %v8277_v39, %s9419_s22  ;;  %v1989_v35 = vsel %vm9663_vm7, %v1984_v5, %v11438_v61  ;;  %v2384_v49 = vshrl.u32 %v11504_v60, 16  ;;  %v3402_v5 = vpop.permute.xlu1 %3401 }
 0x1af   : > { %v2367_v52 = vor.u32 %v2365_v47, %v2364_v2  ;;  %v8309_v57 = vcombine.low %v1981_v13, %v1989_v35  ;;  %v8213_v27 = vrot.slane %v2370_v43, 11  ;;  %v2377_v16 = vrot.slane %v2375_v59, 7  ;;  %v2405_v13 = vld [vmem:[#allocation2 + $0x10c] sm:$0x1]  ;;  %v2406_v43 = vld [vmem:[#allocation2 + $0x11c] sm:$0x1] }
 0x1b0   : > { %v2359_v56 = vsel %vm9764_vm10, %v8212_v21, %v2358_v28  ;;  %v2386_v4 = vrot.slane %v2384_v49, 7  ;;  %v2387_v33 = vshll.u32 %v11504_v60, 16  ;;  %v3482_v61 = vsel %vm3464_vm12, %v3442_v50, %v11245_v17  ;;  %v11535_v50 = vpop.permute.xlu0 %2939 }
 0x1b1   : > { %v2368_v10 = vsel %vm9764_vm10, %v2360_v14, %v2367_v52  ;;  %v2380_v0 = vor.u32 %v2378_v30, %v2377_v16  ;;  %v2382_v25 = vrot.slane %v2377_v16, 4  ;;  %v3484_v39 = vsel %vm3464_vm12, %v3445_v58, %v11346_v26 }
 0x1b2   : > { %v8324_v44 = vcombine.low %v2359_v56, %v2368_v10  ;;  %3061 = vrot.lane.b32.xlu1 %v8293_v9, %s15124_s20  ;;  %v2389_v21 = vor.u32 %v2387_v33, %v2386_v4  ;;  %v8340_v2 = vcombine.low %v11483_v29, %v11487_v40  ;;  %v8341_v28 = vcombine.low %v11495_v54, %v11504_v60  ;;  %s8013_s20 = sshll.u32 %s9532_s24, 4  ;;  %s14718_s20 = int_to_ptr.vmem [resolvable:$true] %s8013_s20 }
 0x1b3   : > { %v3515_v17 = vsel %vm3497_vm13, %v3482_v61, %v11281_v12  ;;  %v2381_v26 = vsel %vm9764_vm10, %v8213_v27, %v2380_v0  ;;  %v3517_v9 = vsel %vm3497_vm13, %v3484_v39, %v11380_v22  ;;  %v2603_v58 = vrot.slane %v2353_v37, 4  ;;  %p9325_p1 = scmp.lt.s32.totalorder %s14718_s20, %s9323_s23 }
 0x1b4   : > { %3219 = vrot.lane.b32.xlu0 %v8324_v44, %s15146_s10  ;;  %v2604_v14 = vrot.slane %v2356_v45, 5  ;;  %v2390_v29 = vsel %vm9764_vm10, %v2382_v25, %v2389_v21  ;;  %v2607_v40 = vrot.slane %v2365_v47, 5  ;;  %v2609_v54 = vrot.slane %v2362_v24, 4  ;;  %v11548_v47 = vpop.permute.xlu1 %2781 }
 0x1b5   : > { %v2613_v60 = vshll.u32 %v2405_v13, 16  ;;  %v8325_v12 = vcombine.low %v2381_v26, %v2390_v29  ;;  %v2617_v52 = vrot.slane %v2375_v59, 4  ;;  %v2618_v56 = vrot.slane %v2378_v30, 5 }
 0x1b6   : > { %v2605_v35 = vor.u32 %v2604_v14, %v2603_v58  ;;  %3141 = vrot.lane.b32.xlu1 %v8309_v57, %s9421_s12  ;;  %v2610_v16 = vor.u32 %v2609_v54, %v2607_v40  ;;  %v2621_v10 = vrot.slane %v2387_v33, 5  ;;  %v2623_v4 = vrot.slane %v2384_v49, 4  ;;  %v3052_v57 = vpop.permute.xlu0 %3051 }
 0x1b7   : > { %v2615_v27 = vrot.slane %v2613_v60, 5  ;;  %v2619_v37 = vor.u32 %v2618_v56, %v2617_v52  ;;  %v2627_v45 = vshll.u32 %v2406_v43, 16  ;;  %v3548_v24 = vsel %vm3530_vm14, %v3515_v17, %v11332_v3  ;;  %v734_v3 = vld [vmem:[#allocation2 + $0xa0] sm:$0x8] }
 0x1b8   : > { %3331 = vrot.lane.b32.xlu0 %v8340_v2, %s9418_s21  ;;  %v2606_v22 = vrot.slane %v2605_v35, 4  ;;  %v2611_v61 = vrot.slane %v2610_v16, 4  ;;  %v2624_v44 = vor.u32 %v2623_v4, %v2621_v10  ;;  %v3550_v59 = vsel %vm3530_vm14, %v3517_v9, %v11405_v34  ;;  %v737_v16 = vld [vmem:[#allocation2 + $0xb0] sm:$0x8] }
 0x1b9   : > { %v3581_v30 = vsel %vm3563_vm15, %v3548_v24, %v11355_v31  ;;  %v2620_v33 = vrot.slane %v2619_v37, 4  ;;  %v2629_v0 = vrot.slane %v2627_v45, 5  ;;  %v3583_v25 = vsel %vm3563_vm15, %v3550_v59, %v11440_v1  ;;  %v749_v59 = vld [vmem:[#allocation2 + $0xf0] sm:$0x8] }
 0x1ba   : > { %v2608_v49 = vsel %vm9663_vm7, %v2606_v22, %v2607_v40  ;;  %3221 = vrot.lane.b32.xlu1 %v8325_v12, %s15146_s10  ;;  %v2616_v39 = vsel %vm9663_vm7, %v2611_v61, %v2615_v27  ;;  %v2625_v13 = vrot.slane %v2624_v44, 4  ;;  %v3614_v34 = vsel %vm3596_vm0, %v3581_v30, %v11387_v46  ;;  %v3132_v54 = vpop.permute.xlu0 %3131  ;;  %s9318_s10 = scalar_lea.vmem %s14718_s20, 2048 }
 0x1bb   : > { %v3616_v31 = vsel %vm3596_vm0, %v3583_v25, %v11476_v51  ;;  %v8356_v21 = vcombine.low %v2608_v49, %v2616_v39  ;;  %v2622_v2 = vsel %vm9663_vm7, %v2620_v33, %v2621_v10  ;;  %v3647_v1 = vsel %vm3629_vm3, %v3614_v34, %v11417_v11  ;;  %p9319_p12 = scmp.ne.s32.totalorder %s14718_s20, %s9318_s10 }
 0x1bc   : > { %v3649_v17 = vsel %vm3629_vm3, %v3616_v31, %v11506_v38  ;;  %v2630_v26 = vsel %vm9663_vm7, %v2625_v13, %v2629_v0  ;;  %v3680_v9 = vsel %vm3662_vm4, %v3647_v1, %v11446_v53  ;;  %v976_v58 = vshrl.u32 %v734_v3, 16  ;;  %v2862_v38 = vpop.permute.xlu1 %2861 }
 0x1bd   : > { %v3682_v46 = vsel %vm3662_vm4, %v3649_v17, %v3402_v5  ;;  %3411 = vrot.lane.b32.xlu0 %v8356_v21, %s9422_s13  ;;  %9075 = vmatprep.mubr.msk.bf16.mxu0 %vm3717_vm5, %v3680_v9  ;;  %v15165_v51 = vshrl.u32 %v10722_v42, 16  ;;  %v15166_v11 = vshrl.u32 %v10726_v8, 16  ;;  %v8357_v40 = vcombine.low %v2622_v2, %v2630_v26  ;;  %p9320_p13 = pnand %p9319_p12, %p9511_p5 }
 0x1be   : > { %3333 = vrot.lane.b32.xlu1 %v8341_v28, %s9418_s21  ;;  %9076 = vmatmul.mubr.msk.bf16.gmra.mrb[16].mxu0 %vm3717_vm5, %v3682_v46  ;;  %v8176_v53 = vrot.slane %v976_v58, 11  ;;  %v15167_v5 = vshll.u32 %v10722_v42, 16  ;;  %v15168_v12 = vshll.u32 %v10726_v8, 16  ;;  %v998_v4 = vshrl.u32 %v737_v16, 16  ;;  %v11621_v46 = vld [vmem:[#allocation2 + $0x4] sm:$0xf] }
 0x1bf   : > { %v983_v14 = vrot.slane %v15165_v51, 7  ;;  %v992_v29 = vrot.slane %v15166_v11, 7  ;;  %v15169_v22 = vshrl.u32 %v10748_v15, 16  ;;  %v15170_v45 = vshrl.u32 %v10774_v7, 16  ;;  %v11623_v58 = vld [vmem:[#allocation2 + $0x8] sm:$0xf]  ;;  %p9321_p0 = pneg %p9320_p13 }
 0x1c0   : > { %v2942_v27 = vpop.permute.xlu1 %2941  ;;  %v3212_v10 = vpop.permute.xlu0 %3211  ;;  %v8177_v33 = vrot.slane %v998_v4, 11  ;;  %v15172_v3 = vshrl.u32 %v11275_v32, 16  ;;  %v1086_v34 = vshrl.u32 %v749_v59, 16  ;;  %v15174_v21 = vshll.u32 %v10774_v7, 16  ;;  %s15112_s21 = smov 64  }
 0x1c1   : > { %v986_v60 = vor.u32 %v15167_v5, %v983_v14  ;;  %v988_v43 = vrot.slane %v983_v14, 4  ;;  %v995_v35 = vor.u32 %v15168_v12, %v992_v29  ;;  %v1005_v8 = vrot.slane %v15169_v22, 7  ;;  %v740_v22 = vld [vmem:[#allocation2 + $0xc0] sm:$0x8] }
 0x1c2   : > { %3413 = vrot.lane.b32.xlu1 %v8357_v40, %s9422_s13  ;;  %v1014_v24 = vrot.slane %v15170_v45, 7  ;;  %v15176_v26 = vshrl.u32 %v11330_v20, 16  ;;  %v8181_v14 = vrot.slane %v1086_v34, 11  ;;  %v15177_v7 = vshll.u32 %v11311_v23, 16  ;;  %s14715_s13 = scalar_lea.hbm %s14956_s7, %s15114_s18 }
 0x1c3   : > { %v987_v52 = vsel %vm9764_vm10, %v8176_v53, %v986_v60  ;;  %v996_v56 = vsel %vm9764_vm10, %v988_v43, %v995_v35  ;;  %v1010_v39 = vrot.slane %v1005_v8, 4  ;;  %v8473_v5 = vcombine.low %v11621_v46, %v11623_v58 }
 0x1c4   : > { %v8224_v28 = vcombine.low %v987_v52, %v996_v56  ;;  %v3324_v44 = vpop.permute.xlu0 %3323  ;;  %v3054_v49 = vpop.permute.xlu1 %3053  ;;  %v1102_v9 = vrot.slane %v15176_v26, 7  ;;  %v15180_v59 = vshrl.u32 %v10991_v19, 16  ;;  %v15185_v26 = vshll.u32 %v11037_v48, 16 }
 0x1c5   : > { %vm4078_vm6 = vcmask 519168   ;;  %vm6719_vm8 = vcmask 523264  }
 0x1c6   : > { %v3448_v42 = vsel %vm3415_vm11, %v8224_v28, %v11485_v62  ;;  %v15171_v62 = vshll.u32 %v10748_v15, 16  ;;  %v15175_v15 = vshll.u32 %v11275_v32, 16  ;;  %v15178_v32 = vshll.u32 %v11330_v20, 16  ;;  %6191 = vrot.lane.b32.xlu1 %v8473_v5, %s15112_s21 }
 0x1c7   : > { %v3486_v37 = vsel %vm3464_vm12, %v3448_v42, %v11510_v18  ;;  %v1080_v18 = vrot.slane %v15172_v3, 7  ;;  %v11669_v3 = vld [vmem:[%s14953_s4] ss:$0 sm:$0xff] }
 0x1c8   : > { %v3519_v61 = vsel %vm3497_vm13, %v3486_v37, %v11535_v50  ;;  %v1008_v0 = vor.u32 %v15171_v62, %v1005_v8  ;;  %v15173_v50 = vshrl.u32 %v11311_v23, 16  ;;  %v3404_v1 = vpop.permute.xlu0 %3403  ;;  %v1105_v40 = vor.u32 %v15178_v32, %v1102_v9  ;;  %v3134_v53 = vpop.permute.xlu1 %3133  ;;  %v743_v37 = vld [vmem:[#allocation2 + $0xd0] sm:$0x8] }
 0x1c9   : > { %v3552_v30 = vsel %vm3530_vm14, %v3519_v61, %v3052_v57  ;;  %v1017_v57 = vor.u32 %v15174_v21, %v1014_v24  ;;  %v11617_v17 = vor.u32 %v15175_v15, %v1080_v18 }
 0x1ca   : > { %v3585_v25 = vsel %vm3563_vm15, %v3552_v30, %v3132_v54  ;;  %v1093_v31 = vrot.slane %v15173_v50, 7  ;;  %v1009_v60 = vsel %vm9764_vm10, %v8177_v33, %v1008_v0  ;;  %v1036_v30 = vrot.slane %v15180_v59, 7 }
 0x1cb   : > { %v3618_v13 = vsel %vm3596_vm0, %v3585_v25, %v3212_v10  ;;  %v1018_v23 = vsel %vm9764_vm10, %v1010_v39, %v1017_v57  ;;  %v15181_v33 = vshrl.u32 %v11037_v48, 16  ;;  %v15182_v0 = vshrl.u32 %v11054_v55, 16 }
 0x1cc   : > { %v3651_v2 = vsel %vm3629_vm3, %v3618_v13, %v3324_v44  ;;  %v1096_v11 = vor.u32 %v15177_v7, %v1093_v31  ;;  %v1098_v29 = vrot.slane %v1093_v31, 4  ;;  %v8225_v20 = vcombine.low %v1009_v60, %v1018_v23  ;;  %v11646_v56 = vpop.permute.xlu0 %2783 }
 0x1cd   : > { %v3684_v51 = vsel %vm3662_vm4, %v3651_v2, %v3404_v1  ;;  %v1020_v44 = vshrl.u32 %v740_v22, 16  ;;  %v1049_v62 = vrot.slane %v15181_v33, 7  ;;  %v1058_v25 = vrot.slane %v15182_v0, 7  ;;  %v4149_v22 = vld [vmem:[#allocation2 + $0x20] sm:$0x8] }
 0x1ce   : > { %9079 = vmatprep.mubr.msk.bf16.mxu0 %vm3717_vm5, %v3684_v51  ;;  %v1097_v54 = vsel %vm9764_vm10, %v8181_v14, %v1096_v11  ;;  %v1106_v43 = vsel %vm9764_vm10, %v1098_v29, %v1105_v40  ;;  %v3451_v52 = vsel %vm3415_vm11, %v8225_v20, %v11548_v47  ;;  %v15183_v39 = vshll.u32 %v10988_v63, 16 }
 0x1cf   : > { %v11641_v12 = vcombine.low %v1097_v54, %v1106_v43  ;;  %v3488_v28 = vsel %vm3464_vm12, %v3451_v52, %v2862_v38  ;;  %v15179_v38 = vshrl.u32 %v10988_v63, 16  ;;  %v8178_v18 = vrot.slane %v1020_v44, 11  ;;  %v746_v63 = vld [vmem:[#allocation2 + $0xe0] sm:$0x8]  ;;  %v4789_v52 = vld [vmem:[#allocation2 + $0x30] sm:$0x8] }
 0x1d0   : > { %v3521_v16 = vsel %vm3497_vm13, %v3488_v28, %v2942_v27  ;;  %v15184_v31 = vshll.u32 %v10991_v19, 16  ;;  %v1052_v9 = vor.u32 %v15185_v26, %v1049_v62  ;;  %v1054_v51 = vrot.slane %v1049_v62, 4  ;;  %v9241_v26 = vld [vmem:[%s14954_s5 + $0x40] sm:$0xff]  }
 0x1d1   : > { %v3214_v35 = vpop.permute.xlu1 %3213  ;;  %v3554_v42 = vsel %vm3530_vm14, %v3521_v16, %v3054_v49  ;;  %v1027_v27 = vrot.slane %v15179_v38, 7  ;;  %v1042_v49 = vshrl.u32 %v743_v37, 16  ;;  %v15186_v14 = vshll.u32 %v11054_v55, 16  ;;  %v4783_v55 = vld [vmem:[#allocation2 + $0x10] sm:$0x8]  ;;  %8811 = vmatprep.subr.bf16.mxu1 %v9241_v26 }
 0x1d2   : > { %v3587_v4 = vsel %vm3563_vm15, %v3554_v42, %v3134_v53  ;;  %v1039_v21 = vor.u32 %v15184_v31, %v1036_v30  ;;  %v1064_v23 = vshrl.u32 %v746_v63, 16  ;;  %v15187_v38 = vshrl.u32 %v11269_v41, 16  ;;  %v4544_v30 = vld [vmem:[#allocation2 + $0x1c] sm:$0x1] }
 0x1d3   : > { %v3620_v8 = vsel %vm3596_vm0, %v3587_v4, %v3214_v35  ;;  %v11654_v61 = vpop.permute.xlu0 %2863  ;;  %v1030_v13 = vor.u32 %v15183_v39, %v1027_v27  ;;  %v1032_v50 = vrot.slane %v1027_v27, 4  ;;  %v8179_v57 = vrot.slane %v1042_v49, 11  ;;  %v4786_v35 = vld [vmem:[#allocation2 + $0x20] sm:$0x8]  ;;  %v4545_v49 = vld [vmem:[#allocation2 + $0x2c] sm:$0x1] }
 0x1d4   : > { %v1061_v7 = vor.u32 %v15186_v14, %v1058_v25  ;;  %v4792_v4 = vld [vmem:[#allocation2 + $0x40] sm:$0x8]  ;;  %v11702_v27 = vrot.slane %v15187_v38, 7  ;;  %v11707_v0 = vrot.slane %v1064_v23, 11  ;;  %v4832_v25 = vshrl.u32 %v4783_v55, 16 }
 0x1d5   : > { %v3326_v10 = vpop.permute.xlu1 %3325  ;;  %v1031_v54 = vsel %vm9764_vm10, %v8178_v18, %v1030_v13  ;;  %v1040_v60 = vsel %vm9764_vm10, %v1032_v50, %v1039_v21  ;;  %v1053_v28 = vsel %vm9764_vm10, %v8179_v57, %v1052_v9  ;;  %v4854_v18 = vshrl.u32 %v4786_v35, 16  ;;  %v5423_v39 = vld [vmem:[#allocation2 + $0x20] sm:$0x8] }
 0x1d6   : > { %v3653_v45 = vsel %vm3629_vm3, %v3620_v8, %v3326_v10  ;;  %v1062_v16 = vsel %vm9764_vm10, %v1054_v51, %v1061_v7  ;;  %v8226_v44 = vcombine.low %v1031_v54, %v1040_v60  ;;  %v4876_v13 = vshrl.u32 %v4789_v52, 16 }
 0x1d7   : > { %v8227_v33 = vcombine.low %v1053_v28, %v1062_v16  ;;  %v4583_v21 = vshll.u32 %v4544_v30, 16  ;;  %v5472_v14 = vshrl.u32 %v5423_v39, 16  ;;  %v9243_v16 = vld [vmem:[%s14954_s5] sm:$0xff]  }
 0x1d8   : > { %v3454_v7 = vsel %vm3415_vm11, %v8226_v44, %v11646_v56  ;;  %8812 = vmatpush3.bf16.msra.mxu1 %v9243_v16 }
 0x1d9   : > { %v3406_v24 = vpop.permute.xlu1 %3405  ;;  %v11737_v56 = vrot.slane %v4583_v21, 5  ;;  %v3490_v35 = vsel %vm3464_vm12, %v3454_v7, %v11654_v61 }
 0x1da   : > { %v3686_v47 = vsel %vm3662_vm4, %v3653_v45, %v3406_v24  ;;  %v9061_v34 = vpop.f32.mrb[0].mxu0  ;;  %v5183_v45 = vld [vmem:[#allocation2 + $0x1c] sm:$0x1]  ;;  %v5184_v24 = vld [vmem:[#allocation2 + $0x2c] sm:$0x1] }
 0x1db   : > { %9080 = vmatmul.mubr.msk.bf16.gmra.mrb[20].mxu0 %vm3717_vm5, %v3686_v47  ;;  %v3800_v1 = vadd.f32 %v9061_v34, %v11669_v3  ;;  %v3791_v15 = vpop.f32.mrb[1].mxu0  ;;  %v4146_v47 = vld [vmem:[#allocation2 + $0x10] sm:$0x8]  ;;  %v4898_v34 = vshrl.u32 %v4792_v4, 16  ;;  %v5209_v50 = vshll.u32 %v5183_v45, 16  ;;  %v5223_v31 = vshll.u32 %v5184_v24, 16 }
 0x1dc   : > { %v11675_v2 = vpop.permute.xlu0 %2943  ;;  %v3792_v11 = vadd.f32 %v11669_v3, %v3791_v15  ;;  %v9062_v29 = vpop.f32.mrb[2].mxu0  ;;  %v4214_v57 = vshrl.u32 %v4146_v47, 16  ;;  %v4236_v15 = vshrl.u32 %v4149_v22, 16  ;;  %v15190_v47 = vshll.u32 %v11269_v41, 16 }
 0x1dd   : > { %v11683_v32 = vpop.permute.xlu1 %2785  ;;  %v3920_v19 = vmax.f32 %v3800_v1, 0.0  ;;  %v3803_v40 = vadd.f32 %v9062_v29, %v11669_v3  ;;  %v3794_v53 = vpop.f32.mrb[3].mxu0  ;;  %v4597_v1 = vshll.u32 %v4545_v49, 16  ;;  %v11721_v29 = vrot.slane %v4832_v25, 11 }
 0x1de   : > { %v3918_v48 = vmax.f32 %v3792_v11, 0.0  ;;  %v3795_v5 = vadd.f32 %v11669_v3, %v3794_v53  ;;  %v11727_v53 = vrot.slane %v4876_v13, 11  ;;  %v11729_v54 = vrot.slane %v4898_v34, 11 }
 0x1df   : > { %v8729_v43 = vpack.c.bf16 %v3920_v19, %v3920_v19  ;;  %v3921_v20 = vmax.f32 %v3803_v40, 0.0  ;;  %v11723_v19 = vrot.slane %v4854_v18, 11  ;;  %v11725_v40 = vld [vmem:[#allocation2 + $0x50] sm:$0x8]  ;;  %v11739_v23 = vrot.slane %v4214_v57, 11 }
 0x1e0   : > { %v8727_v10 = vpack.c.bf16 %v3918_v48, %v3918_v48  ;;  %v3919_v42 = vmax.f32 %v3795_v5, 0.0  ;;  %v11695_v8 = vpop.permute.xlu0 %3055  ;;  %v11731_v48 = vrot.slane %v5209_v50, 5  ;;  %v11733_v5 = vrot.slane %v5223_v31, 5 }
 0x1e1   : > { %4081 = vst.msk [vmem:[%s9532_s24 + $0x8] sm:$0xf] %vm4078_vm6, %v8729_v43  ;;  %4113 = vst.msk [vmem:[#allocation2 + $0x24] sm:$0xf] %vm4078_vm6, %v8729_v43  ;;  %v8730_v37 = vpack.c.bf16 %v3921_v20, %v3921_v20  ;;  %v2866_v62 = vpop.permute.xlu1 %2865  ;;  %v11741_v43 = vrot.slane %v4597_v1, 5  ;;  %v11743_v20 = vrot.slane %v4236_v15, 11  ;;  %v3523_v4 = vsel %vm3497_vm13, %v3490_v35, %v11675_v2 }
 0x1e2   : > { %4079 = vst.msk [vmem:[%s9532_s24] sm:$0xf] %vm4078_vm6, %v8727_v10  ;;  %4111 = vst.msk [vmem:[#allocation2 + $0x14] sm:$0xf] %vm4078_vm6, %v8727_v10  ;;  %v8728_v59 = vpack.c.bf16 %v3919_v42, %v3919_v42  ;;  %v11751_v10 = vrot.slane %v5472_v14, 11  ;;  %v3457_v42 = vsel %vm3415_vm11, %v8227_v33, %v11683_v32  ;;  %v3556_v24 = vsel %vm3530_vm14, %v3523_v4, %v11695_v8 }
 0x1e3   : > { %4082 = vst.msk [vmem:[%s9532_s24 + $0xc] sm:$0xf] %vm4078_vm6, %v8730_v37  ;;  %4114 = vst.msk [vmem:[#allocation2 + $0x28] sm:$0xf] %vm4078_vm6, %v8730_v37  ;;  %v3492_v61 = vsel %vm3464_vm12, %v3457_v42, %v2866_v62  ;;  %v11769_v44 = vor.u32 %v15190_v47, %v11702_v27 }
 0x1e4   : > { %4080 = vst.msk [vmem:[%s9532_s24 + $0x4] sm:$0xf] %vm4078_vm6, %v8728_v59  ;;  %4112 = vst.msk [vmem:[#allocation2 + $0x18] sm:$0xf] %vm4078_vm6, %v8728_v59  ;;  %v3136_v63 = vpop.permute.xlu0 %3135 }
 0x1e5   : > { %v3589_v49 = vsel %vm3563_vm15, %v3556_v24, %v3136_v63 }
 0x1e8   : > { %v11747_v52 = vld [vmem:[#allocation2 + $0x24] sm:$0xf] }
 0x1e9   : > { %v11735_v60 = vld [vmem:[#allocation2 + $0x14] sm:$0xf]  ;;  %v11761_v45 = vld [vmem:[#allocation2 + $0x24] sm:$0xf]  ;;  %v15026_v33 = vshrl.u32 %v11747_v52, 16  ;;  %v15025_v41 = vshll.u32 %v11747_v52, 16 }
 0x1ea   : > { %15188 = vst [vmem:[#allocation9_spill] sm:$0xff] %v11735_v60  ;;  %v15027_v28 = vshrl.u32 %v11735_v60, 16  ;;  %v11757_v22 = vld [vmem:[#allocation2 + $0x14] sm:$0xf]  ;;  %15189 = vst [vmem:[#allocation10_spill] sm:$0xff] %v11761_v45  ;;  %v4840_v18 = vshll.u32 %v11735_v60, 16 }
 0x1eb   : > { %v11759_v37 = vld [vmem:[#allocation2 + $0x18] sm:$0xf]  ;;  %v11773_v2 = vld [vmem:[#allocation2 + $0x28] sm:$0xf]  ;;  %v4219_v62 = vshrl.u32 %v11757_v22, 16  ;;  %v4222_v34 = vshll.u32 %v11757_v22, 16 }
 0x1ec   : > { %v8474_v32 = vcombine.low %v11757_v22, %v11759_v37  ;;  %v11775_v38 = vld [vmem:[#allocation2 + $0x18] sm:$0xf]  ;;  %v11777_v59 = vld [vmem:[#allocation2 + $0x28] sm:$0xf]  ;;  %v4839_v25 = vrot.slane %v15027_v28, 7  ;;  %v4859_v31 = vshrl.u32 %v11761_v45, 16  ;;  %v8475_v57 = vcombine.low %v11747_v52, %v11773_v2 }
 0x1ed   : > { %v2946_v55 = vpop.permute.xlu1 %2945  ;;  %15191 = vst [vmem:[#allocation11_spill] sm:$0xff] %v11775_v38  ;;  %15192 = vst [vmem:[#allocation12_spill] sm:$0xff] %v11777_v59  ;;  %v4846_v39 = vshrl.u32 %v11775_v38, 16  ;;  %v4868_v21 = vshrl.u32 %v11777_v59, 16  ;;  %v4849_v14 = vshll.u32 %v11775_v38, 16  ;;  %v4871_v42 = vshll.u32 %v11777_v59, 16 }
 0x1ee   : > { %v11780_v30 = vsel %vm3497_vm13, %v3492_v61, %v2946_v55  ;;  %6193 = vrot.lane.b32.xlu1 %v8474_v32, %s15112_s21  ;;  %v4842_v1 = vor.u32 %v4840_v18, %v4839_v25  ;;  %v4861_v63 = vrot.slane %v4859_v31, 7  ;;  %v4862_v55 = vshll.u32 %v11761_v45, 16 }
 0x1ef   : > { %v4848_v15 = vrot.slane %v4846_v39, 7  ;;  %v4870_v35 = vrot.slane %v4868_v21, 7  ;;  %v11803_v61 = vrot.slane %v15026_v33, 4  ;;  %v4844_v24 = vrot.slane %v4839_v25, 4  ;;  %v9244_v25 = vld [vmem:[%s14954_s5 + $0x48] sm:$0xff]  }
 0x1f0   : > { %v11809_v11 = vrot.slane %v15025_v41, 5  ;;  %v4864_v51 = vor.u32 %v4862_v55, %v4861_v63  ;;  %v4866_v41 = vrot.slane %v4861_v63, 4  ;;  %v4573_v50 = vrot.slane %v4219_v62, 4  ;;  %8813 = vmatprep.subr.bf16.mxu1 %v9244_v25 }
 0x1f1   : > { %v3058_v13 = vpop.permute.xlu1 %3057  ;;  %v4851_v47 = vor.u32 %v4849_v14, %v4848_v15  ;;  %v4873_v9 = vor.u32 %v4871_v42, %v4870_v35  ;;  %v4843_v15 = vsel %vm9764_vm10, %v11721_v29, %v4842_v1  ;;  %v4574_v32 = vrot.slane %v4222_v34, 5 }
 0x1f2   : > { %6195 = vrot.lane.b32.xlu1 %v8475_v57, %s15112_s21  ;;  %v4865_v29 = vsel %vm9764_vm10, %v11723_v19, %v4864_v51  ;;  %v15193_v1 = vshrl.u32 %v11735_v60, 16  ;;  %v5203_v26 = vrot.slane %v4849_v14, 5  ;;  %v5214_v19 = vrot.slane %v4862_v55, 5 }
 0x1f3   : > { %v3216_v8 = vpop.permute.xlu0 %3215  ;;  %v4852_v35 = vsel %vm9764_vm10, %v4844_v24, %v4851_v47  ;;  %v9245_v24 = vld [vmem:[%s14954_s5 + $0x8] sm:$0xff]   ;;  %v5217_v16 = vrot.slane %v4871_v42, 5  ;;  %v4575_v14 = vor.u32 %v4574_v32, %v4573_v50  ;;  %v15196_v50 = vshrl.u32 %v11773_v2, 16 }
 0x1f4   : > { %v3622_v57 = vsel %vm3596_vm0, %v3589_v49, %v3216_v8  ;;  %v8505_v28 = vcombine.low %v4843_v15, %v4852_v35  ;;  %v4874_v8 = vsel %vm9764_vm10, %v4866_v41, %v4873_v9  ;;  %v5199_v63 = vrot.slane %v15193_v1, 4  ;;  %v9246_v9 = vld [vmem:[%s14954_s5 + $0x50] sm:$0xff]   ;;  %8814 = vmatpush3.bf16.msra.mxu1 %v9245_v24 }
 0x1f5   : > { %v3138_v33 = vpop.permute.xlu1 %3137  ;;  %v5213_v15 = vrot.slane %v4859_v31, 4  ;;  %v5219_v41 = vrot.slane %v4868_v21, 4  ;;  %v8506_v35 = vcombine.low %v4865_v29, %v4874_v8  ;;  %v11852_v31 = vld [vmem:[#allocation2 + $0x28] sm:$0xf]  ;;  %v9248_v21 = vld [vmem:[%s14954_s5 + $0x10] sm:$0xff]   ;;  %v15195_v29 = vshrl.u32 %v11759_v37, 16  ;;  %8815 = vmatprep.subr.bf16.mxu1 %v9246_v9 }
 0x1f6   : > { %6319 = vrot.lane.b32.xlu0 %v8505_v28, %s15112_s21  ;;  %15194 = vst [vmem:[#allocation13_spill] sm:$0xff] %v11852_v31  ;;  %v4593_v32 = vrot.slane %v15196_v50, 4 }
 0x1f7   : > { %v3328_v7 = vpop.permute.xlu0 %3327  ;;  %v5220_v1 = vor.u32 %v5219_v41, %v5217_v16  ;;  %v4579_v8 = vrot.slane %v15195_v29, 4 }
 0x1f8   : > { %v3655_v4 = vsel %vm3629_vm3, %v3622_v57, %v3328_v7  ;;  %v5200_v7 = vrot.slane %v4840_v18, 5  ;;  %v5205_v57 = vrot.slane %v4846_v39, 4  ;;  %v4231_v18 = vshll.u32 %v11759_v37, 16  ;;  %8816 = vmatpush3.bf16.msra.mxu1 %v9248_v21 }
 0x1f9   : > { %v3558_v39 = vsel %vm3530_vm14, %v11780_v30, %v3058_v13  ;;  %v5221_v24 = vrot.slane %v5220_v1, 4 }
 0x1fa   : > { %v5201_v51 = vor.u32 %v5200_v7, %v5199_v63  ;;  %v5206_v28 = vor.u32 %v5205_v57, %v5203_v26  ;;  %v3591_v55 = vsel %vm3563_vm15, %v3558_v39, %v3138_v33  ;;  %6321 = vrot.lane.b32.xlu0 %v8506_v35, %s15112_s21  ;;  %v5486_v33 = vshrl.u32 %v11852_v31, 16 }
 0x1fb   : > { %v4576_v57 = vrot.slane %v4575_v14, 4  ;;  %v15198_v39 = vmov %v15195_v29  ;;  %v15199_v29 = vshll.u32 %v11773_v2, 16 }
 0x1fc   : > { %v3408_v49 = vpop.permute.xlu0 %3407  ;;  %v5202_v25 = vrot.slane %v5201_v51, 4  ;;  %v5207_v30 = vrot.slane %v5206_v28, 4 }
 0x1fd   : > { %v3688_v47 = vsel %vm3662_vm4, %v3655_v4, %v3408_v49  ;;  %v11848_v4 = vld [vmem:[#allocation2 + $0x24] sm:$0xf]  ;;  %v5215_v49 = vor.u32 %v5214_v19, %v5213_v15  ;;  %v4577_v15 = vrot.slane %v4231_v18, 5  ;;  %v5226_v19 = vsel %vm9663_vm7, %v5221_v24, %v11733_v5 }
 0x1fe   : > { %9083 = vmatprep.mubr.msk.bf16.mxu0 %vm3717_vm5, %v3688_v47  ;;  %v5477_v13 = vshrl.u32 %v11848_v4, 16  ;;  %v5204_v63 = vsel %vm9663_vm7, %v5202_v25, %v5203_v26  ;;  %v5212_v47 = vsel %vm9663_vm7, %v5207_v30, %v11731_v48  ;;  %v4221_v26 = vrot.slane %v4219_v62, 7 }
 0x1ff   : > { %v5216_v7 = vrot.slane %v5215_v49, 4  ;;  %v11870_v51 = vcombine.low %v5204_v63, %v5212_v47  ;;  %v4578_v48 = vsel %vm9663_vm7, %v4576_v57, %v4577_v15  ;;  %v4580_v14 = vor.u32 %v4579_v8, %v4577_v15  ;;  %v11902_v63 = vld [vmem:[#allocation2 + $0x40] sm:$0x8]  ;;  %v9249_v57 = vld [vmem:[%s14954_s5 + $0x58] sm:$0xff]  }
 0x200   : > { %v11879_v35 = vpop.permute.xlu0 %2787  ;;  %v4224_v5 = vor.u32 %v4222_v34, %v4221_v26  ;;  %v4226_v49 = vrot.slane %v4221_v26, 4  ;;  %v4589_v62 = vor.u32 %v11809_v11, %v11803_v61  ;;  %v4591_v50 = vrot.slane %v15199_v29, 5  ;;  %v9250_v15 = vld [vmem:[%s14954_s5 + $0x18] sm:$0xff]   ;;  %8817 = vmatprep.subr.bf16.mxu1 %v9249_v57 }
 0x201   : > { %v5218_v9 = vsel %vm9663_vm7, %v5216_v7, %v5217_v16  ;;  %v4230_v16 = vrot.slane %v15198_v39, 7  ;;  %v4581_v1 = vrot.slane %v4580_v14, 4  ;;  %v15200_v30 = vshrl.u32 %v11747_v52, 16  ;;  %8818 = vmatpush3.bf16.msra.mxu1 %v9250_v15 }
 0x202   : > { %v3218_v42 = vpop.permute.xlu1 %3217  ;;  %v11881_v28 = vcombine.low %v5218_v9, %v5226_v19  ;;  %v4590_v22 = vrot.slane %v4589_v62, 4  ;;  %v15201_v34 = vshrl.u32 %v11773_v2, 16  ;;  %v4594_v7 = vor.u32 %v4593_v32, %v4591_v50 }
 0x203   : > { %v3624_v25 = vsel %vm3596_vm0, %v3591_v55, %v3218_v42  ;;  %v4233_v21 = vor.u32 %v4231_v18, %v4230_v16  ;;  %v4243_v8 = vrot.slane %v15200_v30, 7  ;;  %v4225_v55 = vsel %vm9764_vm10, %v11739_v23, %v4224_v5  ;;  %v11930_v16 = vld [vmem:[#allocation2 + $0x40] sm:$0x8]  ;;  %v4152_v30 = vld [vmem:[#allocation2 + $0x30] sm:$0x8] }
 0x204   : > { %15197 = vst [vmem:[#allocation14_spill] sm:$0xff] %v11881_v28  ;;  %v4252_v42 = vrot.slane %v15201_v34, 7  ;;  %v4586_v61 = vsel %vm9663_vm7, %v4581_v1, %v11737_v56  ;;  %v15202_v24 = vshll.u32 %v11747_v52, 16  ;;  %v4592_v32 = vsel %vm9663_vm7, %v4590_v22, %v4591_v50  ;;  %v11933_v5 = vld [vmem:[#allocation2 + $0x60] sm:$0x8] }
 0x205   : > { %v4234_v18 = vsel %vm9764_vm10, %v4226_v49, %v4233_v21  ;;  %v11918_v9 = vcombine.low %v4578_v48, %v4586_v61  ;;  %v4595_v19 = vrot.slane %v4594_v7, 4  ;;  %v4248_v26 = vrot.slane %v4243_v8, 4  ;;  %v5426_v34 = vld [vmem:[#allocation2 + $0x30] sm:$0x8]  ;;  %v5186_v61 = vld [vmem:[#allocation2 + $0x4c] sm:$0x1] }
 0x206   : > { %v3330_v41 = vpop.permute.xlu1 %3329  ;;  %v4246_v47 = vor.u32 %v15202_v24, %v4243_v8  ;;  %v11920_v56 = vcombine.low %v4225_v55, %v4234_v18  ;;  %v4280_v39 = vshrl.u32 %v11902_v63, 16  ;;  %v5479_v49 = vrot.slane %v5477_v13, 7 }
 0x207   : > { %v3657_v37 = vsel %vm3629_vm3, %v3624_v25, %v3330_v41  ;;  %15203 = vst [vmem:[#allocation15_spill] sm:$0xff] %v11918_v9  ;;  %v11925_v52 = vpop.permute.xlu0 %2867  ;;  %v15205_v41 = vmov %v15199_v29  ;;  %v5480_v25 = vshll.u32 %v11848_v4, 16  ;;  %v5488_v62 = vrot.slane %v5486_v33, 7 }
 0x208   : > { %15204 = vst [vmem:[#allocation16_spill] sm:$0xff] %v11920_v56  ;;  %v4255_v14 = vor.u32 %v15205_v41, %v4252_v42  ;;  %v9065_v48 = vpop.f32.mrb[4].mxu0  ;;  %v4600_v21 = vsel %vm9663_vm7, %v4595_v19, %v11741_v43  ;;  %v4247_v29 = vsel %vm9764_vm10, %v11743_v20, %v4246_v47  ;;  %v5516_v42 = vshrl.u32 %v11930_v16, 16 }
 0x209   : > { %v3816_v1 = vadd.f32 %v9065_v48, %v11669_v3  ;;  %v3807_v8 = vpop.f32.mrb[5].mxu0  ;;  %v11951_v55 = vcombine.low %v4592_v32, %v4600_v21  ;;  %v4942_v20 = vshrl.u32 %v11933_v5, 16  ;;  %v5482_v18 = vor.u32 %v5480_v25, %v5479_v49  ;;  %v5185_v48 = vld [vmem:[#allocation2 + $0x3c] sm:$0x1] }
 0x20a   : > { %v3410_v11 = vpop.permute.xlu1 %3409  ;;  %v4256_v50 = vsel %vm9764_vm10, %v4248_v26, %v4255_v14  ;;  %v3808_v43 = vadd.f32 %v11669_v3, %v3807_v8  ;;  %v4258_v47 = vshrl.u32 %v4152_v30, 16  ;;  %v5494_v41 = vshrl.u32 %v5426_v34, 16 }
 0x20b   : > { %v3690_v23 = vsel %vm3662_vm4, %v3657_v37, %v3410_v11  ;;  %v15028_v37 = vshll.u32 %v11852_v31, 16  ;;  %15206 = vst [vmem:[#allocation17_spill] sm:$0xff] %v11951_v55  ;;  %v11953_v22 = vcombine.low %v4247_v29, %v4256_v50  ;;  %v3924_v63 = vmax.f32 %v3816_v1, 0.0  ;;  %v9066_v11 = vpop.f32.mrb[6].mxu0  ;;  %v4546_v29 = vld [vmem:[#allocation2 + $0x3c] sm:$0x1] }
 0x20c   : > { %9084 = vmatmul.mubr.msk.bf16.gmra.mrb[24].mxu0 %vm3717_vm5, %v3690_v23  ;;  %v3819_v7 = vadd.f32 %v9066_v11, %v11669_v3  ;;  %v3810_v24 = vpop.f32.mrb[7].mxu0  ;;  %v5484_v23 = vrot.slane %v5479_v49, 4  ;;  %v3922_v19 = vmax.f32 %v3808_v43, 0.0  ;;  %v5251_v5 = vshll.u32 %v5186_v61, 16  ;;  %v5187_v43 = vld [vmem:[#allocation2 + $0x5c] sm:$0x1] }
 0x20d   : > { %15207 = vst [vmem:[#allocation18_spill] sm:$0xff] %v11953_v22  ;;  %v5491_v57 = vor.u32 %v15028_v37, %v5488_v62  ;;  %v11963_v15 = vpop.permute.xlu0 %2947  ;;  %v8733_v32 = vpack.c.bf16 %v3924_v63, %v3924_v63  ;;  %v3811_v26 = vadd.f32 %v11669_v3, %v3810_v24  ;;  %v5483_v1 = vsel %vm9764_vm10, %v11751_v10, %v5482_v18  ;;  %v4547_v62 = vld [vmem:[#allocation2 + $0x4c] sm:$0x1] }
 0x20e   : > { %v11966_v14 = vpop.permute.xlu1 %2789  ;;  %v3925_v16 = vmax.f32 %v3819_v7, 0.0  ;;  %v8731_v3 = vpack.c.bf16 %v3922_v19, %v3922_v19  ;;  %v1075_v10 = vsel %vm9764_vm10, %v11707_v0, %v11769_v44  ;;  %v15209_v34 = vshrl.u32 %v11725_v40, 16  ;;  %v5188_v11 = vld [vmem:[#allocation2 + $0x6c] sm:$0x1]  ;;  %v4801_v40 = vld [vmem:[#allocation2 + $0x70] sm:$0x8] }
 0x20f   : > { %v5492_v49 = vsel %vm9764_vm10, %v5484_v23, %v5491_v57  ;;  %4085 = vst.msk [vmem:[%s9532_s24 + $0x18] sm:$0xf] %vm4078_vm6, %v8733_v32  ;;  %4117 = vst.msk [vmem:[#allocation2 + $0x44] sm:$0xf] %vm4078_vm6, %v8733_v32  ;;  %v3923_v21 = vmax.f32 %v3811_v26, 0.0  ;;  %v11988_v61 = vrot.slane %v4280_v39, 11 }
 0x210   : > { %v11976_v50 = vcombine.low %v5483_v1, %v5492_v49  ;;  %v8734_v8 = vpack.c.bf16 %v3925_v16, %v3925_v16  ;;  %v11986_v63 = vrot.slane %v15209_v34, 11  ;;  %v15210_v18 = vrot.slane %v11702_v27, 4  ;;  %4083 = vst.msk [vmem:[%s9532_s24 + $0x10] sm:$0xf] %vm4078_vm6, %v8731_v3  ;;  %4115 = vst.msk [vmem:[#allocation2 + $0x34] sm:$0xf] %vm4078_vm6, %v8731_v3 }
 0x211   : > { %v8732_v0 = vpack.c.bf16 %v3923_v21, %v3923_v21  ;;  %v5237_v44 = vshll.u32 %v5185_v48, 16  ;;  %v4625_v24 = vshll.u32 %v4547_v62, 16  ;;  %v4548_v23 = vld [vmem:[#allocation2 + $0x5c] sm:$0x1]  ;;  %v12001_v39 = vrot.slane %v4942_v20, 11  ;;  %v12010_v19 = vpop.permute.xlu0 %3059  ;;  %v9254_v20 = vld [vmem:[%s14954_s5 + $0x20] sm:$0xff]  }
 0x212   : > { %15208 = vst [vmem:[#allocation19_spill] sm:$0xff] %v11976_v50  ;;  %v1084_v7 = vsel %vm9764_vm10, %v15210_v18, %v11617_v17  ;;  %4086 = vst.msk [vmem:[%s9532_s24 + $0x1c] sm:$0xf] %vm4078_vm6, %v8734_v8  ;;  %v9252_v17 = vld [vmem:[%s14954_s5 + $0x60] sm:$0xff]   ;;  %v4611_v27 = vshll.u32 %v4546_v29, 16  ;;  %v12006_v57 = vrot.slane %v4258_v47, 11  ;;  %v2870_v47 = vpop.permute.xlu1 %2869 }
 0x213   : > { %4118 = vst.msk [vmem:[#allocation2 + $0x48] sm:$0xf] %vm4078_vm6, %v8734_v8  ;;  %v12008_v32 = vrot.slane %v5516_v42, 11  ;;  %4084 = vst.msk [vmem:[%s9532_s24 + $0x14] sm:$0xf] %vm4078_vm6, %v8732_v0  ;;  %v12015_v26 = vrot.slane %v5251_v5, 5  ;;  %8819 = vmatprep.subr.bf16.mxu1 %v9252_v17  ;;  %v8228_v21 = vcombine.low %v1075_v10, %v1084_v7 }
 0x214   : > { %4116 = vst.msk [vmem:[#allocation2 + $0x38] sm:$0xf] %vm4078_vm6, %v8732_v0  ;;  %v5265_v16 = vshll.u32 %v5187_v43, 16  ;;  %v5279_v48 = vshll.u32 %v5188_v11, 16  ;;  %v12020_v1 = vrot.slane %v5494_v41, 11  ;;  %v4964_v49 = vshrl.u32 %v4801_v40, 16  ;;  %8820 = vmatpush3.bf16.msra.mxu1 %v9254_v20 }
 0x215   : > { %v4639_v42 = vshll.u32 %v4548_v23, 16  ;;  %v4158_v62 = vld [vmem:[#allocation2 + $0x50] sm:$0x8]  ;;  %v5435_v3 = vld [vmem:[#allocation2 + $0x60] sm:$0x8]  ;;  %v12022_v29 = vrot.slane %v5237_v44, 5  ;;  %v3460_v37 = vsel %vm3415_vm11, %v8228_v21, %v11879_v35 }
 0x216   : > { %v9255_v5 = vld [vmem:[%s14954_s5 + $0x68] sm:$0xff]   ;;  %v12030_v41 = vrot.slane %v4625_v24, 5  ;;  %v5432_v34 = vld [vmem:[#allocation2 + $0x50] sm:$0x8]  ;;  %v12034_v43 = vrot.slane %v5477_v13, 4  ;;  %v12038_v10 = vrot.slane %v5480_v25, 5 }
 0x217   : > { %v9256_v8 = vld [vmem:[%s14954_s5 + $0x28] sm:$0xff]   ;;  %v9258_v11 = vld [vmem:[%s14954_s5 + $0x70] sm:$0xff]   ;;  %v12043_v18 = vrot.slane %v4611_v27, 5  ;;  %v12045_v0 = vld [vmem:[#allocation2 + $0x44] sm:$0xf]  ;;  %v12049_v44 = vrot.slane %v5486_v33, 4  ;;  %8821 = vmatprep.subr.bf16.mxu1 %v9255_v5  ;;  %v12063_v30 = vpop.permute.xlu0 %3139 }
 0x218   : > { %15211 = vst [vmem:[#allocation20_spill] sm:$0xff] %v12034_v43  ;;  %15212 = vst [vmem:[#allocation21_spill] sm:$0xff] %v12038_v10  ;;  %v4549_v7 = vld [vmem:[#allocation2 + $0x6c] sm:$0x1]  ;;  %v12051_v40 = vrot.slane %v5265_v16, 5  ;;  %v12053_v13 = vrot.slane %v5279_v48, 5  ;;  %8822 = vmatpush3.bf16.msra.mxu1 %v9256_v8 }
 0x219   : > { %15213 = vst [vmem:[#allocation22_spill] sm:$0xff] %v12045_v0  ;;  %15214 = vst [vmem:[#allocation23_spill] sm:$0xff] %v12049_v44  ;;  %v4302_v25 = vshrl.u32 %v4158_v62, 16  ;;  %v12055_v24 = vrot.slane %v4964_v49, 11  ;;  %v12057_v23 = vrot.slane %v4639_v42, 5  ;;  %v5538_v17 = vshrl.u32 %v5432_v34, 16  ;;  %8823 = vmatprep.subr.bf16.mxu1 %v9258_v11 }
 0x21a   : > { %15215 = vst [vmem:[#allocation24_spill] sm:$0xff] %v12051_v40  ;;  %15216 = vst [vmem:[#allocation25_spill] sm:$0xff] %v12053_v13  ;;  %v5560_v27 = vshrl.u32 %v5435_v3, 16  ;;  %v12059_v20 = vld [vmem:[#allocation2 + $0x60] sm:$0x8]  ;;  %v9260_v48 = vld [vmem:[%s14954_s5 + $0x30] sm:$0xff]   ;;  %v3463_v42 = vsel %vm3415_vm11, %v11641_v12, %v11966_v14  ;;  %v3494_v62 = vsel %vm3464_vm12, %v3460_v37, %v11925_v52 }
 0x21b   : > { %15217 = vst [vmem:[#allocation26_spill] sm:$0xff] %v12055_v24  ;;  %15218 = vst [vmem:[#allocation27_spill] sm:$0xff] %v12057_v23  ;;  %v12065_v33 = vld [vmem:[#allocation2 + $0x44] sm:$0xf]  ;;  %v12067_v16 = vld [vmem:[#allocation2 + $0x34] sm:$0xf]  ;;  %v12090_v12 = vsel %vm3464_vm12, %v3463_v42, %v2870_v47  ;;  %v3527_v52 = vsel %vm3497_vm13, %v3494_v62, %v11963_v15 }
 0x21c   : > { %15219 = vst [vmem:[#allocation28_spill] sm:$0xff] %v12067_v16  ;;  %v4653_v49 = vshll.u32 %v4549_v7, 16  ;;  %v12079_v3 = vld [vmem:[#allocation2 + $0x38] sm:$0xf]  ;;  %v12094_v37 = vld [vmem:[#allocation2 + $0x34] sm:$0xf]  ;;  %v3560_v15 = vsel %vm3530_vm14, %v3527_v52, %v12010_v19  ;;  %8824 = vmatpush3.bf16.msra.mxu1 %v9260_v48 }
 0x21d   : > { %v12081_v21 = vld [vmem:[#allocation2 + $0x38] sm:$0xf]  ;;  %v12096_v14 = vld [vmem:[#allocation2 + $0x48] sm:$0xf]  ;;  %v12098_v7 = vrot.slane %v4302_v25, 11  ;;  %v4324_v2 = vshrl.u32 %v12059_v20, 16  ;;  %v8476_v11 = vcombine.low %v12094_v37, %v12079_v3 }
 0x21e   : > { %15220 = vst [vmem:[#allocation29_spill] sm:$0xff] %v12081_v21  ;;  %v9261_v34 = vld [vmem:[%s14954_s5 + $0x78] sm:$0xff]   ;;  %15221 = vst [vmem:[#allocation30_spill] sm:$0xff] %v12096_v14  ;;  %v12104_v5 = vld [vmem:[#allocation2 + $0x34] sm:$0xf]  ;;  %v12106_v47 = vrot.slane %v5538_v17, 11 }
 0x21f   : > { %15222 = vst [vmem:[#allocation31_spill] sm:$0xff] %v12098_v7  ;;  %v12108_v42 = vrot.slane %v5560_v27, 11  ;;  %v12112_v62 = vld [vmem:[#allocation2 + $0x48] sm:$0xf]  ;;  %v9262_v8 = vld [vmem:[%s14954_s5 + $0x38] sm:$0xff]   ;;  %v12119_v44 = vrot.slane %v4653_v49, 5  ;;  %6197 = vrot.lane.b32.xlu1 %v8476_v11, %s15112_s21  ;;  %8825 = vmatprep.subr.bf16.mxu1 %v9261_v34 }
 0x220   : > { %v12077_v35 = vpop.permute.xlu1 %2949  ;;  %15223 = vst [vmem:[#allocation32_spill] sm:$0xff] %v12106_v47  ;;  %v15226_v27 = vshrl.u32 %v12067_v16, 16  ;;  %v15227_v25 = vshrl.u32 %v12045_v0, 16  ;;  %v12130_v20 = vld [vmem:[#allocation2 + $0x38] sm:$0xf]  ;;  %v15228_v49 = vshrl.u32 %v12081_v21, 16  ;;  %v8477_v52 = vcombine.low %v12065_v33, %v12112_v62  ;;  %8826 = vmatpush3.bf16.msra.mxu1 %v9262_v8 }
 0x221   : > { %15224 = vst [vmem:[#allocation33_spill] sm:$0xff] %v12108_v42  ;;  %15225 = vst [vmem:[#allocation34_spill] sm:$0xff] %v12119_v44  ;;  %v4893_v60 = vshll.u32 %v12081_v21, 16  ;;  %v4906_v48 = vshll.u32 %v12045_v0, 16  ;;  %v4915_v34 = vshll.u32 %v12096_v14, 16  ;;  %v15035_v24 = vshll.u32 %v12065_v33, 16 }
 0x222   : > { %v4883_v19 = vrot.slane %v15226_v27, 7  ;;  %v4905_v59 = vrot.slane %v15227_v25, 7  ;;  %v4892_v38 = vrot.slane %v15228_v49, 7  ;;  %v15229_v25 = vshll.u32 %v12067_v16, 16  ;;  %v4143_v47 = vld [vmem:[#allocation2] sm:$0x8] }
 0x223   : > { %v15230_v49 = vshrl.u32 %v12096_v14, 16  ;;  %6199 = vrot.lane.b32.xlu1 %v8477_v52, %s15112_s21  ;;  %v15235_v44 = vshrl.u32 %v12130_v20, 16  ;;  %v15268_v23 = vshll.u32 %v12079_v3, 16 }
 0x224   : > { %v12121_v17 = vpop.permute.xlu1 %3061  ;;  %v4886_v50 = vor.u32 %v15229_v25, %v4883_v19  ;;  %v4888_v10 = vrot.slane %v4883_v19, 4  ;;  %v4895_v43 = vor.u32 %v4893_v60, %v4892_v38  ;;  %v4908_v27 = vor.u32 %v4906_v48, %v4905_v59 }
 0x225   : > { %v4914_v55 = vrot.slane %v15230_v49, 7  ;;  %v4910_v22 = vrot.slane %v4905_v59, 4  ;;  %v15231_v25 = vshrl.u32 %v12104_v5, 16  ;;  %v15232_v49 = vshll.u32 %v12104_v5, 16  ;;  %v12161_v59 = vld [vmem:[#allocation2 + $0x80] sm:$0x8] }
 0x226   : > { %v3220_v45 = vpop.permute.xlu0 %3219  ;;  %v4887_v38 = vsel %vm9764_vm10, %v11727_v53, %v4886_v50  ;;  %v4896_v19 = vsel %vm9764_vm10, %v4888_v10, %v4895_v43  ;;  %v12170_v53 = vrot.slane %v15235_v44, 4  ;;  %v12178_v10 = vrot.slane %v4324_v2, 11 }
 0x227   : > { %v12150_v56 = vrot.slane %v15231_v25, 4  ;;  %v4917_v8 = vor.u32 %v4915_v34, %v4914_v55  ;;  %v12159_v52 = vrot.slane %v15232_v49, 5  ;;  %v8507_v13 = vcombine.low %v4887_v38, %v4896_v19 }
 0x228   : > { %v3142_v11 = vpop.permute.xlu1 %3141  ;;  %v15233_v25 = vshll.u32 %v12130_v20, 16  ;;  %v3593_v55 = vsel %vm3563_vm15, %v3560_v15, %v12063_v30  ;;  %15236 = vst [vmem:[#allocation36_spill] sm:$0xff] %v12178_v10  ;;  %v15237_v30 = vshrl.u32 %v11621_v46, 16  ;;  %v15238_v2 = vshrl.u32 %v12065_v33, 16 }
 0x229   : > { %v4918_v50 = vsel %vm9764_vm10, %v4910_v22, %v4917_v8  ;;  %6323 = vrot.lane.b32.xlu0 %v8507_v13, %s15112_s21  ;;  %v4909_v13 = vsel %vm9764_vm10, %v11729_v54, %v4908_v27  ;;  %v3626_v19 = vsel %vm3596_vm0, %v3593_v55, %v3220_v45  ;;  %v12200_v43 = vrot.slane %v15035_v24, 5 }
 0x22a   : > { %v3332_v9 = vpop.permute.xlu0 %3331  ;;  %v12166_v40 = vrot.slane %v15233_v25, 5  ;;  %v4559_v15 = vrot.slane %v15237_v30, 4  ;;  %v12191_v25 = vrot.slane %v15238_v2, 4  ;;  %v8508_v30 = vcombine.low %v4909_v13, %v4918_v50 }
 0x22b   : > { %v3529_v8 = vsel %vm3497_vm13, %v12090_v12, %v12077_v35  ;;  %v3659_v2 = vsel %vm3629_vm3, %v3626_v19, %v3332_v9  ;;  %v12206_v49 = vrot.slane %v4893_v60, 5  ;;  %v15239_v54 = vshrl.u32 %v12081_v21, 16 }
 0x22c   : > { %15234 = vst [vmem:[#allocation35_spill] sm:$0xff] %v12166_v40  ;;  %v3222_v38 = vpop.permute.xlu1 %3221  ;;  %v15240_v24 = vshrl.u32 %v12045_v0, 16  ;;  %v5242_v13 = vrot.slane %v4906_v48, 5  ;;  %v5245_v44 = vrot.slane %v4915_v34, 5  ;;  %v3562_v35 = vsel %vm3530_vm14, %v3529_v8, %v12121_v17  ;;  %v12226_v17 = vld [vmem:[#allocation2 + $0x44] sm:$0xf] }
 0x22d   : > { %v5233_v27 = vrot.slane %v15239_v54, 4  ;;  %6325 = vrot.lane.b32.xlu0 %v8508_v30, %s15112_s21  ;;  %v15241_v12 = vshrl.u32 %v12096_v14, 16  ;;  %v15243_v8 = vshrl.u32 %v12067_v16, 16 }
 0x22e   : > { %v5241_v50 = vrot.slane %v15240_v24, 4  ;;  %v15242_v24 = vshll.u32 %v11621_v46, 16 }
 0x22f   : > { %v3412_v22 = vpop.permute.xlu0 %3411  ;;  %v5247_v19 = vrot.slane %v15241_v12, 4  ;;  %v5227_v54 = vrot.slane %v15243_v8, 4  ;;  %v5189_v8 = vld [vmem:[#allocation2 + $0x7c] sm:$0x1] }
 0x230   : > { %v3334_v45 = vpop.permute.xlu1 %3333  ;;  %v3692_v55 = vsel %vm3662_vm4, %v3659_v2, %v3412_v22  ;;  %v3595_v22 = vsel %vm3563_vm15, %v3562_v35, %v3142_v11  ;;  %v5243_v2 = vor.u32 %v5242_v13, %v5241_v50  ;;  %v4560_v48 = vrot.slane %v15242_v24, 5  ;;  %v12233_v35 = vld [vmem:[#allocation2 + $0x48] sm:$0xf] }
 0x231   : > { %9087 = vmatprep.mubr.msk.bf16.mxu0 %vm3717_vm5, %v3692_v55  ;;  %v3628_v34 = vsel %vm3596_vm0, %v3595_v22, %v3222_v38  ;;  %v15244_v55 = vshll.u32 %v12067_v16, 16  ;;  %v5248_v60 = vor.u32 %v5247_v19, %v5245_v44  ;;  %v5234_v50 = vor.u32 %v5233_v27, %v12206_v49 }
 0x232   : > { %v3661_v12 = vsel %vm3629_vm3, %v3628_v34, %v3334_v45  ;;  %v5244_v13 = vrot.slane %v5243_v2, 4  ;;  %v15245_v24 = vshll.u32 %v11623_v58, 16  ;;  %v4561_v10 = vor.u32 %v4560_v48, %v4559_v15 }
 0x233   : > { %v5228_v9 = vrot.slane %v15244_v55, 5  ;;  %v5249_v30 = vrot.slane %v5248_v60, 4  ;;  %v15246_v55 = vshrl.u32 %v11623_v58, 16  ;;  %v15247_v45 = vshrl.u32 %v12094_v37, 16 }
 0x234   : > { %v3414_v11 = vpop.permute.xlu1 %3413  ;;  %v12238_v38 = vrot.slane %v15245_v24, 5  ;;  %v15248_v27 = vshll.u32 %v12094_v37, 16  ;;  %v5246_v24 = vsel %vm9663_vm7, %v5244_v13, %v5245_v44  ;;  %v15249_v60 = vshrl.u32 %v12112_v62, 16 }
 0x235   : > { %v3694_v22 = vsel %vm3662_vm4, %v3661_v12, %v3414_v11  ;;  %v4565_v19 = vrot.slane %v15246_v55, 4  ;;  %v4601_v34 = vrot.slane %v15247_v45, 4  ;;  %v5254_v11 = vsel %vm9663_vm7, %v5249_v30, %v12015_v26 }
 0x236   : > { %9088 = vmatmul.mubr.msk.bf16.gmra.mrb[28].mxu0 %vm3717_vm5, %v3694_v22  ;;  %v4602_v2 = vrot.slane %v15248_v27, 5  ;;  %v12253_v12 = vrot.slane %v15249_v60, 4  ;;  %v4543_v22 = vld [vmem:[#allocation2 + $0xc] sm:$0x1]  ;;  %v5229_v55 = vor.u32 %v5228_v9, %v5227_v54  ;;  %v12260_v45 = vrot.slane %v5234_v50, 4 }
 0x237   : > { %v12262_v27 = vcombine.low %v5246_v24, %v5254_v11  ;;  %v5293_v42 = vshll.u32 %v5189_v8, 16  ;;  %v15251_v44 = vshrl.u32 %v12079_v3, 16  ;;  %v12268_v15 = vrot.slane %v4561_v10, 4 }
 0x238   : > { %v4566_v48 = vor.u32 %v4565_v19, %v12238_v38  ;;  %v15252_v26 = vor.u32 %v12159_v52, %v12150_v56  ;;  %v15254_v54 = vshrl.u32 %v12226_v17, 16  ;;  %v4569_v8 = vshll.u32 %v4543_v22, 16 }
 0x239   : > { %15250 = vst [vmem:[#allocation37_spill] sm:$0xff] %v12262_v27  ;;  %v4607_v13 = vrot.slane %v15251_v44, 4  ;;  %v15255_v24 = vor.u32 %v12170_v53, %v12166_v40  ;;  %v15257_v19 = vshll.u32 %v12226_v17, 16  ;;  %v15258_v56 = vshrl.u32 %v12233_v35, 16 }
 0x23a   : > { %v12274_v9 = vrot.slane %v15252_v26, 4  ;;  %v12279_v50 = vrot.slane %v15254_v54, 4  ;;  %v15260_v44 = vshrl.u32 %v12161_v59, 16  ;;  %v12298_v54 = vrot.slane %v5229_v55, 4  ;;  %v9268_v59 = vld [vmem:[%s14954_s5 + $0x80] sm:$0xff]   ;;  %v9269_v55 = vld [vmem:[%s14954_s5 + $0xc8] sm:$0xff]  }
 0x23b   : > { %v12284_v10 = vrot.slane %v15255_v24, 4  ;;  %v12288_v11 = vrot.slane %v15257_v19, 5  ;;  %v12292_v52 = vrot.slane %v15258_v56, 4  ;;  %v12304_v22 = vrot.slane %v5293_v42, 5  ;;  %v9267_v19 = vld [vmem:[%s14954_s5 + $0xc0] sm:$0xff]   ;;  %v9069_v60 = vpop.f32.mrb[8].mxu0 }
 0x23c   : > { %15253 = vst [vmem:[#allocation38_spill] sm:$0xff] %v12274_v9  ;;  %v12296_v26 = vrot.slane %v15260_v44, 11  ;;  %v4192_v24 = vshrl.u32 %v4143_v47, 16  ;;  %v12319_v42 = vrot.slane %v4566_v48, 4  ;;  %v4603_v47 = vor.u32 %v4602_v2, %v4601_v34  ;;  %8923 = vmatprep.subr.bf16.mxu0 %v9267_v19  ;;  %v12336_v34 = vld [vmem:[%s14953_s4] ss:$0 sm:$0xff] }
 0x23d   : > { %15256 = vst [vmem:[#allocation39_spill] sm:$0xff] %v12284_v10  ;;  %15259 = vst [vmem:[#allocation40_spill] sm:$0xff] %v12292_v52  ;;  %v15263_v44 = vshll.u32 %v12079_v3, 16  ;;  %v12323_v53 = vrot.slane %v4569_v8, 5  ;;  %v15264_v10 = vshrl.u32 %v11621_v46, 16  ;;  %v15265_v40 = vshrl.u32 %v12094_v37, 16  ;;  %8924 = vmatpush3.bf16.msra.mxu0 %v9268_v59 }
 0x23e   : > { %15261 = vst [vmem:[#allocation41_spill] sm:$0xff] %v12296_v26  ;;  %15262 = vst [vmem:[#allocation42_spill] sm:$0xff] %v12304_v22  ;;  %v15266_v26 = vshrl.u32 %v12079_v3, 16  ;;  %v3832_v2 = vadd.f32 %v12336_v34, %v9069_v60  ;;  %v3823_v48 = vpop.f32.mrb[9].mxu0  ;;  %v4604_v8 = vrot.slane %v4603_v47, 4  ;;  %8925 = vmatprep.subr.bf16.mxu0 %v9269_v55  ;;  %v12350_v55 = vrot.slane %v4192_v24, 11 }
 0x23f   : > { %v4605_v30 = vrot.slane %v15263_v44, 5  ;;  %v12327_v9 = vrot.slane %v15264_v10, 7  ;;  %v4265_v22 = vrot.slane %v15265_v40, 7  ;;  %v4617_v10 = vor.u32 %v12200_v43, %v12191_v25  ;;  %v9070_v40 = vpop.f32.mrb[10].mxu0 }
 0x240   : > { %v4274_v56 = vrot.slane %v15266_v26, 7  ;;  %v3824_v19 = vadd.f32 %v12336_v34, %v3823_v48  ;;  %v15267_v26 = vshll.u32 %v12094_v37, 16  ;;  %v3928_v28 = vmax.f32 %v3832_v2, 0.0  ;;  %v3826_v59 = vpop.f32.mrb[11].mxu0 }
 0x241   : > { %v4608_v44 = vor.u32 %v4607_v13, %v4605_v30  ;;  %v4270_v27 = vrot.slane %v4265_v22, 4  ;;  %v3835_v60 = vadd.f32 %v12336_v34, %v9070_v40  ;;  %v4606_v13 = vsel %vm9663_vm7, %v4604_v8, %v4605_v30  ;;  %v12359_v8 = vld [vmem:[#allocation2 + $0x8c] sm:$0x1] }
 0x242   : > { %v4268_v52 = vor.u32 %v15267_v26, %v4265_v22  ;;  %v4277_v7 = vor.u32 %v15268_v23, %v4274_v56  ;;  %v3926_v25 = vmax.f32 %v3824_v19, 0.0  ;;  %v3827_v47 = vadd.f32 %v12336_v34, %v3826_v59 }
 0x243   : > { %v4609_v43 = vrot.slane %v4608_v44, 4  ;;  %v15269_v37 = vshrl.u32 %v11623_v58, 16  ;;  %v8737_v3 = vpack.c.bf16 %v3928_v28, %v3928_v28  ;;  %v3929_v23 = vmax.f32 %v3835_v60, 0.0 }
 0x244   : > { %v4278_v2 = vsel %vm9764_vm10, %v4270_v27, %v4277_v7  ;;  %v8735_v30 = vpack.c.bf16 %v3926_v25, %v3926_v25  ;;  %v3927_v48 = vmax.f32 %v3827_v47, 0.0  ;;  %v4269_v44 = vsel %vm9764_vm10, %v12006_v57, %v4268_v52  ;;  %v9272_v25 = vld [vmem:[%s14954_s5 + $0xd0] sm:$0xff]  }
 0x245   : > { %v4208_v22 = vrot.slane %v15269_v37, 7  ;;  %v4614_v56 = vsel %vm9663_vm7, %v4609_v43, %v12043_v18  ;;  %4089 = vst.msk [vmem:[%s9532_s24 + $0x28] sm:$0xf] %vm4078_vm6, %v8737_v3  ;;  %4121 = vst.msk [vmem:[#allocation2 + $0x64] sm:$0xf] %vm4078_vm6, %v8737_v3  ;;  %v8738_v28 = vpack.c.bf16 %v3929_v23, %v3929_v23  ;;  %v12369_v18 = vcombine.low %v4269_v44, %v4278_v2  ;;  %v9271_v43 = vld [vmem:[%s14954_s5 + $0x88] sm:$0xff]  }
 0x246   : > { %v12361_v24 = vcombine.low %v4606_v13, %v4614_v56  ;;  %v4618_v19 = vrot.slane %v4617_v10, 4  ;;  %v15270_v7 = vshll.u32 %v12112_v62, 16  ;;  %4087 = vst.msk [vmem:[%s9532_s24 + $0x20] sm:$0xf] %vm4078_vm6, %v8735_v30  ;;  %4119 = vst.msk [vmem:[#allocation2 + $0x54] sm:$0xf] %vm4078_vm6, %v8735_v30  ;;  %v8736_v40 = vpack.c.bf16 %v3927_v48, %v3927_v48  ;;  %8926 = vmatpush3.bf16.msra.mxu0 %v9271_v43 }
 0x247   : > { %v15271_v26 = vshrl.u32 %v12065_v33, 16  ;;  %v15272_v52 = vshrl.u32 %v12112_v62, 16  ;;  %v15273_v59 = vshrl.u32 %v12104_v5, 16  ;;  %4090 = vst.msk [vmem:[%s9532_s24 + $0x2c] sm:$0xf] %vm4078_vm6, %v8738_v28  ;;  %v5307_v10 = vshll.u32 %v12359_v8, 16  ;;  %8927 = vmatprep.subr.bf16.mxu0 %v9272_v25 }
 0x248   : > { %v4619_v27 = vrot.slane %v15270_v7, 5  ;;  %4122 = vst.msk [vmem:[#allocation2 + $0x68] sm:$0xf] %vm4078_vm6, %v8738_v28  ;;  %v15274_v3 = vshrl.u32 %v12130_v20, 16  ;;  %4088 = vst.msk [vmem:[%s9532_s24 + $0x24] sm:$0xf] %vm4078_vm6, %v8736_v40  ;;  %v15276_v48 = vmov %v15270_v7 }
 0x249   : > { %v4287_v57 = vrot.slane %v15271_v26, 7  ;;  %v4296_v60 = vrot.slane %v15272_v52, 7  ;;  %v5501_v13 = vrot.slane %v15273_v59, 7  ;;  %4120 = vst.msk [vmem:[#allocation2 + $0x58] sm:$0xf] %vm4078_vm6, %v8736_v40  ;;  %v15275_v56 = vshll.u32 %v12065_v33, 16 }
 0x24a   : > { %v4620_v47 = vsel %vm9663_vm7, %v4618_v19, %v4619_v27  ;;  %v4622_v37 = vor.u32 %v12253_v12, %v4619_v27  ;;  %v5510_v23 = vrot.slane %v15274_v3, 7  ;;  %v15277_v44 = vshll.u32 %v12104_v5, 16  ;;  %v12416_v52 = vld [vmem:[#allocation2 + $0x90] sm:$0x8] }
 0x24b   : > { %v4290_v2 = vor.u32 %v15275_v56, %v4287_v57  ;;  %v4292_v30 = vrot.slane %v4287_v57, 4  ;;  %v4299_v8 = vor.u32 %v15276_v48, %v4296_v60  ;;  %v15278_v12 = vshll.u32 %v11621_v46, 16  ;;  %v12418_v60 = vld [vmem:[#allocation2 + $0x9c] sm:$0x1] }
 0x24c   : > { %v5504_v28 = vor.u32 %v15277_v44, %v5501_v13  ;;  %v4623_v7 = vrot.slane %v4622_v37, 4  ;;  %v5506_v27 = vrot.slane %v5501_v13, 4  ;;  %v15279_v40 = vshll.u32 %v12130_v20, 16  ;;  %v9273_v13 = vld [vmem:[%s14954_s5 + $0x90] sm:$0xff]   ;;  %v12438_v43 = vld [vmem:[#allocation2 + $0x64] sm:$0xf] }
 0x24d   : > { %v12409_v19 = vor.u32 %v15278_v12, %v12327_v9  ;;  %v4204_v33 = vrot.slane %v12327_v9, 4  ;;  %v15280_v57 = vshll.u32 %v11623_v58, 16  ;;  %v4291_v46 = vsel %vm9764_vm10, %v11988_v61, %v4290_v2  ;;  %15281 = vst [vmem:[#allocation43_spill] sm:$0xff] %v12438_v43  ;;  %v12456_v2 = vld [vmem:[#allocation2 + $0xa0] sm:$0x8]  ;;  %8928 = vmatpush3.bf16.msra.mxu0 %v9273_v13 }
 0x24e   : > { %v5513_v26 = vor.u32 %v15279_v40, %v5510_v23  ;;  %v4300_v59 = vsel %vm9764_vm10, %v4292_v30, %v4299_v8  ;;  %v4628_v58 = vsel %vm9663_vm7, %v4623_v7, %v12030_v41  ;;  %v12448_v23 = vld [vmem:[#allocation2 + $0x54] sm:$0xf]  ;;  %v5008_v56 = vshrl.u32 %v12416_v52, 16 }
 0x24f   : > { %v4211_v62 = vor.u32 %v15280_v57, %v4208_v22  ;;  %v12431_v9 = vcombine.low %v4291_v46, %v4300_v59  ;;  %v5505_v22 = vsel %vm9764_vm10, %v12020_v1, %v5504_v28  ;;  %v12440_v25 = vcombine.low %v4620_v47, %v4628_v58  ;;  %15282 = vst [vmem:[#allocation44_spill] sm:$0xff] %v12448_v23  ;;  %v12461_v8 = vld [vmem:[#allocation2 + $0x68] sm:$0xf] }
 0x250   : > { %v5514_v61 = vsel %vm9764_vm10, %v5506_v27, %v5513_v26  ;;  %v4572_v1 = vsel %vm9663_vm7, %v12319_v42, %v12323_v53  ;;  %v5321_v47 = vshll.u32 %v12418_v60, 16  ;;  %v15041_v48 = vshrl.u32 %v12448_v23, 16  ;;  %15283 = vst [vmem:[#allocation45_spill] sm:$0xff] %v12461_v8  ;;  %v5192_v42 = vld [vmem:[#allocation2 + $0xac] sm:$0x1]  ;;  %v6192_v60 = vpop.permute.xlu1 %6191 }
 0x251   : > { %v12442_v37 = vcombine.low %v5505_v22, %v5514_v61  ;;  %v15039_v44 = vshrl.u32 %v12438_v43, 16  ;;  %v5232_v53 = vsel %vm9663_vm7, %v12298_v54, %v12206_v49  ;;  %v12470_v12 = vld [vmem:[#allocation2 + $0x58] sm:$0xf]  ;;  %v15038_v27 = vshrl.u32 %v12461_v8, 16  ;;  %v12486_v49 = vld [vmem:[#allocation2 + $0x54] sm:$0xf] }
 0x252   : > { %v12472_v7 = vld [vmem:[#allocation2 + $0x58] sm:$0xf]  ;;  %v15285_v40 = vsel %vm9663_vm7, %v12260_v45, %v12022_v29  ;;  %v12482_v57 = vrot.slane %v5307_v10, 5  ;;  %v12488_v54 = vld [vmem:[#allocation2 + $0x54] sm:$0xf]  ;;  %v15286_v46 = vsel %vm9663_vm7, %v12268_v15, %v12238_v38  ;;  %v4203_v29 = vsel %vm9764_vm10, %v12350_v55, %v12409_v19 }
 0x253   : > { %15284 = vst [vmem:[#allocation46_spill] sm:$0xff] %v12472_v7  ;;  %v12480_v26 = vcombine.low %v5232_v53, %v15285_v40  ;;  %v12495_v59 = vcombine.low %v15286_v46, %v4572_v1  ;;  %v4212_v45 = vsel %vm9764_vm10, %v4204_v33, %v4211_v62  ;;  %v5030_v10 = vshrl.u32 %v12456_v2, 16  ;;  %v12510_v22 = vld [vmem:[#allocation2 + $0x58] sm:$0xf] }
 0x254   : > { %v8478_v13 = vcombine.low %v12486_v49, %v12470_v12  ;;  %v4927_v58 = vrot.slane %v15041_v48, 7  ;;  %v4928_v38 = vshll.u32 %v12448_v23, 16  ;;  %v15040_v15 = vshrl.u32 %v12472_v7, 16  ;;  %v9274_v55 = vld [vmem:[%s14954_s5 + $0xd8] sm:$0xff]  }
 0x255   : > { %v4949_v19 = vrot.slane %v15039_v44, 7  ;;  %v4958_v33 = vrot.slane %v15038_v27, 7  ;;  %v5335_v62 = vshll.u32 %v5192_v42, 16  ;;  %v9275_v61 = vld [vmem:[%s14954_s5 + $0x98] sm:$0xff]   ;;  %v15287_v1 = vshrl.u32 %v12226_v17, 16  ;;  %8929 = vmatprep.subr.bf16.mxu0 %v9274_v55 }
 0x256   : > { %6201 = vrot.lane.b32.xlu1 %v8478_v13, %s15112_s21  ;;  %v4930_v53 = vor.u32 %v4928_v38, %v4927_v58  ;;  %v4936_v40 = vrot.slane %v15040_v15, 7  ;;  %v4937_v46 = vshll.u32 %v12472_v7, 16  ;;  %v15044_v52 = vshll.u32 %v12461_v8, 16  ;;  %8930 = vmatpush3.bf16.msra.mxu0 %v9275_v61 }
 0x257   : > { %v12524_v2 = vrot.slane %v15287_v1, 7  ;;  %v15046_v42 = vshll.u32 %v12438_v43, 16  ;;  %v15042_v41 = vshrl.u32 %v12488_v54, 16  ;;  %v15043_v3 = vshll.u32 %v12488_v54, 16 }
 0x258   : > { %v15045_v1 = vshrl.u32 %v12510_v22, 16  ;;  %v4932_v13 = vrot.slane %v4927_v58, 4  ;;  %v4939_v30 = vor.u32 %v4937_v46, %v4936_v40  ;;  %v4961_v28 = vor.u32 %v15044_v52, %v4958_v33 }
 0x259   : > { %v15047_v27 = vshll.u32 %v12510_v22, 16  ;;  %v4952_v44 = vor.u32 %v15046_v42, %v4949_v19  ;;  %v5881_v55 = vrot.slane %v15042_v41, 4  ;;  %v5882_v15 = vrot.slane %v15043_v3, 5 }
 0x25a   : > { %v5887_v48 = vrot.slane %v15045_v1, 4  ;;  %v15288_v58 = vcombine.low %v11848_v4, %v11852_v31  ;;  %v4931_v33 = vsel %vm9764_vm10, %v11986_v63, %v4930_v53  ;;  %v4940_v61 = vsel %vm9764_vm10, %v4932_v13, %v4939_v30  ;;  %v12565_v53 = vld [vmem:[#allocation2 + $0x64] sm:$0xf] }
 0x25b   : > { %v4954_v40 = vrot.slane %v4949_v19, 4  ;;  %v12557_v41 = vrot.slane %v15047_v27, 5  ;;  %v8509_v3 = vcombine.low %v4931_v33, %v4940_v61  ;;  %v5883_v52 = vor.u32 %v5882_v15, %v5881_v55  ;;  %v12594_v33 = vld [vmem:[#allocation2 + $0x64] sm:$0xf] }
 0x25c   : > { %6639 = vrot.lane.b32.xlu1 %v15288_v58, %s15112_s21  ;;  %v8457_v1 = vcombine.low %v4203_v29, %v4212_v45  ;;  %v12559_v42 = vrot.slane %v5008_v56, 11  ;;  %v4307_v4 = vshrl.u32 %v12486_v49, 16  ;;  %v15290_v30 = vshll.u32 %v12226_v17, 16  ;;  %v12587_v45 = vld [vmem:[#allocation2 + $0x68] sm:$0xf] }
 0x25d   : > { %15289 = vst [vmem:[#allocation47_spill] sm:$0xff] %v12557_v41  ;;  %v4962_v58 = vsel %vm9764_vm10, %v4954_v40, %v4961_v28  ;;  %v5888_v63 = vor.u32 %v5887_v48, %v12557_v41  ;;  %v4310_v13 = vshll.u32 %v12486_v49, 16  ;;  %6327 = vrot.lane.b32.xlu0 %v8509_v3, %s15112_s21  ;;  %v12576_v56 = vrot.slane %v5321_v47, 5  ;;  %15291 = vst [vmem:[#allocation48_spill] sm:$0xff] %v12587_v45 }
 0x25e   : > { %v12570_v19 = vor.u32 %v15290_v30, %v12524_v2  ;;  %v12578_v29 = vrot.slane %v5030_v10, 11  ;;  %v12580_v28 = vrot.slane %v5335_v62, 5  ;;  %v4953_v48 = vsel %vm9764_vm10, %v12001_v39, %v4952_v44 }
 0x25f   : > { %v15292_v49 = vshrl.u32 %v12448_v23, 16  ;;  %v5256_v15 = vrot.slane %v4928_v38, 5  ;;  %v4316_v10 = vshrl.u32 %v12470_v12, 16  ;;  %v8510_v62 = vcombine.low %v4953_v48, %v4962_v58 }
 0x260   : > { %6479 = vrot.lane.b32.xlu1 %v11870_v51, %s15112_s21  ;;  %v15048_v55 = vshrl.u32 %v12565_v53, 16  ;;  %v12596_v51 = vld [vmem:[#allocation2 + $0x68] sm:$0xf]  ;;  %v12599_v39 = vsel %vm6719_vm8, %v8457_v1, %v6192_v60  ;;  %v4319_v44 = vshll.u32 %v12470_v12, 16  ;;  %v4629_v61 = vrot.slane %v4307_v4, 4 }
 0x261   : > { %v5255_v3 = vrot.slane %v15292_v49, 4  ;;  %v4630_v58 = vrot.slane %v4310_v13, 5  ;;  %6329 = vrot.lane.b32.xlu0 %v8510_v62, %s15112_s21  ;;  %v12609_v48 = vrot.slane %v4937_v46, 5  ;;  %v15293_v1 = vshrl.u32 %v12472_v7, 16 }
 0x262   : > { %v15294_v12 = vcombine.low %v12104_v5, %v12130_v20  ;;  %v15052_v27 = vshrl.u32 %v12594_v33, 16  ;;  %v15054_v40 = vshll.u32 %v12594_v33, 16  ;;  %v4635_v62 = vrot.slane %v4316_v10, 4 }
 0x263   : > { %v5261_v49 = vrot.slane %v15293_v1, 4  ;;  %v5257_v60 = vor.u32 %v5256_v15, %v5255_v3  ;;  %v12625_v1 = vrot.slane %v15048_v55, 4  ;;  %v12627_v38 = vrot.slane %v5883_v52, 4  ;;  %v12659_v55 = vld [vmem:[#allocation2 + $0xb0] sm:$0x8] }
 0x264   : > { %6641 = vrot.lane.b32.xlu1 %v15294_v12, %s15112_s21  ;;  %v12629_v5 = vrot.slane %v5888_v63, 4  ;;  %v15298_v20 = vshll.u32 %v12565_v53, 16  ;;  %v15300_v12 = vshrl.u32 %v12587_v45, 16  ;;  %v15302_v52 = vshrl.u32 %v12438_v43, 16  ;;  %v15303_v63 = vld [vmem:[#allocation14_spill] sm:$0xff] }
 0x265   : > { %15295 = vst [vmem:[#allocation49_spill] sm:$0xff] %v12625_v1  ;;  %15296 = vst [vmem:[#allocation50_spill] sm:$0xff] %v12627_v38  ;;  %v5262_v30 = vor.u32 %v5261_v49, %v12609_v48  ;;  %v4643_v15 = vrot.slane %v15052_v27, 4  ;;  %v15304_v31 = vshrl.u32 %v12596_v51, 16  ;;  %v15306_v1 = vshll.u32 %v12461_v8, 16 }
 0x266   : > { %15297 = vst [vmem:[#allocation51_spill] sm:$0xff] %v12629_v5  ;;  %v12633_v3 = vrot.slane %v15298_v20, 5  ;;  %v12639_v46 = vrot.slane %v15300_v12, 4  ;;  %v12645_v47 = vrot.slane %v15302_v52, 4  ;;  %v12649_v20 = vrot.slane %v5257_v60, 4 }
 0x267   : > { %v4644_v12 = vrot.slane %v15054_v40, 5  ;;  %v12657_v49 = vrot.slane %v15304_v31, 4  ;;  %v4633_v52 = vrot.slane %v4319_v44, 5  ;;  %v4309_v5 = vrot.slane %v4307_v4, 7  ;;  %v12669_v38 = vld [vmem:[#allocation2 + $0xbc] sm:$0x1] }
 0x268   : > { %15299 = vst [vmem:[#allocation52_spill] sm:$0xff] %v12633_v3  ;;  %15301 = vst [vmem:[#allocation53_spill] sm:$0xff] %v12639_v46  ;;  %6481 = vrot.lane.b32.xlu1 %v15303_v63, %s15112_s21  ;;  %v4631_v46 = vor.u32 %v4630_v58, %v4629_v61  ;;  %v4318_v3 = vrot.slane %v4316_v10, 7  ;;  %v15305_v63 = vshll.u32 %v12438_v43, 16  ;;  %v12667_v27 = vrot.slane %v15306_v1, 5 }
 0x269   : > { %v15307_v40 = vshrl.u32 %v12233_v35, 16  ;;  %v15308_v41 = vshrl.u32 %v12488_v54, 16  ;;  %v15309_v61 = vshrl.u32 %v12461_v8, 16  ;;  %v4636_v58 = vor.u32 %v4635_v62, %v4633_v52 }
 0x26a   : > { %v12663_v60 = vrot.slane %v15305_v63, 5  ;;  %v4632_v10 = vrot.slane %v4631_v46, 4  ;;  %v4312_v63 = vor.u32 %v4310_v13, %v4309_v5  ;;  %v15310_v1 = vcombine.low %v12226_v17, %v12233_v35  ;;  %v9278_v17 = vld [vmem:[%s14954_s5 + $0xa0] sm:$0xff]  }
 0x26b   : > { %v5532_v31 = vrot.slane %v15307_v40, 7  ;;  %v5545_v14 = vrot.slane %v15308_v41, 7  ;;  %v12677_v4 = vrot.slane %v15309_v61, 4  ;;  %v12683_v43 = vrot.slane %v5262_v30, 4  ;;  %v9277_v40 = vld [vmem:[%s14954_s5 + $0xe0] sm:$0xff]  }
 0x26c   : > { %6643 = vrot.lane.b32.xlu1 %v15310_v1, %s15112_s21  ;;  %v4314_v0 = vrot.slane %v4309_v5, 4  ;;  %v4321_v41 = vor.u32 %v4319_v44, %v4318_v3  ;;  %v15311_v8 = vshll.u32 %v12233_v35, 16  ;;  %v5052_v46 = vshrl.u32 %v12659_v55, 16  ;;  %8931 = vmatprep.subr.bf16.mxu0 %v9277_v40  ;;  %v15312_v1 = vld [vmem:[#allocation31_spill] sm:$0xff] }
 0x26d   : > { %v4634_v30 = vsel %vm9663_vm7, %v4632_v10, %v4633_v52  ;;  %v4637_v62 = vrot.slane %v4636_v58, 4  ;;  %v4313_v44 = vsel %vm9764_vm10, %v15312_v1, %v4312_v63  ;;  %v15313_v5 = vrot.slane %v12524_v2, 4  ;;  %8932 = vmatpush3.bf16.msra.mxu0 %v9278_v17  ;;  %v9279_v52 = vld [vmem:[%s14954_s5 + $0xe8] sm:$0xff]   ;;  %v15315_v58 = vld [vmem:[#allocation27_spill] sm:$0xff] }
 0x26e   : > { %v5535_v61 = vor.u32 %v15311_v8, %v5532_v31  ;;  %v4322_v8 = vsel %vm9764_vm10, %v4314_v0, %v4321_v41  ;;  %v15314_v31 = vshll.u32 %v12488_v54, 16  ;;  %v9280_v10 = vld [vmem:[%s14954_s5 + $0xa8] sm:$0xff]   ;;  %v15316_v63 = vsel %vm9764_vm10, %v12008_v32, %v12570_v19  ;;  %v9282_v17 = vld [vmem:[%s14954_s5 + $0xf0] sm:$0xff]   ;;  %8933 = vmatprep.subr.bf16.mxu0 %v9279_v52 }
 0x26f   : > { %v4642_v0 = vsel %vm9663_vm7, %v4637_v62, %v15315_v58  ;;  %v12717_v2 = vcombine.low %v4313_v44, %v4322_v8  ;;  %v15318_v41 = vshrl.u32 %v12510_v22, 16  ;;  %v15319_v1 = vshrl.u32 %v12565_v53, 16 }
 0x270   : > { %v5536_v3 = vsel %vm9764_vm10, %v15313_v5, %v5535_v61  ;;  %v5548_v13 = vor.u32 %v15314_v31, %v5545_v14  ;;  %6483 = vrot.lane.b32.xlu1 %v12480_v26, %s15112_s21  ;;  %v12733_v62 = vcombine.low %v4634_v30, %v4642_v0  ;;  %v15320_v8 = vshrl.u32 %v12587_v45, 16  ;;  %v12739_v5 = vld [vmem:[#allocation2 + $0xcc] sm:$0x1]  ;;  %v15329_v30 = vld [vmem:[#allocation33_spill] sm:$0xff] }
 0x271   : > { %v12724_v40 = vcombine.low %v15316_v63, %v5536_v3  ;;  %v5554_v61 = vrot.slane %v15318_v41, 7  ;;  %v5567_v44 = vrot.slane %v15319_v1, 7  ;;  %v4645_v19 = vor.u32 %v4644_v12, %v4643_v15  ;;  %8934 = vmatpush3.bf16.msra.mxu0 %v9280_v10 }
 0x272   : > { %v5576_v32 = vrot.slane %v15320_v8, 7  ;;  %v5550_v3 = vrot.slane %v5545_v14, 4  ;;  %v15321_v31 = vshll.u32 %v12510_v22, 16  ;;  %v15322_v58 = vshll.u32 %v12596_v51, 16  ;;  %v9283_v14 = vld [vmem:[%s14954_s5 + $0xb0] sm:$0xff]   ;;  %8935 = vmatprep.subr.bf16.mxu0 %v9282_v17 }
 0x273   : > { %15317 = vst [vmem:[#allocation14_spill] sm:$0xff] %v12724_v40  ;;  %v15323_v0 = vshll.u32 %v12565_v53, 16  ;;  %v5572_v1 = vrot.slane %v5567_v44, 4  ;;  %v15324_v8 = vshll.u32 %v12587_v45, 16  ;;  %v15325_v12 = vshrl.u32 %v12594_v33, 16 }
 0x274   : > { %v5557_v26 = vor.u32 %v15321_v31, %v5554_v61  ;;  %v4647_v63 = vrot.slane %v15322_v58, 5  ;;  %v15326_v61 = vld [vmem:[#allocation32_spill] sm:$0xff]  ;;  %v5363_v10 = vshll.u32 %v12739_v5, 16 }
 0x275   : > { %v5570_v41 = vor.u32 %v15323_v0, %v5567_v44  ;;  %v5579_v15 = vor.u32 %v15324_v8, %v5576_v32  ;;  %v4331_v52 = vrot.slane %v15325_v12, 7  ;;  %v5549_v31 = vsel %vm9764_vm10, %v15326_v61, %v5548_v13  ;;  %v12767_v8 = vld [vmem:[#allocation2 + $0xc0] sm:$0x8]  ;;  %8936 = vmatpush3.bf16.msra.mxu0 %v9283_v14 }
 0x276   : > { %v5558_v58 = vsel %vm9764_vm10, %v5550_v3, %v5557_v26  ;;  %v4646_v0 = vrot.slane %v4645_v19, 4  ;;  %v4650_v44 = vor.u32 %v12657_v49, %v4647_v63  ;;  %v15327_v32 = vcombine.low %v12488_v54, %v12510_v22  ;;  %v9284_v22 = vld [vmem:[%s14954_s5 + $0xf8] sm:$0xff]   ;;  %v9073_v3 = vpop.f32.mrb[12].mxu0 }
 0x277   : > { %v12769_v12 = vcombine.low %v5549_v31, %v5558_v58  ;;  %v5571_v13 = vsel %vm9764_vm10, %v15329_v30, %v5570_v41  ;;  %v5580_v19 = vsel %vm9764_vm10, %v5572_v1, %v5579_v15  ;;  %v5260_v54 = vsel %vm9663_vm7, %v12649_v20, %v12609_v48  ;;  %v6320_v41 = vpop.permute.xlu0 %6319  ;;  %v3839_v31 = vpop.f32.mrb[13].mxu0  ;;  %v15337_v26 = vld [vmem:[#allocation24_spill] sm:$0xff]  ;;  %8937 = vmatprep.subr.bf16.mxu0 %v9284_v22 }
 0x278   : > { %6645 = vrot.lane.b32.xlu1 %v15327_v32, %s15112_s21  ;;  %v12783_v49 = vcombine.low %v5571_v13, %v5580_v19  ;;  %v4648_v17 = vsel %vm9663_vm7, %v4646_v0, %v4647_v63  ;;  %v4651_v5 = vrot.slane %v4650_v44, 4  ;;  %v5276_v30 = vor.u32 %v12677_v4, %v12667_v27  ;;  %v9285_v4 = vld [vmem:[%s14954_s5 + $0xb8] sm:$0xff]   ;;  %v15333_v0 = vld [vmem:[#allocation34_spill] sm:$0xff]  ;;  %v9074_v13 = vpop.f32.mrb[14].mxu0  ;;  %v15334_v19 = vld [vmem:[#allocation37_spill] sm:$0xff] }
 0x279   : > { %15328 = vst [vmem:[#allocation31_spill] sm:$0xff] %v12769_v12  ;;  %v15331_v48 = vshll.u32 %v12594_v33, 16  ;;  %v15332_v1 = vshrl.u32 %v12596_v51, 16  ;;  %v3848_v61 = vadd.f32 %v12336_v34, %v9073_v3  ;;  %v6786_v63 = vsel %vm6719_vm8, %v12495_v59, %v6320_v41  ;;  %v3842_v58 = vpop.f32.mrb[15].mxu0  ;;  %8938 = vmatpush3.bf16.msra.mxu0 %v9285_v4  ;;  %v5444_v4 = vld [vmem:[#allocation2 + $0x90] sm:$0x8] }
 0x27a   : > { %15330 = vst [vmem:[#allocation27_spill] sm:$0xff] %v12783_v49  ;;  %v4656_v44 = vsel %vm9663_vm7, %v4651_v5, %v15333_v0  ;;  %v3840_v32 = vadd.f32 %v12336_v34, %v3839_v31  ;;  %7351 = vmatprep.mubr.bf16.mxu1 %v6786_v63  ;;  %v4336_v59 = vrot.slane %v4331_v52, 4  ;;  %v15336_v14 = vshll.u32 %v12596_v51, 16  ;;  %v4819_v0 = vld [vmem:[#allocation2 + $0xd0] sm:$0x8] }
 0x27b   : > { %v4334_v20 = vor.u32 %v15331_v48, %v4331_v52  ;;  %v4340_v15 = vrot.slane %v15332_v1, 7  ;;  %v12808_v3 = vcombine.low %v4648_v17, %v4656_v44  ;;  %v3932_v48 = vmax.f32 %v3848_v61, 0.0  ;;  %7352 = vmatmul.mubr.bf16.vlgmr.msra.gmra.mrb[0].mxu1 %v12599_v39  ;;  %v5438_v52 = vld [vmem:[#allocation2 + $0x70] sm:$0x8]  ;;  %v4550_v17 = vld [vmem:[#allocation2 + $0x7c] sm:$0x1]  ;;  %v6322_v61 = vpop.permute.xlu0 %6321 }
 0x27c   : > { %6485 = vrot.lane.b32.xlu1 %v15334_v19, %s15112_s21  ;;  %v3851_v1 = vadd.f32 %v12336_v34, %v9074_v13  ;;  %v5268_v5 = vsel %vm9663_vm7, %v12683_v43, %v15337_v26  ;;  %v12820_v31 = vrot.slane %v5052_v46, 11  ;;  %v3930_v63 = vmax.f32 %v3840_v32, 0.0  ;;  %v15338_v44 = vld [vmem:[#allocation36_spill] sm:$0xff]  ;;  %v4164_v39 = vld [vmem:[#allocation2 + $0x70] sm:$0x8] }
 0x27d   : > { %15335 = vst [vmem:[#allocation32_spill] sm:$0xff] %v12808_v3  ;;  %v4343_v41 = vor.u32 %v15336_v14, %v4340_v15  ;;  %v3843_v15 = vadd.f32 %v12336_v34, %v3842_v58  ;;  %v4335_v13 = vsel %vm9764_vm10, %v15338_v44, %v4334_v20  ;;  %v8741_v55 = vpack.c.bf16 %v3932_v48, %v3932_v48  ;;  %v15339_v26 = vld [vmem:[#allocation15_spill] sm:$0xff]  ;;  %v5441_v58 = vld [vmem:[#allocation2 + $0x80] sm:$0x8]  ;;  %v4551_v19 = vld [vmem:[#allocation2 + $0x8c] sm:$0x1] }
 0x27e   : > { %v3933_v46 = vmax.f32 %v3851_v1, 0.0  ;;  %v6790_v22 = vsel %vm6719_vm8, %v15339_v26, %v6322_v61  ;;  %v8739_v14 = vpack.c.bf16 %v3930_v63, %v3930_v63  ;;  %v15341_v20 = vcombine.low %v12565_v53, %v12587_v45  ;;  %v5447_v53 = vld [vmem:[#allocation2 + $0xa0] sm:$0x8] }
 0x27f   : > { %v4344_v43 = vsel %vm9764_vm10, %v4336_v59, %v4343_v41  ;;  %v3931_v3 = vmax.f32 %v3843_v15, 0.0  ;;  %v6194_v59 = vpop.permute.xlu1 %6193  ;;  %7359 = vmatprep.mubr.bf16.mxu1 %v6790_v22  ;;  %v15342_v41 = vshll.u32 %v12669_v38, 16  ;;  %v12840_v1 = vrot.slane %v5363_v10, 5  ;;  %4093 = vst.msk [vmem:[%s9532_s24 + $0x38] sm:$0xf] %vm4078_vm6, %v8741_v55 }
 0x280   : > { %v12830_v32 = vcombine.low %v4335_v13, %v4344_v43  ;;  %6647 = vrot.lane.b32.xlu1 %v15341_v20, %s15112_s21  ;;  %4125 = vst.msk [vmem:[#allocation2 + $0x84] sm:$0xf] %vm4078_vm6, %v8741_v55  ;;  %v8742_v63 = vpack.c.bf16 %v3933_v46, %v3933_v46  ;;  %v8541_v15 = vcombine.low %v5260_v54, %v5268_v5  ;;  %v5277_v61 = vrot.slane %v5276_v30, 4  ;;  %v4167_v13 = vld [vmem:[#allocation2 + $0x80] sm:$0x8]  ;;  %v15344_v5 = vld [vmem:[#allocation16_spill] sm:$0xff] }
 0x281   : > { %v12838_v48 = vrot.slane %v15342_v41, 5  ;;  %v5096_v44 = vshrl.u32 %v4819_v0, 16  ;;  %4091 = vst.msk [vmem:[%s9532_s24 + $0x30] sm:$0xf] %vm4078_vm6, %v8739_v14  ;;  %4123 = vst.msk [vmem:[#allocation2 + $0x74] sm:$0xf] %vm4078_vm6, %v8739_v14  ;;  %v8740_v38 = vpack.c.bf16 %v3931_v3, %v3931_v3  ;;  %v15343_v54 = vor.u32 %v12663_v60, %v12645_v47 }
 0x282   : > { %15340 = vst [vmem:[#allocation33_spill] sm:$0xff] %v12830_v32  ;;  %v5582_v10 = vshrl.u32 %v5438_v52, 16  ;;  %v4667_v43 = vshll.u32 %v4550_v17, 16  ;;  %v4346_v26 = vshrl.u32 %v4164_v39, 16  ;;  %v4170_v22 = vld [vmem:[#allocation2 + $0x90] sm:$0x8]  ;;  %v6726_v0 = vsel %vm6719_vm8, %v15344_v5, %v6194_v59 }
 0x283   : > { %4094 = vst.msk [vmem:[%s9532_s24 + $0x3c] sm:$0xf] %vm4078_vm6, %v8742_v63  ;;  %4126 = vst.msk [vmem:[#allocation2 + $0x88] sm:$0xf] %vm4078_vm6, %v8742_v63  ;;  %v5272_v30 = vrot.slane %v15343_v54, 4  ;;  %v5604_v55 = vshrl.u32 %v5441_v58, 16  ;;  %v15345_v39 = vor.u32 %v12288_v11, %v12279_v50  ;;  %7360 = vmatmul.mubr.bf16.gmra.mrb[4].mxu1 %v6726_v0 }
 0x284   : > { %v5626_v46 = vshrl.u32 %v5444_v4, 16  ;;  %4092 = vst.msk [vmem:[%s9532_s24 + $0x34] sm:$0xf] %vm4078_vm6, %v8740_v38  ;;  %4124 = vst.msk [vmem:[#allocation2 + $0x78] sm:$0xf] %vm4078_vm6, %v8740_v38  ;;  %6487 = vrot.lane.b32.xlu1 %v8541_v15, %s15112_s21  ;;  %v4681_v3 = vshll.u32 %v4551_v19, 16 }
 0x285   : > { %v5648_v52 = vshrl.u32 %v5447_v53, 16  ;;  %v4368_v17 = vshrl.u32 %v4167_v13, 16  ;;  %v12863_v14 = vrot.slane %v15345_v39, 4  ;;  %v15347_v47 = vld [vmem:[#allocation25_spill] sm:$0xff]  ;;  %v15348_v58 = vshrl.u32 %v12767_v8, 16 }
 0x286   : > { %v5282_v60 = vsel %vm9663_vm7, %v5277_v61, %v15347_v47  ;;  %v4552_v59 = vld [vmem:[#allocation2 + $0x9c] sm:$0x1]  ;;  %v4390_v41 = vshrl.u32 %v4170_v22, 16  ;;  %v15349_v19 = vshll.u32 %v12233_v35, 16  ;;  %v12876_v63 = vrot.slane %v5096_v44, 11 }
 0x287   : > { %15346 = vst [vmem:[#allocation34_spill] sm:$0xff] %v12863_v14  ;;  %v12870_v20 = vrot.slane %v15348_v58, 11  ;;  %v12878_v50 = vrot.slane %v5582_v10, 11  ;;  %v12880_v11 = vrot.slane %v4667_v43, 5  ;;  %v12882_v15 = vrot.slane %v4346_v26, 11  ;;  %v6196_v43 = vpop.permute.xlu1 %6195 }
 0x288   : > { %v12874_v4 = vrot.slane %v15349_v19, 5  ;;  %15351 = vst [vmem:[#allocation24_spill] sm:$0xff] %v12876_v63  ;;  %v12884_v61 = vrot.slane %v5604_v55, 11  ;;  %v12886_v53 = vrot.slane %v5626_v46, 11  ;;  %v4553_v8 = vld [vmem:[#allocation2 + $0xac] sm:$0x1]  ;;  %v5274_v46 = vsel %vm9663_vm7, %v5272_v30, %v12667_v27 }
 0x289   : > { %v4173_v13 = vld [vmem:[#allocation2 + $0xa0] sm:$0x8]  ;;  %v12894_v10 = vld [vmem:[#allocation2 + $0x84] sm:$0xf]  ;;  %v12896_v22 = vrot.slane %v4681_v3, 5  ;;  %v12898_v26 = vrot.slane %v5648_v52, 11 }
 0x28a   : > { %15350 = vst [vmem:[#allocation37_spill] sm:$0xff] %v12874_v4  ;;  %15353 = vst [vmem:[#allocation36_spill] sm:$0xff] %v12894_v10  ;;  %v12900_v54 = vrot.slane %v4368_v17, 11  ;;  %v4695_v5 = vshll.u32 %v4552_v59, 16  ;;  %v12902_v0 = vld [vmem:[#allocation2 + $0x74] sm:$0xf]  ;;  %v8542_v59 = vcombine.low %v5274_v46, %v5282_v60 }
 0x28b   : > { %15354 = vst [vmem:[#allocation15_spill] sm:$0xff] %v12896_v22  ;;  %15355 = vst [vmem:[#allocation16_spill] sm:$0xff] %v12902_v0  ;;  %v5195_v39 = vld [vmem:[#allocation2 + $0xdc] sm:$0x1]  ;;  %v12908_v47 = vrot.slane %v4390_v41, 11  ;;  %v4969_v58 = vshrl.u32 %v12902_v0, 16 }
 0x28c   : > { %v12913_v52 = vld [vmem:[#allocation2 + $0x74] sm:$0xf]  ;;  %v12915_v17 = vld [vmem:[#allocation2 + $0x88] sm:$0xf]  ;;  %v4709_v19 = vshll.u32 %v4553_v8, 16  ;;  %v4412_v3 = vshrl.u32 %v4173_v13, 16 }
 0x28d   : > { %15356 = vst [vmem:[#allocation25_spill] sm:$0xff] %v12908_v47  ;;  %15357 = vst [vmem:[#allocation54_spill] sm:$0xff] %v12915_v17  ;;  %v12917_v35 = vld [vmem:[#allocation2 + $0x78] sm:$0xf]  ;;  %v5000_v27 = vshrl.u32 %v12915_v17, 16  ;;  %v15360_v30 = vld [vmem:[#allocation18_spill] sm:$0xff] }
 0x28e   : > { %15358 = vst [vmem:[#allocation55_spill] sm:$0xff] %v12917_v35  ;;  %v12919_v38 = vld [vmem:[#allocation2 + $0x78] sm:$0xf]  ;;  %v12924_v41 = vsel %vm6719_vm8, %v15360_v30, %v6196_v43  ;;  %v4971_v45 = vrot.slane %v4969_v58, 7  ;;  %v4972_v14 = vshll.u32 %v12902_v0, 16  ;;  %v4978_v60 = vshrl.u32 %v12917_v35, 16 }
 0x28f   : > { %15359 = vst [vmem:[#allocation56_spill] sm:$0xff] %v12919_v38  ;;  %v15361_v8 = vshrl.u32 %v12894_v10, 16  ;;  %v8574_v4 = vcombine.low %v12913_v52, %v12919_v38  ;;  %v4994_v44 = vshll.u32 %v12894_v10, 16  ;;  %v5377_v32 = vshll.u32 %v5195_v39, 16  ;;  %v12939_v7 = vld [vmem:[#allocation2 + $0x74] sm:$0xf] }
 0x290   : > { %v12935_v43 = vrot.slane %v4695_v5, 5  ;;  %v4974_v30 = vor.u32 %v4972_v14, %v4971_v45  ;;  %v4980_v63 = vrot.slane %v4978_v60, 7  ;;  %v4981_v13 = vshll.u32 %v12917_v35, 16  ;;  %v12948_v47 = vld [vmem:[#allocation2 + $0x78] sm:$0xf] }
 0x291   : > { %v4993_v46 = vrot.slane %v15361_v8, 7  ;;  %6649 = vrot.lane.b32.xlu1 %v8574_v4, %s15112_s21  ;;  %v5002_v49 = vrot.slane %v5000_v27, 7  ;;  %v12944_v12 = vrot.slane %v4709_v19, 5  ;;  %v4976_v39 = vrot.slane %v4971_v45, 4  ;;  %v15366_v8 = vld [vmem:[#allocation26_spill] sm:$0xff] }
 0x292   : > { %15362 = vst [vmem:[#allocation18_spill] sm:$0xff] %v12935_v43  ;;  %v4983_v5 = vor.u32 %v4981_v13, %v4980_v63  ;;  %v5003_v16 = vshll.u32 %v12915_v17, 16  ;;  %v12951_v40 = vrot.slane %v5377_v32, 5  ;;  %v12953_v23 = vrot.slane %v4412_v3, 11  ;;  %v12964_v17 = vld [vmem:[#allocation2 + $0x88] sm:$0xf] }
 0x293   : > { %15363 = vst [vmem:[#allocation57_spill] sm:$0xff] %v12944_v12  ;;  %v4996_v21 = vor.u32 %v4994_v44, %v4993_v46  ;;  %v4975_v4 = vsel %vm9764_vm10, %v15366_v8, %v4974_v30  ;;  %v15367_v63 = vshrl.u32 %v12913_v52, 16  ;;  %15369 = vst [vmem:[#allocation60_spill] sm:$0xff] %v12964_v17  ;;  %v15370_v32 = vshll.u32 %v12913_v52, 16  ;;  %v12976_v8 = vld [vmem:[#allocation2 + $0x84] sm:$0xf] }
 0x294   : > { %15364 = vst [vmem:[#allocation58_spill] sm:$0xff] %v12951_v40  ;;  %15365 = vst [vmem:[#allocation59_spill] sm:$0xff] %v12953_v23  ;;  %v4984_v45 = vsel %vm9764_vm10, %v4976_v39, %v4983_v5  ;;  %v5005_v43 = vor.u32 %v5003_v16, %v5002_v49  ;;  %v15372_v3 = vshrl.u32 %v12919_v38, 16  ;;  %v15374_v39 = vld [vmem:[#allocation41_spill] sm:$0xff]  ;;  %v4998_v5 = vrot.slane %v4993_v46, 4 }
 0x295   : > { %v12962_v19 = vrot.slane %v15367_v63, 4  ;;  %v8511_v12 = vcombine.low %v4975_v4, %v4984_v45  ;;  %v12968_v55 = vrot.slane %v15370_v32, 5  ;;  %6489 = vrot.lane.b32.xlu1 %v8542_v59, %s15112_s21  ;;  %v4997_v49 = vsel %vm9764_vm10, %v15374_v39, %v4996_v21 }
 0x296   : > { %v12972_v40 = vrot.slane %v15372_v3, 4  ;;  %v15375_v63 = vshrl.u32 %v12939_v7, 16  ;;  %v8575_v59 = vcombine.low %v12976_v8, %v12964_v17  ;;  %v5283_v3 = vrot.slane %v4969_v58, 4 }
 0x297   : > { %15368 = vst [vmem:[#allocation26_spill] sm:$0xff] %v12962_v19  ;;  %15371 = vst [vmem:[#allocation61_spill] sm:$0xff] %v12968_v55  ;;  %6331 = vrot.lane.b32.xlu0 %v8511_v12, %s15112_s21  ;;  %v5284_v30 = vrot.slane %v4972_v14, 5  ;;  %v5287_v46 = vrot.slane %v4981_v13, 5  ;;  %v5289_v39 = vrot.slane %v4978_v60, 4  ;;  %v15376_v45 = vshll.u32 %v12939_v7, 16 }
 0x298   : > { %15373 = vst [vmem:[#allocation62_spill] sm:$0xff] %v12972_v40  ;;  %v12986_v32 = vrot.slane %v15375_v63, 4  ;;  %v5006_v40 = vsel %vm9764_vm10, %v4998_v5, %v5005_v43  ;;  %v8480_v12 = vcombine.low %v12939_v7, %v12948_v47  ;;  %v15377_v14 = vshrl.u32 %v12948_v47, 16  ;;  %v13007_v13 = vld [vmem:[#allocation2 + $0x84] sm:$0xf]  ;;  %v9077_v19 = vpop.f32.mrb[16].mxu0 }
 0x299   : > { %v12995_v4 = vrot.slane %v15376_v45, 5  ;;  %6651 = vrot.lane.b32.xlu1 %v8575_v59, %s15112_s21  ;;  %v5285_v58 = vor.u32 %v5284_v30, %v5283_v3  ;;  %v5290_v43 = vor.u32 %v5289_v39, %v5287_v46  ;;  %v13005_v5 = vrot.slane %v5003_v16, 5 }
 0x29a   : > { %v13003_v55 = vrot.slane %v15377_v14, 4  ;;  %v5303_v60 = vrot.slane %v5000_v27, 4  ;;  %v15378_v45 = vcombine.low %v12594_v33, %v12596_v51  ;;  %v8512_v21 = vcombine.low %v4997_v49, %v5006_v40  ;;  %v3855_v33 = vpop.f32.mrb[17].mxu0  ;;  %v13026_v49 = vld [vmem:[#allocation2 + $0x88] sm:$0xf] }
 0x29b   : > { %v5286_v63 = vrot.slane %v5285_v58, 4  ;;  %v15379_v59 = vshrl.u32 %v12894_v10, 16  ;;  %v5298_v3 = vrot.slane %v4994_v44, 5  ;;  %v15380_v27 = vshrl.u32 %v12976_v8, 16 }
 0x29c   : > { %6203 = vrot.lane.b32.xlu0 %v15378_v45, %s15112_s21  ;;  %v5291_v23 = vrot.slane %v5290_v43, 4  ;;  %v3864_v22 = vadd.f32 %v12336_v34, %v9077_v19  ;;  %v15382_v51 = vshll.u32 %v12976_v8, 16  ;;  %v3856_v45 = vadd.f32 %v12336_v34, %v3855_v33  ;;  %v15384_v43 = vld [vmem:[#allocation42_spill] sm:$0xff] }
 0x29d   : > { %v5297_v30 = vrot.slane %v15379_v59, 4  ;;  %v13019_v39 = vrot.slane %v15380_v27, 4  ;;  %v9078_v59 = vpop.f32.mrb[18].mxu0  ;;  %v5288_v27 = vsel %vm9663_vm7, %v5286_v63, %v5287_v46  ;;  %v5304_v16 = vor.u32 %v5303_v60, %v13005_v5 }
 0x29e   : > { %v13024_v40 = vrot.slane %v15382_v51, 5  ;;  %v5296_v19 = vsel %vm9663_vm7, %v5291_v23, %v15384_v43  ;;  %v3936_v51 = vmax.f32 %v3864_v22, 0.0  ;;  %v3867_v14 = vadd.f32 %v12336_v34, %v9078_v59 }
 0x29f   : > { %15381 = vst [vmem:[#allocation41_spill] sm:$0xff] %v13019_v39  ;;  %v8543_v58 = vcombine.low %v5288_v27, %v5296_v19  ;;  %v5299_v44 = vor.u32 %v5298_v3, %v5297_v30  ;;  %v3934_v33 = vmax.f32 %v3856_v45, 0.0  ;;  %v15385_v46 = vshrl.u32 %v12964_v17, 16 }
 0x2a0   : > { %15383 = vst [vmem:[#allocation63_spill] sm:$0xff] %v13024_v40  ;;  %v3858_v40 = vpop.f32.mrb[19].mxu0  ;;  %6333 = vrot.lane.b32.xlu0 %v8512_v21, %s15112_s21  ;;  %v15072_v23 = vshrl.u32 %v13026_v49, 16  ;;  %v8745_v43 = vpack.c.bf16 %v3936_v51, %v3936_v51  ;;  %v3937_v22 = vmax.f32 %v3867_v14, 0.0  ;;  %v15387_v21 = vshrl.u32 %v13007_v13, 16 }
 0x2a1   : > { %v3859_v39 = vadd.f32 %v12336_v34, %v3858_v40  ;;  %v13042_v63 = vrot.slane %v15385_v46, 4  ;;  %6491 = vrot.lane.b32.xlu1 %v8543_v58, %s15112_s21  ;;  %v8743_v30 = vpack.c.bf16 %v3934_v33, %v3934_v33  ;;  %v5305_v34 = vrot.slane %v5304_v16, 4  ;;  %v6198_v46 = vpop.permute.xlu1 %6197 }
 0x2a2   : > { %v13049_v59 = vrot.slane %v15387_v21, 4  ;;  %v15388_v40 = vshll.u32 %v13007_v13, 16  ;;  %4097 = vst.msk [vmem:[%s9532_s24 + $0x48] sm:$0xf] %vm4078_vm6, %v8745_v43  ;;  %4129 = vst.msk [vmem:[#allocation2 + $0xa4] sm:$0xf] %vm4078_vm6, %v8745_v43  ;;  %v8746_v14 = vpack.c.bf16 %v3937_v22, %v3937_v22 }
 0x2a3   : > { %15386 = vst [vmem:[#allocation42_spill] sm:$0xff] %v13042_v63  ;;  %v3935_v3 = vmax.f32 %v3859_v39, 0.0  ;;  %v5300_v58 = vrot.slane %v5299_v44, 4  ;;  %v15389_v27 = vshrl.u32 %v12913_v52, 16  ;;  %v15390_v51 = vshrl.u32 %v12919_v38, 16 }
 0x2a4   : > { %v13053_v45 = vrot.slane %v15388_v40, 5  ;;  %6205 = vrot.lane.b32.xlu0 %v8480_v12, %s15112_s21  ;;  %4095 = vst.msk [vmem:[%s9532_s24 + $0x40] sm:$0xf] %vm4078_vm6, %v8743_v30  ;;  %4127 = vst.msk [vmem:[#allocation2 + $0x94] sm:$0xf] %vm4078_vm6, %v8743_v30  ;;  %v13068_v33 = vrot.slane %v15072_v23, 4  ;;  %v4659_v44 = vor.u32 %v12995_v4, %v12986_v32  ;;  %v5310_v4 = vsel %vm9663_vm7, %v5305_v34, %v12482_v57 }
 0x2a5   : > { %v5589_v19 = vrot.slane %v15389_v27, 7  ;;  %v5598_v39 = vrot.slane %v15390_v51, 7  ;;  %v8744_v16 = vpack.c.bf16 %v3935_v3, %v3935_v3  ;;  %v5196_v43 = vld [vmem:[#allocation2 + $0xec] sm:$0x1]  ;;  %v4822_v12 = vld [vmem:[#allocation2 + $0xe0] sm:$0x8] }
 0x2a6   : > { %v15391_v22 = vshll.u32 %v12948_v47, 16  ;;  %4098 = vst.msk [vmem:[%s9532_s24 + $0x4c] sm:$0xf] %vm4078_vm6, %v8746_v14  ;;  %4130 = vst.msk [vmem:[#allocation2 + $0xa8] sm:$0xf] %vm4078_vm6, %v8746_v14  ;;  %v15392_v30 = vshll.u32 %v12913_v52, 16 }
 0x2a7   : > { %v5594_v40 = vrot.slane %v5589_v19, 4  ;;  %v15393_v27 = vshll.u32 %v12919_v38, 16  ;;  %v4825_v23 = vld [vmem:[#allocation2 + $0xf0] sm:$0x8]  ;;  %v15394_v60 = vshrl.u32 %v12939_v7, 16  ;;  %v4660_v32 = vrot.slane %v4659_v44, 4 }
 0x2a8   : > { %v4661_v21 = vrot.slane %v15391_v22, 5  ;;  %v5592_v3 = vor.u32 %v15392_v30, %v5589_v19  ;;  %4096 = vst.msk [vmem:[%s9532_s24 + $0x44] sm:$0xf] %vm4078_vm6, %v8744_v16  ;;  %4128 = vst.msk [vmem:[#allocation2 + $0x98] sm:$0xf] %vm4078_vm6, %v8744_v16  ;;  %v5391_v19 = vshll.u32 %v5196_v43, 16  ;;  %v6324_v43 = vpop.permute.xlu0 %6323 }
 0x2a9   : > { %v5601_v51 = vor.u32 %v15393_v27, %v5598_v39  ;;  %v4353_v63 = vrot.slane %v15394_v60, 7  ;;  %v5118_v39 = vshrl.u32 %v4822_v12, 16  ;;  %v5140_v30 = vshrl.u32 %v4825_v23, 16 }
 0x2aa   : > { %v4664_v14 = vor.u32 %v13003_v55, %v4661_v21  ;;  %v5593_v60 = vsel %vm9764_vm10, %v12878_v50, %v5592_v3  ;;  %v4662_v57 = vsel %vm9663_vm7, %v4660_v32, %v4661_v21  ;;  %v5302_v55 = vsel %vm9663_vm7, %v5300_v58, %v13005_v5  ;;  %v15398_v21 = vld [vmem:[#allocation17_spill] sm:$0xff] }
 0x2ab   : > { %v5602_v22 = vsel %vm9764_vm10, %v5594_v40, %v5601_v51  ;;  %v15396_v12 = vshll.u32 %v12939_v7, 16  ;;  %v15397_v50 = vshrl.u32 %v12948_v47, 16  ;;  %v8544_v27 = vcombine.low %v5302_v55, %v5310_v4  ;;  %v6200_v51 = vpop.permute.xlu1 %6199 }
 0x2ac   : > { %v13097_v16 = vcombine.low %v5593_v60, %v5602_v22  ;;  %v4665_v34 = vrot.slane %v4664_v14, 4  ;;  %v6794_v23 = vsel %vm6719_vm8, %v15398_v21, %v6324_v43  ;;  %v13119_v14 = vld [vmem:[#allocation2 + $0x94] sm:$0xf]  ;;  %v13121_v60 = vld [vmem:[#allocation2 + $0xa4] sm:$0xf]  ;;  %v13123_v22 = vrot.slane %v5391_v19, 5 }
 0x2ad   : > { %v13106_v44 = vor.u32 %v15396_v12, %v4353_v63  ;;  %v4362_v3 = vrot.slane %v15397_v50, 7  ;;  %15401 = vst [vmem:[#allocation17_spill] sm:$0xff] %v13119_v14  ;;  %7367 = vmatprep.mubr.bf16.mxu1 %v6794_v23  ;;  %v4358_v4 = vrot.slane %v4353_v63, 4  ;;  %v15404_v55 = vshll.u32 %v12948_v47, 16  ;;  %v13129_v50 = vld [vmem:[#allocation2 + $0x94] sm:$0xf] }
 0x2ae   : > { %15395 = vst [vmem:[#allocation64_spill] sm:$0xff] %v13097_v16  ;;  %v4670_v5 = vsel %vm9663_vm7, %v4665_v34, %v12880_v11  ;;  %15402 = vst [vmem:[#allocation65_spill] sm:$0xff] %v13123_v22  ;;  %v5013_v11 = vshrl.u32 %v13119_v14, 16  ;;  %7368 = vmatmul.mubr.bf16.gmra.mrb[8].mxu1 %v12924_v41  ;;  %v13133_v34 = vrot.slane %v5118_v39, 11  ;;  %v13135_v21 = vrot.slane %v5140_v30, 11 }
 0x2af   : > { %v13125_v12 = vcombine.low %v4662_v57, %v4670_v5  ;;  %v4365_v43 = vor.u32 %v15404_v55, %v4362_v3  ;;  %v15407_v23 = vshrl.u32 %v12976_v8, 16  ;;  %v13141_v57 = vld [vmem:[#allocation2 + $0x98] sm:$0xf]  ;;  %v13145_v47 = vld [vmem:[#allocation2 + $0xa8] sm:$0xf]  ;;  %v13149_v3 = vsel %vm6719_vm8, %v12369_v18, %v6198_v46 }
 0x2b0   : > { %15405 = vst [vmem:[#allocation67_spill] sm:$0xff] %v13133_v34  ;;  %15406 = vst [vmem:[#allocation68_spill] sm:$0xff] %v13135_v21  ;;  %v13143_v63 = vld [vmem:[#allocation2 + $0x98] sm:$0xf]  ;;  %v13153_v41 = vsel %vm6719_vm8, %v12431_v9, %v6200_v51  ;;  %v5016_v5 = vshll.u32 %v13119_v14, 16  ;;  %v15411_v18 = vshrl.u32 %v12964_v17, 16  ;;  %v8576_v51 = vcombine.low %v13129_v50, %v13141_v57 }
 0x2b1   : > { %15403 = vst [vmem:[#allocation66_spill] sm:$0xff] %v13125_v12  ;;  %v13139_v19 = vrot.slane %v15407_v23, 7  ;;  %15408 = vst [vmem:[#allocation69_spill] sm:$0xff] %v13141_v57  ;;  %v13161_v30 = vsel %vm9764_vm10, %v4358_v4, %v4365_v43  ;;  %v5015_v23 = vrot.slane %v5013_v11, 7  ;;  %v5022_v7 = vshrl.u32 %v13143_v63, 16 }
 0x2b2   : > { %15409 = vst [vmem:[#allocation70_spill] sm:$0xff] %v13143_v63  ;;  %15410 = vst [vmem:[#allocation71_spill] sm:$0xff] %v13145_v47  ;;  %v13167_v46 = vrot.slane %v15411_v18, 7  ;;  %v5025_v4 = vshll.u32 %v13143_v63, 16  ;;  %v13175_v43 = vld [vmem:[#allocation2 + $0xa4] sm:$0xf]  ;;  %6653 = vrot.lane.b32.xlu1 %v8576_v51, %s15112_s21  ;;  %v8577_v18 = vcombine.low %v13121_v60, %v13145_v47 }
 0x2b3   : > { %15412 = vst [vmem:[#allocation72_spill] sm:$0xff] %v13175_v43  ;;  %v13181_v55 = vld [vmem:[#allocation2 + $0xa8] sm:$0xf]  ;;  %v5018_v9 = vor.u32 %v5016_v5, %v5015_v23  ;;  %v5024_v58 = vrot.slane %v5022_v7, 7  ;;  %v5311_v38 = vrot.slane %v5013_v11, 4  ;;  %v5312_v10 = vrot.slane %v5016_v5, 5 }
 0x2b4   : > { %15413 = vst [vmem:[#allocation73_spill] sm:$0xff] %v13181_v55  ;;  %v5315_v21 = vrot.slane %v5025_v4, 5  ;;  %v5317_v35 = vrot.slane %v5022_v7, 4  ;;  %v5035_v40 = vshrl.u32 %v13175_v43, 16  ;;  %v5020_v0 = vrot.slane %v5015_v23, 4 }
 0x2b5   : > { %v5027_v39 = vor.u32 %v5025_v4, %v5024_v58  ;;  %v5044_v52 = vshrl.u32 %v13181_v55, 16  ;;  %v5313_v51 = vor.u32 %v5312_v10, %v5311_v38  ;;  %v5019_v7 = vsel %vm9764_vm10, %v12559_v42, %v5018_v9  ;;  %v13197_v23 = vld [vmem:[#allocation2 + $0x94] sm:$0xf]  ;;  %v13200_v38 = vld [vmem:[#allocation2 + $0x98] sm:$0xf]  ;;  %v13205_v10 = vld [vmem:[%s14954_s5 + $0x100] sm:$0xff]  }
 0x2b6   : > { %v5318_v34 = vor.u32 %v5317_v35, %v5315_v21  ;;  %v5037_v16 = vrot.slane %v5035_v40, 7  ;;  %6493 = vrot.lane.b32.xlu1 %v8544_v27, %s15112_s21  ;;  %v5047_v5 = vshll.u32 %v13181_v55, 16  ;;  %v5038_v35 = vshll.u32 %v13175_v43, 16  ;;  %9131 = vmatprep.subr.bf16.mxu1 %v13205_v10 }
 0x2b7   : > { %v5028_v11 = vsel %vm9764_vm10, %v5020_v0, %v5027_v39  ;;  %v5046_v58 = vrot.slane %v5044_v52, 7  ;;  %v5314_v32 = vrot.slane %v5313_v51, 4  ;;  %v15414_v0 = vshrl.u32 %v13129_v50, 16  ;;  %v6326_v51 = vpop.permute.xlu0 %6325  ;;  %9135 = vmatpush3.bf16.msra.mxu1 %v13205_v10  ;;  %9091 = vmatprep.subr.bf16.mxu0 %v13205_v10 }
 0x2b8   : > { %v8513_v4 = vcombine.low %v5019_v7, %v5028_v11  ;;  %v5319_v12 = vrot.slane %v5318_v34, 4  ;;  %v15416_v39 = vshll.u32 %v13129_v50, 16  ;;  %v5040_v11 = vor.u32 %v5038_v35, %v5037_v16 }
 0x2b9   : > { %v13210_v27 = vrot.slane %v15414_v0, 4  ;;  %v5049_v34 = vor.u32 %v5047_v5, %v5046_v58  ;;  %v15418_v0 = vshrl.u32 %v13141_v57, 16  ;;  %v15420_v58 = vshrl.u32 %v13121_v60, 16 }
 0x2ba   : > { %v13214_v9 = vrot.slane %v15416_v39, 5  ;;  %6335 = vrot.lane.b32.xlu0 %v8513_v4, %s15112_s21  ;;  %v5324_v7 = vsel %vm9663_vm7, %v5319_v12, %v12576_v56  ;;  %6655 = vrot.lane.b32.xlu1 %v8577_v18, %s15112_s21  ;;  %v5042_v4 = vrot.slane %v5037_v16, 4  ;;  %v15422_v12 = vshll.u32 %v13121_v60, 16 }
 0x2bb   : > { %15415 = vst [vmem:[#allocation74_spill] sm:$0xff] %v13210_v27  ;;  %v13225_v27 = vrot.slane %v15418_v0, 4  ;;  %v13229_v39 = vrot.slane %v15420_v58, 4  ;;  %v15424_v22 = vshrl.u32 %v13145_v47, 16  ;;  %v5316_v0 = vsel %vm9663_vm7, %v5314_v32, %v5315_v21 }
 0x2bc   : > { %15417 = vst [vmem:[#allocation75_spill] sm:$0xff] %v13214_v9  ;;  %v13236_v42 = vrot.slane %v15422_v12, 5  ;;  %v6798_v58 = vsel %vm6719_vm8, %v12361_v24, %v6326_v51  ;;  %v8545_v16 = vcombine.low %v5316_v0, %v5324_v7  ;;  %v5050_v18 = vsel %vm9764_vm10, %v5042_v4, %v5049_v34  ;;  %v9081_v7 = vpop.f32.mrb[20].mxu0 }
 0x2bd   : > { %15419 = vst [vmem:[#allocation76_spill] sm:$0xff] %v13225_v27  ;;  %15421 = vst [vmem:[#allocation77_spill] sm:$0xff] %v13229_v39  ;;  %v13240_v9 = vrot.slane %v15424_v22, 4  ;;  %7375 = vmatprep.mubr.bf16.mxu1 %v6798_v58  ;;  %v13249_v56 = vrot.slane %v5047_v5, 5  ;;  %v5331_v12 = vrot.slane %v5044_v52, 4  ;;  %v15426_v22 = vcombine.low %v13007_v13, %v13026_v49 }
 0x2be   : > { %15423 = vst [vmem:[#allocation78_spill] sm:$0xff] %v13236_v42  ;;  %v5041_v32 = vsel %vm9764_vm10, %v12578_v29, %v5040_v11  ;;  %v15427_v21 = vshrl.u32 %v13197_v23, 16  ;;  %v15428_v34 = vshll.u32 %v13197_v23, 16  ;;  %7376 = vmatmul.mubr.bf16.gmra.mrb[12].mxu1 %v13149_v3  ;;  %v13268_v52 = vld [vmem:[#allocation2 + $0xa4] sm:$0xf]  ;;  %6495 = vrot.lane.b32.xlu1 %v8545_v16, %s15112_s21  ;;  %v15429_v4 = vshrl.u32 %v13200_v38, 16 }
 0x2bf   : > { %15425 = vst [vmem:[#allocation79_spill] sm:$0xff] %v13240_v9  ;;  %6207 = vrot.lane.b32.xlu0 %v15426_v22, %s15112_s21  ;;  %v5325_v11 = vrot.slane %v5035_v40, 4  ;;  %v5326_v0 = vrot.slane %v5038_v35, 5  ;;  %v15430_v58 = vsel %vm9764_vm10, %v12882_v15, %v13106_v44  ;;  %v13286_v3 = vld [vmem:[%s14953_s4] ss:$0 sm:$0xff]  ;;  %v8482_v40 = vcombine.low %v13197_v23, %v13200_v38 }
 0x2c0   : > { %v13261_v51 = vrot.slane %v15427_v21, 4  ;;  %v13265_v5 = vrot.slane %v15428_v34, 5  ;;  %v13273_v29 = vrot.slane %v15429_v4, 4  ;;  %v13281_v22 = vcombine.low %v15430_v58, %v13161_v30  ;;  %v3871_v21 = vpop.f32.mrb[21].mxu0  ;;  %v13291_v35 = vld [vmem:[#allocation2 + $0xa8] sm:$0xf] }
 0x2c1   : > { %v3880_v16 = vadd.f32 %v13286_v3, %v9081_v7  ;;  %v8514_v34 = vcombine.low %v5041_v32, %v5050_v18  ;;  %v15431_v4 = vshll.u32 %v12976_v8, 16  ;;  %v3872_v44 = vadd.f32 %v13286_v3, %v3871_v21  ;;  %v9082_v30 = vpop.f32.mrb[22].mxu0 }
 0x2c2   : > { %v5332_v58 = vor.u32 %v5331_v12, %v13249_v56  ;;  %v3883_v18 = vadd.f32 %v13286_v3, %v9082_v30  ;;  %v3874_v32 = vpop.f32.mrb[23].mxu0  ;;  %v5616_v27 = vrot.slane %v13139_v19, 4  ;;  %v15432_v8 = vshll.u32 %v12964_v17, 16 }
 0x2c3   : > { %v5614_v15 = vor.u32 %v15431_v4, %v13139_v19  ;;  %v3940_v9 = vmax.f32 %v3880_v16, 0.0  ;;  %6337 = vrot.lane.b32.xlu0 %v8514_v34, %s15112_s21  ;;  %v3938_v4 = vmax.f32 %v3872_v44, 0.0  ;;  %v3875_v12 = vadd.f32 %v13286_v3, %v3874_v32 }
 0x2c4   : > { %v5623_v21 = vor.u32 %v15432_v8, %v13167_v46  ;;  %v5327_v42 = vor.u32 %v5326_v0, %v5325_v11  ;;  %v15077_v24 = vshrl.u32 %v13291_v35, 16  ;;  %v3941_v16 = vmax.f32 %v3883_v18, 0.0  ;;  %v5198_v8 = vld [vmem:[#allocation2 + $0x10c] sm:$0x1] }
 0x2c5   : > { %v8749_v7 = vpack.c.bf16 %v3940_v9, %v3940_v9  ;;  %v5615_v30 = vsel %vm9764_vm10, %v12884_v61, %v5614_v15  ;;  %v8747_v34 = vpack.c.bf16 %v3938_v4, %v3938_v4  ;;  %v3939_v39 = vmax.f32 %v3875_v12, 0.0 }
 0x2c6   : > { %v5624_v19 = vsel %vm9764_vm10, %v5616_v27, %v5623_v21  ;;  %v8750_v9 = vpack.c.bf16 %v3941_v16, %v3941_v16  ;;  %v5333_v11 = vrot.slane %v5332_v58, 4  ;;  %v5197_v27 = vld [vmem:[#allocation2 + $0xfc] sm:$0x1]  ;;  %v15433_v0 = vshrl.u32 %v13129_v50, 16 }
 0x2c7   : > { %v13314_v44 = vcombine.low %v5615_v30, %v5624_v19  ;;  %4101 = vst.msk [vmem:[%s9532_s24 + $0x58] sm:$0xf] %vm4078_vm6, %v8749_v7  ;;  %4133 = vst.msk [vmem:[#allocation2 + $0xc4] sm:$0xf] %vm4078_vm6, %v8749_v7  ;;  %6209 = vrot.lane.b32.xlu0 %v8482_v40, %s15112_s21  ;;  %v8748_v18 = vpack.c.bf16 %v3939_v39, %v3939_v39  ;;  %v15434_v32 = vshrl.u32 %v13268_v52, 16  ;;  %v15435_v40 = vshrl.u32 %v13141_v57, 16 }
 0x2c8   : > { %v5633_v15 = vrot.slane %v15433_v0, 7  ;;  %4099 = vst.msk [vmem:[%s9532_s24 + $0x50] sm:$0xf] %vm4078_vm6, %v8747_v34  ;;  %4131 = vst.msk [vmem:[#allocation2 + $0xb4] sm:$0xf] %vm4078_vm6, %v8747_v34  ;;  %v15436_v21 = vor.u32 %v13053_v45, %v13049_v59  ;;  %v5328_v12 = vrot.slane %v5327_v42, 4 }
 0x2c9   : > { %v13329_v7 = vrot.slane %v15434_v32, 4  ;;  %v5642_v58 = vrot.slane %v15435_v40, 7  ;;  %4102 = vst.msk [vmem:[%s9532_s24 + $0x5c] sm:$0xf] %vm4078_vm6, %v8750_v9  ;;  %4134 = vst.msk [vmem:[#allocation2 + $0xc8] sm:$0xf] %vm4078_vm6, %v8750_v9 }
 0x2ca   : > { %v13336_v4 = vrot.slane %v15436_v21, 4  ;;  %v15437_v39 = vshll.u32 %v13268_v52, 16  ;;  %v15438_v30 = vshll.u32 %v13129_v50, 16  ;;  %v5638_v34 = vrot.slane %v5633_v15, 4  ;;  %4100 = vst.msk [vmem:[%s9532_s24 + $0x54] sm:$0xf] %vm4078_vm6, %v8748_v18 }
 0x2cb   : > { %4132 = vst.msk [vmem:[#allocation2 + $0xb8] sm:$0xf] %vm4078_vm6, %v8748_v18  ;;  %v4828_v59 = vld [vmem:[#allocation2 + $0x100] sm:$0x8]  ;;  %v15439_v45 = vshll.u32 %v13141_v57, 16  ;;  %v15440_v32 = vshll.u32 %v13026_v49, 16 }
 0x2cc   : > { %v13343_v16 = vrot.slane %v15437_v39, 5  ;;  %v5636_v19 = vor.u32 %v15438_v30, %v5633_v15  ;;  %v15441_v42 = vshrl.u32 %v13121_v60, 16  ;;  %v15442_v21 = vshrl.u32 %v13145_v47, 16 }
 0x2cd   : > { %v5645_v0 = vor.u32 %v15439_v45, %v5642_v58  ;;  %v13354_v9 = vrot.slane %v15440_v32, 5  ;;  %v5338_v15 = vsel %vm9663_vm7, %v5333_v11, %v12580_v28  ;;  %v5405_v39 = vshll.u32 %v5197_v27, 16 }
 0x2ce   : > { %v5655_v40 = vrot.slane %v15441_v42, 7  ;;  %v5664_v50 = vrot.slane %v15442_v21, 7  ;;  %v5419_v18 = vshll.u32 %v5198_v8, 16  ;;  %v5637_v58 = vsel %vm9764_vm10, %v12886_v53, %v5636_v19 }
 0x2cf   : > { %v5646_v45 = vsel %vm9764_vm10, %v5638_v34, %v5645_v0  ;;  %v15443_v42 = vshll.u32 %v13121_v60, 16  ;;  %v5162_v11 = vshrl.u32 %v4828_v59, 16  ;;  %v15445_v21 = vshll.u32 %v13145_v47, 16  ;;  %v13387_v34 = vld [vmem:[#allocation2 + $0xc4] sm:$0xf] }
 0x2d0   : > { %v13376_v27 = vcombine.low %v5637_v58, %v5646_v45  ;;  %v5660_v8 = vrot.slane %v5655_v40, 4  ;;  %v5330_v53 = vsel %vm9663_vm7, %v5328_v12, %v13249_v56  ;;  %v13385_v19 = vrot.slane %v15077_v24, 4  ;;  %v4814_v58 = vld [vmem:[#allocation2 + $0xb4] sm:$0xf]  ;;  %v4818_v24 = vld [vmem:[#allocation2 + $0xc8] sm:$0xf] }
 0x2d1   : > { %v5658_v28 = vor.u32 %v15443_v42, %v5655_v40  ;;  %v5667_v30 = vor.u32 %v15445_v21, %v5664_v50  ;;  %v15446_v60 = vshrl.u32 %v13007_v13, 16  ;;  %v8546_v40 = vcombine.low %v5330_v53, %v5338_v15 }
 0x2d2   : > { %15444 = vst [vmem:[#allocation80_spill] sm:$0xff] %v13376_v27  ;;  %v13395_v50 = vrot.slane %v5405_v39, 5  ;;  %v15448_v12 = vshrl.u32 %v13026_v49, 16  ;;  %v5057_v42 = vshrl.u32 %v4814_v58, 16  ;;  %v5060_v21 = vshll.u32 %v4814_v58, 16 }
 0x2d3   : > { %v13391_v0 = vrot.slane %v15446_v60, 7  ;;  %v5668_v56 = vsel %vm9764_vm10, %v5660_v8, %v5667_v30  ;;  %v5079_v46 = vshrl.u32 %v13387_v34, 16  ;;  %v5659_v60 = vsel %vm9764_vm10, %v12898_v26, %v5658_v28  ;;  %v13405_v59 = vld [vmem:[#allocation2 + $0xb8] sm:$0xf]  ;;  %v13415_v58 = vld [vmem:[#allocation2 + $0xb4] sm:$0xf]  ;;  %v13425_v30 = vpop.permute.xlu1 %6201 }
 0x2d4   : > { %15447 = vst [vmem:[#allocation81_spill] sm:$0xff] %v13395_v50  ;;  %v4384_v45 = vrot.slane %v15448_v12, 7  ;;  %15449 = vst [vmem:[#allocation82_spill] sm:$0xff] %v13405_v59  ;;  %v4815_v15 = vld [vmem:[#allocation2 + $0xb8] sm:$0xf]  ;;  %v13407_v39 = vrot.slane %v5419_v18, 5  ;;  %v13413_v8 = vcombine.low %v5659_v60, %v5668_v56  ;;  %v8578_v18 = vcombine.low %v13415_v58, %v13405_v59 }
 0x2d5   : > { %v13409_v53 = vrot.slane %v5162_v11, 11  ;;  %v5082_v12 = vshll.u32 %v13387_v34, 16  ;;  %v5088_v32 = vshrl.u32 %v4818_v24, 16  ;;  %v5091_v61 = vshll.u32 %v4818_v24, 16  ;;  %v13430_v56 = vld [vmem:[%s14954_s5 + $0x108] sm:$0xff]  }
 0x2d6   : > { %15450 = vst [vmem:[#allocation83_spill] sm:$0xff] %v13407_v39  ;;  %15452 = vst [vmem:[#allocation85_spill] sm:$0xff] %v13413_v8  ;;  %v15453_v26 = vshll.u32 %v13007_v13, 16  ;;  %v5059_v11 = vrot.slane %v5057_v42, 7  ;;  %v5066_v47 = vshrl.u32 %v4815_v15, 16  ;;  %v5069_v57 = vshll.u32 %v4815_v15, 16  ;;  %6657 = vrot.lane.b32.xlu1 %v8578_v18, %s15112_s21  ;;  %9132 = vmatprep.subr.bf16.mxu1 %v13430_v56 }
 0x2d7   : > { %15451 = vst [vmem:[#allocation84_spill] sm:$0xff] %v13409_v53  ;;  %v5339_v34 = vrot.slane %v5057_v42, 4  ;;  %v5340_v24 = vrot.slane %v5060_v21, 5  ;;  %v5353_v60 = vrot.slane %v5079_v46, 4  ;;  %v15454_v13 = vshll.u32 %v13026_v49, 16  ;;  %9136 = vmatpush3.bf16.msra.mxu1 %v13430_v56  ;;  %v6640_v18 = vpop.permute.xlu1 %6639 }
 0x2d8   : > { %v13421_v28 = vor.u32 %v15453_v26, %v13391_v0  ;;  %v5062_v55 = vor.u32 %v5060_v21, %v5059_v11  ;;  %v5068_v43 = vrot.slane %v5066_v47, 7  ;;  %v5343_v17 = vrot.slane %v5069_v57, 5 }
 0x2d9   : > { %v13434_v26 = vor.u32 %v15454_v13, %v4384_v45  ;;  %v5341_v63 = vor.u32 %v5340_v24, %v5339_v34  ;;  %v5345_v14 = vrot.slane %v5066_v47, 4  ;;  %v5354_v53 = vrot.slane %v5082_v12, 5 }
 0x2da   : > { %v5357_v42 = vrot.slane %v5091_v61, 5  ;;  %v5064_v45 = vrot.slane %v5059_v11, 4  ;;  %v5071_v13 = vor.u32 %v5069_v57, %v5068_v43  ;;  %v5359_v8 = vrot.slane %v5088_v32, 4  ;;  %6497 = vrot.lane.b32.xlu1 %v8546_v40, %s15112_s21  ;;  %v6328_v43 = vpop.permute.xlu0 %6327 }
 0x2db   : > { %v5342_v21 = vrot.slane %v5341_v63, 4  ;;  %v5346_v27 = vor.u32 %v5345_v14, %v5343_v17  ;;  %v5355_v39 = vor.u32 %v5354_v53, %v5353_v60  ;;  %v5090_v50 = vrot.slane %v5088_v32, 7  ;;  %v13453_v53 = vld [vmem:[#allocation2 + $0xb4] sm:$0xf] }
 0x2dc   : > { %v5063_v47 = vsel %vm9764_vm10, %v12820_v31, %v5062_v55  ;;  %v5072_v34 = vsel %vm9764_vm10, %v5064_v45, %v5071_v13  ;;  %v5360_v24 = vor.u32 %v5359_v8, %v5357_v42  ;;  %v5081_v15 = vrot.slane %v5079_v46, 7  ;;  %v6480_v31 = vpop.permute.xlu1 %6479 }
 0x2dd   : > { %v8515_v49 = vcombine.low %v5063_v47, %v5072_v34  ;;  %v5347_v11 = vrot.slane %v5346_v27, 4  ;;  %v5356_v57 = vrot.slane %v5355_v39, 4  ;;  %v4379_v14 = vsel %vm9764_vm10, %v12900_v54, %v13421_v28  ;;  %v13476_v34 = vld [vmem:[#allocation2 + $0xc4] sm:$0xf] }
 0x2de   : > { %v5678_v63 = vshll.u32 %v13415_v58, 16  ;;  %v5361_v32 = vrot.slane %v5360_v24, 4  ;;  %v5093_v40 = vor.u32 %v5091_v61, %v5090_v50  ;;  %v4701_v55 = vor.u32 %v13343_v16, %v13329_v7  ;;  %v13465_v61 = vld [vmem:[#allocation2 + $0xb8] sm:$0xf]  ;;  %v13470_v50 = vld [vmem:[%s14954_s5 + $0x110] sm:$0xff]   ;;  %v15479_v7 = vld [vmem:[#allocation18_spill] sm:$0xff] }
 0x2df   : > { %v5684_v46 = vshrl.u32 %v13405_v59, 16  ;;  %v15089_v27 = vshll.u32 %v13405_v59, 16  ;;  %6339 = vrot.lane.b32.xlu0 %v8515_v49, %s15112_s21  ;;  %v5344_v39 = vsel %vm9663_vm7, %v5342_v21, %v5343_v17  ;;  %v5352_v8 = vsel %vm9663_vm7, %v5347_v11, %v12838_v48  ;;  %v6330_v11 = vpop.permute.xlu0 %6329  ;;  %9133 = vmatprep.subr.bf16.mxu1 %v13470_v50 }
 0x2e0   : > { %v15455_v60 = vshrl.u32 %v13415_v58, 16  ;;  %v8547_v13 = vcombine.low %v5344_v39, %v5352_v8  ;;  %v5084_v49 = vor.u32 %v5082_v12, %v5081_v15  ;;  %v5086_v47 = vrot.slane %v5081_v15, 4  ;;  %v15457_v39 = vld [vmem:[#allocation19_spill] sm:$0xff]  ;;  %9137 = vmatpush3.bf16.msra.mxu1 %v13470_v50 }
 0x2e1   : > { %v5358_v17 = vsel %vm9663_vm7, %v5356_v57, %v5357_v42  ;;  %v5366_v48 = vsel %vm9663_vm7, %v5361_v32, %v12840_v1  ;;  %v4439_v21 = vshrl.u32 %v13453_v53, 16  ;;  %v4442_v24 = vshll.u32 %v13453_v53, 16  ;;  %v15458_v57 = vld [vmem:[#allocation9_spill] sm:$0xff]  ;;  %v15459_v8 = vld [vmem:[#allocation11_spill] sm:$0xff] }
 0x2e2   : > { %v13474_v45 = vrot.slane %v15455_v60, 4  ;;  %6499 = vrot.lane.b32.xlu1 %v8547_v13, %s15112_s21  ;;  %v5094_v12 = vsel %vm9764_vm10, %v5086_v47, %v5093_v40  ;;  %v4448_v15 = vshrl.u32 %v13465_v61, 16  ;;  %v6914_v42 = vsel %vm6719_vm8, %v15457_v39, %v6640_v18  ;;  %v6642_v60 = vpop.permute.xlu1 %6641 }
 0x2e3   : > { %v15460_v1 = vcombine.low %v15458_v57, %v15459_v8  ;;  %v15461_v13 = vcombine.low %v13268_v52, %v13291_v35  ;;  %7512 = vmatprep.mubr.bf16.mxu0 %v6914_v42  ;;  %v6802_v40 = vsel %vm6719_vm8, %v12440_v25, %v6328_v43  ;;  %v6806_v18 = vsel %vm6719_vm8, %v12733_v62, %v6330_v11  ;;  %v13519_v62 = vld [vmem:[#allocation2 + $0xc8] sm:$0xf] }
 0x2e4   : > { %15456 = vst [vmem:[#allocation86_spill] sm:$0xff] %v13474_v45  ;;  %v6918_v47 = vsel %vm6719_vm8, %v12442_v37, %v6642_v60  ;;  %v13510_v39 = vrot.slane %v5678_v63, 5  ;;  %v13514_v57 = vrot.slane %v5684_v46, 4  ;;  %v8548_v42 = vcombine.low %v5358_v17, %v5366_v48  ;;  %7383 = vmatprep.mubr.bf16.mxu1 %v6802_v40  ;;  %v15464_v40 = vld [vmem:[#allocation10_spill] sm:$0xff] }
 0x2e5   : > { %v6850_v32 = vsel %vm6719_vm8, %v15460_v1, %v6480_v31  ;;  %6211 = vrot.lane.b32.xlu0 %v15461_v13, %s15112_s21  ;;  %v15085_v31 = vshrl.u32 %v13476_v34, 16  ;;  %v5085_v25 = vsel %vm9764_vm10, %v12870_v20, %v5084_v49  ;;  %v15095_v43 = vshll.u32 %v13465_v61, 16  ;;  %7384 = vmatmul.mubr.bf16.gmra.mrb[16].mxu1 %v13153_v41  ;;  %v5450_v1 = vld [vmem:[#allocation2 + $0xb0] sm:$0x8] }
 0x2e6   : > { %15462 = vst [vmem:[#allocation19_spill] sm:$0xff] %v13510_v39  ;;  %15463 = vst [vmem:[#allocation9_spill] sm:$0xff] %v13514_v57  ;;  %7513 = vmatmul.mubr.bf16.vlgmr.msra.gmra.mrb[32].mxu0 %v6850_v32  ;;  %v8516_v37 = vcombine.low %v5085_v25, %v5094_v12  ;;  %v13524_v11 = vrot.slane %v4439_v21, 4  ;;  %v13528_v8 = vrot.slane %v4442_v24, 5  ;;  %6501 = vrot.lane.b32.xlu1 %v8548_v42, %s15112_s21  ;;  %v13534_v20 = vrot.slane %v4448_v15, 4  ;;  %v6482_v17 = vpop.permute.xlu1 %6481  ;;  %v15563_v39 = vld [vmem:[#allocation40_spill] sm:$0xff] }
 0x2e7   : > { %7520 = vmatprep.mubr.bf16.mxu0 %v6918_v47  ;;  %v8484_v49 = vcombine.low %v13453_v53, %v13465_v61  ;;  %7391 = vmatprep.mubr.bf16.mxu1 %v6806_v18  ;;  %v6742_v48 = vsel %vm6719_vm8, %v12717_v2, %v13425_v30  ;;  %v15094_v12 = vshll.u32 %v13476_v34, 16  ;;  %v15093_v41 = vshrl.u32 %v13519_v62, 16  ;;  %v15465_v2 = vld [vmem:[#allocation12_spill] sm:$0xff] }
 0x2e8   : > { %v13547_v60 = vrot.slane %v15085_v31, 4  ;;  %9092 = vmatpush3.bf16.msra.mxu0 %v13205_v10  ;;  %v15466_v30 = vcombine.low %v15464_v40, %v15465_v2  ;;  %v15467_v47 = vor.u32 %v13068_v33, %v13354_v9  ;;  %v4380_v25 = vrot.slane %v13391_v0, 4 }
 0x2e9   : > { %6341 = vrot.lane.b32.xlu0 %v8516_v37, %s15112_s21  ;;  %v15468_v37 = vor.u32 %v13265_v5, %v13261_v51  ;;  %9093 = vmatprep.subr.bf16.mxu0 %v13430_v56  ;;  %v15469_v13 = vshll.u32 %v13200_v38, 16  ;;  %v15470_v32 = vshrl.u32 %v13197_v23, 16  ;;  %v15473_v5 = vshrl.u32 %v13415_v58, 16  ;;  %v13619_v58 = vld [vmem:[#allocation2 + $0xc8] sm:$0xf] }
 0x2ea   : > { %v6854_v18 = vsel %vm6719_vm8, %v15466_v30, %v6482_v17  ;;  %v4679_v42 = vrot.slane %v15467_v47, 4  ;;  %v15471_v17 = vshrl.u32 %v13200_v38, 16  ;;  %v5670_v30 = vshrl.u32 %v5450_v1, 16  ;;  %v6644_v33 = vpop.permute.xlu1 %6643  ;;  %v15472_v47 = vld [vmem:[#allocation15_spill] sm:$0xff] }
 0x2eb   : > { %v4688_v31 = vrot.slane %v15468_v37, 4  ;;  %v4689_v10 = vrot.slane %v15469_v13, 5  ;;  %v4397_v40 = vrot.slane %v15470_v32, 7  ;;  %v4388_v51 = vsel %vm9764_vm10, %v4380_v25, %v13434_v26  ;;  %v15474_v32 = vld [vmem:[#allocation14_spill] sm:$0xff] }
 0x2ec   : > { %v4406_v2 = vrot.slane %v15471_v17, 7  ;;  %v4684_v0 = vsel %vm9663_vm7, %v4679_v42, %v15472_v47  ;;  %v5677_v37 = vrot.slane %v15473_v5, 7  ;;  %v5686_v13 = vrot.slane %v5684_v46, 7  ;;  %9094 = vmatpush3.bf16.msra.mxu0 %v13430_v56 }
 0x2ed   : > { %6213 = vrot.lane.b32.xlu0 %v8484_v49, %s15112_s21  ;;  %v6922_v1 = vsel %vm6719_vm8, %v15474_v32, %v6644_v33  ;;  %v15475_v42 = vsel %vm9663_vm7, %v13336_v4, %v13354_v9  ;;  %v13595_v26 = vcombine.low %v4379_v14, %v4388_v51  ;;  %v4690_v46 = vsel %vm9663_vm7, %v4688_v31, %v4689_v10  ;;  %v13599_v49 = vld [vmem:[#allocation2 + $0xc4] sm:$0xf] }
 0x2ee   : > { %v13588_v17 = vcombine.low %v15475_v42, %v4684_v0  ;;  %7521 = vmatmul.mubr.bf16.gmra.mrb[36].mxu0 %v6854_v18  ;;  %v4692_v25 = vor.u32 %v13273_v29, %v4689_v10  ;;  %v15476_v33 = vshll.u32 %v13197_v23, 16  ;;  %v4402_v9 = vrot.slane %v4397_v40, 4  ;;  %7392 = vmatmul.mubr.bf16.gmra.mrb[20].mxu1 %v6742_v48  ;;  %v6484_v18 = vpop.permute.xlu1 %6483  ;;  %v15478_v29 = vld [vmem:[#allocation25_spill] sm:$0xff] }
 0x2ef   : > { %v15477_v47 = vshll.u32 %v13200_v38, 16  ;;  %7528 = vmatprep.mubr.bf16.mxu0 %v6922_v1  ;;  %v8450_v54 = vrot.slane %v5670_v30, 11  ;;  %v5680_v28 = vor.u32 %v5678_v63, %v5677_v37  ;;  %v5682_v14 = vrot.slane %v5677_v37, 4  ;;  %9095 = vmatprep.subr.bf16.mxu0 %v13470_v50  ;;  %v9085_v37 = vpop.f32.mrb[24].mxu0  ;;  %v15481_v1 = vld [vmem:[#allocation28_spill] sm:$0xff]  ;;  %v15482_v42 = vld [vmem:[#allocation29_spill] sm:$0xff] }
 0x2f0   : > { %v4400_v4 = vor.u32 %v15476_v33, %v4397_v40  ;;  %v5689_v31 = vor.u32 %v15089_v27, %v5686_v13  ;;  %v4693_v51 = vrot.slane %v4692_v25, 4  ;;  %v4702_v48 = vrot.slane %v4701_v55, 4  ;;  %9096 = vmatpush3.bf16.msra.mxu0 %v13470_v50 }
 0x2f1   : > { %v4409_v0 = vor.u32 %v15477_v47, %v4406_v2  ;;  %v15092_v63 = vshrl.u32 %v13599_v49, 16  ;;  %v5681_v40 = vsel %vm9764_vm10, %v8450_v54, %v5680_v28  ;;  %v15090_v30 = vshll.u32 %v13599_v49, 16  ;;  %v3887_v47 = vpop.f32.mrb[25].mxu0 }
 0x2f2   : > { %v4401_v23 = vsel %vm9764_vm10, %v15478_v29, %v4400_v4  ;;  %v5690_v2 = vsel %vm9764_vm10, %v5682_v14, %v5689_v31  ;;  %v4698_v16 = vsel %vm9663_vm7, %v4693_v51, %v15479_v7  ;;  %v15480_v55 = vshll.u32 %v13291_v35, 16  ;;  %v9086_v51 = vpop.f32.mrb[26].mxu0  ;;  %v15484_v29 = vld [vmem:[#allocation31_spill] sm:$0xff] }
 0x2f3   : > { %v4410_v38 = vsel %vm9764_vm10, %v4402_v9, %v4409_v0  ;;  %v13633_v56 = vcombine.low %v5681_v40, %v5690_v2  ;;  %v13639_v13 = vrot.slane %v15094_v12, 5  ;;  %v13643_v32 = vrot.slane %v15093_v41, 4  ;;  %v6646_v0 = vpop.permute.xlu1 %6645 }
 0x2f4   : > { %v13622_v10 = vcombine.low %v4401_v23, %v4410_v38  ;;  %v4703_v5 = vrot.slane %v15480_v55, 5  ;;  %v15483_v25 = vcombine.low %v15481_v1, %v15482_v42  ;;  %v13649_v4 = vcombine.low %v4690_v46, %v4698_v16 }
 0x2f5   : > { %v3896_v9 = vadd.f32 %v13286_v3, %v9085_v37  ;;  %v15091_v54 = vshrl.u32 %v13619_v58, 16  ;;  %v3888_v31 = vadd.f32 %v13286_v3, %v3887_v47  ;;  %v6926_v46 = vsel %vm6719_vm8, %v15484_v29, %v6646_v0  ;;  %v4554_v47 = vld [vmem:[#allocation2 + $0xbc] sm:$0x1]  ;;  %v15491_v29 = vld [vmem:[#allocation30_spill] sm:$0xff] }
 0x2f6   : > { %v6858_v33 = vsel %vm6719_vm8, %v15483_v25, %v6484_v18  ;;  %v4704_v28 = vsel %vm9663_vm7, %v4702_v48, %v4703_v5  ;;  %v4706_v14 = vor.u32 %v13385_v19, %v4703_v5  ;;  %v13663_v23 = vrot.slane %v15092_v63, 4  ;;  %v3890_v48 = vpop.f32.mrb[27].mxu0 }
 0x2f7   : > { %v3944_v38 = vmax.f32 %v3896_v9, 0.0  ;;  %v3899_v40 = vadd.f32 %v13286_v3, %v9086_v51  ;;  %7529 = vmatmul.mubr.bf16.gmra.mrb[40].mxu0 %v6858_v33  ;;  %v13668_v19 = vrot.slane %v15090_v30, 5  ;;  %v3942_v2 = vmax.f32 %v3888_v31, 0.0  ;;  %v6486_v25 = vpop.permute.xlu1 %6485  ;;  %v15489_v33 = vld [vmem:[#allocation57_spill] sm:$0xff]  ;;  %v15490_v51 = vld [vmem:[#allocation22_spill] sm:$0xff] }
 0x2f8   : > { %15485 = vst [vmem:[#allocation11_spill] sm:$0xff] %v13663_v23  ;;  %v4707_v50 = vrot.slane %v4706_v14, 4  ;;  %v3891_v7 = vadd.f32 %v13286_v3, %v3890_v48  ;;  %7536 = vmatprep.mubr.bf16.mxu0 %v6926_v46  ;;  %v15487_v16 = vshrl.u32 %v13268_v52, 16  ;;  %v15488_v5 = vshrl.u32 %v13291_v35, 16 }
 0x2f9   : > { %15486 = vst [vmem:[#allocation10_spill] sm:$0xff] %v13668_v19  ;;  %v8753_v1 = vpack.c.bf16 %v3944_v38, %v3944_v38  ;;  %v3945_v42 = vmax.f32 %v3899_v40, 0.0  ;;  %v4715_v0 = vor.u32 %v13528_v8, %v13524_v11  ;;  %v8751_v14 = vpack.c.bf16 %v3942_v2, %v3942_v2  ;;  %v4176_v40 = vld [vmem:[#allocation2 + $0xb0] sm:$0x8] }
 0x2fa   : > { %v4419_v55 = vrot.slane %v15487_v16, 7  ;;  %v4428_v37 = vrot.slane %v15488_v5, 7  ;;  %v4712_v9 = vsel %vm9663_vm7, %v4707_v50, %v15489_v33  ;;  %v3943_v31 = vmax.f32 %v3891_v7, 0.0 }
 0x2fb   : > { %v15492_v46 = vcombine.low %v15490_v51, %v15491_v29  ;;  %v13684_v38 = vcombine.low %v4704_v28, %v4712_v9  ;;  %4105 = vst.msk [vmem:[%s9532_s24 + $0x68] sm:$0xf] %vm4078_vm6, %v8753_v1  ;;  %4137 = vst.msk [vmem:[#allocation2 + $0xe4] sm:$0xf] %vm4078_vm6, %v8753_v1  ;;  %v8754_v50 = vpack.c.bf16 %v3945_v42, %v3945_v42  ;;  %v15493_v16 = vshll.u32 %v13268_v52, 16  ;;  %v6648_v52 = vpop.permute.xlu1 %6647  ;;  %v15495_v1 = vld [vmem:[#allocation59_spill] sm:$0xff] }
 0x2fc   : > { %v4424_v11 = vrot.slane %v4419_v55, 4  ;;  %v15494_v8 = vshll.u32 %v13291_v35, 16  ;;  %4103 = vst.msk [vmem:[%s9532_s24 + $0x60] sm:$0xf] %vm4078_vm6, %v8751_v14  ;;  %4135 = vst.msk [vmem:[#allocation2 + $0xd4] sm:$0xf] %vm4078_vm6, %v8751_v14  ;;  %v8752_v28 = vpack.c.bf16 %v3943_v31, %v3943_v31 }
 0x2fd   : > { %v6862_v48 = vsel %vm6719_vm8, %v15492_v46, %v6486_v25  ;;  %v4422_v5 = vor.u32 %v15493_v16, %v4419_v55  ;;  %v4716_v7 = vrot.slane %v4715_v0, 4  ;;  %v4717_v25 = vrot.slane %v15095_v43, 5  ;;  %4106 = vst.msk [vmem:[%s9532_s24 + $0x6c] sm:$0xf] %vm4078_vm6, %v8754_v50  ;;  %4138 = vst.msk [vmem:[#allocation2 + $0xe8] sm:$0xf] %vm4078_vm6, %v8754_v50 }
 0x2fe   : > { %v4431_v2 = vor.u32 %v15494_v8, %v4428_v37  ;;  %v4723_v33 = vshll.u32 %v4554_v47, 16  ;;  %v4434_v37 = vshrl.u32 %v4176_v40, 16  ;;  %v13708_v42 = vrot.slane %v4439_v21, 7  ;;  %4104 = vst.msk [vmem:[%s9532_s24 + $0x64] sm:$0xf] %vm4078_vm6, %v8752_v28  ;;  %v15496_v9 = vld [vmem:[#allocation27_spill] sm:$0xff] }
 0x2ff   : > { %v4423_v35 = vsel %vm9764_vm10, %v15495_v1, %v4422_v5  ;;  %4136 = vst.msk [vmem:[#allocation2 + $0xd8] sm:$0xf] %vm4078_vm6, %v8752_v28  ;;  %v6930_v47 = vsel %vm6719_vm8, %v15496_v9, %v6648_v52  ;;  %v13715_v0 = vld [vmem:[#allocation2 + $0x114] sm:$0xf]  ;;  %v13717_v14 = vld [vmem:[#allocation2 + $0x118] sm:$0xf]  ;;  %v4718_v51 = vsel %vm9663_vm7, %v4716_v7, %v4717_v25  ;;  %v4720_v29 = vor.u32 %v13534_v20, %v4717_v25  ;;  %v6488_v20 = vpop.permute.xlu1 %6487 }
 0x300   : > { %v4432_v55 = vsel %vm9764_vm10, %v4424_v11, %v4431_v2  ;;  %7537 = vmatmul.mubr.bf16.gmra.mrb[44].mxu0 %v6862_v48  ;;  %v15088_v21 = vshrl.u32 %v13715_v0, 16  ;;  %v15086_v46 = vshll.u32 %v13715_v0, 16  ;;  %v15087_v40 = vshrl.u32 %v13717_v14, 16 }
 0x301   : > { %v13719_v31 = vcombine.low %v4423_v35, %v4432_v55  ;;  %v4725_v50 = vrot.slane %v4723_v33, 5  ;;  %7544 = vmatprep.mubr.bf16.mxu0 %v6930_v47  ;;  %v13729_v16 = vrot.slane %v15091_v54, 4  ;;  %v4721_v8 = vrot.slane %v4720_v29, 4 }
 0x302   : > { %v13736_v48 = vrot.slane %v15088_v21, 4  ;;  %v13740_v2 = vrot.slane %v15086_v46, 5  ;;  %v13744_v28 = vrot.slane %v15087_v40, 4  ;;  %v4823_v25 = vld [vmem:[#allocation2 + $0xe4] sm:$0xf]  ;;  %v13750_v52 = vrot.slane %v4434_v37, 11 }
 0x303   : > { %15497 = vst [vmem:[#allocation12_spill] sm:$0xff] %v13729_v16  ;;  %v4726_v33 = vsel %vm9663_vm7, %v4721_v8, %v4725_v50  ;;  %v13755_v1 = vor.u32 %v4442_v24, %v13708_v42  ;;  %v4820_v55 = vld [vmem:[#allocation2 + $0xd4] sm:$0xf]  ;;  %v5123_v9 = vshrl.u32 %v4823_v25, 16  ;;  %v5126_v47 = vshll.u32 %v4823_v25, 16  ;;  %v15502_v37 = vld [vmem:[#allocation44_spill] sm:$0xff] }
 0x304   : > { %15498 = vst [vmem:[#allocation15_spill] sm:$0xff] %v13736_v48  ;;  %15499 = vst [vmem:[#allocation14_spill] sm:$0xff] %v13740_v2  ;;  %v13758_v29 = vcombine.low %v4718_v51, %v4726_v33  ;;  %v4450_v11 = vrot.slane %v4448_v15, 7  ;;  %v5101_v46 = vshrl.u32 %v4820_v55, 16  ;;  %v5104_v40 = vshll.u32 %v4820_v55, 16  ;;  %v15503_v8 = vld [vmem:[#allocation46_spill] sm:$0xff] }
 0x305   : > { %15500 = vst [vmem:[#allocation25_spill] sm:$0xff] %v13744_v28  ;;  %v4824_v50 = vld [vmem:[#allocation2 + $0xe8] sm:$0xf]  ;;  %v15504_v21 = vcombine.low %v15502_v37, %v15503_v8  ;;  %v5381_v25 = vrot.slane %v5123_v9, 4  ;;  %v5382_v51 = vrot.slane %v5126_v47, 5  ;;  %v15505_v37 = vshll.u32 %v13519_v62, 16 }
 0x306   : > { %15501 = vst [vmem:[#allocation18_spill] sm:$0xff] %v13758_v29  ;;  %v4821_v27 = vld [vmem:[#allocation2 + $0xd8] sm:$0xf]  ;;  %v5132_v7 = vshrl.u32 %v4824_v50, 16  ;;  %v5135_v5 = vshll.u32 %v4824_v50, 16  ;;  %v5103_v33 = vrot.slane %v5101_v46, 7 }
 0x307   : > { %v6866_v53 = vsel %vm6719_vm8, %v15504_v21, %v6488_v20  ;;  %v5110_v18 = vshrl.u32 %v4821_v27, 16  ;;  %v5113_v30 = vshll.u32 %v4821_v27, 16  ;;  %v5367_v15 = vrot.slane %v5101_v46, 4  ;;  %v13774_v24 = vld [vmem:[#allocation2 + $0xcc] sm:$0x1] }
 0x308   : > { %v5368_v54 = vrot.slane %v5104_v40, 5  ;;  %v13768_v55 = vrot.slane %v5135_v5, 5  ;;  %v5387_v63 = vrot.slane %v5132_v7, 4  ;;  %7545 = vmatmul.mubr.bf16.gmra.mrb[48].mxu0 %v6866_v53  ;;  %v13772_v21 = vrot.slane %v15505_v37, 5 }
 0x309   : > { %v5106_v20 = vor.u32 %v5104_v40, %v5103_v33  ;;  %v5112_v8 = vrot.slane %v5110_v18, 7  ;;  %v5371_v41 = vrot.slane %v5113_v30, 5  ;;  %v15506_v50 = vshrl.u32 %v13476_v34, 16  ;;  %v13838_v40 = vld [vmem:[#allocation2 + $0xd4] sm:$0xf] }
 0x30a   : > { %v5369_v27 = vor.u32 %v5368_v54, %v5367_v15  ;;  %v5373_v46 = vrot.slane %v5110_v18, 4  ;;  %v5383_v12 = vor.u32 %v5382_v51, %v5381_v25  ;;  %v5388_v43 = vor.u32 %v5387_v63, %v13768_v55  ;;  %v13793_v15 = vld [vmem:[#allocation2 + $0xd8] sm:$0xf] }
 0x30b   : > { %v13778_v35 = vrot.slane %v15506_v50, 7  ;;  %v5108_v28 = vrot.slane %v5103_v33, 4  ;;  %v5115_v53 = vor.u32 %v5113_v30, %v5112_v8  ;;  %v5125_v2 = vrot.slane %v5123_v9, 7  ;;  %v15507_v50 = vld [vmem:[#allocation24_spill] sm:$0xff]  ;;  %v13791_v9 = vld [vmem:[#allocation2 + $0xd4] sm:$0xf] }
 0x30c   : > { %v5134_v48 = vrot.slane %v5132_v7, 7  ;;  %v5370_v37 = vrot.slane %v5369_v27, 4  ;;  %v5374_v16 = vor.u32 %v5373_v46, %v5371_v41  ;;  %v5107_v54 = vsel %vm9764_vm10, %v15507_v50, %v5106_v20  ;;  %v6650_v7 = vpop.permute.xlu1 %6649  ;;  %v13799_v20 = vld [vmem:[#allocation2 + $0xe4] sm:$0xf] }
 0x30d   : > { %v5116_v63 = vsel %vm9764_vm10, %v5108_v28, %v5115_v53  ;;  %v5389_v18 = vrot.slane %v5388_v43, 4  ;;  %v5384_v33 = vrot.slane %v5383_v12, 4  ;;  %v15508_v8 = vshll.u32 %v13465_v61, 16  ;;  %v15510_v12 = vld [vmem:[#allocation58_spill] sm:$0xff]  ;;  %v9299_v53 = vld [vmem:[%s14954_s5 + $0x118] sm:$0xff]   ;;  %v15514_v43 = vld [vmem:[#allocation45_spill] sm:$0xff] }
 0x30e   : > { %v5137_v30 = vor.u32 %v5135_v5, %v5134_v48  ;;  %v8517_v25 = vcombine.low %v5107_v54, %v5116_v63  ;;  %v5375_v51 = vrot.slane %v5374_v16, 4  ;;  %v5128_v46 = vor.u32 %v5126_v47, %v5125_v2  ;;  %v13803_v5 = vld [vmem:[#allocation2 + $0xc0] sm:$0x8]  ;;  %v13818_v47 = vld [vmem:[#allocation2 + $0xe8] sm:$0xf]  ;;  %9134 = vmatprep.subr.bf16.mxu1 %v9299_v53  ;;  %9097 = vmatprep.subr.bf16.mxu0 %v9299_v53 }
 0x30f   : > { %v13797_v27 = vor.u32 %v15508_v8, %v4450_v11  ;;  %v5130_v19 = vrot.slane %v5125_v2, 4  ;;  %v15509_v48 = vshll.u32 %v13476_v34, 16  ;;  %v5372_v61 = vsel %vm9663_vm7, %v5370_v37, %v5371_v41  ;;  %v15511_v54 = vld [vmem:[#allocation65_spill] sm:$0xff]  ;;  %v15512_v8 = vld [vmem:[#allocation64_spill] sm:$0xff]  ;;  %9138 = vmatpush3.bf16.msra.mxu1 %v9299_v53  ;;  %9098 = vmatpush3.bf16.msra.mxu0 %v9299_v53 }
 0x310   : > { %6343 = vrot.lane.b32.xlu0 %v8517_v25, %s15112_s21  ;;  %v5380_v11 = vsel %vm9663_vm7, %v5375_v51, %v15510_v12  ;;  %v4483_v2 = vshrl.u32 %v13791_v9, 16  ;;  %v4486_v28 = vshll.u32 %v13791_v9, 16  ;;  %v5394_v63 = vsel %vm9663_vm7, %v5389_v18, %v15511_v54  ;;  %v6490_v25 = vpop.permute.xlu1 %6489  ;;  %v15513_v12 = vld [vmem:[#allocation43_spill] sm:$0xff]  ;;  %v15519_v53 = vld [vmem:[#allocation33_spill] sm:$0xff] }
 0x311   : > { %v13808_v16 = vor.u32 %v15509_v48, %v13778_v35  ;;  %v8549_v50 = vcombine.low %v5372_v61, %v5380_v11  ;;  %v5138_v41 = vsel %vm9764_vm10, %v5130_v19, %v5137_v30  ;;  %v4492_v37 = vshrl.u32 %v13793_v15, 16  ;;  %v15516_v19 = vld [vmem:[#allocation67_spill] sm:$0xff]  ;;  %v6332_v30 = vpop.permute.xlu0 %6331 }
 0x312   : > { %v5386_v51 = vsel %vm9663_vm7, %v5384_v33, %v13768_v55  ;;  %v6934_v48 = vsel %vm6719_vm8, %v15512_v8, %v6650_v7  ;;  %v15515_v61 = vcombine.low %v15513_v12, %v15514_v43  ;;  %v4456_v18 = vshrl.u32 %v13803_v5, 16  ;;  %v15518_v8 = vld [vmem:[#allocation32_spill] sm:$0xff] }
 0x313   : > { %6503 = vrot.lane.b32.xlu1 %v8549_v50, %s15112_s21  ;;  %v5129_v55 = vsel %vm9764_vm10, %v15516_v19, %v5128_v46  ;;  %7552 = vmatprep.mubr.bf16.mxu0 %v6934_v48  ;;  %v15096_v7 = vshrl.u32 %v13799_v20, 16  ;;  %v15097_v33 = vshll.u32 %v13799_v20, 16  ;;  %v15098_v43 = vshrl.u32 %v13818_v47, 16 }
 0x314   : > { %v6870_v11 = vsel %vm6719_vm8, %v15515_v61, %v6490_v25  ;;  %v15517_v5 = vcombine.low %v13476_v34, %v13519_v62  ;;  %v8550_v54 = vcombine.low %v5386_v51, %v5394_v63  ;;  %v8518_v25 = vcombine.low %v5129_v55, %v5138_v41  ;;  %v6652_v34 = vpop.permute.xlu1 %6651  ;;  %v13863_v63 = vld [vmem:[#allocation2 + $0xd8] sm:$0xf] }
 0x315   : > { %v15100_v50 = vshll.u32 %v13793_v15, 16  ;;  %v6810_v46 = vsel %vm6719_vm8, %v15518_v8, %v6332_v30  ;;  %7553 = vmatmul.mubr.bf16.gmra.mrb[52].mxu0 %v6870_v11  ;;  %v4741_v48 = vrot.slane %v4483_v2, 4  ;;  %v4742_v12 = vrot.slane %v4486_v28, 5  ;;  %v13873_v30 = vld [vmem:[#allocation2 + $0xe4] sm:$0xf] }
 0x316   : > { %6215 = vrot.lane.b32.xlu0 %v15517_v5, %s15112_s21  ;;  %v13861_v61 = vrot.slane %v4492_v37, 4  ;;  %7399 = vmatprep.mubr.bf16.mxu1 %v6810_v46  ;;  %v15099_v41 = vshrl.u32 %v13838_v40, 16  ;;  %v8486_v51 = vcombine.low %v13791_v9, %v13793_v15  ;;  %v6938_v11 = vsel %vm6719_vm8, %v13314_v44, %v6652_v34  ;;  %v6204_v5 = vpop.permute.xlu0 %6203 }
 0x317   : > { %6505 = vrot.lane.b32.xlu1 %v8550_v54, %s15112_s21  ;;  %7560 = vmatprep.mubr.bf16.mxu0 %v6938_v11  ;;  %v13878_v8 = vrot.slane %v15096_v7, 4  ;;  %v13882_v46 = vrot.slane %v15097_v33, 5  ;;  %v13886_v44 = vrot.slane %v15098_v43, 4  ;;  %v6746_v54 = vsel %vm6719_vm8, %v15519_v53, %v6204_v5  ;;  %v4556_v11 = vld [vmem:[#allocation2 + $0xdc] sm:$0x1] }
 0x318   : > { %v15520_v7 = vrot.slane %v13708_v42, 4  ;;  %7400 = vmatmul.mubr.bf16.gmra.mrb[24].mxu1 %v6746_v54  ;;  %v13901_v43 = vrot.slane %v15099_v41, 4  ;;  %v15522_v5 = vsel %vm9764_vm10, %v13750_v52, %v13755_v1  ;;  %v15524_v42 = vor.u32 %v13639_v13, %v13547_v60 }
 0x319   : > { %v15526_v54 = vshll.u32 %v13774_v24, 16  ;;  %v4468_v34 = vrot.slane %v13778_v35, 4  ;;  %v15527_v1 = vshrl.u32 %v13519_v62, 16  ;;  %v4743_v13 = vor.u32 %v4742_v12, %v4741_v48  ;;  %v15528_v24 = vld [vmem:[#allocation66_spill] sm:$0xff] }
 0x31a   : > { %6345 = vrot.lane.b32.xlu0 %v8518_v25, %s15112_s21  ;;  %v4454_v33 = vsel %vm9764_vm10, %v15520_v7, %v13797_v27  ;;  %15521 = vst [vmem:[#allocation28_spill] sm:$0xff] %v13901_v43  ;;  %v4730_v55 = vrot.slane %v15524_v42, 4  ;;  %v15525_v27 = vor.u32 %v13643_v32, %v13772_v21  ;;  %v8421_v25 = vrot.slane %v4456_v18, 11  ;;  %v6334_v19 = vpop.permute.xlu0 %6333  ;;  %v4182_v32 = vld [vmem:[#allocation2 + $0xd0] sm:$0x8] }
 0x31b   : > { %v13909_v53 = vcombine.low %v15522_v5, %v4454_v33  ;;  %v4739_v41 = vrot.slane %v15526_v54, 5  ;;  %v4472_v60 = vrot.slane %v15527_v1, 7  ;;  %v4745_v33 = vrot.slane %v15100_v50, 5  ;;  %v6492_v5 = vpop.permute.xlu1 %6491  ;;  %v9089_v54 = vpop.f32.mrb[28].mxu0  ;;  %v15532_v1 = vld [vmem:[#allocation55_spill] sm:$0xff] }
 0x31c   : > { %v4735_v7 = vrot.slane %v15525_v27, 4  ;;  %v4732_v52 = vsel %vm9663_vm7, %v4730_v55, %v13772_v21  ;;  %v6814_v18 = vsel %vm6719_vm8, %v15528_v24, %v6334_v19  ;;  %v4467_v21 = vsel %vm9764_vm10, %v8421_v25, %v13808_v16  ;;  %v15531_v19 = vld [vmem:[#allocation16_spill] sm:$0xff]  ;;  %v3903_v25 = vpop.f32.mrb[29].mxu0 }
 0x31d   : > { %15523 = vst [vmem:[#allocation29_spill] sm:$0xff] %v13909_v53  ;;  %v4751_v55 = vshll.u32 %v4556_v11, 16  ;;  %7407 = vmatprep.mubr.bf16.mxu1 %v6814_v18  ;;  %v15530_v12 = vshll.u32 %v13519_v62, 16  ;;  %v4744_v27 = vrot.slane %v4743_v13, 4  ;;  %v15533_v24 = vcombine.low %v15531_v19, %v15532_v1  ;;  %v9090_v18 = vpop.f32.mrb[30].mxu0 }
 0x31e   : > { %6217 = vrot.lane.b32.xlu0 %v8486_v51, %s15112_s21  ;;  %v4740_v35 = vsel %vm9663_vm7, %v4735_v7, %v4739_v41  ;;  %v4748_v51 = vor.u32 %v13861_v61, %v4745_v33  ;;  %v4478_v50 = vshrl.u32 %v4182_v32, 16  ;;  %v4485_v16 = vrot.slane %v4483_v2, 7 }
 0x31f   : > { %v13935_v48 = vcombine.low %v4732_v52, %v4740_v35  ;;  %v4475_v42 = vor.u32 %v15530_v12, %v4472_v60  ;;  %v6874_v41 = vsel %vm6719_vm8, %v15533_v24, %v6492_v5  ;;  %v4753_v7 = vrot.slane %v4751_v55, 5  ;;  %v6206_v52 = vpop.permute.xlu0 %6205  ;;  %v3906_v12 = vpop.f32.mrb[31].mxu0 }
 0x320   : > { %v3912_v11 = vadd.f32 %v13286_v3, %v9089_v54  ;;  %7561 = vmatmul.mubr.bf16.gmra.mrb[56].mxu0 %v6874_v41  ;;  %v4746_v61 = vsel %vm9663_vm7, %v4744_v27, %v4745_v33  ;;  %v4749_v60 = vrot.slane %v4748_v51, 4  ;;  %v3904_v13 = vadd.f32 %v13286_v3, %v3903_v25 }
 0x321   : > { %15529 = vst [vmem:[#allocation31_spill] sm:$0xff] %v13935_v48  ;;  %v4476_v62 = vsel %vm9764_vm10, %v4468_v34, %v4475_v42  ;;  %v6750_v32 = vsel %vm6719_vm8, %v13281_v22, %v6206_v52  ;;  %v8422_v2 = vrot.slane %v4478_v50, 11  ;;  %v3915_v5 = vadd.f32 %v13286_v3, %v9090_v18  ;;  %v4185_v50 = vld [vmem:[#allocation2 + $0xe0] sm:$0x8] }
 0x322   : > { %v13954_v35 = vcombine.low %v4467_v21, %v4476_v62  ;;  %v3948_v55 = vmax.f32 %v3912_v11, 0.0  ;;  %7408 = vmatmul.mubr.bf16.gmra.mrb[28].mxu1 %v6750_v32  ;;  %v4754_v34 = vsel %vm9663_vm7, %v4749_v60, %v4753_v7  ;;  %v4488_v33 = vor.u32 %v4486_v28, %v4485_v16  ;;  %v4557_v21 = vld [vmem:[#allocation2 + $0xec] sm:$0x1] }
 0x323   : > { %v3946_v42 = vmax.f32 %v3904_v13, 0.0  ;;  %v3907_v27 = vadd.f32 %v13286_v3, %v3906_v12  ;;  %v13962_v51 = vcombine.low %v4746_v61, %v4754_v34  ;;  %v4490_v22 = vrot.slane %v4485_v16, 4 }
 0x324   : > { %15534 = vst [vmem:[#allocation57_spill] sm:$0xff] %v13954_v35  ;;  %v8757_v54 = vpack.c.bf16 %v3948_v55, %v3948_v55  ;;  %v3949_v19 = vmax.f32 %v3915_v5, 0.0  ;;  %v4489_v1 = vsel %vm9764_vm10, %v8422_v2, %v4488_v33  ;;  %v4494_v24 = vrot.slane %v4492_v37, 7 }
 0x325   : > { %15535 = vst [vmem:[#allocation22_spill] sm:$0xff] %v13962_v51  ;;  %v8755_v9 = vpack.c.bf16 %v3946_v42, %v3946_v42  ;;  %v3947_v28 = vmax.f32 %v3907_v27, 0.0  ;;  %v4757_v3 = vor.u32 %v13882_v46, %v13878_v8  ;;  %v15536_v41 = vshll.u32 %v13818_v47, 16 }
 0x326   : > { %4109 = vst.msk [vmem:[%s9532_s24 + $0x78] sm:$0xf] %vm4078_vm6, %v8757_v54  ;;  %4141 = vst.msk [vmem:[#allocation2 + $0x104] sm:$0xf] %vm4078_vm6, %v8757_v54  ;;  %v8758_v16 = vpack.c.bf16 %v3949_v19, %v3949_v19  ;;  %v15537_v11 = vshll.u32 %v13793_v15, 16  ;;  %v4765_v52 = vshll.u32 %v4557_v21, 16 }
 0x327   : > { %v4759_v7 = vrot.slane %v15536_v41, 5  ;;  %v4500_v37 = vshrl.u32 %v4185_v50, 16  ;;  %4107 = vst.msk [vmem:[%s9532_s24 + $0x70] sm:$0xf] %vm4078_vm6, %v8755_v9  ;;  %4139 = vst.msk [vmem:[#allocation2 + $0xf4] sm:$0xf] %vm4078_vm6, %v8755_v9  ;;  %v8756_v62 = vpack.c.bf16 %v3947_v28, %v3947_v28  ;;  %v15544_v50 = vmov %v15536_v41 }
 0x328   : > { %v4497_v25 = vor.u32 %v15537_v11, %v4494_v24  ;;  %v4758_v8 = vrot.slane %v4757_v3, 4  ;;  %v15538_v61 = vshrl.u32 %v13799_v20, 16  ;;  %4110 = vst.msk [vmem:[%s9532_s24 + $0x7c] sm:$0xf] %vm4078_vm6, %v8758_v16  ;;  %4142 = vst.msk [vmem:[#allocation2 + $0x108] sm:$0xf] %vm4078_vm6, %v8758_v16 }
 0x329   : > { %v4762_v46 = vor.u32 %v13886_v44, %v4759_v7  ;;  %v13986_v15 = vld [vmem:[#allocation2 + $0xe8] sm:$0xf]  ;;  %v4767_v18 = vrot.slane %v4765_v52, 5  ;;  %v8423_v32 = vrot.slane %v4500_v37, 11  ;;  %v15539_v2 = vshrl.u32 %v13818_v47, 16 }
 0x32a   : > { %v4507_v60 = vrot.slane %v15538_v61, 7  ;;  %v4498_v13 = vsel %vm9764_vm10, %v4490_v22, %v4497_v25  ;;  %4108 = vst.msk [vmem:[%s9532_s24 + $0x74] sm:$0xf] %vm4078_vm6, %v8756_v62  ;;  %4140 = vst.msk [vmem:[#allocation2 + $0xf8] sm:$0xf] %vm4078_vm6, %v8756_v62  ;;  %v4760_v5 = vsel %vm9663_vm7, %v4758_v8, %v4759_v7  ;;  %v15541_v34 = vshll.u32 %v13799_v20, 16 }
 0x32b   : > { %v4516_v55 = vrot.slane %v15539_v2, 7  ;;  %v13995_v44 = vcombine.low %v4489_v1, %v4498_v13  ;;  %v4763_v12 = vrot.slane %v4762_v46, 4  ;;  %v15542_v42 = vshll.u32 %v13838_v40, 16  ;;  %v4558_v8 = vld [vmem:[#allocation2 + $0xfc] sm:$0x1]  ;;  %v15552_v46 = vld [vmem:[#allocation47_spill] sm:$0xff]  ;;  %v14042_v2 = vpop.permute.xlu1 %6653 }
 0x32c   : > { %v4510_v33 = vor.u32 %v15541_v34, %v4507_v60  ;;  %v4512_v21 = vrot.slane %v4507_v60, 4  ;;  %v15545_v19 = vshrl.u32 %v13863_v63, 16  ;;  %v15101_v24 = vshll.u32 %v13873_v30, 16  ;;  %v15553_v61 = vld [vmem:[#allocation50_spill] sm:$0xff] }
 0x32d   : > { %15540 = vst [vmem:[#allocation30_spill] sm:$0xff] %v13995_v44  ;;  %v14003_v27 = vrot.slane %v15542_v42, 5  ;;  %v4519_v54 = vor.u32 %v15544_v50, %v4516_v55  ;;  %v15102_v9 = vshrl.u32 %v13986_v15, 16  ;;  %v4768_v28 = vsel %vm9663_vm7, %v4763_v12, %v4767_v18  ;;  %v14024_v11 = vld [vmem:[#allocation2 + $0x104] sm:$0xf]  ;;  %v15556_v12 = vld [vmem:[#allocation52_spill] sm:$0xff] }
 0x32e   : > { %v14011_v1 = vrot.slane %v15545_v19, 4  ;;  %v14018_v41 = vcombine.low %v4760_v5, %v4768_v28  ;;  %v4511_v7 = vsel %vm9764_vm10, %v8423_v32, %v4510_v33  ;;  %15548 = vst [vmem:[#allocation46_spill] sm:$0xff] %v14024_v11  ;;  %v15549_v25 = vshrl.u32 %v13873_v30, 16  ;;  %v14038_v13 = vld [vmem:[#allocation2 + $0xf4] sm:$0xf]  ;;  %v15555_v5 = vld [vmem:[#allocation49_spill] sm:$0xff] }
 0x32f   : > { %15543 = vst [vmem:[#allocation59_spill] sm:$0xff] %v14003_v27  ;;  %v4520_v16 = vsel %vm9764_vm10, %v4512_v21, %v4519_v54  ;;  %15554 = vst [vmem:[#allocation65_spill] sm:$0xff] %v14038_v13  ;;  %v5167_v18 = vshrl.u32 %v14024_v11, 16  ;;  %v5170_v32 = vshll.u32 %v14024_v11, 16  ;;  %v4188_v55 = vld [vmem:[#allocation2 + $0xf0] sm:$0x8]  ;;  %v6494_v35 = vpop.permute.xlu1 %6493 }
 0x330   : > { %15546 = vst [vmem:[#allocation27_spill] sm:$0xff] %v14011_v1  ;;  %15547 = vst [vmem:[#allocation44_spill] sm:$0xff] %v14018_v41  ;;  %v14028_v52 = vrot.slane %v15549_v25, 4  ;;  %v14032_v62 = vcombine.low %v4511_v7, %v4520_v16  ;;  %v15557_v33 = vld [vmem:[#allocation26_spill] sm:$0xff]  ;;  %v15558_v42 = vld [vmem:[#allocation61_spill] sm:$0xff]  ;;  %v5145_v50 = vshrl.u32 %v14038_v13, 16 }
 0x331   : > { %v5148_v54 = vshll.u32 %v14038_v13, 16  ;;  %v14050_v19 = vld [vmem:[#allocation2 + $0x108] sm:$0xf]  ;;  %v14054_v28 = vrot.slane %v15101_v24, 5  ;;  %v14058_v7 = vrot.slane %v15102_v9, 4  ;;  %v5409_v3 = vrot.slane %v5167_v18, 4 }
 0x332   : > { %15550 = vst [vmem:[#allocation24_spill] sm:$0xff] %v14028_v52  ;;  %15551 = vst [vmem:[#allocation58_spill] sm:$0xff] %v14032_v62  ;;  %v14060_v16 = vld [vmem:[#allocation2 + $0xf8] sm:$0xf]  ;;  %v5176_v25 = vshrl.u32 %v14050_v19, 16  ;;  %v5179_v37 = vshll.u32 %v14050_v19, 16 }
 0x333   : > { %15559 = vst [vmem:[#allocation64_spill] sm:$0xff] %v14050_v19  ;;  %15560 = vst [vmem:[#allocation43_spill] sm:$0xff] %v14054_v28  ;;  %v4779_v21 = vshll.u32 %v4558_v8, 16  ;;  %v5147_v22 = vrot.slane %v5145_v50, 7  ;;  %v5154_v34 = vshrl.u32 %v14060_v16, 16  ;;  %v5157_v60 = vshll.u32 %v14060_v16, 16 }
 0x334   : > { %15561 = vst [vmem:[#allocation45_spill] sm:$0xff] %v14058_v7  ;;  %15562 = vst [vmem:[#allocation67_spill] sm:$0xff] %v14060_v16  ;;  %v5395_v62 = vrot.slane %v5145_v50, 4  ;;  %v5825_v24 = vld [vmem:[#allocation2 + $0x4c] sm:$0x1]  ;;  %v5396_v41 = vrot.slane %v5148_v54, 5  ;;  %v6336_v16 = vpop.permute.xlu0 %6335 }
 0x335   : > { %v5410_v44 = vrot.slane %v5170_v32, 5  ;;  %v14066_v51 = vrot.slane %v5179_v37, 5  ;;  %v5415_v9 = vrot.slane %v5176_v25, 4  ;;  %v5150_v48 = vor.u32 %v5148_v54, %v5147_v22  ;;  %v14069_v59 = vld [vmem:[#allocation2 + $0xf4] sm:$0xf]  ;;  %v15564_v54 = vld [vmem:[#allocation37_spill] sm:$0xff] }
 0x336   : > { %v5156_v11 = vrot.slane %v5154_v34, 7  ;;  %v5399_v7 = vrot.slane %v5157_v60, 5  ;;  %v4522_v28 = vshrl.u32 %v4188_v55, 16  ;;  %v5397_v19 = vor.u32 %v5396_v41, %v5395_v62  ;;  %v15566_v41 = vld [vmem:[#allocation68_spill] sm:$0xff]  ;;  %v6656_v62 = vpop.permute.xlu1 %6655 }
 0x337   : > { %v5401_v52 = vrot.slane %v5154_v34, 4  ;;  %v5416_v8 = vor.u32 %v5415_v9, %v14066_v51  ;;  %v5877_v1 = vshll.u32 %v5825_v24, 16  ;;  %v5152_v27 = vrot.slane %v5147_v22, 4 }
 0x338   : > { %v5159_v43 = vor.u32 %v5157_v60, %v5156_v11  ;;  %v5169_v13 = vrot.slane %v5167_v18, 7  ;;  %v5178_v50 = vrot.slane %v5176_v25, 7  ;;  %v5398_v23 = vrot.slane %v5397_v19, 4 }
 0x339   : > { %v5402_v57 = vor.u32 %v5401_v52, %v5399_v7  ;;  %v5411_v53 = vor.u32 %v5410_v44, %v5409_v3  ;;  %v15565_v45 = vor.u32 %v15563_v39, %v15564_v54  ;;  %v5151_v9 = vsel %vm9764_vm10, %v15566_v41, %v5150_v48  ;;  %v14081_v44 = vld [vmem:[#allocation2 + $0xf8] sm:$0xf]  ;;  %v6208_v48 = vpop.permute.xlu0 %6207 }
 0x33a   : > { %v5160_v22 = vsel %vm9764_vm10, %v5152_v27, %v5159_v43  ;;  %v5417_v24 = vrot.slane %v5416_v8, 4  ;;  %v5181_v11 = vor.u32 %v5179_v37, %v5178_v50  ;;  %v14083_v3 = vrot.slane %v4779_v21, 5  ;;  %v14103_v50 = vld [vmem:[#allocation2 + $0xf4] sm:$0xf]  ;;  %v15570_v41 = vld [vmem:[#allocation36_spill] sm:$0xff] }
 0x33b   : > { %v14074_v29 = vrot.slane %v15565_v45, 4  ;;  %v8519_v60 = vcombine.low %v5151_v9, %v5160_v22  ;;  %v5403_v52 = vrot.slane %v5402_v57, 4  ;;  %v14085_v18 = vrot.slane %v4522_v28, 11  ;;  %v15567_v57 = vld [vmem:[#allocation81_spill] sm:$0xff]  ;;  %v15568_v28 = vld [vmem:[#allocation83_spill] sm:$0xff]  ;;  %v15571_v9 = vld [vmem:[#allocation54_spill] sm:$0xff] }
 0x33c   : > { %v5174_v45 = vrot.slane %v5169_v13, 4  ;;  %v4527_v39 = vshrl.u32 %v14069_v59, 16  ;;  %v4530_v55 = vshll.u32 %v14069_v59, 16  ;;  %v14089_v34 = vrot.slane %v5877_v1, 5  ;;  %v15573_v22 = vld [vmem:[#allocation85_spill] sm:$0xff] }
 0x33d   : > { %6347 = vrot.lane.b32.xlu0 %v8519_v60, %s15112_s21  ;;  %v5400_v43 = vsel %vm9663_vm7, %v5398_v23, %v5399_v7  ;;  %v5408_v27 = vsel %vm9663_vm7, %v5403_v52, %v15567_v57  ;;  %v5412_v37 = vrot.slane %v5411_v53, 4  ;;  %v5172_v21 = vor.u32 %v5170_v32, %v5169_v13  ;;  %v15569_v23 = vld [vmem:[#allocation80_spill] sm:$0xff] }
 0x33e   : > { %v8551_v19 = vcombine.low %v5400_v43, %v5408_v27  ;;  %v5422_v25 = vsel %vm9663_vm7, %v5417_v24, %v15568_v28  ;;  %v5182_v1 = vsel %vm9764_vm10, %v5174_v45, %v5181_v11  ;;  %v4536_v8 = vshrl.u32 %v14081_v44, 16  ;;  %v14116_v11 = vld [vmem:[#allocation2 + $0x5c] sm:$0x1]  ;;  %v14122_v57 = vld [vmem:[#allocation2 + $0xf8] sm:$0xf] }
 0x33f   : > { %v6942_v7 = vsel %vm6719_vm8, %v15569_v23, %v14042_v2  ;;  %v15572_v53 = vcombine.low %v15570_v41, %v15571_v9  ;;  %v6818_v32 = vsel %vm6719_vm8, %v13588_v17, %v6336_v16  ;;  %v6946_v24 = vsel %vm6719_vm8, %v15573_v22, %v6656_v62  ;;  %v6496_v2 = vpop.permute.xlu1 %6495  ;;  %v15575_v62 = vld [vmem:[#allocation84_spill] sm:$0xff] }
 0x340   : > { %6507 = vrot.lane.b32.xlu1 %v8551_v19, %s15112_s21  ;;  %v4539_v60 = vshll.u32 %v14081_v44, 16  ;;  %v4769_v52 = vrot.slane %v4527_v39, 4  ;;  %v4770_v45 = vrot.slane %v4530_v55, 5  ;;  %7568 = vmatprep.mubr.bf16.mxu0 %v6942_v7  ;;  %v6754_v43 = vsel %vm6719_vm8, %v13595_v26, %v6208_v48 }
 0x341   : > { %v6878_v13 = vsel %vm6719_vm8, %v15572_v53, %v6494_v35  ;;  %v6338_v35 = vpop.permute.xlu0 %6337  ;;  %v15574_v17 = vcombine.low %v13799_v20, %v13818_v47  ;;  %v5414_v16 = vsel %vm9663_vm7, %v5412_v37, %v14066_v51  ;;  %v5173_v27 = vsel %vm9764_vm10, %v15575_v62, %v5172_v21  ;;  %7415 = vmatprep.mubr.bf16.mxu1 %v6818_v32  ;;  %v15576_v51 = vld [vmem:[#allocation17_spill] sm:$0xff]  ;;  %v15577_v37 = vld [vmem:[#allocation70_spill] sm:$0xff] }
 0x342   : > { %7569 = vmatmul.mubr.bf16.gmra.mrb[60].mxu0 %v6878_v13  ;;  %v5763_v19 = vshrl.u32 %v14103_v50, 16  ;;  %v6822_v26 = vsel %vm6719_vm8, %v13649_v4, %v6338_v35  ;;  %v8552_v48 = vcombine.low %v5414_v16, %v5422_v25  ;;  %v8520_v28 = vcombine.low %v5173_v27, %v5182_v1  ;;  %7416 = vmatmul.mubr.bf16.gmra.mrb[32].mxu1 %v6754_v43  ;;  %v5453_v25 = vld [vmem:[#allocation2 + $0xc0] sm:$0x8]  ;;  %v15579_v16 = vld [vmem:[#allocation34_spill] sm:$0xff] }
 0x343   : > { %6219 = vrot.lane.b32.xlu0 %v15574_v17, %s15112_s21  ;;  %v4775_v23 = vrot.slane %v4536_v8, 4  ;;  %7576 = vmatprep.mubr.bf16.mxu0 %v6946_v24  ;;  %v5891_v20 = vshll.u32 %v14116_v11, 16  ;;  %v8488_v47 = vcombine.low %v14069_v59, %v14081_v44  ;;  %v15578_v21 = vcombine.low %v15576_v51, %v15577_v37 }
 0x344   : > { %v5766_v41 = vshll.u32 %v14103_v50, 16  ;;  %v5772_v4 = vshrl.u32 %v14122_v57, 16  ;;  %6509 = vrot.lane.b32.xlu1 %v8552_v48, %s15112_s21  ;;  %v5775_v1 = vshll.u32 %v14122_v57, 16  ;;  %v8582_v9 = vcombine.low %v14103_v50, %v14122_v57  ;;  %7423 = vmatprep.mubr.bf16.mxu1 %v6822_v26  ;;  %v5831_v50 = vld [vmem:[#allocation2 + $0xac] sm:$0x1] }
 0x345   : > { %v6882_v7 = vsel %vm6719_vm8, %v15578_v21, %v6496_v2  ;;  %v6210_v59 = vpop.permute.xlu0 %6209  ;;  %v4771_v44 = vor.u32 %v4770_v45, %v4769_v52  ;;  %v4773_v53 = vrot.slane %v4539_v60, 5  ;;  %v14153_v13 = vrot.slane %v5763_v19, 4 }
 0x346   : > { %v6758_v32 = vsel %vm6719_vm8, %v13622_v10, %v6210_v59  ;;  %v4529_v22 = vrot.slane %v4527_v39, 7  ;;  %v4538_v24 = vrot.slane %v4536_v8, 7  ;;  %v5880_v43 = vsel %vm9663_vm7, %v14074_v29, %v14089_v34  ;;  %v5456_v29 = vld [vmem:[#allocation2 + $0xd0] sm:$0x8]  ;;  %v14177_v34 = vld [vmem:[#allocation2 + $0x104] sm:$0xf] }
 0x347   : > { %6349 = vrot.lane.b32.xlu0 %v8520_v28, %s15112_s21  ;;  %v4772_v11 = vrot.slane %v4771_v44, 4  ;;  %v4776_v2 = vor.u32 %v4775_v23, %v4773_v53  ;;  %v5692_v52 = vshrl.u32 %v5453_v25, 16  ;;  %v15580_v62 = vsel %vm9663_vm7, %v15579_v16, %v15564_v54 }
 0x348   : > { %v4532_v45 = vor.u32 %v4530_v55, %v4529_v22  ;;  %v4534_v35 = vrot.slane %v4529_v22, 4  ;;  %v4541_v17 = vor.u32 %v4539_v60, %v4538_v24  ;;  %v14166_v27 = vcombine.low %v15580_v62, %v5880_v43 }
 0x349   : > { %v4774_v10 = vsel %vm9663_vm7, %v4772_v11, %v4773_v53  ;;  %v4777_v39 = vrot.slane %v4776_v2, 4  ;;  %v8451_v8 = vrot.slane %v5692_v52, 11  ;;  %v15581_v26 = vshrl.u32 %v13599_v49, 16  ;;  %v5827_v52 = vld [vmem:[#allocation2 + $0x6c] sm:$0x1] }
 0x34a   : > { %7577 = vmatmul.mubr.bf16.gmra.mrb[64].mxu0 %v6882_v7  ;;  %v14175_v55 = vrot.slane %v5766_v41, 5  ;;  %v4533_v54 = vsel %vm9764_vm10, %v14085_v18, %v4532_v45  ;;  %v4542_v60 = vsel %vm9764_vm10, %v4534_v35, %v4541_v17  ;;  %v15582_v28 = vshrl.u32 %v13619_v58, 16  ;;  %7424 = vmatmul.mubr.bf16.gmra.mrb[36].mxu1 %v6758_v32 }
 0x34b   : > { %v5699_v48 = vrot.slane %v15581_v26, 7  ;;  %6221 = vrot.lane.b32.xlu0 %v8488_v47, %s15112_s21  ;;  %v4782_v47 = vsel %vm9663_vm7, %v4777_v39, %v14083_v3  ;;  %v14189_v51 = vcombine.low %v4533_v54, %v4542_v60  ;;  %v15583_v37 = vshll.u32 %v13599_v49, 16  ;;  %v15590_v26 = vld [vmem:[#allocation51_spill] sm:$0xff] }
 0x34c   : > { %v5708_v23 = vrot.slane %v15582_v28, 7  ;;  %v14193_v25 = vcombine.low %v4774_v10, %v4782_v47  ;;  %v15584_v18 = vshll.u32 %v13619_v58, 16  ;;  %v5714_v44 = vshrl.u32 %v5456_v29, 16  ;;  %v5459_v10 = vld [vmem:[#allocation2 + $0xe0] sm:$0x8] }
 0x34d   : > { %v5702_v21 = vor.u32 %v15583_v37, %v5699_v48  ;;  %v5704_v7 = vrot.slane %v5699_v48, 4  ;;  %v15585_v53 = vshrl.u32 %v13838_v40, 16  ;;  %v5785_v24 = vshrl.u32 %v14177_v34, 16 }
 0x34e   : > { %v5711_v59 = vor.u32 %v15584_v18, %v5708_v23  ;;  %v15586_v11 = vshrl.u32 %v13863_v63, 16  ;;  %v5893_v43 = vrot.slane %v5891_v20, 5  ;;  %v15587_v32 = vcombine.low %v13599_v49, %v13619_v58  ;;  %v15591_v49 = vld [vmem:[#allocation48_spill] sm:$0xff] }
 0x34f   : > { %v5721_v22 = vrot.slane %v15585_v53, 7  ;;  %v5703_v3 = vsel %vm9764_vm10, %v8451_v8, %v5702_v21  ;;  %v8452_v35 = vrot.slane %v5714_v44, 11  ;;  %v15588_v17 = vshll.u32 %v13838_v40, 16 }
 0x350   : > { %v5730_v2 = vrot.slane %v15586_v11, 7  ;;  %6659 = vrot.lane.b32.xlu0 %v15587_v32, %s15112_s21  ;;  %v5712_v45 = vsel %vm9764_vm10, %v5704_v7, %v5711_v59  ;;  %v15589_v8 = vshll.u32 %v13863_v63, 16  ;;  %v5894_v48 = vsel %vm9663_vm7, %v15590_v26, %v5893_v43  ;;  %v15595_v59 = vld [vmem:[#allocation53_spill] sm:$0xff]  ;;  %v6658_v43 = vpop.permute.xlu1 %6657 }
 0x351   : > { %v5724_v16 = vor.u32 %v15588_v17, %v5721_v22  ;;  %v5726_v62 = vrot.slane %v5721_v22, 4  ;;  %v14212_v39 = vcombine.low %v5703_v3, %v5712_v45  ;;  %v15592_v29 = vshll.u32 %v15591_v49, 16  ;;  %v15600_v17 = vld [vmem:[#allocation56_spill] sm:$0xff] }
 0x352   : > { %v5733_v20 = vor.u32 %v15589_v8, %v5730_v2  ;;  %v5788_v60 = vshll.u32 %v14177_v34, 16  ;;  %v15593_v28 = vsel %vm9663_vm7, %v15553_v61, %v15552_v46  ;;  %v15594_v47 = vor.u32 %v15556_v12, %v15555_v5  ;;  %v5828_v2 = vld [vmem:[#allocation2 + $0x7c] sm:$0x1] }
 0x353   : > { %v5899_v54 = vrot.slane %v15592_v29, 5  ;;  %v14227_v23 = vcombine.low %v15593_v28, %v5894_v48  ;;  %v5905_v21 = vshll.u32 %v5827_v52, 16  ;;  %v5725_v7 = vsel %vm9764_vm10, %v8452_v35, %v5724_v16 }
 0x354   : > { %v5898_v37 = vrot.slane %v15594_v47, 4  ;;  %v5734_v18 = vsel %vm9764_vm10, %v5726_v62, %v5733_v20  ;;  %v5736_v53 = vshrl.u32 %v5459_v10, 16  ;;  %v15596_v46 = vcombine.low %v13838_v40, %v13863_v63  ;;  %v5829_v47 = vld [vmem:[#allocation2 + $0x8c] sm:$0x1] }
 0x355   : > { %v5902_v44 = vor.u32 %v15595_v59, %v5899_v54  ;;  %v14241_v61 = vcombine.low %v5725_v7, %v5734_v18  ;;  %v5907_v22 = vrot.slane %v5905_v21, 5  ;;  %v15597_v5 = vshrl.u32 %v13873_v30, 16  ;;  %v15607_v18 = vld [vmem:[#allocation63_spill] sm:$0xff] }
 0x356   : > { %6661 = vrot.lane.b32.xlu0 %v15596_v46, %s15112_s21  ;;  %v15598_v3 = vshrl.u32 %v13986_v15, 16  ;;  %v8453_v32 = vrot.slane %v5736_v53, 11  ;;  %v15599_v45 = vor.u32 %v15558_v42, %v15557_v33  ;;  %v15601_v40 = vshll.u32 %v15600_v17, 16  ;;  %v15604_v42 = vld [vmem:[#allocation62_spill] sm:$0xff]  ;;  %v6498_v46 = vpop.permute.xlu1 %6497 }
 0x357   : > { %v5743_v12 = vrot.slane %v15597_v5, 7  ;;  %v5903_v52 = vrot.slane %v5902_v44, 4  ;;  %v6950_v62 = vsel %vm6719_vm8, %v13633_v56, %v6658_v43  ;;  %v15602_v10 = vshll.u32 %v13873_v30, 16  ;;  %v5462_v44 = vld [vmem:[#allocation2 + $0xf0] sm:$0x8]  ;;  %v15611_v43 = vld [vmem:[#allocation73_spill] sm:$0xff] }
 0x358   : > { %v5752_v11 = vrot.slane %v15598_v3, 7  ;;  %v5912_v35 = vrot.slane %v15599_v45, 4  ;;  %v5913_v16 = vrot.slane %v15601_v40, 5  ;;  %v15603_v26 = vshll.u32 %v13986_v15, 16  ;;  %7584 = vmatprep.mubr.bf16.mxu0 %v6950_v62  ;;  %v14275_v53 = vld [vmem:[#allocation2 + $0x108] sm:$0xf] }
 0x359   : > { %v5746_v8 = vor.u32 %v15602_v10, %v5743_v12  ;;  %v5748_v20 = vrot.slane %v5743_v12, 4  ;;  %v5900_v49 = vsel %vm9663_vm7, %v5898_v37, %v5899_v54  ;;  %v5908_v33 = vsel %vm9663_vm7, %v5903_v52, %v5907_v22  ;;  %v15606_v37 = vld [vmem:[#allocation41_spill] sm:$0xff]  ;;  %v15608_v12 = vld [vmem:[#allocation60_spill] sm:$0xff]  ;;  %v15613_v10 = vld [vmem:[#allocation42_spill] sm:$0xff] }
 0x35a   : > { %v5755_v48 = vor.u32 %v15603_v26, %v5752_v11  ;;  %v5916_v29 = vor.u32 %v15604_v42, %v5913_v16  ;;  %v5919_v28 = vshll.u32 %v5828_v2, 16  ;;  %v15605_v56 = vcombine.low %v13873_v30, %v13986_v15  ;;  %v15610_v2 = vld [vmem:[#allocation72_spill] sm:$0xff] }
 0x35b   : > { %v14267_v21 = vcombine.low %v5900_v49, %v5908_v33  ;;  %v5747_v7 = vsel %vm9764_vm10, %v8453_v32, %v5746_v8  ;;  %v5925_v59 = vor.u32 %v15607_v18, %v15606_v37  ;;  %v15609_v3 = vshll.u32 %v15608_v12, 16  ;;  %v5830_v42 = vld [vmem:[#allocation2 + $0x9c] sm:$0x1]  ;;  %v15616_v18 = vld [vmem:[#allocation69_spill] sm:$0xff] }
 0x35c   : > { %6663 = vrot.lane.b32.xlu0 %v15605_v56, %s15112_s21  ;;  %v5756_v54 = vsel %vm9764_vm10, %v5748_v20, %v5755_v48  ;;  %v5917_v5 = vrot.slane %v5916_v29, 4  ;;  %v5921_v30 = vrot.slane %v5919_v28, 5  ;;  %v15612_v52 = vcombine.low %v15610_v2, %v15611_v43 }
 0x35d   : > { %v14277_v22 = vcombine.low %v5747_v7, %v5756_v54  ;;  %v5927_v11 = vrot.slane %v15609_v3, 5  ;;  %v5914_v45 = vsel %vm9663_vm7, %v5912_v35, %v5913_v16  ;;  %v5926_v17 = vrot.slane %v5925_v59, 4  ;;  %v6340_v16 = vpop.permute.xlu0 %6339  ;;  %v15614_v7 = vld [vmem:[#allocation74_spill] sm:$0xff]  ;;  %v15615_v54 = vld [vmem:[#allocation75_spill] sm:$0xff] }
 0x35e   : > { %v6886_v32 = vsel %vm6719_vm8, %v15612_v52, %v6498_v46  ;;  %v5933_v40 = vshll.u32 %v5829_v47, 16  ;;  %v5922_v62 = vsel %vm9663_vm7, %v5917_v5, %v5921_v30  ;;  %v5758_v20 = vshrl.u32 %v5462_v44, 16  ;;  %v15619_v30 = vld [vmem:[#allocation78_spill] sm:$0xff] }
 0x35f   : > { %7585 = vmatmul.mubr.bf16.gmra.mrb[68].mxu0 %v6886_v32  ;;  %v5930_v8 = vor.u32 %v15613_v10, %v5927_v11  ;;  %v5765_v26 = vrot.slane %v5763_v19, 7  ;;  %v8583_v35 = vcombine.low %v14177_v34, %v14275_v53  ;;  %v14298_v48 = vcombine.low %v5914_v45, %v5922_v62  ;;  %v5465_v32 = vld [vmem:[#allocation2 + $0x100] sm:$0x8] }
 0x360   : > { %6665 = vrot.lane.b32.xlu0 %v8582_v9, %s15112_s21  ;;  %v5935_v49 = vrot.slane %v5933_v40, 5  ;;  %v5774_v33 = vrot.slane %v5772_v4, 7  ;;  %v6826_v29 = vsel %vm6719_vm8, %v13684_v38, %v6340_v16  ;;  %v8454_v28 = vrot.slane %v5758_v20, 11  ;;  %v15620_v40 = vld [vmem:[#allocation76_spill] sm:$0xff] }
 0x361   : > { %v5931_v19 = vrot.slane %v5930_v8, 4  ;;  %v5768_v47 = vor.u32 %v5766_v41, %v5765_v26  ;;  %7431 = vmatprep.mubr.bf16.mxu1 %v6826_v29  ;;  %v5770_v9 = vrot.slane %v5765_v26, 4  ;;  %v5939_v37 = vor.u32 %v15615_v54, %v15614_v7  ;;  %v15618_v41 = vld [vmem:[#allocation77_spill] sm:$0xff]  ;;  %v6212_v3 = vpop.permute.xlu0 %6211  ;;  %v15621_v26 = vld [vmem:[#allocation71_spill] sm:$0xff] }
 0x362   : > { %v5777_v56 = vor.u32 %v5775_v1, %v5774_v33  ;;  %v15617_v59 = vshll.u32 %v15616_v18, 16  ;;  %v5928_v46 = vsel %vm9663_vm7, %v5926_v17, %v5927_v11  ;;  %v5947_v5 = vshll.u32 %v5830_v42, 16  ;;  %v8827_v33 = vpop.f32.mrb[0].mxu1  ;;  %v15624_v7 = vld [vmem:[#allocation79_spill] sm:$0xff]  ;;  %v15625_v18 = vld [vmem:[#allocation18_spill] sm:$0xff] }
 0x363   : > { %v5936_v38 = vsel %vm9663_vm7, %v5931_v19, %v5935_v49  ;;  %v5953_v12 = vor.u32 %v15619_v30, %v15618_v41  ;;  %v5769_v43 = vsel %vm9764_vm10, %v8454_v28, %v5768_v47  ;;  %v5940_v11 = vrot.slane %v5939_v37, 4  ;;  %v5832_v41 = vld [vmem:[#allocation2 + $0xbc] sm:$0x1] }
 0x364   : > { %v5941_v44 = vrot.slane %v15617_v59, 5  ;;  %6667 = vrot.lane.b32.xlu0 %v8583_v35, %s15112_s21  ;;  %v14319_v2 = vcombine.low %v5928_v46, %v5936_v38  ;;  %v5778_v52 = vsel %vm9764_vm10, %v5770_v9, %v5777_v56  ;;  %v6762_v45 = vsel %vm6719_vm8, %v13719_v31, %v6212_v3  ;;  %v8828_v9 = vpop.f32.mrb[1].mxu1 }
 0x365   : > { %v14327_v17 = vcombine.low %v5769_v43, %v5778_v52  ;;  %v5949_v10 = vrot.slane %v5947_v5, 5  ;;  %v14332_v8 = vrot.slane %v5772_v4, 4  ;;  %v5794_v20 = vshrl.u32 %v14275_v53, 16  ;;  %7432 = vmatmul.mubr.bf16.gmra.mrb[40].mxu1 %v6762_v45  ;;  %v6342_v47 = vpop.permute.xlu0 %6341  ;;  %v8830_v38 = vpop.f32.mrb[2].mxu1  ;;  %v15626_v45 = vld [vmem:[#allocation86_spill] sm:$0xff] }
 0x366   : > { %v5944_v62 = vor.u32 %v15620_v40, %v5941_v44  ;;  %v15622_v35 = vshll.u32 %v15621_v26, 16  ;;  %v5961_v49 = vshll.u32 %v5831_v50, 16  ;;  %v5954_v29 = vrot.slane %v5953_v12, 4  ;;  %v15627_v40 = vld [vmem:[#allocation19_spill] sm:$0xff] }
 0x367   : > { %v5780_v31 = vshrl.u32 %v5465_v32, 16  ;;  %v5787_v19 = vrot.slane %v5785_v24, 7  ;;  %v5797_v28 = vshll.u32 %v14275_v53, 16  ;;  %v15623_v4 = vcombine.low %v13715_v0, %v13717_v14  ;;  %v5838_v53 = vld [vmem:[#allocation2 + $0x11c] sm:$0x1] }
 0x368   : > { %v5955_v16 = vrot.slane %v15622_v35, 5  ;;  %v5945_v42 = vrot.slane %v5944_v62, 4  ;;  %v5942_v56 = vsel %vm9663_vm7, %v5940_v11, %v5941_v44  ;;  %v5963_v37 = vrot.slane %v5961_v49, 5  ;;  %v8831_v44 = vpop.f32.mrb[3].mxu1  ;;  %v15628_v35 = vld [vmem:[#allocation82_spill] sm:$0xff] }
 0x369   : > { %6669 = vrot.lane.b32.xlu0 %v15623_v4, %s15112_s21  ;;  %v6830_v59 = vsel %vm6719_vm8, %v15625_v18, %v6342_v47  ;;  %v14349_v46 = vadd.f32 %v8828_v9, %v8827_v33  ;;  %v8455_v50 = vrot.slane %v5780_v31, 11  ;;  %v14355_v30 = vrot.slane %v5785_v24, 4  ;;  %v6214_v62 = vpop.permute.xlu0 %6213  ;;  %v5833_v31 = vld [vmem:[#allocation2 + $0xcc] sm:$0x1]  ;;  %v15630_v4 = vld [vmem:[#allocation29_spill] sm:$0xff]  ;;  %s9324_s21 = scalar_lea.vmem %s9323_s23, 4096 }
 0x36a   : > { %v5958_v54 = vor.u32 %v15624_v7, %v5955_v16  ;;  %v5950_v5 = vsel %vm9663_vm7, %v5945_v42, %v5949_v10  ;;  %7439 = vmatprep.mubr.bf16.mxu1 %v6830_v59  ;;  %v5790_v43 = vor.u32 %v5788_v60, %v5787_v19  ;;  %v14361_v52 = vadd.f32 %v8831_v44, %v8830_v38  ;;  %v15631_v7 = vld [vmem:[#allocation9_spill] sm:$0xff]  ;;  %v15633_v18 = vld [vmem:[#allocation10_spill] sm:$0xff]  ;;  %v8833_v38 = vpop.f32.mrb[4].mxu1  ;;  %p9326_p2 = scmp.lt.s32.totalorder %s9324_s21, %s9318_s10 }
 0x36b   : > { %v14357_v12 = vcombine.low %v5942_v56, %v5950_v5  ;;  %v5956_v11 = vsel %vm9663_vm7, %v5954_v29, %v5955_v16  ;;  %v5796_v32 = vrot.slane %v5794_v20, 7  ;;  %v5967_v24 = vor.u32 %v15627_v40, %v15626_v45  ;;  %v8834_v45 = vpop.f32.mrb[5].mxu1 }
 0x36c   : > { %v5959_v3 = vrot.slane %v5958_v54, 4  ;;  %v5792_v26 = vrot.slane %v5787_v19, 4  ;;  %v15629_v49 = vshll.u32 %v15628_v35, 16  ;;  %v5975_v42 = vshll.u32 %v5832_v41, 16  ;;  %p9327_p3 = por %p9326_p2, %p9325_p1 }
 0x36d   : > { %v6766_v47 = vsel %vm6719_vm8, %v15630_v4, %v6214_v62  ;;  %v5791_v29 = vsel %vm9764_vm10, %v8455_v50, %v5790_v43  ;;  %v5799_v9 = vor.u32 %v5797_v28, %v5796_v32  ;;  %v5968_v56 = vrot.slane %v5967_v24, 4  ;;  %v15635_v50 = vld [vmem:[#allocation67_spill] sm:$0xff]  ;;  %v15636_v43 = vld [vmem:[#allocation65_spill] sm:$0xff]  ;;  %v5834_v32 = vld [vmem:[#allocation2 + $0xdc] sm:$0x1] }
 0x36e   : > { %v5964_v10 = vsel %vm9663_vm7, %v5959_v3, %v5963_v37  ;;  %v5969_v33 = vrot.slane %v15629_v49, 5  ;;  %7440 = vmatmul.mubr.bf16.gmra.mrb[44].mxu1 %v6766_v47  ;;  %v5977_v54 = vrot.slane %v5975_v42, 5  ;;  %v15632_v37 = vld [vmem:[#allocation11_spill] sm:$0xff]  ;;  %v15634_v41 = vshll.u32 %v13619_v58, 16  ;;  %v8836_v49 = vpop.f32.mrb[6].mxu1  ;;  %v15638_v4 = vld [vmem:[#allocation28_spill] sm:$0xff]  ;;  %p9328_p4 = pnand %p9327_p3, %p9321_p0 }
 0x36f   : > { %v14375_v16 = vcombine.low %v5956_v11, %v5964_v10  ;;  %v5981_v59 = vor.u32 %v15633_v18, %v15632_v37  ;;  %v5800_v5 = vsel %vm9764_vm10, %v5792_v26, %v5799_v9  ;;  %v5989_v3 = vshll.u32 %v5833_v31, 16  ;;  %v15637_v26 = vld [vmem:[#allocation12_spill] sm:$0xff]  ;;  %v15639_v31 = vld [vmem:[#allocation59_spill] sm:$0xff]  ;;  %v8837_v9 = vpop.f32.mrb[7].mxu1  ;;  %v5835_v37 = vld [vmem:[#allocation2 + $0xec] sm:$0x1] }
 0x370   : > { %v5972_v19 = vor.u32 %v15631_v7, %v5969_v33  ;;  %v5983_v44 = vrot.slane %v15634_v41, 5  ;;  %v8535_v11 = vcombine.low %v15636_v43, %v15635_v50  ;;  %v14390_v40 = vcombine.low %v5791_v29, %v5800_v5 }
 0x371   : > { %v5970_v24 = vsel %vm9663_vm7, %v5968_v56, %v5969_v33  ;;  %v5982_v10 = vrot.slane %v5981_v59, 4  ;;  %v14394_v35 = vadd.f32 %v8834_v45, %v8833_v38  ;;  %v5991_v58 = vrot.slane %v5989_v3, 5  ;;  %v15641_v3 = vld [vmem:[#allocation27_spill] sm:$0xff] }
 0x372   : > { %v5973_v62 = vrot.slane %v5972_v19, 4  ;;  %v5986_v42 = vor.u32 %v15637_v26, %v5983_v44  ;;  %v5995_v47 = vor.u32 %v15639_v31, %v15638_v4  ;;  %v15640_v33 = vshll.u32 %v13863_v63, 16  ;;  %v15643_v26 = vld [vmem:[#allocation43_spill] sm:$0xff] }
 0x373   : > { %v5984_v29 = vsel %vm9663_vm7, %v5982_v10, %v5983_v44  ;;  %v6003_v19 = vshll.u32 %v5834_v32, 16  ;;  %v6036_v18 = vrot.slane %v5788_v60, 5  ;;  %v14407_v59 = vadd.f32 %v8837_v9, %v8836_v49  ;;  %v5468_v10 = vld [vmem:[#allocation2 + $0x110] sm:$0x8] }
 0x374   : > { %v5978_v7 = vsel %vm9663_vm7, %v5973_v62, %v5977_v54  ;;  %v5997_v56 = vrot.slane %v15640_v33, 5  ;;  %v5987_v5 = vrot.slane %v5986_v42, 4  ;;  %v5996_v41 = vrot.slane %v5995_v47, 4  ;;  %v15642_v62 = vld [vmem:[#allocation24_spill] sm:$0xff]  ;;  %v15645_v47 = vld [vmem:[#allocation45_spill] sm:$0xff] }
 0x375   : > { %v14409_v38 = vcombine.low %v5970_v24, %v5978_v7  ;;  %v6005_v54 = vrot.slane %v6003_v19, 5  ;;  %v6009_v44 = vor.u32 %v15643_v26, %v15642_v62  ;;  %v6041_v63 = vrot.slane %v5794_v20, 4 }
 0x376   : > { %v6000_v45 = vor.u32 %v15641_v3, %v5997_v56  ;;  %v5992_v34 = vsel %vm9663_vm7, %v5987_v5, %v5991_v58  ;;  %v15644_v60 = vshll.u32 %v13986_v15, 16  ;;  %v6017_v24 = vshll.u32 %v5835_v37, 16  ;;  %v15648_v5 = vld [vmem:[#allocation64_spill] sm:$0xff]  ;;  %v5823_v3 = vld [vmem:[#allocation2 + $0x2c] sm:$0x1] }
 0x377   : > { %v14420_v49 = vcombine.low %v5984_v29, %v5992_v34  ;;  %v5998_v42 = vsel %vm9663_vm7, %v5996_v41, %v5997_v56  ;;  %v6010_v31 = vrot.slane %v6009_v44, 4  ;;  %v5802_v33 = vshrl.u32 %v5468_v10, 16  ;;  %v15649_v56 = vld [vmem:[#allocation46_spill] sm:$0xff] }
 0x378   : > { %v6011_v32 = vrot.slane %v15644_v60, 5  ;;  %v6001_v4 = vrot.slane %v6000_v45, 4  ;;  %v6019_v7 = vrot.slane %v6017_v24, 5  ;;  %v15646_v20 = vshrl.u32 %v13715_v0, 16  ;;  %v15652_v24 = vld [vmem:[#allocation21_spill] sm:$0xff] }
 0x379   : > { %v15647_v29 = vshrl.u32 %v13717_v14, 16  ;;  %v8536_v41 = vcombine.low %v15649_v56, %v15648_v5  ;;  %v8456_v26 = vrot.slane %v5802_v33, 11  ;;  %v15650_v44 = vshll.u32 %v13715_v0, 16  ;;  %v5836_v0 = vld [vmem:[#allocation2 + $0xfc] sm:$0x1] }
 0x37a   : > { %v6014_v9 = vor.u32 %v15645_v47, %v6011_v32  ;;  %v5809_v19 = vrot.slane %v15646_v20, 7  ;;  %v6006_v58 = vsel %vm9663_vm7, %v6001_v4, %v6005_v54  ;;  %v6012_v15 = vsel %vm9663_vm7, %v6010_v31, %v6011_v32  ;;  %v15653_v32 = vld [vmem:[#allocation20_spill] sm:$0xff]  ;;  %v15655_v47 = vld [vmem:[#allocation13_spill] sm:$0xff] }
 0x37b   : > { %v5818_v37 = vrot.slane %v15647_v29, 7  ;;  %v14435_v45 = vcombine.low %v5998_v42, %v6006_v58  ;;  %v15651_v54 = vshll.u32 %v13717_v14, 16  ;;  %v15654_v4 = vor.u32 %v15652_v24, %v15653_v32  ;;  %v5837_v32 = vld [vmem:[#allocation2 + $0x10c] sm:$0x1] }
 0x37c   : > { %v6015_v62 = vrot.slane %v6014_v9, 4  ;;  %v5812_v10 = vor.u32 %v15650_v44, %v5809_v19  ;;  %v5814_v34 = vrot.slane %v5809_v19, 4  ;;  %v15656_v20 = vshll.u32 %v15655_v47, 16  ;;  %v15659_v47 = vld [vmem:[#allocation38_spill] sm:$0xff] }
 0x37d   : > { %v5821_v60 = vor.u32 %v15651_v54, %v5818_v37  ;;  %v5842_v31 = vrot.slane %v15654_v4, 4  ;;  %v5849_v33 = vshll.u32 %v5823_v3, 16  ;;  %v6023_v19 = vor.u32 %v14175_v55, %v14153_v13  ;;  %v15657_v54 = vld [vmem:[#allocation23_spill] sm:$0xff] }
 0x37e   : > { %v5843_v29 = vrot.slane %v15656_v20, 5  ;;  %v6020_v42 = vsel %vm9663_vm7, %v6015_v62, %v6019_v7  ;;  %v5813_v9 = vsel %vm9764_vm10, %v8456_v26, %v5812_v10  ;;  %v6025_v3 = vrot.slane %v5775_v1, 5 }
 0x37f   : > { %v14452_v58 = vcombine.low %v6012_v15, %v6020_v42  ;;  %v5822_v37 = vsel %vm9764_vm10, %v5814_v34, %v5821_v60  ;;  %v5851_v62 = vrot.slane %v5849_v33, 5  ;;  %v6024_v26 = vrot.slane %v6023_v19, 4  ;;  %v5824_v15 = vld [vmem:[#allocation2 + $0x3c] sm:$0x1]  ;;  %v15661_v19 = vld [vmem:[#allocation14_spill] sm:$0xff] }
 0x380   : > { %v5844_v44 = vsel %vm9663_vm7, %v5842_v31, %v5843_v29  ;;  %v5846_v24 = vor.u32 %v15657_v54, %v5843_v29  ;;  %v14459_v7 = vcombine.low %v5813_v9, %v5822_v37  ;;  %v6031_v13 = vshll.u32 %v5836_v0, 16  ;;  %v15658_v31 = vld [vmem:[#allocation35_spill] sm:$0xff] }
 0x381   : > { %v6037_v55 = vor.u32 %v6036_v18, %v14355_v30  ;;  %v6039_v36 = vrot.slane %v5797_v28, 5  ;;  %v6026_v34 = vsel %vm9663_vm7, %v6024_v26, %v6025_v3  ;;  %v6028_v60 = vor.u32 %v14332_v8, %v6025_v3  ;;  %v15660_v0 = vld [vmem:[#allocation15_spill] sm:$0xff] }
 0x382   : > { %v5847_v10 = vrot.slane %v5846_v24, 4  ;;  %v6045_v4 = vshll.u32 %v5837_v32, 16  ;;  %v5858_v57 = vsel %vm9663_vm7, %v15659_v47, %v15658_v31  ;;  %v6033_v20 = vrot.slane %v6031_v13, 5 }
 0x383   : > { %v6038_v30 = vrot.slane %v6037_v55, 4  ;;  %v6042_v18 = vor.u32 %v6041_v63, %v6039_v36  ;;  %v6029_v29 = vrot.slane %v6028_v60, 4  ;;  %v5863_v9 = vshll.u32 %v5824_v15, 16 }
 0x384   : > { %v5852_v1 = vsel %vm9663_vm7, %v5847_v10, %v5851_v62  ;;  %v6047_v42 = vrot.slane %v6045_v4, 5  ;;  %v6051_v37 = vor.u32 %v15661_v19, %v15660_v0  ;;  %v15662_v54 = vshll.u32 %v13717_v14, 16  ;;  %v15663_v10 = vld [vmem:[#allocation25_spill] sm:$0xff] }
 0x385   : > { %v14475_v28 = vcombine.low %v5844_v44, %v5852_v1  ;;  %v6040_v8 = vsel %vm9663_vm7, %v6038_v30, %v6039_v36  ;;  %v6043_v33 = vrot.slane %v6042_v18, 4  ;;  %v6034_v32 = vsel %vm9663_vm7, %v6029_v29, %v6033_v20  ;;  %v15664_v36 = vld [vmem:[#allocation39_spill] sm:$0xff]  ;;  %v6344_v1 = vpop.permute.xlu0 %6343 }
 0x386   : > { %v6053_v24 = vrot.slane %v15662_v54, 5  ;;  %v5865_v63 = vrot.slane %v5863_v9, 5  ;;  %v6059_v62 = vshll.u32 %v5838_v53, 16  ;;  %v14485_v44 = vcombine.low %v6026_v34, %v6034_v32  ;;  %v15665_v20 = vld [vmem:[#allocation31_spill] sm:$0xff]  ;;  %v15666_v53 = vld [vmem:[#allocation57_spill] sm:$0xff] }
 0x387   : > { %v6048_v26 = vsel %vm9663_vm7, %v6043_v33, %v6047_v42  ;;  %v6052_v3 = vrot.slane %v6051_v37, 4  ;;  %v6834_v30 = vsel %vm6719_vm8, %v15665_v20, %v6344_v1 }
 0x388   : > { %v6056_v13 = vor.u32 %v15663_v10, %v6053_v24  ;;  %v14490_v55 = vcombine.low %v6040_v8, %v6048_v26  ;;  %v5866_v14 = vsel %vm9663_vm7, %v15664_v36, %v5865_v63  ;;  %v6061_v15 = vrot.slane %v6059_v62, 5  ;;  %7447 = vmatprep.mubr.bf16.mxu1 %v6834_v30  ;;  %v15667_v8 = vld [vmem:[#allocation22_spill] sm:$0xff] }
 0x389   : > { %v14495_v60 = vcombine.low %v5858_v57, %v5866_v14  ;;  %v6054_v4 = vsel %vm9663_vm7, %v6052_v3, %v6053_v24  ;;  %v6216_v18 = vpop.permute.xlu0 %6215  ;;  %v8839_v57 = vpop.f32.mrb[8].mxu1  ;;  %v15668_v24 = vld [vmem:[#allocation30_spill] sm:$0xff]  ;;  %v15669_v14 = vld [vmem:[#allocation44_spill] sm:$0xff] }
 0x38a   : > { %v6057_v34 = vrot.slane %v6056_v13, 4  ;;  %v6770_v29 = vsel %vm6719_vm8, %v15666_v53, %v6216_v18  ;;  %v8840_v9 = vpop.f32.mrb[9].mxu1  ;;  %v6500_v53 = vpop.permute.xlu1 %6499 }
 0x38b   : > { %7448 = vmatmul.mubr.bf16.gmra.mrb[48].mxu1 %v6770_v29  ;;  %v14509_v6 = vadd.f32 %v8840_v9, %v8839_v57  ;;  %v8842_v0 = vpop.f32.mrb[10].mxu1  ;;  %v9310_v57 = vld [vmem:[#allocation2 + $0xb4] sm:$0xf] }
 0x38c   : > { %v6062_v31 = vsel %vm9663_vm7, %v6057_v34, %v6061_v15  ;;  %v8843_v19 = vpop.f32.mrb[11].mxu1  ;;  %v15670_v34 = vld [vmem:[#allocation58_spill] sm:$0xff] }
 0x38d   : > { %v14501_v47 = vcombine.low %v6054_v4, %v6062_v31  ;;  %v6346_v42 = vpop.permute.xlu0 %6345  ;;  %v14511_v37 = vadd.f32 %v8843_v19, %v8842_v0 }
 0x38e   : > { %v6838_v33 = vsel %vm6719_vm8, %v15667_v8, %v6346_v42  ;;  %v9311_v42 = vld [vmem:[#allocation2 + $0xb8] sm:$0xf] }
 0x38f   : > { %7455 = vmatprep.mubr.bf16.mxu1 %v6838_v33  ;;  %v8531_v9 = vcombine.low %v9310_v57, %v9311_v42 }
 0x391   : > { %v6218_v54 = vpop.permute.xlu0 %6217  ;;  %v8845_v63 = vpop.f32.mrb[12].mxu1  ;;  %v6890_v19 = vsel %vm6719_vm8, %v8531_v9, %v6500_v53 }
 0x392   : > { %v6774_v32 = vsel %vm6719_vm8, %v15668_v24, %v6218_v54  ;;  %v8846_v62 = vpop.f32.mrb[13].mxu1 }
 0x393   : > { %7456 = vmatmul.mubr.bf16.gmra.mrb[52].mxu1 %v6774_v32  ;;  %v14515_v26 = vadd.f32 %v8846_v62, %v8845_v63  ;;  %v8848_v3 = vpop.f32.mrb[14].mxu1 }
 0x394   : > { %v8849_v10 = vpop.f32.mrb[15].mxu1 }
 0x395   : > { %v14517_v13 = vadd.f32 %v8849_v10, %v8848_v3 }
 0x3af   : > { %v6348_v36 = vpop.permute.xlu0 %6347 }
 0x3b0   : > { %v6842_v15 = vsel %vm6719_vm8, %v15669_v14, %v6348_v36  ;;  %v6502_v14 = vpop.permute.xlu1 %6501 }
 0x3b1   : > { %7463 = vmatprep.mubr.bf16.mxu1 %v6842_v15 }
 0x3b5   : > { %v6220_v4 = vpop.permute.xlu0 %6219 }
 0x3b6   : > { %v6778_v31 = vsel %vm6719_vm8, %v15670_v34, %v6220_v4  ;;  %v9312_v4 = vld [vmem:[#allocation2 + $0xc4] sm:$0xf]  ;;  %v9313_v34 = vld [vmem:[#allocation2 + $0xc8] sm:$0xf] }
 0x3b7   : > { %7464 = vmatmul.mubr.bf16.gmra.mrb[56].mxu1 %v6778_v31  ;;  %v8532_v31 = vcombine.low %v9312_v4, %v9313_v34  ;;  %v9316_v4 = vld [vmem:[#allocation2 + $0xe4] sm:$0xf]  ;;  %v9317_v34 = vld [vmem:[#allocation2 + $0xe8] sm:$0xf] }
 0x3b8   : > { %v8851_v0 = vpop.f32.mrb[16].mxu1 }
 0x3b9   : > { %v6350_v1 = vpop.permute.xlu0 %6349  ;;  %v8939_v8 = vpop.f32.mrb[32].mxu0 }
 0x3ba   : > { %v6846_v20 = vsel %vm6719_vm8, %v14193_v25, %v6350_v1  ;;  %v8940_v25 = vpop.f32.mrb[33].mxu0  ;;  %v8852_v54 = vpop.f32.mrb[17].mxu1 }
 0x3bb   : > { %7471 = vmatprep.mubr.bf16.mxu1 %v6846_v20  ;;  %v8942_v24 = vpop.f32.mrb[34].mxu0  ;;  %v14534_v32 = vadd.f32 %v8852_v54, %v8851_v0  ;;  %v6504_v0 = vpop.permute.xlu1 %6503 }
 0x3bc   : > { %v8943_v63 = vpop.f32.mrb[35].mxu0 }
 0x3bd   : > { %v6222_v30 = vpop.permute.xlu0 %6221  ;;  %v14536_v10 = vadd.f32 %v8943_v63, %v8942_v24 }
 0x3be   : > { %v6782_v18 = vsel %vm6719_vm8, %v14189_v51, %v6222_v30  ;;  %v14532_v51 = vadd.f32 %v8940_v25, %v8939_v8 }
 0x3bf   : > { %7472 = vmatmul.mubr.bf16.gmra.mrb[60].mxu1 %v6782_v18  ;;  %v6894_v18 = vsel %vm6719_vm8, %v8532_v31, %v6502_v14  ;;  %v8534_v31 = vcombine.low %v9316_v4, %v9317_v34 }
 0x3c0   : > { %9103 = vmatprep.mubr.msk.bf16.mxu1 %vm6719_vm8, %v14166_v27  ;;  %v8854_v27 = vpop.f32.mrb[18].mxu1 }
 0x3c1   : > { %v8855_v3 = vpop.f32.mrb[19].mxu1  ;;  %v8945_v1 = vpop.f32.mrb[36].mxu0 }
 0x3c2   : > { %v6660_v29 = vpop.permute.xlu0 %6659  ;;  %v14540_v36 = vadd.f32 %v8855_v3, %v8854_v27  ;;  %v8857_v20 = vpop.f32.mrb[20].mxu1 }
 0x3c3   : > { %v6954_v33 = vsel %vm6719_vm8, %v14212_v39, %v6660_v29  ;;  %v8946_v30 = vpop.f32.mrb[37].mxu0 }
 0x3c4   : > { %7592 = vmatprep.mubr.bf16.mxu0 %v6954_v33  ;;  %v14547_v53 = vadd.f32 %v8946_v30, %v8945_v1  ;;  %v8948_v29 = vpop.f32.mrb[38].mxu0 }
 0x3c5   : > { %7593 = vmatmul.mubr.bf16.gmra.mrb[72].mxu0 %v6890_v19  ;;  %v8949_v42 = vpop.f32.mrb[39].mxu0  ;;  %v9314_v19 = vld [vmem:[#allocation2 + $0xd4] sm:$0xf] }
 0x3c6   : > { %v14553_v8 = vadd.f32 %v8949_v42, %v8948_v29 }
 0x3c7   : > { %9104 = vmatmul.mubr.msk.bf16.vlgmr.msra.gmra.mrb[64].mxu1 %vm6719_vm8, %v14227_v23 }
 0x3c8   : > { %v6662_v62 = vpop.permute.xlu0 %6661  ;;  %9107 = vmatprep.mubr.msk.bf16.mxu1 %vm6719_vm8, %v14267_v21 }
 0x3c9   : > { %v6958_v39 = vsel %vm6719_vm8, %v14241_v61, %v6662_v62  ;;  %v8858_v61 = vpop.f32.mrb[21].mxu1 }
 0x3ca   : > { %7600 = vmatprep.mubr.bf16.mxu0 %v6958_v39  ;;  %v14551_v57 = vadd.f32 %v8858_v61, %v8857_v20  ;;  %v8860_v21 = vpop.f32.mrb[22].mxu1  ;;  %v8951_v24 = vpop.f32.mrb[40].mxu0 }
 0x3cb   : > { %v8861_v9 = vpop.f32.mrb[23].mxu1  ;;  %v8952_v27 = vpop.f32.mrb[41].mxu0 }
 0x3cc   : > { %v14555_v33 = vadd.f32 %v8861_v9, %v8860_v21  ;;  %v14562_v62 = vadd.f32 %v8952_v27, %v8951_v24  ;;  %v8954_v3 = vpop.f32.mrb[42].mxu0 }
 0x3cd   : > { %7601 = vmatmul.mubr.bf16.gmra.mrb[76].mxu0 %v6894_v18 }
 0x3ce   : > { %v6664_v15 = vpop.permute.xlu0 %6663 }
 0x3cf   : > { %v6962_v23 = vsel %vm6719_vm8, %v14277_v22, %v6664_v15  ;;  %9108 = vmatmul.mubr.msk.bf16.gmra.mrb[68].mxu1 %vm6719_vm8, %v14298_v48  ;;  %v9315_v22 = vld [vmem:[#allocation2 + $0xd8] sm:$0xf]  ;;  %v8955_v48 = vpop.f32.mrb[43].mxu0 }
 0x3d0   : > { %7608 = vmatprep.mubr.bf16.mxu0 %v6962_v23  ;;  %9111 = vmatprep.mubr.msk.bf16.mxu1 %vm6719_vm8, %v14319_v2  ;;  %v8533_v54 = vcombine.low %v9314_v19, %v9315_v22  ;;  %v14566_v14 = vadd.f32 %v8955_v48, %v8954_v3  ;;  %v6506_v2 = vpop.permute.xlu1 %6505 }
 0x3d1   : > { %v6902_v30 = vsel %vm6719_vm8, %v8534_v31, %v6506_v2 }
 0x3d2   : > { %v6666_v25 = vpop.permute.xlu0 %6665  ;;  %v6898_v63 = vsel %vm6719_vm8, %v8533_v54, %v6504_v0 }
 0x3d3   : > { %v6966_v39 = vsel %vm6719_vm8, %v14327_v17, %v6666_v25  ;;  %v8957_v1 = vpop.f32.mrb[44].mxu0 }
 0x3d4   : > { %v8958_v20 = vpop.f32.mrb[45].mxu0  ;;  %v6508_v23 = vpop.permute.xlu1 %6507 }
 0x3d5   : > { %7609 = vmatmul.mubr.bf16.gmra.mrb[80].mxu0 %v6898_v63  ;;  %v14573_v17 = vadd.f32 %v8958_v20, %v8957_v1  ;;  %v8960_v18 = vpop.f32.mrb[46].mxu0  ;;  %v14616_v20 = vld [vmem:[%s14955_s6] ss:$0 sm:$0xff] }
 0x3d6   : > { %7616 = vmatprep.mubr.bf16.mxu0 %v6966_v39  ;;  %v6668_v15 = vpop.permute.xlu0 %6667 }
 0x3d7   : > { %9112 = vmatmul.mubr.msk.bf16.gmra.mrb[72].mxu1 %vm6719_vm8, %v14357_v12  ;;  %v6970_v61 = vsel %vm6719_vm8, %v14390_v40, %v6668_v15  ;;  %v8961_v12 = vpop.f32.mrb[47].mxu0  ;;  %v6906_v40 = vsel %vm6719_vm8, %v8535_v11, %v6508_v23 }
 0x3d8   : > { %9115 = vmatprep.mubr.msk.bf16.mxu1 %vm6719_vm8, %v14375_v16  ;;  %v14577_v29 = vadd.f32 %v8961_v12, %v8960_v18 }
 0x3db   : > { %v6670_v16 = vpop.permute.xlu0 %6669  ;;  %v8963_v21 = vpop.f32.mrb[48].mxu0 }
 0x3dc   : > { %v6974_v42 = vsel %vm6719_vm8, %v14459_v7, %v6670_v16  ;;  %v8964_v9 = vpop.f32.mrb[49].mxu0 }
 0x3dd   : > { %7617 = vmatmul.mubr.bf16.gmra.mrb[84].mxu0 %v6902_v30  ;;  %v14589_v0 = vadd.f32 %v8964_v9, %v8963_v21  ;;  %v8966_v25 = vpop.f32.mrb[50].mxu0 }
 0x3de   : > { %7624 = vmatprep.mubr.bf16.mxu0 %v6970_v61  ;;  %v7378_v61 = vadd.f32 %v14515_v26, %v14616_v20 }
 0x3df   : > { %9116 = vmatmul.mubr.msk.bf16.gmra.mrb[76].mxu1 %vm6719_vm8, %v14409_v38  ;;  %v8967_v38 = vpop.f32.mrb[51].mxu0 }
 0x3e0   : > { %9119 = vmatprep.mubr.msk.bf16.mxu1 %vm6719_vm8, %v14420_v49  ;;  %v14591_v19 = vadd.f32 %v8967_v38, %v8966_v25  ;;  %v6510_v49 = vpop.permute.xlu1 %6509 }
 0x3e1   : > { %v6910_v50 = vsel %vm6719_vm8, %v8536_v41, %v6510_v49  ;;  %v7370_v49 = vadd.f32 %v14509_v6, %v14616_v20 }
 0x3e5   : > { %7625 = vmatmul.mubr.bf16.gmra.mrb[88].mxu0 %v6906_v40  ;;  %v14621_v40 = vadd.f32 %v14573_v17, %v7378_v61  ;;  %v14630_v17 = vadd.f32 %v14562_v62, %v7370_v49  ;;  %v7386_v62 = vadd.f32 %v14534_v32, %v14616_v20 }
 0x3e6   : > { %7632 = vmatprep.mubr.bf16.mxu0 %v6974_v42 }
 0x3e7   : > { %9120 = vmatmul.mubr.msk.bf16.gmra.mrb[80].mxu1 %vm6719_vm8, %v14435_v45 }
 0x3e8   : > { %9123 = vmatprep.mubr.msk.bf16.mxu1 %vm6719_vm8, %v14452_v58  ;;  %v8969_v43 = vpop.f32.mrb[52].mxu0 }
 0x3e9   : > { %v8970_v11 = vpop.f32.mrb[53].mxu0 }
 0x3ea   : > { %v8971_v7 = vadd.f32 %v8970_v11, %v8969_v43  ;;  %v8972_v45 = vpop.f32.mrb[54].mxu0  ;;  %v7381_v43 = vadd.f32 %v14517_v13, %v14616_v20 }
 0x3eb   : > { %v8973_v58 = vpop.f32.mrb[55].mxu0  ;;  %v8863_v54 = vpop.f32.mrb[24].mxu1 }
 0x3ec   : > { %v8974_v22 = vadd.f32 %v8973_v58, %v8972_v45  ;;  %v8864_v5 = vpop.f32.mrb[25].mxu1  ;;  %v7373_v58 = vadd.f32 %v14511_v37, %v14616_v20 }
 0x3ed   : > { %7633 = vmatmul.mubr.bf16.gmra.mrb[92].mxu0 %v6910_v50  ;;  %v8865_v56 = vadd.f32 %v8864_v5, %v8863_v54  ;;  %v8866_v41 = vpop.f32.mrb[26].mxu1 }
 0x3ee   : > { %9099 = vmatprep.mubr.msk.bf16.mxu0 %vm6719_vm8, %v14475_v28  ;;  %v8867_v28 = vpop.f32.mrb[27].mxu1 }
 0x3ef   : > { %9124 = vmatmul.mubr.msk.bf16.gmra.mrb[84].mxu1 %vm6719_vm8, %v14485_v44  ;;  %v14609_v24 = vadd.f32 %v8867_v28, %v8866_v41  ;;  %v7394_v41 = vadd.f32 %v14551_v57, %v14616_v20  ;;  %v7389_v57 = vadd.f32 %v14540_v36, %v14616_v20 }
 0x3f0   : > { %9127 = vmatprep.mubr.msk.bf16.mxu1 %vm6719_vm8, %v14490_v55 }
 0x3f1   : > { %v14640_v37 = vadd.f32 %v8971_v7, %v7394_v41  ;;  %v7365_v41 = vadd.f32 %v14407_v59, %v14616_v20 }
 0x3f3   : > { %v8975_v44 = vpop.f32.mrb[56].mxu0 }
 0x3f4   : > { %v8976_v27 = vpop.f32.mrb[57].mxu0 }
 0x3f5   : > { %9100 = vmatmul.mubr.msk.bf16.vlgmr.msra.gmra.mrb[96].mxu0 %vm6719_vm8, %v14495_v60  ;;  %v8869_v63 = vpop.f32.mrb[28].mxu1  ;;  %v8977_v3 = vadd.f32 %v8976_v27, %v8975_v44  ;;  %v8978_v55 = vpop.f32.mrb[58].mxu0  ;;  %v14635_v27 = vadd.f32 %v14577_v29, %v7381_v43 }
 0x3f6   : > { %v8870_v39 = vpop.f32.mrb[29].mxu1  ;;  %v8979_v48 = vpop.f32.mrb[59].mxu0 }
 0x3f7   : > { %9128 = vmatmul.mubr.msk.bf16.gmra.mrb[88].mxu1 %vm6719_vm8, %v14501_v47  ;;  %v8871_v2 = vadd.f32 %v8870_v39, %v8869_v63  ;;  %v8872_v15 = vpop.f32.mrb[30].mxu1  ;;  %v8980_v4 = vadd.f32 %v8979_v48, %v8978_v55  ;;  %v14638_v63 = vadd.f32 %v14566_v14, %v7373_v58  ;;  %v7397_v39 = vadd.f32 %v14555_v33, %v14616_v20 }
 0x3f8   : > { %v8873_v34 = vpop.f32.mrb[31].mxu1  ;;  %v14649_v48 = vadd.f32 %v14589_v0, %v7386_v62  ;;  %v14655_v14 = vadd.f32 %v14591_v19, %v7389_v57  ;;  %v7405_v0 = vadd.f32 %v14609_v24, %v14616_v20  ;;  %v7362_v58 = vadd.f32 %v14394_v35, %v14616_v20 }
 0x3f9   : > { %v8874_v60 = vadd.f32 %v8873_v34, %v8872_v15  ;;  %v7410_v29 = vadd.f32 %v8871_v2, %v14616_v20  ;;  %v14652_v15 = vadd.f32 %v8974_v22, %v7397_v39 }
 0x3fb   : > { %v7413_v36 = vadd.f32 %v8874_v60, %v14616_v20 }
 0x415   : > { %v8981_v31 = vpop.f32.mrb[60].mxu0  ;;  %v8875_v18 = vpop.f32.mrb[32].mxu1 }
 0x416   : > { %v8982_v1 = vpop.f32.mrb[61].mxu0  ;;  %v8876_v16 = vpop.f32.mrb[33].mxu1 }
 0x417   : > { %v8983_v47 = vadd.f32 %v8982_v1, %v8981_v31  ;;  %v8984_v30 = vpop.f32.mrb[62].mxu0  ;;  %v8877_v21 = vadd.f32 %v8876_v16, %v8875_v18  ;;  %v8878_v42 = vpop.f32.mrb[34].mxu1  ;;  %v7402_v31 = vadd.f32 %v8865_v56, %v14616_v20 }
 0x418   : > { %v8985_v12 = vpop.f32.mrb[63].mxu0  ;;  %v8879_v9 = vpop.f32.mrb[35].mxu1 }
 0x419   : > { %v8986_v23 = vadd.f32 %v8985_v12, %v8984_v30  ;;  %v8880_v25 = vadd.f32 %v8879_v9, %v8878_v42  ;;  %v14657_v7 = vadd.f32 %v8983_v47, %v7410_v29  ;;  %v14663_v22 = vadd.f32 %v8977_v3, %v7402_v31 }
 0x41a   : > { %v14668_v47 = vadd.f32 %v8980_v4, %v7405_v0  ;;  %v7418_v56 = vadd.f32 %v8877_v21, %v14616_v20 }
 0x41b   : > { %v14666_v18 = vadd.f32 %v8986_v23, %v7413_v36  ;;  %v7421_v24 = vadd.f32 %v8880_v25, %v14616_v20 }
 0x41d   : > { %v8987_v38 = vpop.f32.mrb[64].mxu0  ;;  %v8881_v45 = vpop.f32.mrb[36].mxu1 }
 0x41e   : > { %v8988_v50 = vpop.f32.mrb[65].mxu0  ;;  %v8882_v5 = vpop.f32.mrb[37].mxu1 }
 0x41f   : > { %v8989_v11 = vadd.f32 %v8988_v50, %v8987_v38  ;;  %v8990_v26 = vpop.f32.mrb[66].mxu0  ;;  %v8883_v6 = vadd.f32 %v8882_v5, %v8881_v45  ;;  %v8884_v44 = vpop.f32.mrb[38].mxu1  ;;  %v14696_v5 = vadd.f32 %v14547_v53, %v7362_v58 }
 0x420   : > { %v8991_v54 = vpop.f32.mrb[67].mxu0  ;;  %v8885_v13 = vpop.f32.mrb[39].mxu1 }
 0x421   : > { %v8992_v28 = vadd.f32 %v8991_v54, %v8990_v26  ;;  %v8886_v55 = vadd.f32 %v8885_v13, %v8884_v44  ;;  %v7426_v19 = vadd.f32 %v8883_v6, %v14616_v20  ;;  %v14679_v23 = vadd.f32 %v8989_v11, %v7418_v56 }
 0x422   : > { %v7354_v11 = vadd.f32 %v14349_v46, %v14616_v20  ;;  %v7357_v54 = vadd.f32 %v14361_v52, %v14616_v20  ;;  %v14704_v6 = vadd.f32 %v14553_v8, %v7365_v41 }
 0x423   : > { %v7429_v3 = vadd.f32 %v8886_v55, %v14616_v20  ;;  %v14683_v49 = vadd.f32 %v8992_v28, %v7421_v24 }
 0x424   : > { %v14701_v28 = vadd.f32 %v14532_v51, %v7354_v11  ;;  %v14707_v46 = vadd.f32 %v14536_v10, %v7357_v54 }
 0x432   : > { %v8993_v34 = vpop.f32.mrb[68].mxu0 }
 0x433   : > { %v8994_v32 = vpop.f32.mrb[69].mxu0 }
 0x434   : > { %v8995_v33 = vadd.f32 %v8994_v32, %v8993_v34  ;;  %v8996_v1 = vpop.f32.mrb[70].mxu0 }
 0x435   : > { %v8997_v30 = vpop.f32.mrb[71].mxu0 }
 0x436   : > { %v8998_v2 = vadd.f32 %v8997_v30, %v8996_v1  ;;  %v14670_v12 = vadd.f32 %v8995_v33, %v7426_v19 }
 0x438   : > { %v8887_v61 = vpop.f32.mrb[40].mxu1  ;;  %v14681_v4 = vadd.f32 %v8998_v2, %v7429_v3 }
 0x439   : > { %v8888_v16 = vpop.f32.mrb[41].mxu1 }
 0x43a   : > { %v14673_v60 = vadd.f32 %v8888_v16, %v8887_v61  ;;  %v8890_v42 = vpop.f32.mrb[42].mxu1 }
 0x43b   : > { %v8891_v9 = vpop.f32.mrb[43].mxu1 }
 0x43c   : > { %v14677_v38 = vadd.f32 %v8891_v9, %v8890_v42 }
 0x441   : > { %v8893_v21 = vpop.f32.mrb[44].mxu1 }
 0x442   : > { %v8894_v50 = vpop.f32.mrb[45].mxu1 }
 0x443   : > { %v14685_v43 = vadd.f32 %v8894_v50, %v8893_v21  ;;  %v8896_v25 = vpop.f32.mrb[46].mxu1 }
 0x444   : > { %v8897_v26 = vpop.f32.mrb[47].mxu1 }
 0x445   : > { %v14687_v45 = vadd.f32 %v8897_v26, %v8896_v25 }
 0x446   : > { %9331 = shalt.err (!%p9328_p4)
}
 0x447   : > { %s9332_s24 = scalar_lea.hbm %s14715_s13, 2048  ;;  %s9336_s19 = scalar_lea.hbm %s14956_s7, 4096 }
 0x448   : > { %p9333_p7 = scmp.ne.s32.totalorder %s14715_s13, %s9332_s24  ;;  %p9337_p10 = scmp.lt.u32.totalorder %s14715_s13, %s14956_s7 }
 0x449   : > { %p9338_p11 = scmp.lt.u32.totalorder %s9336_s19, %s9332_s24  ;;  %p9340_p13 = scmp.lt.u32.totalorder %s9332_s24, %s14715_s13 }
 0x44a   : > { %p9334_p8 = pnand %p9333_p7, %p9511_p5 }
 0x44b   : > { %p9339_p12 = por %p9338_p11, %p9337_p10 }
 0x44c   : > { %p9335_p9 = pneg %p9334_p8 }
 0x44d   : > { %p9341_p0 = por %p9340_p13, %p9339_p12 }
 0x44f   : > { %p9342_p1 = pnand %p9341_p0, %p9335_p9 }
 0x451   : > { %9345 = shalt.err (!%p9342_p1)
}
 0x452   : > { %s9426_s21 = smov 4   ;;  %s15671_s10 = smov 64   ;;  %v7434_v16 = vadd.f32 %v14673_v60, %v14616_v20  ;;  %v7437_v21 = vadd.f32 %v14677_v38, %v14616_v20 }
 0x453   : > { %9139 = dma.vmem_to_hbm [thread:$0]  (%p9511_p5), %s14718_s20, 2048, %s14715_s13, %s7995_s26, %s15671_s10, %s15671_s10, %s9426_s21  }
 0x454   : > { %s8029_s18 = sshll.u32 %s9534_s25, 4  ;;  %s15672_s13 = sshll.u32 %s9494_s9, 11  ;;  %s14899_s18 = int_to_ptr.vmem [resolvable:$true] %s8029_s18 }
 0x455   : > { %s14897_s24 = scalar_lea.hbm %s14957_s8, %s15672_s13  ;;  %s8000_s22 = scalar_lea.sflag [#allocation6], %s9522_s17 }
 0x456   : > { %s9346_s12 = scalar_lea.vmem %s14899_s18, 2048  ;;  %s9427_s9 = smov [#allocation5]  }
 0x457   : > { %p9347_p2 = scmp.ne.s32.totalorder %s14899_s18, %s9346_s12  ;;  %s9350_s19 = sshll.u32 %s9427_s9, 4  ;;  %s9351_s19 = int_to_ptr.vmem [resolvable:$false] %s9350_s19 }
 0x458   : > { %s9352_s23 = scalar_lea.vmem %s9351_s19, 4096  ;;  %p9353_p7 = scmp.lt.s32.totalorder %s14899_s18, %s9351_s19 }
 0x459   : > { %p9348_p3 = pnand %p9347_p2, %p9511_p5  ;;  %p9354_p8 = scmp.lt.s32.totalorder %s9352_s23, %s9346_s12 }
 0x45b   : > { %p9349_p4 = pneg %p9348_p3  ;;  %p9355_p9 = por %p9354_p8, %p9353_p7 }
 0x45d   : > { %p9356_p10 = pnand %p9355_p9, %p9349_p4 }
 0x45e   : > { %v8899_v52 = vpop.f32.mrb[48].mxu1 }
 0x45f   : > { %v8900_v35 = vpop.f32.mrb[49].mxu1 }
 0x460   : > { %v14747_v59 = vadd.f32 %v8900_v35, %v8899_v52  ;;  %v8902_v51 = vpop.f32.mrb[50].mxu1 }
 0x461   : > { %v8903_v10 = vpop.f32.mrb[51].mxu1 }
 0x462   : > { %v14749_v53 = vadd.f32 %v8903_v10, %v8902_v51 }
 0x466   : > { %v8905_v8 = vpop.f32.mrb[52].mxu1 }
 0x467   : > { %v8906_v44 = vpop.f32.mrb[53].mxu1 }
 0x468   : > { %v14751_v13 = vadd.f32 %v8906_v44, %v8905_v8  ;;  %v8908_v55 = vpop.f32.mrb[54].mxu1 }
 0x469   : > { %v8909_v62 = vpop.f32.mrb[55].mxu1 }
 0x46a   : > { %v14753_v39 = vadd.f32 %v8909_v62, %v8908_v55 }
 0x48a   : > { %v8911_v57 = vpop.f32.mrb[56].mxu1 }
 0x48b   : > { %v8912_v29 = vpop.f32.mrb[57].mxu1 }
 0x48c   : > { %v14755_v34 = vadd.f32 %v8912_v29, %v8911_v57  ;;  %v8914_v32 = vpop.f32.mrb[58].mxu1 }
 0x48d   : > { %v8915_v31 = vpop.f32.mrb[59].mxu1 }
 0x48e   : > { %v14757_v33 = vadd.f32 %v8915_v31, %v8914_v32 }
 0x492   : > { %v8917_v1 = vpop.f32.mrb[60].mxu1 }
 0x493   : > { %v8918_v36 = vpop.f32.mrb[61].mxu1 }
 0x494   : > { %v14759_v30 = vadd.f32 %v8918_v36, %v8917_v1  ;;  %v8920_v0 = vpop.f32.mrb[62].mxu1  ;;  %v7445_v1 = vadd.f32 %v14687_v45, %v14616_v20 }
 0x495   : > { %v8921_v2 = vpop.f32.mrb[63].mxu1 }
 0x496   : > { %v14761_v19 = vadd.f32 %v8921_v2, %v8920_v0 }
 0x498   : > { %v8999_v61 = vpop.f32.mrb[72].mxu0 }
 0x499   : > { %v9000_v56 = vpop.f32.mrb[73].mxu0 }
 0x49a   : > { %v9001_v42 = vadd.f32 %v9000_v56, %v8999_v61  ;;  %v9002_v24 = vpop.f32.mrb[74].mxu0  ;;  %v9105_v3 = vpop.f32.mrb[64].mxu1 }
 0x49b   : > { %v9003_v9 = vpop.f32.mrb[75].mxu0  ;;  %v7700_v25 = vadd.f32 %v9105_v3, %v14621_v40  ;;  %v7691_v26 = vpop.f32.mrb[65].mxu1 }
 0x49c   : > { %v9004_v50 = vadd.f32 %v9003_v9, %v9002_v24  ;;  %v14768_v11 = vadd.f32 %v9001_v42, %v7434_v16  ;;  %v7692_v58 = vadd.f32 %v7691_v26, %v14630_v17  ;;  %v9106_v54 = vpop.f32.mrb[66].mxu1  ;;  %v7442_v17 = vadd.f32 %v14685_v43, %v14616_v20 }
 0x49d   : > { %v7808_v41 = vmax.f32 %v7700_v25, 0.0  ;;  %v7703_v60 = vadd.f32 %v9106_v54, %v14635_v27  ;;  %v7694_v52 = vpop.f32.mrb[67].mxu1 }
 0x49e   : > { %v14772_v35 = vadd.f32 %v9004_v50, %v7437_v21  ;;  %v7806_v51 = vmax.f32 %v7692_v58, 0.0  ;;  %v7695_v38 = vadd.f32 %v7694_v52, %v14638_v63 }
 0x49f   : > { %v8765_v10 = vpack.c.bf16 %v7808_v41, %v7808_v41  ;;  %v7809_v40 = vmax.f32 %v7703_v60, 0.0 }
 0x4a0   : > { %v9005_v8 = vpop.f32.mrb[76].mxu0  ;;  %v8763_v44 = vpack.c.bf16 %v7806_v51, %v7806_v51  ;;  %v7807_v55 = vmax.f32 %v7695_v38, 0.0  ;;  %v7453_v51 = vadd.f32 %v14749_v53, %v14616_v20 }
 0x4a1   : > { %v9006_v62 = vpop.f32.mrb[77].mxu0  ;;  %7968 = vst.msk [vmem:[%s9534_s25 + $0x18] sm:$0xf] %vm4078_vm6, %v8765_v10  ;;  %v8766_v27 = vpack.c.bf16 %v7809_v40, %v7809_v40 }
 0x4a2   : > { %v9007_v57 = vadd.f32 %v9006_v62, %v9005_v8  ;;  %v9008_v29 = vpop.f32.mrb[78].mxu0  ;;  %7966 = vst.msk [vmem:[%s9534_s25 + $0x10] sm:$0xf] %vm4078_vm6, %v8763_v44  ;;  %v8764_v32 = vpack.c.bf16 %v7807_v55, %v7807_v55  ;;  %v9109_v31 = vpop.f32.mrb[68].mxu1 }
 0x4a3   : > { %v9009_v63 = vpop.f32.mrb[79].mxu0  ;;  %7969 = vst.msk [vmem:[%s9534_s25 + $0x1c] sm:$0xf] %vm4078_vm6, %v8766_v27  ;;  %v7716_v0 = vadd.f32 %v9109_v31, %v14640_v37  ;;  %v7707_v2 = vpop.f32.mrb[69].mxu1 }
 0x4a4   : > { %v9010_v36 = vadd.f32 %v9009_v63, %v9008_v29  ;;  %v14786_v43 = vadd.f32 %v9007_v57, %v7442_v17  ;;  %7967 = vst.msk [vmem:[%s9534_s25 + $0x14] sm:$0xf] %vm4078_vm6, %v8764_v32  ;;  %v7708_v61 = vadd.f32 %v7707_v2, %v14649_v48  ;;  %v9110_v56 = vpop.f32.mrb[70].mxu1  ;;  %v7450_v48 = vadd.f32 %v14747_v59, %v14616_v20 }
 0x4a5   : > { %v7812_v16 = vmax.f32 %v7716_v0, 0.0  ;;  %v7719_v42 = vadd.f32 %v9110_v56, %v14652_v15  ;;  %v7710_v24 = vpop.f32.mrb[71].mxu1  ;;  %v7461_v56 = vadd.f32 %v14753_v39, %v14616_v20 }
 0x4a6   : > { %v14792_v45 = vadd.f32 %v9010_v36, %v7445_v1  ;;  %v7810_v9 = vmax.f32 %v7708_v61, 0.0  ;;  %v7711_v3 = vadd.f32 %v7710_v24, %v14655_v14 }
 0x4a7   : > { %v8769_v37 = vpack.c.bf16 %v7812_v16, %v7812_v16  ;;  %v7813_v21 = vmax.f32 %v7719_v42, 0.0 }
 0x4a8   : > { %v9011_v50 = vpop.f32.mrb[80].mxu0  ;;  %v8767_v25 = vpack.c.bf16 %v7810_v9, %v7810_v9  ;;  %v7811_v26 = vmax.f32 %v7711_v3, 0.0 }
 0x4a9   : > { %v9012_v58 = vpop.f32.mrb[81].mxu0  ;;  %7972 = vst.msk [vmem:[%s9534_s25 + $0x28] sm:$0xf] %vm4078_vm6, %v8769_v37  ;;  %v8770_v15 = vpack.c.bf16 %v7813_v21, %v7813_v21 }
 0x4aa   : > { %v9013_v54 = vadd.f32 %v9012_v58, %v9011_v50  ;;  %v9014_v41 = vpop.f32.mrb[82].mxu0  ;;  %7970 = vst.msk [vmem:[%s9534_s25 + $0x20] sm:$0xf] %vm4078_vm6, %v8767_v25  ;;  %v8768_v60 = vpack.c.bf16 %v7811_v26, %v7811_v26  ;;  %v9113_v52 = vpop.f32.mrb[72].mxu1 }
 0x4ab   : > { %v9015_v14 = vpop.f32.mrb[83].mxu0  ;;  %7973 = vst.msk [vmem:[%s9534_s25 + $0x2c] sm:$0xf] %vm4078_vm6, %v8770_v15  ;;  %v7732_v10 = vadd.f32 %v9113_v52, %v14657_v7  ;;  %v7723_v40 = vpop.f32.mrb[73].mxu1 }
 0x4ac   : > { %v9016_v38 = vadd.f32 %v9015_v14, %v9014_v41  ;;  %v14806_v59 = vadd.f32 %v9013_v54, %v7450_v48  ;;  %7971 = vst.msk [vmem:[%s9534_s25 + $0x24] sm:$0xf] %vm4078_vm6, %v8768_v60  ;;  %v7724_v8 = vadd.f32 %v7723_v40, %v14663_v22  ;;  %v9114_v44 = vpop.f32.mrb[74].mxu1  ;;  %v7458_v22 = vadd.f32 %v14751_v13, %v14616_v20 }
 0x4ad   : > { %v7816_v55 = vmax.f32 %v7732_v10, 0.0  ;;  %v7735_v62 = vadd.f32 %v9114_v44, %v14666_v18  ;;  %v7726_v17 = vpop.f32.mrb[75].mxu1 }
 0x4ae   : > { %v14812_v53 = vadd.f32 %v9016_v38, %v7453_v51  ;;  %v7814_v27 = vmax.f32 %v7724_v8, 0.0  ;;  %v7727_v57 = vadd.f32 %v7726_v17, %v14668_v47  ;;  %v7469_v38 = vadd.f32 %v14757_v33, %v14616_v20 }
 0x4af   : > { %v8773_v7 = vpack.c.bf16 %v7816_v55, %v7816_v55  ;;  %v7817_v29 = vmax.f32 %v7735_v62, 0.0 }
 0x4b0   : > { %v9017_v32 = vpop.f32.mrb[84].mxu0  ;;  %v8771_v63 = vpack.c.bf16 %v7814_v27, %v7814_v27  ;;  %v7815_v31 = vmax.f32 %v7727_v57, 0.0 }
 0x4b1   : > { %v9018_v1 = vpop.f32.mrb[85].mxu0  ;;  %7976 = vst.msk [vmem:[%s9534_s25 + $0x38] sm:$0xf] %vm4078_vm6, %v8773_v7  ;;  %v8774_v18 = vpack.c.bf16 %v7817_v29, %v7817_v29 }
 0x4b2   : > { %v9019_v36 = vadd.f32 %v9018_v1, %v9017_v32  ;;  %v9020_v0 = vpop.f32.mrb[86].mxu0  ;;  %7974 = vst.msk [vmem:[%s9534_s25 + $0x30] sm:$0xf] %vm4078_vm6, %v8771_v63  ;;  %v8772_v2 = vpack.c.bf16 %v7815_v31, %v7815_v31  ;;  %v9117_v61 = vpop.f32.mrb[76].mxu1 }
 0x4b3   : > { %v9021_v47 = vpop.f32.mrb[87].mxu0  ;;  %7977 = vst.msk [vmem:[%s9534_s25 + $0x3c] sm:$0xf] %vm4078_vm6, %v8774_v18  ;;  %v7748_v42 = vadd.f32 %v9117_v61, %v14670_v12  ;;  %v7739_v24 = vpop.f32.mrb[77].mxu1 }
 0x4b4   : > { %v9022_v16 = vadd.f32 %v9021_v47, %v9020_v0  ;;  %v7619_v13 = vadd.f32 %v9019_v36, %v7458_v22  ;;  %7975 = vst.msk [vmem:[%s9534_s25 + $0x34] sm:$0xf] %vm4078_vm6, %v8772_v2  ;;  %v7740_v9 = vadd.f32 %v7739_v24, %v14679_v23  ;;  %v9118_v3 = vpop.f32.mrb[78].mxu1  ;;  %v7466_v23 = vadd.f32 %v14755_v34, %v14616_v20 }
 0x4b5   : > { %v7820_v37 = vmax.f32 %v7748_v42, 0.0  ;;  %v7751_v21 = vadd.f32 %v9118_v3, %v14681_v4  ;;  %v7742_v50 = vpop.f32.mrb[79].mxu1  ;;  %v7477_v2 = vadd.f32 %v14761_v19, %v14616_v20 }
 0x4b6   : > { %v7622_v25 = vadd.f32 %v9022_v16, %v7461_v56  ;;  %v7818_v39 = vmax.f32 %v7740_v9, 0.0  ;;  %v7743_v26 = vadd.f32 %v7742_v50, %v14683_v49 }
 0x4b7   : > { %v8777_v58 = vpack.c.bf16 %v7820_v37, %v7820_v37  ;;  %v7821_v12 = vmax.f32 %v7751_v21, 0.0 }
 0x4b8   : > { %v9023_v48 = vpop.f32.mrb[88].mxu0  ;;  %v8775_v15 = vpack.c.bf16 %v7818_v39, %v7818_v39  ;;  %v7819_v54 = vmax.f32 %v7743_v26, 0.0 }
 0x4b9   : > { %v9024_v41 = vpop.f32.mrb[89].mxu0  ;;  %7980 = vst.msk [vmem:[%s9534_s25 + $0x48] sm:$0xf] %vm4078_vm6, %v8777_v58  ;;  %v8778_v4 = vpack.c.bf16 %v7821_v12, %v7821_v12 }
 0x4ba   : > { %v9025_v60 = vadd.f32 %v9024_v41, %v9023_v48  ;;  %v9026_v14 = vpop.f32.mrb[90].mxu0  ;;  %7978 = vst.msk [vmem:[%s9534_s25 + $0x40] sm:$0xf] %vm4078_vm6, %v8775_v15  ;;  %v8776_v52 = vpack.c.bf16 %v7819_v54, %v7819_v54  ;;  %v9121_v51 = vpop.f32.mrb[80].mxu1 }
 0x4bb   : > { %v9027_v49 = vpop.f32.mrb[91].mxu0  ;;  %7981 = vst.msk [vmem:[%s9534_s25 + $0x4c] sm:$0xf] %vm4078_vm6, %v8778_v4  ;;  %v7764_v40 = vadd.f32 %v9121_v51, %v14786_v43  ;;  %v7755_v8 = vpop.f32.mrb[81].mxu1 }
 0x4bc   : > { %v9028_v10 = vadd.f32 %v9027_v49, %v9026_v14  ;;  %v14842_v34 = vadd.f32 %v9025_v60, %v7466_v23  ;;  %7979 = vst.msk [vmem:[%s9534_s25 + $0x44] sm:$0xf] %vm4078_vm6, %v8776_v52  ;;  %v7756_v44 = vadd.f32 %v7755_v8, %v14768_v11  ;;  %v9122_v55 = vpop.f32.mrb[82].mxu1  ;;  %v7474_v11 = vadd.f32 %v14759_v30, %v14616_v20 }
 0x4bd   : > { %v7824_v62 = vmax.f32 %v7764_v40, 0.0  ;;  %v7767_v17 = vadd.f32 %v9122_v55, %v14792_v45  ;;  %v7758_v27 = vpop.f32.mrb[83].mxu1 }
 0x4be   : > { %v14848_v33 = vadd.f32 %v9028_v10, %v7469_v38  ;;  %v7822_v57 = vmax.f32 %v7756_v44, 0.0  ;;  %v7759_v7 = vadd.f32 %v7758_v27, %v14772_v35 }
 0x4bf   : > { %v8781_v43 = vpack.c.bf16 %v7824_v62, %v7824_v62  ;;  %v7825_v29 = vmax.f32 %v7767_v17, 0.0 }
 0x4c0   : > { %v9029_v32 = vpop.f32.mrb[92].mxu0  ;;  %v8779_v63 = vpack.c.bf16 %v7822_v57, %v7822_v57  ;;  %v7823_v31 = vmax.f32 %v7759_v7, 0.0 }
 0x4c1   : > { %v9030_v1 = vpop.f32.mrb[93].mxu0  ;;  %7984 = vst.msk [vmem:[%s9534_s25 + $0x58] sm:$0xf] %vm4078_vm6, %v8781_v43  ;;  %v8782_v45 = vpack.c.bf16 %v7825_v29, %v7825_v29 }
 0x4c2   : > { %v9031_v22 = vadd.f32 %v9030_v1, %v9029_v32  ;;  %v9032_v18 = vpop.f32.mrb[94].mxu0  ;;  %7982 = vst.msk [vmem:[%s9534_s25 + $0x50] sm:$0xf] %vm4078_vm6, %v8779_v63  ;;  %v8780_v36 = vpack.c.bf16 %v7823_v31, %v7823_v31  ;;  %v9125_v0 = vpop.f32.mrb[84].mxu1 }
 0x4c3   : > { %v9033_v35 = vpop.f32.mrb[95].mxu0  ;;  %7985 = vst.msk [vmem:[%s9534_s25 + $0x5c] sm:$0xf] %vm4078_vm6, %v8782_v45  ;;  %v7780_v61 = vadd.f32 %v9125_v0, %v7619_v13  ;;  %v7771_v56 = vpop.f32.mrb[85].mxu1 }
 0x4c4   : > { %v9034_v47 = vadd.f32 %v9033_v35, %v9032_v18  ;;  %v7635_v16 = vadd.f32 %v9031_v22, %v7474_v11  ;;  %7983 = vst.msk [vmem:[%s9534_s25 + $0x54] sm:$0xf] %vm4078_vm6, %v8780_v36  ;;  %v7772_v30 = vadd.f32 %v7771_v56, %v14806_v59  ;;  %v9126_v42 = vpop.f32.mrb[86].mxu1 }
 0x4c5   : > { %v7828_v24 = vmax.f32 %v7780_v61, 0.0  ;;  %v7783_v9 = vadd.f32 %v9126_v42, %v7622_v25  ;;  %v7774_v3 = vpop.f32.mrb[87].mxu1 }
 0x4c6   : > { %v7638_v37 = vadd.f32 %v9034_v47, %v7477_v2  ;;  %v7826_v21 = vmax.f32 %v7772_v30, 0.0  ;;  %v7775_v20 = vadd.f32 %v7774_v3, %v14812_v53 }
 0x4c7   : > { %v8785_v19 = vpack.c.bf16 %v7828_v24, %v7828_v24  ;;  %v7829_v50 = vmax.f32 %v7783_v9, 0.0 }
 0x4c8   : > { %v9101_v13 = vpop.f32.mrb[96].mxu0  ;;  %v8783_v39 = vpack.c.bf16 %v7826_v21, %v7826_v21  ;;  %v7827_v26 = vmax.f32 %v7775_v20, 0.0 }
 0x4c9   : > { %v7684_v58 = vadd.f32 %v9101_v13, %v14696_v5  ;;  %v7675_v12 = vpop.f32.mrb[97].mxu0  ;;  %7988 = vst.msk [vmem:[%s9534_s25 + $0x68] sm:$0xf] %vm4078_vm6, %v8785_v19  ;;  %v8786_v59 = vpack.c.bf16 %v7829_v50, %v7829_v50 }
 0x4ca   : > { %v7676_v25 = vadd.f32 %v7675_v12, %v14701_v28  ;;  %v9102_v48 = vpop.f32.mrb[98].mxu0  ;;  %7986 = vst.msk [vmem:[%s9534_s25 + $0x60] sm:$0xf] %vm4078_vm6, %v8783_v39  ;;  %v8784_v15 = vpack.c.bf16 %v7827_v26, %v7827_v26  ;;  %v9129_v23 = vpop.f32.mrb[88].mxu1 }
 0x4cb   : > { %v7804_v53 = vmax.f32 %v7684_v58, 0.0  ;;  %v7687_v54 = vadd.f32 %v9102_v48, %v14704_v6  ;;  %v7678_v41 = vpop.f32.mrb[99].mxu0  ;;  %7989 = vst.msk [vmem:[%s9534_s25 + $0x6c] sm:$0xf] %vm4078_vm6, %v8786_v59  ;;  %v7796_v60 = vadd.f32 %v9129_v23, %v7635_v16  ;;  %v7787_v14 = vpop.f32.mrb[89].mxu1 }
 0x4cc   : > { %v7802_v5 = vmax.f32 %v7676_v25, 0.0  ;;  %v7679_v4 = vadd.f32 %v7678_v41, %v14707_v46  ;;  %7987 = vst.msk [vmem:[%s9534_s25 + $0x64] sm:$0xf] %vm4078_vm6, %v8784_v15  ;;  %v7788_v49 = vadd.f32 %v7787_v14, %v14842_v34  ;;  %v9130_v6 = vpop.f32.mrb[90].mxu1 }
 0x4cd   : > { %v8761_v28 = vpack.c.bf16 %v7804_v53, %v7804_v53  ;;  %v7805_v52 = vmax.f32 %v7687_v54, 0.0  ;;  %v7832_v10 = vmax.f32 %v7796_v60, 0.0  ;;  %v7799_v40 = vadd.f32 %v9130_v6, %v7638_v37  ;;  %v7790_v8 = vpop.f32.mrb[91].mxu1 }
 0x4ce   : > { %v8759_v51 = vpack.c.bf16 %v7802_v5, %v7802_v5  ;;  %v7803_v38 = vmax.f32 %v7679_v4, 0.0  ;;  %v7830_v44 = vmax.f32 %v7788_v49, 0.0  ;;  %v7791_v55 = vadd.f32 %v7790_v8, %v14848_v33 }
 0x4cf   : > { %7964 = vst.msk [vmem:[%s9534_s25 + $0x8] sm:$0xf] %vm4078_vm6, %v8761_v28  ;;  %v8762_v46 = vpack.c.bf16 %v7805_v52, %v7805_v52  ;;  %v8789_v62 = vpack.c.bf16 %v7832_v10, %v7832_v10  ;;  %v7833_v17 = vmax.f32 %v7799_v40, 0.0 }
 0x4d0   : > { %7962 = vst.msk [vmem:[%s9534_s25] sm:$0xf] %vm4078_vm6, %v8759_v51  ;;  %v8760_v34 = vpack.c.bf16 %v7803_v38, %v7803_v38  ;;  %v8787_v27 = vpack.c.bf16 %v7830_v44, %v7830_v44  ;;  %v7831_v57 = vmax.f32 %v7791_v55, 0.0 }
 0x4d1   : > { %7965 = vst.msk [vmem:[%s9534_s25 + $0xc] sm:$0xf] %vm4078_vm6, %v8762_v46  ;;  %7992 = vst.msk [vmem:[%s9534_s25 + $0x78] sm:$0xf] %vm4078_vm6, %v8789_v62  ;;  %v8790_v7 = vpack.c.bf16 %v7833_v17, %v7833_v17 }
 0x4d2   : > { %7963 = vst.msk [vmem:[%s9534_s25 + $0x4] sm:$0xf] %vm4078_vm6, %v8760_v34  ;;  %7990 = vst.msk [vmem:[%s9534_s25 + $0x70] sm:$0xf] %vm4078_vm6, %v8787_v27  ;;  %v8788_v33 = vpack.c.bf16 %v7831_v57, %v7831_v57 }
 0x4d3   : > { %7993 = vst.msk [vmem:[%s9534_s25 + $0x7c] sm:$0xf] %vm4078_vm6, %v8790_v7 }
 0x4d4   : > { %7991 = vst.msk [vmem:[%s9534_s25 + $0x74] sm:$0xf] %vm4078_vm6, %v8788_v33 }
 0x4d5   : > { %9359 = shalt.err (!%p9356_p10)
}
 0x4d6   : > { %s9360_s25 = scalar_lea.hbm %s14897_s24, 2048  ;;  %s9364_s26 = scalar_lea.hbm %s14957_s8, 4096 }
 0x4d7   : > { %p9361_p11 = scmp.ne.s32.totalorder %s14897_s24, %s9360_s25  ;;  %p9365_p0 = scmp.lt.u32.totalorder %s14897_s24, %s14957_s8 }
 0x4d8   : > { %p9366_p1 = scmp.lt.u32.totalorder %s9364_s26, %s9360_s25  ;;  %p9368_p3 = scmp.lt.u32.totalorder %s9360_s25, %s14897_s24 }
 0x4d9   : > { %p9362_p12 = pnand %p9361_p11, %p9511_p5 }
 0x4da   : > { %p9367_p2 = por %p9366_p1, %p9365_p0 }
 0x4db   : > { %p9363_p13 = pneg %p9362_p12 }
 0x4dc   : > { %p9369_p4 = por %p9368_p3, %p9367_p2 }
 0x4de   : > { %p9370_p7 = pnand %p9369_p4, %p9363_p13 }
 0x4e0   : > { %9373 = shalt.err (!%p9370_p7)
}
 0x4e1   : > { %9140 = dma.vmem_to_hbm [thread:$0]  (%p9511_p5), %s14899_s18, 2048, %s14897_s24, %s8000_s22, %s15671_s10, %s15671_s10, %s9426_s21  }
 0x4e2 PF: > { %p9150_p8 = scmp.ge.s32.totalorder %s9412_s30, 2  ;;  %s8044_s12 = sand.u32 1, %s9400_s27  }
 0x4e3   : > { %s8045_s23 = scalar_lea.sflag [#allocation4], %s8044_s12 }
 0x4e4   : > { %p9144_p9 = pnand %p9150_p8, %p9515_p6 }
 0x4e6   : > { %9391 = dma.done.wait (!%p9144_p9), %s8045_s23, 2048  }
 0x4e7   : > { %9393 = vsyncadd (!%p9144_p9), %s8045_s23, 4294965248  ;;  %s8054_s15 = scalar_lea.sflag [#allocation6], %s8044_s12 }
 0x4e8   : > { %9395 = dma.done.wait (!%p9144_p9), %s8054_s15, 2048  }
 0x4e9   : > { %9397 = vsyncadd (!%p9144_p9), %s8054_s15, 4294965248  ;;  %p22_p5 = scmp.ge.s32.totalorder %s9498_s11, 4   ;;  %s15673_s27 = smov %s9404_s28 }
 0x4ea   : > { %s15674_s28 = smov %s9408_s29  ;;  %s15675_s29 = smov %s9509_s14 }
 0x4eb   : > { %s15676_s30 = smov %s9498_s11  ;;  %24 = sbr.rel (!%p22_p5) target bundleno = 5 (0x5), region = 106 }
 0x4f2   :  { %8059 = vsyncpa [#allocation4], 1 }
 0x4f3   :  { %8061 = vsyncpa [#allocation4 + $0x1], 1 }
 0x4f4   :  { %8062 = vsyncpa [#allocation6], 1 }
 0x4f5   :  { %8064 = vsyncpa [#allocation6 + $0x1], 1 }

</bundles_post_ra>
